<compile_context>
chip_gen: v6e
topology: v6e:2x2x1
jax: 0.10.0
libtpu: 0.0.40
codegen_flags: <defaults>
</compile_context>

<pallas_src>
import jax
import jax.numpy as jnp
import numpy as np
from jax.experimental import pallas as pl
from jax.experimental.pallas import tpu as pltpu


def _round_up(x, m):
    return (x + m - 1) // m * m


# ---------------------------------------------------------------------------
# Fused block kernel.  One grid step = b_tile batch elements.
# ---------------------------------------------------------------------------
def _make_block_kernel(num_layers, b_tile, H, W, C, Ho, Wo):
    """Refs per grid step:
      x_ref   : (b_tile, H, W, C)       bf16  channel-padded input
      w_ref   : (L, 9, C, C)            bf16  tap-major conv weights (zero-padded)
      b_ref   : (L, 1, C)               f32   biases (zero-padded)
      o_ref   : (b_tile, Ho*Wo, C)      f32   lane-dense pooled output
      pad_ref : (b_tile, H+2, W+2, C)   bf16  zero-haloed activation scratch
      acc_ref : (b_tile*H*W, C)         f32   conv accumulator
    """
    M = b_tile * H * W

    def kernel(x_ref, w_ref, b_ref, o_ref, pad_ref, acc_ref):
        # Zero only the 1-pixel halo ring; the interior is fully overwritten
        # below (input and inter-layer stores cover all C padded channels).
        zrow = jnp.zeros((b_tile, 1, W + 2, C), pad_ref.dtype)
        zcol = jnp.zeros((b_tile, H + 2, 1, C), pad_ref.dtype)
        pad_ref[:, pl.ds(0, 1), :, :] = zrow
        pad_ref[:, pl.ds(H + 1, 1), :, :] = zrow
        pad_ref[:, :, pl.ds(0, 1), :] = zcol
        pad_ref[:, :, pl.ds(W + 1, 1), :] = zcol

        # Stage this step's (channel-padded, bf16) images into the interior.
        # Full 128-lane stores; activations stay resident in VMEM from here on.
        pad_ref[:, pl.ds(1, H), pl.ds(1, W), :] = x_ref[...]

        act = None
        for l in range(num_layers):
            # 3x3 conv == 9 accumulating MXU matmuls over shifted windows
            # (bf16 operands, f32 accumulation into a VMEM scratch).
            for t in range(9):
                dy, dx = divmod(t, 3)
                lhs = pad_ref[:, pl.ds(dy, H), pl.ds(dx, W), :].reshape(M, C)
                prod = jnp.dot(lhs, w_ref[l, t],
                               preferred_element_type=jnp.float32)
                if t == 0:
                    acc_ref[...] = prod
                else:
                    acc_ref[...] += prod

            # Bias + ReLU epilogue in f32 (v5e-friendly, cheap everywhere).
            act = jnp.maximum(acc_ref[...] + b_ref[l], 0.0)      # (M, C) f32

            if l + 1 < num_layers:
                # Re-stage for the next conv; never leaves VMEM.
                pad_ref[:, pl.ds(1, H), pl.ds(1, W), :] = (
                    act.reshape(b_tile, H, W, C).astype(pad_ref.dtype))

        # 2x2 max pool, stride 2 — stays lane-dense (C is a 128-multiple):
        # split leading/sublane dims and compare; no lane-axis re-splits.
        a4 = act.reshape(b_tile * Ho, 2, W, C)
        rowmax = jnp.maximum(a4[:, 0], a4[:, 1])                 # (b*Ho, W, C)
        r4 = rowmax.reshape(b_tile * Ho, Wo, 2, C)
        pooled = jnp.maximum(r4[:, :, 0, :], r4[:, :, 1, :])     # (b*Ho, Wo, C)

        # Lane-dense store: last dim C (128-multiple), leading dims merged.
        o_ref[...] = pooled.reshape(b_tile, Ho * Wo, C).astype(o_ref.dtype)

    return kernel


def block_forward_pallas(x, params, *, b_tile=1):
    """x: (N, H, W, Cin) NHWC f32; params: list of (w: (3,3,cin,cout), b: (1,cout))."""
    N, H, W, Cin = x.shape
    num_layers = len(params)
    Cout = params[-1][0].shape[-1]
    Ho, Wo = H // 2, W // 2
    assert H % 2 == 0 and W % 2 == 0 and N % b_tile == 0

    # Channel padding to a 128-lane multiple (full-lane stores, real MXU K/N).
    c_max = max([Cin] + [w.shape[3] for w, _ in params])
    C = _round_up(max(c_max, 128), 128)

    # Host-side one-time packing:
    #   input   -> channel-padded bf16 NHWC
    #   weights -> (L, 9, C, C) bf16, tap-major, zero-padded K (cin) and N (cout)
    #   bias    -> (L, 1, C) f32, zero-padded
    # Zero-padded weight/bias channels keep padded activation channels exactly 0.
    x_p = jnp.pad(x, ((0, 0), (0, 0), (0, 0), (0, C - Cin))).astype(jnp.bfloat16)
    w_list, b_list = [], []
    for w, b in params:
        cin_l, cout_l = w.shape[2], w.shape[3]
        wp = jnp.pad(w, ((0, 0), (0, 0), (0, C - cin_l), (0, C - cout_l)))
        w_list.append(wp.reshape(9, C, C))
        b_list.append(jnp.pad(b.reshape(1, cout_l), ((0, 0), (0, C - cout_l))))
    w_all = jnp.stack(w_list).astype(jnp.bfloat16)     # (L, 9, C, C)
    b_all = jnp.stack(b_list).astype(jnp.float32)      # (L, 1, C)

    kernel = _make_block_kernel(num_layers, b_tile, H, W, C, Ho, Wo)

    out = pl.pallas_call(
        kernel,
        out_shape=jax.ShapeDtypeStruct((N, Ho * Wo, C), jnp.float32),
        grid=(N // b_tile,),
        in_specs=[
            pl.BlockSpec((b_tile, H, W, C), lambda n: (n, 0, 0, 0)),
            pl.BlockSpec((num_layers, 9, C, C), lambda n: (0, 0, 0, 0)),
            pl.BlockSpec((num_layers, 1, C), lambda n: (0, 0, 0)),
        ],
        out_specs=pl.BlockSpec((b_tile, Ho * Wo, C), lambda n: (n, 0, 0)),
        scratch_shapes=[
            pltpu.VMEM((b_tile, H + 2, W + 2, C), jnp.bfloat16),   # haloed acts
            pltpu.VMEM((b_tile * H * W, C), jnp.float32),          # f32 conv acc
        ],
        compiler_params=pltpu.CompilerParams(
            dimension_semantics=("parallel",),        # megacore on v7x
            vmem_limit_bytes=32 * 1024 * 1024,        # explicit VMEM budget
        ),
    )(x_p, w_all, b_all)

    # Lane-dense HBM layout back to NHWC, drop channel padding.
    return out.reshape(N, Ho, Wo, C)[..., :Cout].astype(x.dtype)


block_forward = jax.jit(block_forward_pallas)


# ---------------------------------------------------------------------------
# Parameter init + pure-JAX reference (identical semantics, NHWC, f32).
# ---------------------------------------------------------------------------
def init_block_params(key, in_channels, out_channels, num_layers):
    params = []
    cin = in_channels
    for _ in range(num_layers):
        key, wk, bk = jax.random.split(key, 3)
        w = jax.random.normal(wk, (3, 3, cin, out_channels), jnp.float32) * 0.1
        b = jax.random.normal(bk, (1, out_channels), jnp.float32) * 0.1
        params.append((w, b))
        cin = out_channels
    return params


def block_reference(x, params):
    for w, b in params:
        x = jax.lax.conv_general_dilated(
            x, w, window_strides=(1, 1), padding="SAME",
            dimension_numbers=("NHWC", "HWIO", "NHWC"))
        x = jnp.maximum(x + b.reshape(1, 1, 1, -1), 0.0)
    return jax.lax.reduce_window(x, -jnp.inf, jax.lax.max,
                                 (1, 2, 2, 1), (1, 2, 2, 1), "VALID")


if __name__ == "__main__":
    N, Cin, Cout, H, W, num_layers = 2, 4, 8, 16, 16, 2

    key = jax.random.PRNGKey(0)
    key, xk = jax.random.split(key)
    x_nchw = jax.random.normal(xk, (N, Cin, H, W), jnp.float32)  # PyTorch-style
    x = jnp.transpose(x_nchw, (0, 2, 3, 1))                      # NCHW -> NHWC
    params = init_block_params(key, Cin, Cout, num_layers)

    out = block_forward(x, params)
    out = jax.block_until_ready(out)
    assert out.shape == (N, H // 2, W // 2, Cout), out.shape

    ref = block_reference(x, params)
    # bf16 MXU operands / bf16 inter-layer acts with f32 accumulation.
    np.testing.assert_allclose(np.asarray(out), np.asarray(ref), atol=3e-2, rtol=3e-2)
    print("KERNEL_OK")
</pallas_src>

<mosaic_0001>
module attributes {stable_mosaic.version = 11 : i64} {
  func.func @kernel(%arg0: i32, %arg1: memref<1x16x16x128xbf16, #tpu.memory_space<vmem>>, %arg2: memref<2x9x128x128xbf16, #tpu.memory_space<vmem>>, %arg3: memref<2x1x128xf32, #tpu.memory_space<vmem>>, %arg4: memref<1x64x128xf32, #tpu.memory_space<vmem>>, %arg5: memref<1x18x18x128xbf16, #tpu.memory_space<vmem>>, %arg6: memref<256x128xf32, #tpu.memory_space<vmem>>) attributes {dimension_semantics = [#tpu.dimension_semantics<parallel>], iteration_bounds = array<i64: 2>, scalar_prefetch = 0 : i64, scratch_operands = 2 : i64, tpu.core_type = #tpu.core_type<tc>, window_params = [{transform_indices = @transform_0, window_bounds = array<i64: 1, 16, 16, 128>}, {pipeline_mode = #tpu.pipeline_mode<synchronous>, transform_indices = @transform_1, window_bounds = array<i64: 2, 9, 128, 128>}, {pipeline_mode = #tpu.pipeline_mode<synchronous>, transform_indices = @transform_2, window_bounds = array<i64: 2, 1, 128>}, {transform_indices = @transform_3, window_bounds = array<i64: 1, 64, 128>}]} {
    %cst = arith.constant 0.000000e+00 : bf16
    %0 = vector.broadcast %cst : bf16 to vector<1x1x18x128xbf16>
    %cst_0 = arith.constant 0.000000e+00 : bf16
    %1 = vector.broadcast %cst_0 : bf16 to vector<1x18x1x128xbf16>
    %c0 = arith.constant 0 : index
    %c0_1 = arith.constant 0 : index
    %c0_2 = arith.constant 0 : index
    %c0_3 = arith.constant 0 : index
    %2 = vector.load %arg5[%c0, %c0_1, %c0_2, %c0_3] : memref<1x18x18x128xbf16, #tpu.memory_space<vmem>>, vector<1x1x18x128xbf16>
    tpu.vector_store %arg5[%c0, %c0_1, %c0_2, %c0_3], %0 {strides = array<i32>} : memref<1x18x18x128xbf16, #tpu.memory_space<vmem>>, vector<1x1x18x128xbf16>,
    %c0_4 = arith.constant 0 : index
    %c17 = arith.constant 17 : index
    %c0_5 = arith.constant 0 : index
    %c0_6 = arith.constant 0 : index
    %3 = vector.load %arg5[%c0_4, %c17, %c0_5, %c0_6] : memref<1x18x18x128xbf16, #tpu.memory_space<vmem>>, vector<1x1x18x128xbf16>
    tpu.vector_store %arg5[%c0_4, %c17, %c0_5, %c0_6], %0 {strides = array<i32>} : memref<1x18x18x128xbf16, #tpu.memory_space<vmem>>, vector<1x1x18x128xbf16>,
    %c0_7 = arith.constant 0 : index
    %c0_8 = arith.constant 0 : index
    %c0_9 = arith.constant 0 : index
    %c0_10 = arith.constant 0 : index
    %4 = vector.load %arg5[%c0_7, %c0_8, %c0_9, %c0_10] : memref<1x18x18x128xbf16, #tpu.memory_space<vmem>>, vector<1x18x1x128xbf16>
    tpu.vector_store %arg5[%c0_7, %c0_8, %c0_9, %c0_10], %1 {strides = array<i32>} : memref<1x18x18x128xbf16, #tpu.memory_space<vmem>>, vector<1x18x1x128xbf16>,
    %c0_11 = arith.constant 0 : index
    %c0_12 = arith.constant 0 : index
    %c17_13 = arith.constant 17 : index
    %c0_14 = arith.constant 0 : index
    %5 = vector.load %arg5[%c0_11, %c0_12, %c17_13, %c0_14] : memref<1x18x18x128xbf16, #tpu.memory_space<vmem>>, vector<1x18x1x128xbf16>
    tpu.vector_store %arg5[%c0_11, %c0_12, %c17_13, %c0_14], %1 {strides = array<i32>} : memref<1x18x18x128xbf16, #tpu.memory_space<vmem>>, vector<1x18x1x128xbf16>,
    %c0_15 = arith.constant 0 : index
    %c0_16 = arith.constant 0 : index
    %c0_17 = arith.constant 0 : index
    %c0_18 = arith.constant 0 : index
    %6 = vector.load %arg1[%c0_15, %c0_16, %c0_17, %c0_18] : memref<1x16x16x128xbf16, #tpu.memory_space<vmem>>, vector<1x16x16x128xbf16>
    %c0_19 = arith.constant 0 : index
    %c1 = arith.constant 1 : index
    %c1_20 = arith.constant 1 : index
    %c0_21 = arith.constant 0 : index
    %7 = vector.load %arg5[%c0_19, %c1, %c1_20, %c0_21] : memref<1x18x18x128xbf16, #tpu.memory_space<vmem>>, vector<1x16x16x128xbf16>
    tpu.vector_store %arg5[%c0_19, %c1, %c1_20, %c0_21], %6 {strides = array<i32>} : memref<1x18x18x128xbf16, #tpu.memory_space<vmem>>, vector<1x16x16x128xbf16>,
    %c0_22 = arith.constant 0 : index
    %c0_23 = arith.constant 0 : index
    %c0_24 = arith.constant 0 : index
    %c0_25 = arith.constant 0 : index
    %8 = vector.load %arg5[%c0_22, %c0_23, %c0_24, %c0_25] : memref<1x18x18x128xbf16, #tpu.memory_space<vmem>>, vector<1x16x16x128xbf16>
    %9 = vector.shape_cast %8 : vector<1x16x16x128xbf16> to vector<256x128xbf16>
    %c0_26 = arith.constant 0 : index
    %c0_27 = arith.constant 0 : index
    %c0_28 = arith.constant 0 : index
    %c0_29 = arith.constant 0 : index
    %10 = vector.load %arg2[%c0_26, %c0_27, %c0_28, %c0_29] : memref<2x9x128x128xbf16, #tpu.memory_space<vmem>>, vector<1x1x128x128xbf16>
    %11 = vector.shape_cast %10 : vector<1x1x128x128xbf16> to vector<128x128xbf16>
    %cst_30 = arith.constant dense<0.000000e+00> : vector<256x128xf32>
    %12 = tpu.matmul %9, %11, %cst_30 {dimension_numbers = #tpu.dot_dimension_numbers<[1], [0], [0], [1], [0, 0, 1, 1], [], []>} : vector<256x128xbf16>, vector<128x128xbf16>, vector<256x128xf32> -> vector<256x128xf32>
    %c0_31 = arith.constant 0 : index
    %c0_32 = arith.constant 0 : index
    %13 = vector.load %arg6[%c0_31, %c0_32] : memref<256x128xf32, #tpu.memory_space<vmem>>, vector<256x128xf32>
    tpu.vector_store %arg6[%c0_31, %c0_32], %12 {strides = array<i32>} : memref<256x128xf32, #tpu.memory_space<vmem>>, vector<256x128xf32>,
    %c0_33 = arith.constant 0 : index
    %c0_34 = arith.constant 0 : index
    %c1_35 = arith.constant 1 : index
    %c0_36 = arith.constant 0 : index
    %14 = vector.load %arg5[%c0_33, %c0_34, %c1_35, %c0_36] : memref<1x18x18x128xbf16, #tpu.memory_space<vmem>>, vector<1x16x16x128xbf16>
    %15 = vector.shape_cast %14 : vector<1x16x16x128xbf16> to vector<256x128xbf16>
    %c0_37 = arith.constant 0 : index
    %c1_38 = arith.constant 1 : index
    %c0_39 = arith.constant 0 : index
    %c0_40 = arith.constant 0 : index
    %16 = vector.load %arg2[%c0_37, %c1_38, %c0_39, %c0_40] : memref<2x9x128x128xbf16, #tpu.memory_space<vmem>>, vector<1x1x128x128xbf16>
    %17 = vector.shape_cast %16 : vector<1x1x128x128xbf16> to vector<128x128xbf16>
    %cst_41 = arith.constant dense<0.000000e+00> : vector<256x128xf32>
    %18 = tpu.matmul %15, %17, %cst_41 {dimension_numbers = #tpu.dot_dimension_numbers<[1], [0], [0], [1], [0, 0, 1, 1], [], []>} : vector<256x128xbf16>, vector<128x128xbf16>, vector<256x128xf32> -> vector<256x128xf32>
    %c0_42 = arith.constant 0 : index
    %c0_43 = arith.constant 0 : index
    %19 = vector.load %arg6[%c0_42, %c0_43] : memref<256x128xf32, #tpu.memory_space<vmem>>, vector<256x128xf32>
    %20 = arith.addf %19, %18 : vector<256x128xf32>
    %c0_44 = arith.constant 0 : index
    %c0_45 = arith.constant 0 : index
    %21 = vector.load %arg6[%c0_44, %c0_45] : memref<256x128xf32, #tpu.memory_space<vmem>>, vector<256x128xf32>
    tpu.vector_store %arg6[%c0_44, %c0_45], %20 {strides = array<i32>} : memref<256x128xf32, #tpu.memory_space<vmem>>, vector<256x128xf32>,
    %c0_46 = arith.constant 0 : index
    %c0_47 = arith.constant 0 : index
    %c2 = arith.constant 2 : index
    %c0_48 = arith.constant 0 : index
    %22 = vector.load %arg5[%c0_46, %c0_47, %c2, %c0_48] : memref<1x18x18x128xbf16, #tpu.memory_space<vmem>>, vector<1x16x16x128xbf16>
    %23 = vector.shape_cast %22 : vector<1x16x16x128xbf16> to vector<256x128xbf16>
    %c0_49 = arith.constant 0 : index
    %c2_50 = arith.constant 2 : index
    %c0_51 = arith.constant 0 : index
    %c0_52 = arith.constant 0 : index
    %24 = vector.load %arg2[%c0_49, %c2_50, %c0_51, %c0_52] : memref<2x9x128x128xbf16, #tpu.memory_space<vmem>>, vector<1x1x128x128xbf16>
    %25 = vector.shape_cast %24 : vector<1x1x128x128xbf16> to vector<128x128xbf16>
    %cst_53 = arith.constant dense<0.000000e+00> : vector<256x128xf32>
    %26 = tpu.matmul %23, %25, %cst_53 {dimension_numbers = #tpu.dot_dimension_numbers<[1], [0], [0], [1], [0, 0, 1, 1], [], []>} : vector<256x128xbf16>, vector<128x128xbf16>, vector<256x128xf32> -> vector<256x128xf32>
    %c0_54 = arith.constant 0 : index
    %c0_55 = arith.constant 0 : index
    %27 = vector.load %arg6[%c0_54, %c0_55] : memref<256x128xf32, #tpu.memory_space<vmem>>, vector<256x128xf32>
    %28 = arith.addf %27, %26 : vector<256x128xf32>
    %c0_56 = arith.constant 0 : index
    %c0_57 = arith.constant 0 : index
    %29 = vector.load %arg6[%c0_56, %c0_57] : memref<256x128xf32, #tpu.memory_space<vmem>>, vector<256x128xf32>
    tpu.vector_store %arg6[%c0_56, %c0_57], %28 {strides = array<i32>} : memref<256x128xf32, #tpu.memory_space<vmem>>, vector<256x128xf32>,
    %c0_58 = arith.constant 0 : index
    %c1_59 = arith.constant 1 : index
    %c0_60 = arith.constant 0 : index
    %c0_61 = arith.constant 0 : index
    %30 = vector.load %arg5[%c0_58, %c1_59, %c0_60, %c0_61] : memref<1x18x18x128xbf16, #tpu.memory_space<vmem>>, vector<1x16x16x128xbf16>
    %31 = vector.shape_cast %30 : vector<1x16x16x128xbf16> to vector<256x128xbf16>
    %c0_62 = arith.constant 0 : index
    %c3 = arith.constant 3 : index
    %c0_63 = arith.constant 0 : index
    %c0_64 = arith.constant 0 : index
    %32 = vector.load %arg2[%c0_62, %c3, %c0_63, %c0_64] : memref<2x9x128x128xbf16, #tpu.memory_space<vmem>>, vector<1x1x128x128xbf16>
    %33 = vector.shape_cast %32 : vector<1x1x128x128xbf16> to vector<128x128xbf16>
    %cst_65 = arith.constant dense<0.000000e+00> : vector<256x128xf32>
    %34 = tpu.matmul %31, %33, %cst_65 {dimension_numbers = #tpu.dot_dimension_numbers<[1], [0], [0], [1], [0, 0, 1, 1], [], []>} : vector<256x128xbf16>, vector<128x128xbf16>, vector<256x128xf32> -> vector<256x128xf32>
    %c0_66 = arith.constant 0 : index
    %c0_67 = arith.constant 0 : index
    %35 = vector.load %arg6[%c0_66, %c0_67] : memref<256x128xf32, #tpu.memory_space<vmem>>, vector<256x128xf32>
    %36 = arith.addf %35, %34 : vector<256x128xf32>
    %c0_68 = arith.constant 0 : index
    %c0_69 = arith.constant 0 : index
    %37 = vector.load %arg6[%c0_68, %c0_69] : memref<256x128xf32, #tpu.memory_space<vmem>>, vector<256x128xf32>
    tpu.vector_store %arg6[%c0_68, %c0_69], %36 {strides = array<i32>} : memref<256x128xf32, #tpu.memory_space<vmem>>, vector<256x128xf32>,
    %c0_70 = arith.constant 0 : index
    %c1_71 = arith.constant 1 : index
    %c1_72 = arith.constant 1 : index
    %c0_73 = arith.constant 0 : index
    %38 = vector.load %arg5[%c0_70, %c1_71, %c1_72, %c0_73] : memref<1x18x18x128xbf16, #tpu.memory_space<vmem>>, vector<1x16x16x128xbf16>
    %39 = vector.shape_cast %38 : vector<1x16x16x128xbf16> to vector<256x128xbf16>
    %c0_74 = arith.constant 0 : index
    %c4 = arith.constant 4 : index
    %c0_75 = arith.constant 0 : index
    %c0_76 = arith.constant 0 : index
    %40 = vector.load %arg2[%c0_74, %c4, %c0_75, %c0_76] : memref<2x9x128x128xbf16, #tpu.memory_space<vmem>>, vector<1x1x128x128xbf16>
    %41 = vector.shape_cast %40 : vector<1x1x128x128xbf16> to vector<128x128xbf16>
    %cst_77 = arith.constant dense<0.000000e+00> : vector<256x128xf32>
    %42 = tpu.matmul %39, %41, %cst_77 {dimension_numbers = #tpu.dot_dimension_numbers<[1], [0], [0], [1], [0, 0, 1, 1], [], []>} : vector<256x128xbf16>, vector<128x128xbf16>, vector<256x128xf32> -> vector<256x128xf32>
    %c0_78 = arith.constant 0 : index
    %c0_79 = arith.constant 0 : index
    %43 = vector.load %arg6[%c0_78, %c0_79] : memref<256x128xf32, #tpu.memory_space<vmem>>, vector<256x128xf32>
    %44 = arith.addf %43, %42 : vector<256x128xf32>
    %c0_80 = arith.constant 0 : index
    %c0_81 = arith.constant 0 : index
    %45 = vector.load %arg6[%c0_80, %c0_81] : memref<256x128xf32, #tpu.memory_space<vmem>>, vector<256x128xf32>
    tpu.vector_store %arg6[%c0_80, %c0_81], %44 {strides = array<i32>} : memref<256x128xf32, #tpu.memory_space<vmem>>, vector<256x128xf32>,
    %c0_82 = arith.constant 0 : index
    %c1_83 = arith.constant 1 : index
    %c2_84 = arith.constant 2 : index
    %c0_85 = arith.constant 0 : index
    %46 = vector.load %arg5[%c0_82, %c1_83, %c2_84, %c0_85] : memref<1x18x18x128xbf16, #tpu.memory_space<vmem>>, vector<1x16x16x128xbf16>
    %47 = vector.shape_cast %46 : vector<1x16x16x128xbf16> to vector<256x128xbf16>
    %c0_86 = arith.constant 0 : index
    %c5 = arith.constant 5 : index
    %c0_87 = arith.constant 0 : index
    %c0_88 = arith.constant 0 : index
    %48 = vector.load %arg2[%c0_86, %c5, %c0_87, %c0_88] : memref<2x9x128x128xbf16, #tpu.memory_space<vmem>>, vector<1x1x128x128xbf16>
    %49 = vector.shape_cast %48 : vector<1x1x128x128xbf16> to vector<128x128xbf16>
    %cst_89 = arith.constant dense<0.000000e+00> : vector<256x128xf32>
    %50 = tpu.matmul %47, %49, %cst_89 {dimension_numbers = #tpu.dot_dimension_numbers<[1], [0], [0], [1], [0, 0, 1, 1], [], []>} : vector<256x128xbf16>, vector<128x128xbf16>, vector<256x128xf32> -> vector<256x128xf32>
    %c0_90 = arith.constant 0 : index
    %c0_91 = arith.constant 0 : index
    %51 = vector.load %arg6[%c0_90, %c0_91] : memref<256x128xf32, #tpu.memory_space<vmem>>, vector<256x128xf32>
    %52 = arith.addf %51, %50 : vector<256x128xf32>
    %c0_92 = arith.constant 0 : index
    %c0_93 = arith.constant 0 : index
    %53 = vector.load %arg6[%c0_92, %c0_93] : memref<256x128xf32, #tpu.memory_space<vmem>>, vector<256x128xf32>
    tpu.vector_store %arg6[%c0_92, %c0_93], %52 {strides = array<i32>} : memref<256x128xf32, #tpu.memory_space<vmem>>, vector<256x128xf32>,
    %c0_94 = arith.constant 0 : index
    %c2_95 = arith.constant 2 : index
    %c0_96 = arith.constant 0 : index
    %c0_97 = arith.constant 0 : index
    %54 = vector.load %arg5[%c0_94, %c2_95, %c0_96, %c0_97] : memref<1x18x18x128xbf16, #tpu.memory_space<vmem>>, vector<1x16x16x128xbf16>
    %55 = vector.shape_cast %54 : vector<1x16x16x128xbf16> to vector<256x128xbf16>
    %c0_98 = arith.constant 0 : index
    %c6 = arith.constant 6 : index
    %c0_99 = arith.constant 0 : index
    %c0_100 = arith.constant 0 : index
    %56 = vector.load %arg2[%c0_98, %c6, %c0_99, %c0_100] : memref<2x9x128x128xbf16, #tpu.memory_space<vmem>>, vector<1x1x128x128xbf16>
    %57 = vector.shape_cast %56 : vector<1x1x128x128xbf16> to vector<128x128xbf16>
    %cst_101 = arith.constant dense<0.000000e+00> : vector<256x128xf32>
    %58 = tpu.matmul %55, %57, %cst_101 {dimension_numbers = #tpu.dot_dimension_numbers<[1], [0], [0], [1], [0, 0, 1, 1], [], []>} : vector<256x128xbf16>, vector<128x128xbf16>, vector<256x128xf32> -> vector<256x128xf32>
    %c0_102 = arith.constant 0 : index
    %c0_103 = arith.constant 0 : index
    %59 = vector.load %arg6[%c0_102, %c0_103] : memref<256x128xf32, #tpu.memory_space<vmem>>, vector<256x128xf32>
    %60 = arith.addf %59, %58 : vector<256x128xf32>
    %c0_104 = arith.constant 0 : index
    %c0_105 = arith.constant 0 : index
    %61 = vector.load %arg6[%c0_104, %c0_105] : memref<256x128xf32, #tpu.memory_space<vmem>>, vector<256x128xf32>
    tpu.vector_store %arg6[%c0_104, %c0_105], %60 {strides = array<i32>} : memref<256x128xf32, #tpu.memory_space<vmem>>, vector<256x128xf32>,
    %c0_106 = arith.constant 0 : index
    %c2_107 = arith.constant 2 : index
    %c1_108 = arith.constant 1 : index
    %c0_109 = arith.constant 0 : index
    %62 = vector.load %arg5[%c0_106, %c2_107, %c1_108, %c0_109] : memref<1x18x18x128xbf16, #tpu.memory_space<vmem>>, vector<1x16x16x128xbf16>
    %63 = vector.shape_cast %62 : vector<1x16x16x128xbf16> to vector<256x128xbf16>
    %c0_110 = arith.constant 0 : index
    %c7 = arith.constant 7 : index
    %c0_111 = arith.constant 0 : index
    %c0_112 = arith.constant 0 : index
    %64 = vector.load %arg2[%c0_110, %c7, %c0_111, %c0_112] : memref<2x9x128x128xbf16, #tpu.memory_space<vmem>>, vector<1x1x128x128xbf16>
    %65 = vector.shape_cast %64 : vector<1x1x128x128xbf16> to vector<128x128xbf16>
    %cst_113 = arith.constant dense<0.000000e+00> : vector<256x128xf32>
    %66 = tpu.matmul %63, %65, %cst_113 {dimension_numbers = #tpu.dot_dimension_numbers<[1], [0], [0], [1], [0, 0, 1, 1], [], []>} : vector<256x128xbf16>, vector<128x128xbf16>, vector<256x128xf32> -> vector<256x128xf32>
    %c0_114 = arith.constant 0 : index
    %c0_115 = arith.constant 0 : index
    %67 = vector.load %arg6[%c0_114, %c0_115] : memref<256x128xf32, #tpu.memory_space<vmem>>, vector<256x128xf32>
    %68 = arith.addf %67, %66 : vector<256x128xf32>
    %c0_116 = arith.constant 0 : index
    %c0_117 = arith.constant 0 : index
    %69 = vector.load %arg6[%c0_116, %c0_117] : memref<256x128xf32, #tpu.memory_space<vmem>>, vector<256x128xf32>
    tpu.vector_store %arg6[%c0_116, %c0_117], %68 {strides = array<i32>} : memref<256x128xf32, #tpu.memory_space<vmem>>, vector<256x128xf32>,
    %c0_118 = arith.constant 0 : index
    %c2_119 = arith.constant 2 : index
    %c2_120 = arith.constant 2 : index
    %c0_121 = arith.constant 0 : index
    %70 = vector.load %arg5[%c0_118, %c2_119, %c2_120, %c0_121] : memref<1x18x18x128xbf16, #tpu.memory_space<vmem>>, vector<1x16x16x128xbf16>
    %71 = vector.shape_cast %70 : vector<1x16x16x128xbf16> to vector<256x128xbf16>
    %c0_122 = arith.constant 0 : index
    %c8 = arith.constant 8 : index
    %c0_123 = arith.constant 0 : index
    %c0_124 = arith.constant 0 : index
    %72 = vector.load %arg2[%c0_122, %c8, %c0_123, %c0_124] : memref<2x9x128x128xbf16, #tpu.memory_space<vmem>>, vector<1x1x128x128xbf16>
    %73 = vector.shape_cast %72 : vector<1x1x128x128xbf16> to vector<128x128xbf16>
    %cst_125 = arith.constant dense<0.000000e+00> : vector<256x128xf32>
    %74 = tpu.matmul %71, %73, %cst_125 {dimension_numbers = #tpu.dot_dimension_numbers<[1], [0], [0], [1], [0, 0, 1, 1], [], []>} : vector<256x128xbf16>, vector<128x128xbf16>, vector<256x128xf32> -> vector<256x128xf32>
    %c0_126 = arith.constant 0 : index
    %c0_127 = arith.constant 0 : index
    %75 = vector.load %arg6[%c0_126, %c0_127] : memref<256x128xf32, #tpu.memory_space<vmem>>, vector<256x128xf32>
    %76 = arith.addf %75, %74 : vector<256x128xf32>
    %c0_128 = arith.constant 0 : index
    %c0_129 = arith.constant 0 : index
    %77 = vector.load %arg6[%c0_128, %c0_129] : memref<256x128xf32, #tpu.memory_space<vmem>>, vector<256x128xf32>
    tpu.vector_store %arg6[%c0_128, %c0_129], %76 {strides = array<i32>} : memref<256x128xf32, #tpu.memory_space<vmem>>, vector<256x128xf32>,
    %c0_130 = arith.constant 0 : index
    %c0_131 = arith.constant 0 : index
    %78 = vector.load %arg6[%c0_130, %c0_131] : memref<256x128xf32, #tpu.memory_space<vmem>>, vector<256x128xf32>
    %c0_132 = arith.constant 0 : index
    %c0_133 = arith.constant 0 : index
    %c0_134 = arith.constant 0 : index
    %79 = vector.load %arg3[%c0_132, %c0_133, %c0_134] : memref<2x1x128xf32, #tpu.memory_space<vmem>>, vector<1x1x128xf32>
    %80 = vector.shape_cast %79 : vector<1x1x128xf32> to vector<1x128xf32>
    %81 = vector.broadcast %80 : vector<1x128xf32> to vector<256x128xf32>
    %82 = arith.addf %78, %81 : vector<256x128xf32>
    %cst_135 = arith.constant 0.000000e+00 : f32
    %83 = vector.broadcast %cst_135 : f32 to vector<256x128xf32>
    %84 = arith.maximumf %82, %83 : vector<256x128xf32>
    %85 = vector.shape_cast %84 : vector<256x128xf32> to vector<1x16x16x128xf32>
    %86 = arith.truncf %85 : vector<1x16x16x128xf32> to vector<1x16x16x128xbf16>
    %c0_136 = arith.constant 0 : index
    %c1_137 = arith.constant 1 : index
    %c1_138 = arith.constant 1 : index
    %c0_139 = arith.constant 0 : index
    %87 = vector.load %arg5[%c0_136, %c1_137, %c1_138, %c0_139] : memref<1x18x18x128xbf16, #tpu.memory_space<vmem>>, vector<1x16x16x128xbf16>
    tpu.vector_store %arg5[%c0_136, %c1_137, %c1_138, %c0_139], %86 {strides = array<i32>} : memref<1x18x18x128xbf16, #tpu.memory_space<vmem>>, vector<1x16x16x128xbf16>,
    %c0_140 = arith.constant 0 : index
    %c0_141 = arith.constant 0 : index
    %c0_142 = arith.constant 0 : index
    %c0_143 = arith.constant 0 : index
    %88 = vector.load %arg5[%c0_140, %c0_141, %c0_142, %c0_143] : memref<1x18x18x128xbf16, #tpu.memory_space<vmem>>, vector<1x16x16x128xbf16>
    %89 = vector.shape_cast %88 : vector<1x16x16x128xbf16> to vector<256x128xbf16>
    %c1_144 = arith.constant 1 : index
    %c0_145 = arith.constant 0 : index
    %c0_146 = arith.constant 0 : index
    %c0_147 = arith.constant 0 : index
    %90 = vector.load %arg2[%c1_144, %c0_145, %c0_146, %c0_147] : memref<2x9x128x128xbf16, #tpu.memory_space<vmem>>, vector<1x1x128x128xbf16>
    %91 = vector.shape_cast %90 : vector<1x1x128x128xbf16> to vector<128x128xbf16>
    %cst_148 = arith.constant dense<0.000000e+00> : vector<256x128xf32>
    %92 = tpu.matmul %89, %91, %cst_148 {dimension_numbers = #tpu.dot_dimension_numbers<[1], [0], [0], [1], [0, 0, 1, 1], [], []>} : vector<256x128xbf16>, vector<128x128xbf16>, vector<256x128xf32> -> vector<256x128xf32>
    %c0_149 = arith.constant 0 : index
    %c0_150 = arith.constant 0 : index
    %93 = vector.load %arg6[%c0_149, %c0_150] : memref<256x128xf32, #tpu.memory_space<vmem>>, vector<256x128xf32>
    tpu.vector_store %arg6[%c0_149, %c0_150], %92 {strides = array<i32>} : memref<256x128xf32, #tpu.memory_space<vmem>>, vector<256x128xf32>,
    %c0_151 = arith.constant 0 : index
    %c0_152 = arith.constant 0 : index
    %c1_153 = arith.constant 1 : index
    %c0_154 = arith.constant 0 : index
    %94 = vector.load %arg5[%c0_151, %c0_152, %c1_153, %c0_154] : memref<1x18x18x128xbf16, #tpu.memory_space<vmem>>, vector<1x16x16x128xbf16>
    %95 = vector.shape_cast %94 : vector<1x16x16x128xbf16> to vector<256x128xbf16>
    %c1_155 = arith.constant 1 : index
    %c1_156 = arith.constant 1 : index
    %c0_157 = arith.constant 0 : index
    %c0_158 = arith.constant 0 : index
    %96 = vector.load %arg2[%c1_155, %c1_156, %c0_157, %c0_158] : memref<2x9x128x128xbf16, #tpu.memory_space<vmem>>, vector<1x1x128x128xbf16>
    %97 = vector.shape_cast %96 : vector<1x1x128x128xbf16> to vector<128x128xbf16>
    %cst_159 = arith.constant dense<0.000000e+00> : vector<256x128xf32>
    %98 = tpu.matmul %95, %97, %cst_159 {dimension_numbers = #tpu.dot_dimension_numbers<[1], [0], [0], [1], [0, 0, 1, 1], [], []>} : vector<256x128xbf16>, vector<128x128xbf16>, vector<256x128xf32> -> vector<256x128xf32>
    %c0_160 = arith.constant 0 : index
    %c0_161 = arith.constant 0 : index
    %99 = vector.load %arg6[%c0_160, %c0_161] : memref<256x128xf32, #tpu.memory_space<vmem>>, vector<256x128xf32>
    %100 = arith.addf %99, %98 : vector<256x128xf32>
    %c0_162 = arith.constant 0 : index
    %c0_163 = arith.constant 0 : index
    %101 = vector.load %arg6[%c0_162, %c0_163] : memref<256x128xf32, #tpu.memory_space<vmem>>, vector<256x128xf32>
    tpu.vector_store %arg6[%c0_162, %c0_163], %100 {strides = array<i32>} : memref<256x128xf32, #tpu.memory_space<vmem>>, vector<256x128xf32>,
    %c0_164 = arith.constant 0 : index
    %c0_165 = arith.constant 0 : index
    %c2_166 = arith.constant 2 : index
    %c0_167 = arith.constant 0 : index
    %102 = vector.load %arg5[%c0_164, %c0_165, %c2_166, %c0_167] : memref<1x18x18x128xbf16, #tpu.memory_space<vmem>>, vector<1x16x16x128xbf16>
    %103 = vector.shape_cast %102 : vector<1x16x16x128xbf16> to vector<256x128xbf16>
    %c1_168 = arith.constant 1 : index
    %c2_169 = arith.constant 2 : index
    %c0_170 = arith.constant 0 : index
    %c0_171 = arith.constant 0 : index
    %104 = vector.load %arg2[%c1_168, %c2_169, %c0_170, %c0_171] : memref<2x9x128x128xbf16, #tpu.memory_space<vmem>>, vector<1x1x128x128xbf16>
    %105 = vector.shape_cast %104 : vector<1x1x128x128xbf16> to vector<128x128xbf16>
    %cst_172 = arith.constant dense<0.000000e+00> : vector<256x128xf32>
    %106 = tpu.matmul %103, %105, %cst_172 {dimension_numbers = #tpu.dot_dimension_numbers<[1], [0], [0], [1], [0, 0, 1, 1], [], []>} : vector<256x128xbf16>, vector<128x128xbf16>, vector<256x128xf32> -> vector<256x128xf32>
    %c0_173 = arith.constant 0 : index
    %c0_174 = arith.constant 0 : index
    %107 = vector.load %arg6[%c0_173, %c0_174] : memref<256x128xf32, #tpu.memory_space<vmem>>, vector<256x128xf32>
    %108 = arith.addf %107, %106 : vector<256x128xf32>
    %c0_175 = arith.constant 0 : index
    %c0_176 = arith.constant 0 : index
    %109 = vector.load %arg6[%c0_175, %c0_176] : memref<256x128xf32, #tpu.memory_space<vmem>>, vector<256x128xf32>
    tpu.vector_store %arg6[%c0_175, %c0_176], %108 {strides = array<i32>} : memref<256x128xf32, #tpu.memory_space<vmem>>, vector<256x128xf32>,
    %c0_177 = arith.constant 0 : index
    %c1_178 = arith.constant 1 : index
    %c0_179 = arith.constant 0 : index
    %c0_180 = arith.constant 0 : index
    %110 = vector.load %arg5[%c0_177, %c1_178, %c0_179, %c0_180] : memref<1x18x18x128xbf16, #tpu.memory_space<vmem>>, vector<1x16x16x128xbf16>
    %111 = vector.shape_cast %110 : vector<1x16x16x128xbf16> to vector<256x128xbf16>
    %c1_181 = arith.constant 1 : index
    %c3_182 = arith.constant 3 : index
    %c0_183 = arith.constant 0 : index
    %c0_184 = arith.constant 0 : index
    %112 = vector.load %arg2[%c1_181, %c3_182, %c0_183, %c0_184] : memref<2x9x128x128xbf16, #tpu.memory_space<vmem>>, vector<1x1x128x128xbf16>
    %113 = vector.shape_cast %112 : vector<1x1x128x128xbf16> to vector<128x128xbf16>
    %cst_185 = arith.constant dense<0.000000e+00> : vector<256x128xf32>
    %114 = tpu.matmul %111, %113, %cst_185 {dimension_numbers = #tpu.dot_dimension_numbers<[1], [0], [0], [1], [0, 0, 1, 1], [], []>} : vector<256x128xbf16>, vector<128x128xbf16>, vector<256x128xf32> -> vector<256x128xf32>
    %c0_186 = arith.constant 0 : index
    %c0_187 = arith.constant 0 : index
    %115 = vector.load %arg6[%c0_186, %c0_187] : memref<256x128xf32, #tpu.memory_space<vmem>>, vector<256x128xf32>
    %116 = arith.addf %115, %114 : vector<256x128xf32>
    %c0_188 = arith.constant 0 : index
    %c0_189 = arith.constant 0 : index
    %117 = vector.load %arg6[%c0_188, %c0_189] : memref<256x128xf32, #tpu.memory_space<vmem>>, vector<256x128xf32>
    tpu.vector_store %arg6[%c0_188, %c0_189], %116 {strides = array<i32>} : memref<256x128xf32, #tpu.memory_space<vmem>>, vector<256x128xf32>,
    %c0_190 = arith.constant 0 : index
    %c1_191 = arith.constant 1 : index
    %c1_192 = arith.constant 1 : index
    %c0_193 = arith.constant 0 : index
    %118 = vector.load %arg5[%c0_190, %c1_191, %c1_192, %c0_193] : memref<1x18x18x128xbf16, #tpu.memory_space<vmem>>, vector<1x16x16x128xbf16>
    %119 = vector.shape_cast %118 : vector<1x16x16x128xbf16> to vector<256x128xbf16>
    %c1_194 = arith.constant 1 : index
    %c4_195 = arith.constant 4 : index
    %c0_196 = arith.constant 0 : index
    %c0_197 = arith.constant 0 : index
    %120 = vector.load %arg2[%c1_194, %c4_195, %c0_196, %c0_197] : memref<2x9x128x128xbf16, #tpu.memory_space<vmem>>, vector<1x1x128x128xbf16>
    %121 = vector.shape_cast %120 : vector<1x1x128x128xbf16> to vector<128x128xbf16>
    %cst_198 = arith.constant dense<0.000000e+00> : vector<256x128xf32>
    %122 = tpu.matmul %119, %121, %cst_198 {dimension_numbers = #tpu.dot_dimension_numbers<[1], [0], [0], [1], [0, 0, 1, 1], [], []>} : vector<256x128xbf16>, vector<128x128xbf16>, vector<256x128xf32> -> vector<256x128xf32>
    %c0_199 = arith.constant 0 : index
    %c0_200 = arith.constant 0 : index
    %123 = vector.load %arg6[%c0_199, %c0_200] : memref<256x128xf32, #tpu.memory_space<vmem>>, vector<256x128xf32>
    %124 = arith.addf %123, %122 : vector<256x128xf32>
    %c0_201 = arith.constant 0 : index
    %c0_202 = arith.constant 0 : index
    %125 = vector.load %arg6[%c0_201, %c0_202] : memref<256x128xf32, #tpu.memory_space<vmem>>, vector<256x128xf32>
    tpu.vector_store %arg6[%c0_201, %c0_202], %124 {strides = array<i32>} : memref<256x128xf32, #tpu.memory_space<vmem>>, vector<256x128xf32>,
    %c0_203 = arith.constant 0 : index
    %c1_204 = arith.constant 1 : index
    %c2_205 = arith.constant 2 : index
    %c0_206 = arith.constant 0 : index
    %126 = vector.load %arg5[%c0_203, %c1_204, %c2_205, %c0_206] : memref<1x18x18x128xbf16, #tpu.memory_space<vmem>>, vector<1x16x16x128xbf16>
    %127 = vector.shape_cast %126 : vector<1x16x16x128xbf16> to vector<256x128xbf16>
    %c1_207 = arith.constant 1 : index
    %c5_208 = arith.constant 5 : index
    %c0_209 = arith.constant 0 : index
    %c0_210 = arith.constant 0 : index
    %128 = vector.load %arg2[%c1_207, %c5_208, %c0_209, %c0_210] : memref<2x9x128x128xbf16, #tpu.memory_space<vmem>>, vector<1x1x128x128xbf16>
    %129 = vector.shape_cast %128 : vector<1x1x128x128xbf16> to vector<128x128xbf16>
    %cst_211 = arith.constant dense<0.000000e+00> : vector<256x128xf32>
    %130 = tpu.matmul %127, %129, %cst_211 {dimension_numbers = #tpu.dot_dimension_numbers<[1], [0], [0], [1], [0, 0, 1, 1], [], []>} : vector<256x128xbf16>, vector<128x128xbf16>, vector<256x128xf32> -> vector<256x128xf32>
    %c0_212 = arith.constant 0 : index
    %c0_213 = arith.constant 0 : index
    %131 = vector.load %arg6[%c0_212, %c0_213] : memref<256x128xf32, #tpu.memory_space<vmem>>, vector<256x128xf32>
    %132 = arith.addf %131, %130 : vector<256x128xf32>
    %c0_214 = arith.constant 0 : index
    %c0_215 = arith.constant 0 : index
    %133 = vector.load %arg6[%c0_214, %c0_215] : memref<256x128xf32, #tpu.memory_space<vmem>>, vector<256x128xf32>
    tpu.vector_store %arg6[%c0_214, %c0_215], %132 {strides = array<i32>} : memref<256x128xf32, #tpu.memory_space<vmem>>, vector<256x128xf32>,
    %c0_216 = arith.constant 0 : index
    %c2_217 = arith.constant 2 : index
    %c0_218 = arith.constant 0 : index
    %c0_219 = arith.constant 0 : index
    %134 = vector.load %arg5[%c0_216, %c2_217, %c0_218, %c0_219] : memref<1x18x18x128xbf16, #tpu.memory_space<vmem>>, vector<1x16x16x128xbf16>
    %135 = vector.shape_cast %134 : vector<1x16x16x128xbf16> to vector<256x128xbf16>
    %c1_220 = arith.constant 1 : index
    %c6_221 = arith.constant 6 : index
    %c0_222 = arith.constant 0 : index
    %c0_223 = arith.constant 0 : index
    %136 = vector.load %arg2[%c1_220, %c6_221, %c0_222, %c0_223] : memref<2x9x128x128xbf16, #tpu.memory_space<vmem>>, vector<1x1x128x128xbf16>
    %137 = vector.shape_cast %136 : vector<1x1x128x128xbf16> to vector<128x128xbf16>
    %cst_224 = arith.constant dense<0.000000e+00> : vector<256x128xf32>
    %138 = tpu.matmul %135, %137, %cst_224 {dimension_numbers = #tpu.dot_dimension_numbers<[1], [0], [0], [1], [0, 0, 1, 1], [], []>} : vector<256x128xbf16>, vector<128x128xbf16>, vector<256x128xf32> -> vector<256x128xf32>
    %c0_225 = arith.constant 0 : index
    %c0_226 = arith.constant 0 : index
    %139 = vector.load %arg6[%c0_225, %c0_226] : memref<256x128xf32, #tpu.memory_space<vmem>>, vector<256x128xf32>
    %140 = arith.addf %139, %138 : vector<256x128xf32>
    %c0_227 = arith.constant 0 : index
    %c0_228 = arith.constant 0 : index
    %141 = vector.load %arg6[%c0_227, %c0_228] : memref<256x128xf32, #tpu.memory_space<vmem>>, vector<256x128xf32>
    tpu.vector_store %arg6[%c0_227, %c0_228], %140 {strides = array<i32>} : memref<256x128xf32, #tpu.memory_space<vmem>>, vector<256x128xf32>,
    %c0_229 = arith.constant 0 : index
    %c2_230 = arith.constant 2 : index
    %c1_231 = arith.constant 1 : index
    %c0_232 = arith.constant 0 : index
    %142 = vector.load %arg5[%c0_229, %c2_230, %c1_231, %c0_232] : memref<1x18x18x128xbf16, #tpu.memory_space<vmem>>, vector<1x16x16x128xbf16>
    %143 = vector.shape_cast %142 : vector<1x16x16x128xbf16> to vector<256x128xbf16>
    %c1_233 = arith.constant 1 : index
    %c7_234 = arith.constant 7 : index
    %c0_235 = arith.constant 0 : index
    %c0_236 = arith.constant 0 : index
    %144 = vector.load %arg2[%c1_233, %c7_234, %c0_235, %c0_236] : memref<2x9x128x128xbf16, #tpu.memory_space<vmem>>, vector<1x1x128x128xbf16>
    %145 = vector.shape_cast %144 : vector<1x1x128x128xbf16> to vector<128x128xbf16>
    %cst_237 = arith.constant dense<0.000000e+00> : vector<256x128xf32>
    %146 = tpu.matmul %143, %145, %cst_237 {dimension_numbers = #tpu.dot_dimension_numbers<[1], [0], [0], [1], [0, 0, 1, 1], [], []>} : vector<256x128xbf16>, vector<128x128xbf16>, vector<256x128xf32> -> vector<256x128xf32>
    %c0_238 = arith.constant 0 : index
    %c0_239 = arith.constant 0 : index
    %147 = vector.load %arg6[%c0_238, %c0_239] : memref<256x128xf32, #tpu.memory_space<vmem>>, vector<256x128xf32>
    %148 = arith.addf %147, %146 : vector<256x128xf32>
    %c0_240 = arith.constant 0 : index
    %c0_241 = arith.constant 0 : index
    %149 = vector.load %arg6[%c0_240, %c0_241] : memref<256x128xf32, #tpu.memory_space<vmem>>, vector<256x128xf32>
    tpu.vector_store %arg6[%c0_240, %c0_241], %148 {strides = array<i32>} : memref<256x128xf32, #tpu.memory_space<vmem>>, vector<256x128xf32>,
    %c0_242 = arith.constant 0 : index
    %c2_243 = arith.constant 2 : index
    %c2_244 = arith.constant 2 : index
    %c0_245 = arith.constant 0 : index
    %150 = vector.load %arg5[%c0_242, %c2_243, %c2_244, %c0_245] : memref<1x18x18x128xbf16, #tpu.memory_space<vmem>>, vector<1x16x16x128xbf16>
    %151 = vector.shape_cast %150 : vector<1x16x16x128xbf16> to vector<256x128xbf16>
    %c1_246 = arith.constant 1 : index
    %c8_247 = arith.constant 8 : index
    %c0_248 = arith.constant 0 : index
    %c0_249 = arith.constant 0 : index
    %152 = vector.load %arg2[%c1_246, %c8_247, %c0_248, %c0_249] : memref<2x9x128x128xbf16, #tpu.memory_space<vmem>>, vector<1x1x128x128xbf16>
    %153 = vector.shape_cast %152 : vector<1x1x128x128xbf16> to vector<128x128xbf16>
    %cst_250 = arith.constant dense<0.000000e+00> : vector<256x128xf32>
    %154 = tpu.matmul %151, %153, %cst_250 {dimension_numbers = #tpu.dot_dimension_numbers<[1], [0], [0], [1], [0, 0, 1, 1], [], []>} : vector<256x128xbf16>, vector<128x128xbf16>, vector<256x128xf32> -> vector<256x128xf32>
    %c0_251 = arith.constant 0 : index
    %c0_252 = arith.constant 0 : index
    %155 = vector.load %arg6[%c0_251, %c0_252] : memref<256x128xf32, #tpu.memory_space<vmem>>, vector<256x128xf32>
    %156 = arith.addf %155, %154 : vector<256x128xf32>
    %c0_253 = arith.constant 0 : index
    %c0_254 = arith.constant 0 : index
    %157 = vector.load %arg6[%c0_253, %c0_254] : memref<256x128xf32, #tpu.memory_space<vmem>>, vector<256x128xf32>
    tpu.vector_store %arg6[%c0_253, %c0_254], %156 {strides = array<i32>} : memref<256x128xf32, #tpu.memory_space<vmem>>, vector<256x128xf32>,
    %c0_255 = arith.constant 0 : index
    %c0_256 = arith.constant 0 : index
    %158 = vector.load %arg6[%c0_255, %c0_256] : memref<256x128xf32, #tpu.memory_space<vmem>>, vector<256x128xf32>
    %c1_257 = arith.constant 1 : index
    %c0_258 = arith.constant 0 : index
    %c0_259 = arith.constant 0 : index
    %159 = vector.load %arg3[%c1_257, %c0_258, %c0_259] : memref<2x1x128xf32, #tpu.memory_space<vmem>>, vector<1x1x128xf32>
    %160 = vector.shape_cast %159 : vector<1x1x128xf32> to vector<1x128xf32>
    %161 = vector.broadcast %160 : vector<1x128xf32> to vector<256x128xf32>
    %162 = arith.addf %158, %161 : vector<256x128xf32>
    %cst_260 = arith.constant 0.000000e+00 : f32
    %163 = vector.broadcast %cst_260 : f32 to vector<256x128xf32>
    %164 = arith.maximumf %162, %163 : vector<256x128xf32>
    %165 = vector.shape_cast %164 : vector<256x128xf32> to vector<8x2x16x128xf32>
    %166 = vector.extract_strided_slice %165 {offsets = [0, 0, 0, 0], sizes = [8, 1, 16, 128], strides = [1, 1, 1, 1]} : vector<8x2x16x128xf32> to vector<8x1x16x128xf32>
    %167 = vector.shape_cast %166 : vector<8x1x16x128xf32> to vector<8x16x128xf32>
    %168 = vector.extract_strided_slice %165 {offsets = [0, 1, 0, 0], sizes = [8, 1, 16, 128], strides = [1, 1, 1, 1]} : vector<8x2x16x128xf32> to vector<8x1x16x128xf32>
    %169 = vector.shape_cast %168 : vector<8x1x16x128xf32> to vector<8x16x128xf32>
    %170 = arith.maximumf %167, %169 : vector<8x16x128xf32>
    %171 = vector.shape_cast %170 : vector<8x16x128xf32> to vector<8x8x2x128xf32>
    %172 = vector.extract_strided_slice %171 {offsets = [0, 0, 0, 0], sizes = [8, 8, 1, 128], strides = [1, 1, 1, 1]} : vector<8x8x2x128xf32> to vector<8x8x1x128xf32>
    %173 = vector.shape_cast %172 : vector<8x8x1x128xf32> to vector<8x8x128xf32>
    %174 = vector.extract_strided_slice %171 {offsets = [0, 0, 1, 0], sizes = [8, 8, 1, 128], strides = [1, 1, 1, 1]} : vector<8x8x2x128xf32> to vector<8x8x1x128xf32>
    %175 = vector.shape_cast %174 : vector<8x8x1x128xf32> to vector<8x8x128xf32>
    %176 = arith.maximumf %173, %175 : vector<8x8x128xf32>
    %177 = vector.shape_cast %176 : vector<8x8x128xf32> to vector<1x64x128xf32>
    %c0_261 = arith.constant 0 : index
    %c0_262 = arith.constant 0 : index
    %c0_263 = arith.constant 0 : index
    %178 = vector.load %arg4[%c0_261, %c0_262, %c0_263] : memref<1x64x128xf32, #tpu.memory_space<vmem>>, vector<1x64x128xf32>
    tpu.vector_store %arg4[%c0_261, %c0_262, %c0_263], %177 {strides = array<i32>} : memref<1x64x128xf32, #tpu.memory_space<vmem>>, vector<1x64x128xf32>,
    return
  }
  func.func @transform_0(%arg0: i32) -> (i32, i32, i32, i32) {
    %c0_i32 = arith.constant 0 : i32
    %c0_i32_0 = arith.constant 0 : i32
    %c0_i32_1 = arith.constant 0 : i32
    %c0_i32_2 = arith.constant 0 : i32
    return %arg0, %c0_i32, %c0_i32_0, %c0_i32_1 : i32, i32, i32, i32
  }
  func.func @transform_1(%arg0: i32) -> (i32, i32, i32, i32) {
    %c0_i32 = arith.constant 0 : i32
    %c0_i32_0 = arith.constant 0 : i32
    %c0_i32_1 = arith.constant 0 : i32
    %c0_i32_2 = arith.constant 0 : i32
    %c0_i32_3 = arith.constant 0 : i32
    return %c0_i32, %c0_i32_0, %c0_i32_1, %c0_i32_2 : i32, i32, i32, i32
  }
  func.func @transform_2(%arg0: i32) -> (i32, i32, i32) {
    %c0_i32 = arith.constant 0 : i32
    %c0_i32_0 = arith.constant 0 : i32
    %c0_i32_1 = arith.constant 0 : i32
    %c0_i32_2 = arith.constant 0 : i32
    return %c0_i32, %c0_i32_0, %c0_i32_1 : i32, i32, i32
  }
  func.func @transform_3(%arg0: i32) -> (i32, i32, i32) {
    %c0_i32 = arith.constant 0 : i32
    %c0_i32_0 = arith.constant 0 : i32
    %c0_i32_1 = arith.constant 0 : i32
    return %arg0, %c0_i32, %c0_i32_0 : i32, i32, i32
  }
}

</mosaic_0001>

<bundles_post_ra>
// kernel: block_forward_pallas.1
= control target key start
LH: loop header
LB: loop body
LE: loop exit
PB: predicated region body
PF: predicated region fallthrough
CT: control target
= control target key end

     0   :  { %8 = vsyncpa [#allocation5], 0  ;;  %s20315_s0 = inlined_call_operand.vmem [shape: bf16[2,16,16,128], index: 0, kind: input, shape index: {}]   ;;  %s20316_s1 = inlined_call_operand.vmem [shape: bf16[2,9,128,128], index: 1, kind: input, shape index: {}]   ;;  %s20317_s2 = inlined_call_operand.vmem [shape: f32[2,1,128], index: 2, kind: input, shape index: {}]   ;;  %s20318_s3 = inlined_call_operand.hbm [shape: f32[2,64,128], index: 3, kind: output, shape index: {}]  }
   0x1   :  { %10 = vsyncpa [#allocation5 + $0x1], 0  ;;  %s16257_s12 = smov 0   ;;  %s16259_s13 = smov 0  }
   0x2   :  { %s16261_s14 = smov 0   ;;  %s16263_s15 = smov 0  }
   0x3 LB: > { %s16278_s16 = sadd.s32 4294967295, %s16230_s15   ;;  %s13643_s17 = sadd.s32 4294967294, %s16230_s15   ;;  %s16230_s15 = sphi %s16263_s15, %s20547_s15   ;;  %s16226_s14 = sphi %s16261_s14, %s20546_s14   ;;  %s16222_s13 = sphi %s16259_s13, %s20545_s13   ;;  %s16218_s12 = sphi %s16257_s12, %s20544_s12  }
   0x4   : > { %s16282_s18 = sadd.s32 1, %s16230_s15   ;;  %s91_s19 = sadd.s32 1, %s16226_s14 }
   0x5   : > { %s88_s20 = ssub.s32 %s16230_s15, %s16282_s18  ;;  %p101_p0 = scmp.ne.s32.totalorder %s16226_s14, %s16222_s13 }
   0x6   : > { %p89_p1 = scmp.eq.s32.totalorder %s88_s20, 0  ;;  %p102_p2 = scmp.eq.s32.totalorder %s16278_s16, 1 }
   0x7   : > { %p107_p3 = scmp.ne.s32.totalorder %s16222_s13, %s16218_s12  ;;  %p108_p4 = scmp.eq.s32.totalorder %s13643_s17, 1 }
   0x8   : > { %s16293_s21 = scalar_select %p89_p1, %s16226_s14, %s91_s19  }
   0x9   : > { %p16295_p5 = por %p102_p2, %p101_p0  ;;  %p16299_p6 = por %p108_p4, %p107_p3 }
   0xa   : > { %p13646_p7 = scmp.ge.s32.totalorder %s16230_s15, 1  ;;  %p140_p8 = scmp.lt.s32.totalorder %s16230_s15, 3 }
   0xc   : > { %p141_p9 = pnand %p13646_p7, %p140_p8 }
   0xe   : > { %144 = sbr.rel (%p141_p9) target bundleno = 1287 (0x507), region = 32 }
  0x13   : > { %v15927_v0 = vld [vmem:[%s20316_s1 + $0x38] sm:$0xff]   ;;  %v16232_v2 = vmov 0   ;;  %v15929_v3 = vld [vmem:[%s20316_s1 + $0x30] sm:$0xff]   ;;  %v15931_v5 = vld [vmem:[%s20316_s1 + $0x28] sm:$0xff]   ;;  %p164_p10 = scmp.lt.s32.totalorder %s16278_s16, 1  ;;  %vm177_vm0 = vcmask 1040384  }
  0x14   : > { %v15928_v1 = vld [vmem:[%s20316_s1 + $0x78] sm:$0xff]   ;;  %170 = vst [vmem:[#allocation2] sm:$0xf] %v16232_v2  ;;  %171 = vst [vmem:[#allocation2 + $0x4] sm:$0xf] %v16232_v2  ;;  %15020 = vmatprep.subr.bf16.mxu0 %v15927_v0  ;;  %v15930_v4 = vld [vmem:[%s20316_s1 + $0x70] sm:$0xff]  }
  0x15   : > { %172 = vst [vmem:[#allocation2 + $0x8] sm:$0x1] %v16232_v2  ;;  %174 = vst [vmem:[#allocation2 + $0xcc] sm:$0xf] %v16232_v2  ;;  %15068 = vmatprep.subr.bf16.mxu1 %v15928_v1  ;;  %15021 = vmatpush3.bf16.msra.mxu0 %v15927_v0  ;;  %v15932_v6 = vld [vmem:[%s20316_s1 + $0x68] sm:$0xff]   ;;  %v15933_v7 = vld [vmem:[%s20316_s1 + $0x20] sm:$0xff]  }
  0x16   : > { %175 = vst [vmem:[#allocation2 + $0xd0] sm:$0xf] %v16232_v2  ;;  %176 = vst [vmem:[#allocation2 + $0xd4] sm:$0x1] %v16232_v2  ;;  %15069 = vmatpush3.bf16.msra.mxu1 %v15928_v1  ;;  %15022 = vmatprep.subr.bf16.mxu0 %v15929_v3  ;;  %v15934_v8 = vld [vmem:[%s20316_s1 + $0x60] sm:$0xff]   ;;  %s165_s19 = scalar_select %p164_p10, %s16278_s16, 1 }
  0x17   : > { %15070 = vmatprep.subr.bf16.mxu1 %v15930_v4  ;;  %v15935_v9 = vld [vmem:[%s20316_s1 + $0x18] sm:$0xff]   ;;  %v15937_v11 = vld [vmem:[%s20316_s1 + $0x10] sm:$0xff]   ;;  %vm178_vm1 = vsmask.f32 256  ;;  %v20332_v14 = vmov 0  ;;  %v15939_v17 = vld [vmem:[%s20316_s1 + $0x8] sm:$0xff]  }
  0x18   : > { %v15936_v10 = vld [vmem:[%s20316_s1 + $0x58] sm:$0xff]   ;;  %s14554_s27 = sshll.u32 %s165_s19, 7  ;;  %v15938_v12 = vld [vmem:[%s20316_s1 + $0x50] sm:$0xff]   ;;  %vm16350_vm2 = vmand %vm177_vm0, %vm178_vm1  ;;  %vm234_vm3 = vsmask.f32 7938  ;;  %vm645_vm5 = vcmask 1043456  }
  0x19   : > { %15023 = vmatpush3.bf16.msra.mxu0 %v15929_v3  ;;  %s16346_s7 = scalar_lea.vmem %s20315_s0, %s14554_s27  ;;  %v20333_v14 = vsel %vm16350_vm2, 4294967295, %v20332_v14  ;;  %vm16361_vm4 = vmand %vm177_vm0, %vm234_vm3  ;;  %vm1192_vm6 = vsmask.f32 3328  ;;  %v15940_v21 = vld [vmem:[%s20316_s1 + $0x48] sm:$0xff]   ;;  %vm322_vm7 = vsmask.f32 4368 }
  0x1a   : > { %15071 = vmatpush3.bf16.msra.mxu1 %v15930_v4  ;;  %15024 = vmatprep.subr.bf16.mxu0 %v15931_v5  ;;  %20334 = vst [vmem:[#allocation7_spill] sm:$0xff] %v20333_v14  ;;  %v183_v24 = vld [vmem:[#allocation2 + $0xc] sm:$0x1]  ;;  %v290_v25 = vld [vmem:[%s16346_s7] sm:$0xf]  ;;  %vm16389_vm9 = vmor %vm178_vm1, %vm322_vm7  ;;  %v20337_v42 = vmov 0 }
  0x1b   : > { %15072 = vmatprep.subr.bf16.mxu1 %v15932_v6  ;;  %v180_v13 = vld [vmem:[#allocation2] sm:$0x1]  ;;  %v1145_v16 = vld [vmem:[#allocation2 + $0x4] sm:$0xf]  ;;  %v184_v27 = vsel %vm16350_vm2, 0, %v183_v24  ;;  %v325_v30 = vshrl.u32 %v290_v25, 16  ;;  %vm16399_vm10 = vmand %vm645_vm5, %vm234_vm3 }
  0x1c   : > { %v236_v15 = vld [vmem:[#allocation2 + $0x8] sm:$0x1]  ;;  %v181_v18 = vsel %vm16350_vm2, 0, %v180_v13  ;;  %v1205_v20 = vshll.u32 %v1145_v16, 16  ;;  %v1209_v23 = vshrl.u32 %v1145_v16, 16  ;;  %v328_v31 = vshll.u32 %v290_v25, 16 }
  0x1d   : > { %15025 = vmatpush3.bf16.msra.mxu0 %v15931_v5  ;;  %182 = vst [vmem:[#allocation2] sm:$0x1] %v181_v18  ;;  %v237_v22 = vsel %vm16361_vm4, 0, %v236_v15  ;;  %v291_v28 = vld [vmem:[%s16346_s7 + $0x4] sm:$0xf]  ;;  %v327_v39 = vrot.slane %v325_v30, 7 }
  0x1e   : > { %15073 = vmatpush3.bf16.msra.mxu1 %v15932_v6  ;;  %15026 = vmatprep.subr.bf16.mxu0 %v15933_v7  ;;  %238 = vst [vmem:[#allocation2 + $0x8] sm:$0x1] %v237_v22  ;;  %v16371_v26 = vrot.slane %v1205_v20, 5  ;;  %v1211_v29 = vrot.slane %v1209_v23, 4  ;;  %185 = vst [vmem:[#allocation2 + $0xc] sm:$0x1] %v184_v27 }
  0x1f   : > { %15074 = vmatprep.subr.bf16.mxu1 %v15934_v8  ;;  %v333_v32 = vshrl.u32 %v291_v28, 16  ;;  %v239_v33 = vld [vmem:[#allocation2 + $0x14] sm:$0x1]  ;;  %v15941_v34 = vld [vmem:[%s20316_s1] sm:$0xff]   ;;  %v336_v35 = vshll.u32 %v291_v28, 16  ;;  %v20338_v42 = vsel %vm16389_vm9, 4294967295, %v20337_v42  ;;  %v330_v48 = vor.u32 %v328_v31, %v327_v39 }
  0x20   : > { %v240_v36 = vsel %vm16361_vm4, 0, %v239_v33  ;;  %v16384_v37 = vld [vmem:[%s20316_s1 + $0x40] sm:$0xff]   ;;  %vm1193_vm8 = vsmask.f32 7440  ;;  %v1212_v38 = vor.u32 %v1211_v29, %v16371_v26  ;;  %v186_v41 = vld [vmem:[#allocation2 + $0x18] sm:$0x1] }
  0x21   : > { %15027 = vmatpush3.bf16.msra.mxu0 %v15933_v7  ;;  %v335_v40 = vrot.slane %v333_v32, 7  ;;  %241 = vst [vmem:[#allocation2 + $0x14] sm:$0x1] %v240_v36  ;;  %20339 = vst [vmem:[#allocation8_spill] sm:$0xff] %v20338_v42  ;;  %v187_v43 = vsel %vm16350_vm2, 0, %v186_v41  ;;  %v20340_v46 = vmov 0 }
  0x22   : > { %15075 = vmatpush3.bf16.msra.mxu1 %v15934_v8  ;;  %15028 = vmatprep.subr.bf16.mxu0 %v15935_v9  ;;  %v292_v44 = vld [vmem:[%s16346_s7 + $0x8] sm:$0xf]  ;;  %v293_v45 = vld [vmem:[%s16346_s7 + $0xc] sm:$0xf]  ;;  %v20341_v46 = vsel %vm16399_vm10, 4294967295, %v20340_v46  ;;  %v16403_v47 = vrot.slane %v1212_v38, 4  ;;  %vm16415_vm11 = vmor %vm1192_vm6, %vm1193_vm8 }
  0x23   : > { %15076 = vmatprep.subr.bf16.mxu1 %v15936_v10  ;;  %20342 = vst [vmem:[#allocation9_spill] sm:$0xff] %v20341_v46  ;;  %v331_v49 = vrot.slane %v327_v39, 4  ;;  %v338_v50 = vor.u32 %v336_v35, %v335_v40  ;;  %188 = vst [vmem:[#allocation2 + $0x18] sm:$0x1] %v187_v43  ;;  %v242_v51 = vld [vmem:[#allocation2 + $0x20] sm:$0x1] }
  0x24   : > { %v189_v52 = vld [vmem:[#allocation2 + $0x24] sm:$0x1]  ;;  %v1144_v54 = vld [vmem:[#allocation2] sm:$0xf]  ;;  %v340_v55 = vrot.slane %v335_v40, 4  ;;  %v16410_v60 = vld [vmem:[%s20316_s1 + $0xb8] sm:$0xff]  }
  0x25   : > { %15029 = vmatpush3.bf16.msra.mxu0 %v15935_v9  ;;  %v15943_v53 = vld [vmem:[#allocation2] sm:$0xff]   ;;  %v1146_v56 = vld [vmem:[#allocation2 + $0x8] sm:$0x1]  ;;  %v1196_v57 = vshrl.u32 %v1144_v54, 16  ;;  %v1199_v58 = vshll.u32 %v1144_v54, 16  ;;  %v339_v59 = vsel %vm16389_vm9, %v331_v49, %v338_v50  ;;  %v342_v61 = vshrl.u32 %v292_v44, 16 }
  0x26   : > { %15077 = vmatpush3.bf16.msra.mxu1 %v15936_v10  ;;  %15030 = vmatprep.subr.bf16.mxu0 %v15937_v11  ;;  %v1215_v62 = vshll.u32 %v1146_v56, 16  ;;  %v647_v63 = vld [vmem:[#allocation2 + $0xc] sm:$0xf]  ;;  %650 = vst [vmem:[#allocation2 + $0x10] sm:$0xf] %v339_v59  ;;  %v345_v0 = vshll.u32 %v292_v44, 16 }
  0x27   : > { %15078 = vmatprep.subr.bf16.mxu1 %v15938_v12  ;;  %v350_v1 = vshrl.u32 %v293_v45, 16  ;;  %v353_v2 = vshll.u32 %v293_v45, 16  ;;  %15036 = vmatprep.mubr.bf16.mxu0 %v15943_v53  ;;  %v20343_v3 = vmov 0  ;;  %v1198_v4 = vrot.slane %v1196_v57, 4  ;;  %v294_v8 = vld [vmem:[%s16346_s7 + $0x10] sm:$0xf] }
  0x28   : > { %v20344_v3 = vsel %vm16415_vm11, 4294967295, %v20343_v3  ;;  %v1201_v5 = vrot.slane %v1199_v58, 5  ;;  %v648_v6 = vsel %vm16399_vm10, %v330_v48, %v647_v63  ;;  %v344_v7 = vrot.slane %v342_v61, 7  ;;  %v651_v10 = vld [vmem:[#allocation2 + $0x14] sm:$0x1]  ;;  %v16432_v22 = vld [vmem:[%s20316_s1 + $0xf8] sm:$0xff]  }
  0x29   : > { %15031 = vmatpush3.bf16.msra.mxu0 %v15937_v11  ;;  %20345 = vst [vmem:[#allocation10_spill] sm:$0xff] %v20344_v3  ;;  %v1217_v9 = vrot.slane %v1215_v62, 5  ;;  %649 = vst [vmem:[#allocation2 + $0xc] sm:$0xf] %v648_v6  ;;  %v352_v11 = vrot.slane %v350_v1, 7  ;;  %v190_v13 = vsel %vm16350_vm2, 0, %v189_v52  ;;  %v652_v16 = vsel %vm16350_vm2, %v340_v55, %v651_v10 }
  0x2a   : > { %15079 = vmatpush3.bf16.msra.mxu1 %v15938_v12  ;;  %15032 = vmatprep.subr.bf16.mxu0 %v15939_v17  ;;  %v243_v12 = vsel %vm16361_vm4, 0, %v242_v51  ;;  %v1202_v15 = vor.u32 %v1201_v5, %v1198_v4  ;;  %v348_v18 = vrot.slane %v344_v7, 4  ;;  %191 = vst [vmem:[#allocation2 + $0x24] sm:$0x1] %v190_v13  ;;  %v295_v20 = vld [vmem:[%s16346_s7 + $0x14] sm:$0xf] }
  0x2b   : > { %15080 = vmatprep.subr.bf16.mxu1 %v15940_v21  ;;  %244 = vst [vmem:[#allocation2 + $0x20] sm:$0x1] %v243_v12  ;;  %v1218_v23 = vsel %vm16415_vm11, %v16403_v47, %v1217_v9  ;;  %653 = vst [vmem:[#allocation2 + $0x14] sm:$0x1] %v652_v16  ;;  %v355_v24 = vor.u32 %v353_v2, %v352_v11  ;;  %v357_v25 = vrot.slane %v352_v11, 4  ;;  %v359_v28 = vshrl.u32 %v294_v8, 16 }
  0x2c   : > { %v654_v27 = vld [vmem:[#allocation2 + $0x18] sm:$0xf]  ;;  %v1203_v29 = vrot.slane %v1202_v15, 4  ;;  %v362_v31 = vshll.u32 %v294_v8, 16  ;;  %v367_v32 = vshrl.u32 %v295_v20, 16  ;;  %v370_v35 = vshll.u32 %v295_v20, 16 }
  0x2d   : > { %15033 = vmatpush3.bf16.msra.mxu0 %v15939_v17  ;;  %v347_v17 = vor.u32 %v345_v0, %v344_v7  ;;  %v356_v33 = vsel %vm16389_vm9, %v348_v18, %v355_v24  ;;  %v1148_v39 = vld [vmem:[#allocation2 + $0x10] sm:$0xf]  ;;  %v296_v48 = vld [vmem:[%s16346_s7 + $0x18] sm:$0xf]  ;;  %v297_v6 = vld [vmem:[%s16346_s7 + $0x1c] sm:$0xf] }
  0x2e   : > { %15081 = vmatpush3.bf16.msra.mxu1 %v15940_v21  ;;  %15034 = vmatprep.subr.bf16.mxu0 %v15941_v34  ;;  %v245_v21 = vld [vmem:[#allocation2 + $0x2c] sm:$0x1]  ;;  %v1208_v38 = vsel %vm16415_vm11, %v1203_v29, %v16371_v26  ;;  %657 = vst [vmem:[#allocation2 + $0x1c] sm:$0xf] %v356_v33  ;;  %v16449_v40 = vrot.slane %v367_v32, 7  ;;  %v1229_v44 = vshll.u32 %v1148_v39, 16 }
  0x2f   : > { %15082 = vmatprep.subr.bf16.mxu1 %v16384_v37  ;;  %v655_v30 = vsel %vm16399_vm10, %v347_v17, %v654_v27  ;;  %v246_v36 = vsel %vm16361_vm4, 0, %v245_v21  ;;  %v13690_v43 = vcombine.low %v1208_v38, %v1218_v23  ;;  %v1233_v45 = vshrl.u32 %v1148_v39, 16  ;;  %v15948_v47 = vld [vmem:[%s20316_s1 + $0xb0] sm:$0xff]   ;;  %v15951_v7 = vld [vmem:[%s20316_s1 + $0xa8] sm:$0xff]   ;;  %v248_v24 = vld [vmem:[#allocation2 + $0x38] sm:$0x1] }
  0x30   : > { %656 = vst [vmem:[#allocation2 + $0x18] sm:$0xf] %v655_v30  ;;  %247 = vst [vmem:[#allocation2 + $0x2c] sm:$0x1] %v246_v36  ;;  %v15944_v49 = vld [vmem:[#allocation2 + $0xc] sm:$0xff]   ;;  %v372_v52 = vor.u32 %v370_v35, %v16449_v40  ;;  %v1231_v55 = vrot.slane %v1229_v44, 5 }
  0x31   : > { %15035 = vmatpush3.bf16.msra.mxu0 %v15941_v34  ;;  %v361_v34 = vrot.slane %v359_v28, 7  ;;  %v1147_v50 = vld [vmem:[#allocation2 + $0xc] sm:$0xf]  ;;  %15084 = vmatprep.mubr.bf16.mxu1 %v13690_v43  ;;  %v1235_v56 = vrot.slane %v1233_v45, 4  ;;  %v374_v62 = vrot.slane %v16449_v40, 4  ;;  %v376_v0 = vshrl.u32 %v296_v48, 16 }
  0x32   : > { %15083 = vmatpush3.bf16.msra.mxu1 %v16384_v37  ;;  %15116 = vmatprep.subr.bf16.mxu0 %v16410_v60  ;;  %v192_v37 = vld [vmem:[#allocation2 + $0x30] sm:$0x1]  ;;  %v1220_v53 = vshrl.u32 %v1147_v50, 16  ;;  %v1223_v54 = vshll.u32 %v1147_v50, 16  ;;  %v658_v57 = vld [vmem:[#allocation2 + $0x20] sm:$0x1] }
  0x33   : > { %15164 = vmatprep.subr.bf16.mxu1 %v16432_v22  ;;  %v193_v41 = vsel %vm16350_vm2, 0, %v192_v37  ;;  %v364_v26 = vor.u32 %v362_v31, %v361_v34  ;;  %v365_v51 = vrot.slane %v361_v34, 4  ;;  %v1149_v58 = vld [vmem:[#allocation2 + $0x14] sm:$0x1]  ;;  %v659_v59 = vsel %vm16350_vm2, %v357_v25, %v658_v57  ;;  %v661_v63 = vld [vmem:[#allocation2 + $0x24] sm:$0xf] }
  0x34   : > { %194 = vst [vmem:[#allocation2 + $0x30] sm:$0x1] %v193_v41  ;;  %15037 = vmatmul.mubr.bf16.vlgmr.msra.gmra.mxu0 %v15944_v49  ;;  %v1222_v1 = vrot.slane %v1220_v53, 4  ;;  %v1225_v2 = vrot.slane %v1223_v54, 5  ;;  %v1236_v4 = vor.u32 %v1235_v56, %v1231_v55  ;;  %v1239_v5 = vshll.u32 %v1149_v58, 16  ;;  %v15954_v36 = vld [vmem:[%s20316_s1 + $0xa0] sm:$0xff]  }
  0x35   : > { %v373_v61 = vsel %vm16389_vm9, %v365_v51, %v372_v52  ;;  %15117 = vmatpush3.bf16.msra.mxu0 %v16410_v60  ;;  %660 = vst [vmem:[#allocation2 + $0x20] sm:$0x1] %v659_v59  ;;  %v662_v9 = vsel %vm16399_vm10, %v364_v26, %v661_v63  ;;  %v16470_v10 = vrot.slane %v376_v0, 7  ;;  %v379_v11 = vshll.u32 %v296_v48, 16  ;;  %v1151_v17 = vld [vmem:[#allocation2 + $0x1c] sm:$0xf] }
  0x36   : > { %664 = vst [vmem:[#allocation2 + $0x28] sm:$0xf] %v373_v61  ;;  %15118 = vmatprep.subr.bf16.mxu0 %v15948_v47  ;;  %v1226_v12 = vor.u32 %v1225_v2, %v1222_v1  ;;  %v1237_v13 = vrot.slane %v1236_v4, 4  ;;  %v1241_v15 = vrot.slane %v1239_v5, 5  ;;  %663 = vst [vmem:[#allocation2 + $0x24] sm:$0xf] %v662_v9 }
  0x37   : > { %v1150_v8 = vld [vmem:[#allocation2 + $0x18] sm:$0xf]  ;;  %v665_v20 = vld [vmem:[#allocation2 + $0x2c] sm:$0x1]  ;;  %v381_v21 = vor.u32 %v379_v11, %v16470_v10  ;;  %v382_v23 = vrot.slane %v16470_v10, 4  ;;  %v1253_v29 = vshll.u32 %v1151_v17, 16 }
  0x38   : > { %v15946_v16 = vld [vmem:[#allocation2 + $0x18] sm:$0xff]   ;;  %v1244_v60 = vshrl.u32 %v1150_v8, 16  ;;  %v1247_v18 = vshll.u32 %v1150_v8, 16  ;;  %v1227_v25 = vrot.slane %v1226_v12, 4  ;;  %v1242_v27 = vsel %vm16415_vm11, %v1237_v13, %v1241_v15  ;;  %v298_v41 = vld [vmem:[%s16346_s7 + $0x20] sm:$0xf] }
  0x39   : > { %15040 = vmatprep.mubr.bf16.mxu0 %v15946_v16  ;;  %15119 = vmatpush3.bf16.msra.mxu0 %v15948_v47  ;;  %v1257_v32 = vshrl.u32 %v1151_v17, 16  ;;  %v666_v33 = vsel %vm16350_vm2, %v374_v62, %v665_v20  ;;  %v384_v34 = vshrl.u32 %v297_v6, 16  ;;  %v195_v35 = vld [vmem:[#allocation2 + $0x3c] sm:$0x1]  ;;  %v1255_v38 = vrot.slane %v1253_v29, 5  ;;  %v15959_v43 = vld [vmem:[%s20316_s1 + $0xf0] sm:$0xff]  }
  0x3a   : > { %v1246_v28 = vrot.slane %v1244_v60, 4  ;;  %v1249_v31 = vrot.slane %v1247_v18, 5  ;;  %15120 = vmatprep.subr.bf16.mxu0 %v15951_v7  ;;  %v1232_v37 = vsel %vm16415_vm11, %v1227_v25, %v1231_v55  ;;  %667 = vst [vmem:[#allocation2 + $0x2c] sm:$0x1] %v666_v33  ;;  %v387_v39 = vshll.u32 %v297_v6, 16  ;;  %v15957_v50 = vld [vmem:[%s20316_s1 + $0x98] sm:$0xff]  }
  0x3b   : > { %v668_v30 = vld [vmem:[#allocation2 + $0x30] sm:$0xf]  ;;  %v13691_v44 = vcombine.low %v1232_v37, %v1242_v27  ;;  %v1259_v48 = vrot.slane %v1257_v32, 4  ;;  %v16489_v49 = vrot.slane %v384_v34, 7  ;;  %v249_v52 = vsel %vm16361_vm4, 0, %v248_v24  ;;  %v15963_v61 = vld [vmem:[%s20316_s1 + $0xe8] sm:$0xff]  }
  0x3c   : > { %v669_v40 = vsel %vm16399_vm10, %v381_v21, %v668_v30  ;;  %v1152_v45 = vld [vmem:[#allocation2 + $0x20] sm:$0x1]  ;;  %v1250_v47 = vor.u32 %v1249_v31, %v1246_v28  ;;  %v196_v53 = vsel %vm16350_vm2, 0, %v195_v35  ;;  %v393_v54 = vshrl.u32 %v298_v41, 16  ;;  %250 = vst [vmem:[#allocation2 + $0x38] sm:$0x1] %v249_v52 }
  0x3d   : > { %670 = vst [vmem:[#allocation2 + $0x30] sm:$0xf] %v669_v40  ;;  %v1263_v26 = vshll.u32 %v1152_v45, 16  ;;  %v1154_v51 = vld [vmem:[#allocation2 + $0x28] sm:$0xf]  ;;  %15121 = vmatpush3.bf16.msra.mxu0 %v15951_v7  ;;  %15085 = vmatmul.mubr.bf16.vlgmr.msra.gmra.mxu1 %v13691_v44  ;;  %v1260_v56 = vor.u32 %v1259_v48, %v1255_v38  ;;  %v389_v59 = vor.u32 %v387_v39, %v16489_v49  ;;  %v391_v11 = vrot.slane %v16489_v49, 4 }
  0x3e   : > { %v1251_v55 = vrot.slane %v1250_v47, 4  ;;  %v15947_v57 = vld [vmem:[#allocation2 + $0x24] sm:$0xff]   ;;  %197 = vst [vmem:[#allocation2 + $0x3c] sm:$0x1] %v196_v53  ;;  %15122 = vmatprep.subr.bf16.mxu0 %v15954_v36  ;;  %v1277_v1 = vshll.u32 %v1154_v51, 16  ;;  %15165 = vmatpush3.bf16.msra.mxu1 %v16432_v22  ;;  %v1281_v6 = vshrl.u32 %v1154_v51, 16 }
  0x3f   : > { %v1153_v58 = vld [vmem:[#allocation2 + $0x24] sm:$0xf]  ;;  %v1265_v62 = vrot.slane %v1263_v26, 5  ;;  %v1261_v5 = vrot.slane %v1260_v56, 4  ;;  %15041 = vmatmul.mubr.bf16.gmra.mxu0 %v15947_v57  ;;  %v390_v7 = vsel %vm16389_vm9, %v382_v23, %v389_v59  ;;  %15166 = vmatprep.subr.bf16.mxu1 %v15959_v43  ;;  %v16513_v15 = vrot.slane %v393_v54, 7  ;;  %v15962_v60 = vld [vmem:[%s20316_s1 + $0x90] sm:$0xff]  }
  0x40   : > { %v1268_v63 = vshrl.u32 %v1153_v58, 16  ;;  %v1271_v0 = vshll.u32 %v1153_v58, 16  ;;  %v16503_v2 = vld [vmem:[%s16346_s7 + $0x24] sm:$0xf]  ;;  %v1256_v4 = vsel %vm16415_vm11, %v1251_v55, %v1255_v38  ;;  %v1279_v10 = vrot.slane %v1277_v1, 5  ;;  %v15968_v26 = vld [vmem:[%s20316_s1 + $0xd8] sm:$0xff]  }
  0x41   : > { %671 = vst [vmem:[#allocation2 + $0x34] sm:$0xf] %v390_v7  ;;  %15123 = vmatpush3.bf16.msra.mxu0 %v15954_v36  ;;  %v1266_v22 = vsel %vm16415_vm11, %v1261_v5, %v1265_v62  ;;  %v1155_v12 = vld [vmem:[#allocation2 + $0x2c] sm:$0x1]  ;;  %v1283_v13 = vrot.slane %v1281_v6, 4  ;;  %v396_v16 = vshll.u32 %v298_v41, 16 }
  0x42   : > { %v1270_v8 = vrot.slane %v1268_v63, 4  ;;  %v1273_v9 = vrot.slane %v1271_v0, 5  ;;  %15124 = vmatprep.subr.bf16.mxu0 %v15957_v50  ;;  %v13692_v17 = vcombine.low %v1256_v4, %v1266_v22  ;;  %v1287_v20 = vshll.u32 %v1155_v12, 16  ;;  %15167 = vmatpush3.bf16.msra.mxu1 %v15959_v43  ;;  %v251_v29 = vld [vmem:[#allocation2 + $0x44] sm:$0x1]  ;;  %v15967_v43 = vld [vmem:[%s20316_s1 + $0x88] sm:$0xff]  }
  0x43   : > { %v401_v23 = vshrl.u32 %v16503_v2, 16  ;;  %v1284_v24 = vor.u32 %v1283_v13, %v1279_v10  ;;  %v398_v28 = vor.u32 %v396_v16, %v16513_v15  ;;  %15168 = vmatprep.subr.bf16.mxu1 %v15963_v61  ;;  %v15964_v30 = vld [vmem:[%s20316_s1 + $0xe0] sm:$0xff]   ;;  %v672_v33 = vld [vmem:[#allocation2 + $0x38] sm:$0x1]  ;;  %v198_v35 = vld [vmem:[#allocation2 + $0x48] sm:$0x1] }
  0x44   : > { %v1274_v18 = vor.u32 %v1273_v9, %v1270_v8  ;;  %v1156_v21 = vld [vmem:[#allocation2 + $0x30] sm:$0xf]  ;;  %15088 = vmatprep.mubr.bf16.mxu1 %v13692_v17  ;;  %v1289_v32 = vrot.slane %v1287_v20, 5  ;;  %v16526_v36 = vld [vmem:[%s16346_s7 + $0x28] sm:$0xf]  ;;  %v673_v38 = vsel %vm16350_vm2, %v391_v11, %v672_v33  ;;  %v399_v45 = vrot.slane %v16513_v15, 4 }
  0x45   : > { %v1292_v25 = vshrl.u32 %v1156_v21, 16  ;;  %v1295_v27 = vshll.u32 %v1156_v21, 16  ;;  %v16523_v34 = vrot.slane %v401_v23, 7  ;;  %15125 = vmatpush3.bf16.msra.mxu0 %v15957_v50  ;;  %v1285_v37 = vrot.slane %v1284_v24, 4  ;;  %v675_v41 = vld [vmem:[#allocation2 + $0x3c] sm:$0xf] }
  0x46   : > { %v1275_v31 = vrot.slane %v1274_v18, 4  ;;  %15126 = vmatprep.subr.bf16.mxu0 %v15962_v60  ;;  %674 = vst [vmem:[#allocation2 + $0x38] sm:$0x1] %v673_v38  ;;  %v404_v47 = vshll.u32 %v16503_v2, 16  ;;  %v676_v48 = vsel %vm16399_vm10, %v398_v28, %v675_v41  ;;  %v301_v49 = vld [vmem:[%s16346_s7 + $0x2c] sm:$0xf]  ;;  %15169 = vmatpush3.bf16.msra.mxu1 %v15963_v61 }
  0x47   : > { %v1294_v39 = vrot.slane %v1292_v25, 4  ;;  %v1297_v40 = vrot.slane %v1295_v27, 5  ;;  %v254_v50 = vld [vmem:[#allocation2 + $0x50] sm:$0x1]  ;;  %v1290_v51 = vsel %vm16415_vm11, %v1285_v37, %v1289_v32  ;;  %677 = vst [vmem:[#allocation2 + $0x3c] sm:$0xf] %v676_v48  ;;  %15170 = vmatprep.subr.bf16.mxu1 %v15964_v30 }
  0x48   : > { %v1280_v44 = vsel %vm16415_vm11, %v1275_v31, %v1279_v10  ;;  %v15949_v52 = vld [vmem:[#allocation2 + $0x30] sm:$0xff]   ;;  %v252_v55 = vsel %vm16361_vm4, 0, %v251_v29  ;;  %v406_v59 = vor.u32 %v404_v47, %v16523_v34  ;;  %v199_v0 = vsel %vm16350_vm2, 0, %v198_v35  ;;  %v15972_v9 = vld [vmem:[%s20316_s1 + $0x80] sm:$0xff]   ;;  %v15973_v41 = vld [vmem:[%s20316_s1 + $0xc8] sm:$0xff]   ;;  %s161_s25 = sand.u32 1, %s16222_s13  }
  0x49   : > { %v1157_v53 = vld [vmem:[#allocation2 + $0x34] sm:$0xf]  ;;  %v1298_v54 = vor.u32 %v1297_v40, %v1294_v39  ;;  %v13693_v56 = vcombine.low %v1280_v44, %v1290_v51  ;;  %253 = vst [vmem:[#allocation2 + $0x44] sm:$0x1] %v252_v55  ;;  %v302_v62 = vld [vmem:[%s16346_s7 + $0x30] sm:$0xf]  ;;  %15127 = vmatpush3.bf16.msra.mxu0 %v15962_v60  ;;  %15044 = vmatprep.mubr.bf16.mxu0 %v15949_v52 }
  0x4a   : > { %v1301_v57 = vshll.u32 %v1157_v53, 16  ;;  %v1305_v58 = vshrl.u32 %v1157_v53, 16  ;;  %v201_v61 = vld [vmem:[#allocation2 + $0x54] sm:$0x1]  ;;  %v410_v1 = vshrl.u32 %v16526_v36, 16  ;;  %v413_v2 = vshll.u32 %v16526_v36, 16  ;;  %15128 = vmatprep.subr.bf16.mxu0 %v15967_v43  ;;  %15171 = vmatpush3.bf16.msra.mxu1 %v15964_v30 }
  0x4b   : > { %v16549_v63 = vrot.slane %v1298_v54, 4  ;;  %v16556_v4 = vld [vmem:[%s16346_s7 + $0x34] sm:$0xf]  ;;  %15089 = vmatmul.mubr.bf16.gmra.mxu1 %v13693_v56  ;;  %v407_v7 = vsel %vm16389_vm9, %v399_v45, %v406_v59  ;;  %200 = vst [vmem:[#allocation2 + $0x48] sm:$0x1] %v199_v0  ;;  %v418_v8 = vshrl.u32 %v301_v49, 16  ;;  %15172 = vmatprep.subr.bf16.mxu1 %v15968_v26 }
  0x4c   : > { %v1303_v5 = vrot.slane %v1301_v57, 5  ;;  %v1307_v6 = vrot.slane %v1305_v58, 4  ;;  %678 = vst [vmem:[#allocation2 + $0x40] sm:$0xf] %v407_v7  ;;  %v412_v10 = vrot.slane %v410_v1, 7  ;;  %v421_v11 = vshll.u32 %v301_v49, 16 }
  0x4d   : > { %v255_v22 = vsel %vm16361_vm4, 0, %v254_v50  ;;  %v202_v12 = vsel %vm16350_vm2, 0, %v201_v61  ;;  %v408_v15 = vrot.slane %v16523_v34, 4  ;;  %v420_v16 = vrot.slane %v418_v8, 7  ;;  %15129 = vmatpush3.bf16.msra.mxu0 %v15967_v43  ;;  %v15969_v17 = vld [vmem:[%s20316_s1 + $0xd0] sm:$0xff]   ;;  %s13647_s26 = sshll.u32 %s161_s25, 6 }
  0x4e   : > { %v1308_v13 = vor.u32 %v1307_v6, %v1303_v5  ;;  %256 = vst [vmem:[#allocation2 + $0x50] sm:$0x1] %v255_v22  ;;  %203 = vst [vmem:[#allocation2 + $0x54] sm:$0x1] %v202_v12  ;;  %v427_v60 = vshrl.u32 %v302_v62, 16  ;;  %v1304_v20 = vsel %vm16415_vm11, %v16549_v63, %v1303_v5  ;;  %v416_v21 = vrot.slane %v412_v10, 4  ;;  %15130 = vmatprep.subr.bf16.mxu0 %v15972_v9 }
  0x4f   : > { %v1158_v18 = vld [vmem:[#allocation2 + $0x38] sm:$0x1]  ;;  %v430_v23 = vshll.u32 %v302_v62, 16  ;;  %v435_v24 = vshrl.u32 %v16556_v4, 16  ;;  %v1159_v28 = vld [vmem:[#allocation2 + $0x3c] sm:$0xf]  ;;  %v415_v29 = vor.u32 %v413_v2, %v412_v10  ;;  %v423_v30 = vor.u32 %v421_v11, %v420_v16  ;;  %15173 = vmatpush3.bf16.msra.mxu1 %v15968_v26 }
  0x50   : > { %v1309_v25 = vrot.slane %v1308_v13, 4  ;;  %v1311_v27 = vshll.u32 %v1158_v18, 16  ;;  %v679_v31 = vld [vmem:[#allocation2 + $0x44] sm:$0x1]  ;;  %v1316_v32 = vshrl.u32 %v1159_v28, 16  ;;  %v1319_v33 = vshll.u32 %v1159_v28, 16  ;;  %15174 = vmatprep.subr.bf16.mxu1 %v15969_v17 }
  0x51   : > { %v425_v34 = vrot.slane %v420_v16, 4  ;;  %v429_v35 = vrot.slane %v427_v60, 7  ;;  %v680_v37 = vsel %vm16350_vm2, %v408_v15, %v679_v31  ;;  %v424_v38 = vsel %vm16389_vm9, %v416_v21, %v423_v30  ;;  %v257_v40 = vld [vmem:[#allocation2 + $0x5c] sm:$0x1]  ;;  %15131 = vmatpush3.bf16.msra.mxu0 %v15972_v9  ;;  %v204_v49 = vld [vmem:[#allocation2 + $0x60] sm:$0x1] }
  0x52   : > { %v1313_v36 = vrot.slane %v1311_v27, 5  ;;  %v16579_v39 = vrot.slane %v435_v24, 7  ;;  %681 = vst [vmem:[#allocation2 + $0x44] sm:$0x1] %v680_v37  ;;  %v1318_v43 = vrot.slane %v1316_v32, 4  ;;  %v1321_v44 = vrot.slane %v1319_v33, 5 }
  0x53   : > { %v682_v45 = vld [vmem:[#allocation2 + $0x48] sm:$0xf]  ;;  %685 = vst [vmem:[#allocation2 + $0x4c] sm:$0xf] %v424_v38  ;;  %v432_v47 = vor.u32 %v430_v23, %v429_v35  ;;  %v433_v48 = vrot.slane %v429_v35, 4  ;;  %v15950_v51 = vld [vmem:[#allocation2 + $0x3c] sm:$0xff]   ;;  %15175 = vmatpush3.bf16.msra.mxu1 %v15969_v17 }
  0x54   : > { %v304_v50 = vld [vmem:[%s16346_s7 + $0x38] sm:$0xf]  ;;  %v1314_v26 = vsel %vm16415_vm11, %v1309_v25, %v1313_v36  ;;  %v1160_v52 = vld [vmem:[#allocation2 + $0x40] sm:$0xf]  ;;  %v683_v53 = vsel %vm16399_vm10, %v415_v29, %v682_v45  ;;  %v438_v54 = vshll.u32 %v16556_v4, 16  ;;  %v1322_v56 = vor.u32 %v1321_v44, %v1318_v43  ;;  %15045 = vmatmul.mubr.bf16.gmra.mxu0 %v15950_v51  ;;  %15176 = vmatprep.subr.bf16.mxu1 %v15973_v41  ;;  %s14587_s27 = sshll.u32 %s16278_s16, 10 }
  0x55   : > { %v13694_v55 = vcombine.low %v1304_v20, %v1314_v26  ;;  %v1325_v57 = vshll.u32 %v1160_v52, 16  ;;  %v1329_v58 = vshrl.u32 %v1160_v52, 16  ;;  %684 = vst [vmem:[#allocation2 + $0x48] sm:$0xf] %v683_v53  ;;  %v686_v59 = vld [vmem:[#allocation2 + $0x50] sm:$0x1]  ;;  %s20266_s4 = scalar_lea.hbm %s20318_s3, %s14587_s27 }
  0x56   : > { %v689_v61 = vld [vmem:[#allocation2 + $0x54] sm:$0xf]  ;;  %v687_v62 = vsel %vm16350_vm2, %v425_v34, %v686_v59  ;;  %v440_v63 = vor.u32 %v438_v54, %v16579_v39  ;;  %v442_v0 = vrot.slane %v16579_v39, 4  ;;  %v16597_v2 = vld [vmem:[%s16346_s7 + $0x3c] sm:$0xf]  ;;  %v15974_v4 = vld [vmem:[%s20316_s1 + $0xc0] sm:$0xff]  }
  0x57   : > { %v690_v1 = vsel %vm16399_vm10, %v432_v47, %v689_v61  ;;  %v15975_v5 = vld [vmem:[%s20316_s1 + $0x138] sm:$0xff]   ;;  %15092 = vmatprep.mubr.bf16.mxu1 %v13694_v55  ;;  %v1323_v6 = vrot.slane %v1322_v56, 4  ;;  %v1327_v7 = vrot.slane %v1325_v57, 5  ;;  %v1331_v8 = vrot.slane %v1329_v58, 4  ;;  %688 = vst [vmem:[#allocation2 + $0x50] sm:$0x1] %v687_v62  ;;  %15177 = vmatpush3.bf16.msra.mxu1 %v15973_v41 }
  0x58   : > { %691 = vst [vmem:[#allocation2 + $0x54] sm:$0xf] %v690_v1  ;;  %v258_v9 = vsel %vm16361_vm4, 0, %v257_v40  ;;  %v441_v10 = vsel %vm16389_vm9, %v433_v48, %v440_v63  ;;  %v205_v11 = vsel %vm16350_vm2, 0, %v204_v49  ;;  %v444_v22 = vshrl.u32 %v304_v50, 16  ;;  %15212 = vmatprep.subr.bf16.mxu0 %v15975_v5  ;;  %15178 = vmatprep.subr.bf16.mxu1 %v15974_v4  ;;  %s20275_s16 = scalar_lea.sflag [#allocation5], %s161_s25 }
  0x59   : > { %259 = vst [vmem:[#allocation2 + $0x5c] sm:$0x1] %v258_v9  ;;  %v447_v12 = vshll.u32 %v304_v50, 16  ;;  %v1332_v13 = vor.u32 %v1331_v8, %v1327_v7  ;;  %692 = vst [vmem:[#allocation2 + $0x58] sm:$0xf] %v441_v10  ;;  %v452_v15 = vshrl.u32 %v16597_v2, 16  ;;  %v1328_v24 = vsel %vm16415_vm11, %v1323_v6, %v1327_v7 }
  0x5a   : > { %206 = vst [vmem:[#allocation2 + $0x60] sm:$0x1] %v205_v11  ;;  %v455_v16 = vshll.u32 %v16597_v2, 16  ;;  %v1161_v60 = vld [vmem:[#allocation2 + $0x44] sm:$0x1]  ;;  %v446_v28 = vrot.slane %v444_v22, 7 }
  0x5b   : > { %v1163_v17 = vld [vmem:[#allocation2 + $0x4c] sm:$0xf]  ;;  %v1333_v18 = vrot.slane %v1332_v13, 4  ;;  %v1335_v20 = vshll.u32 %v1161_v60, 16  ;;  %15179 = vmatpush3.bf16.msra.mxu1 %v15974_v4  ;;  %v16619_v49 = vrot.slane %v452_v15, 7  ;;  %vm2061_vm12 = vcmask 1042432  }
  0x5c   : > { %v1349_v21 = vshll.u32 %v1163_v17, 16  ;;  %v1353_v23 = vshrl.u32 %v1163_v17, 16  ;;  %v15952_v25 = vld [vmem:[#allocation2 + $0x48] sm:$0xff]   ;;  %v449_v35 = vor.u32 %v447_v12, %v446_v28  ;;  %v450_v36 = vrot.slane %v446_v28, 4  ;;  %v306_v56 = vld [vmem:[%s16346_s7 + $0x40] sm:$0xf] }
  0x5d   : > { %v1162_v27 = vld [vmem:[#allocation2 + $0x48] sm:$0xf]  ;;  %v1337_v29 = vrot.slane %v1335_v20, 5  ;;  %15048 = vmatprep.mubr.bf16.mxu0 %v15952_v25  ;;  %v207_v55 = vld [vmem:[#allocation2 + $0x6c] sm:$0x1]  ;;  %v457_v61 = vor.u32 %v455_v16, %v16619_v49  ;;  %v459_v2 = vrot.slane %v16619_v49, 4 }
  0x5e   : > { %v1340_v30 = vshrl.u32 %v1162_v27, 16  ;;  %v1343_v31 = vshll.u32 %v1162_v27, 16  ;;  %v1351_v32 = vrot.slane %v1349_v21, 5  ;;  %v1164_v33 = vld [vmem:[#allocation2 + $0x50] sm:$0x1]  ;;  %v1355_v34 = vrot.slane %v1353_v23, 4 }
  0x5f   : > { %v1338_v37 = vsel %vm16415_vm11, %v1333_v18, %v1337_v29  ;;  %v1359_v40 = vshll.u32 %v1164_v33, 16  ;;  %v1165_v48 = vld [vmem:[#allocation2 + $0x54] sm:$0xf]  ;;  %v260_v50 = vld [vmem:[#allocation2 + $0x68] sm:$0x1]  ;;  %v458_v7 = vsel %vm16389_vm9, %v450_v36, %v457_v61  ;;  %v208_v60 = vsel %vm16350_vm2, 0, %v207_v55 }
  0x60   : > { %v1342_v38 = vrot.slane %v1340_v30, 4  ;;  %v1345_v39 = vrot.slane %v1343_v31, 5  ;;  %v693_v41 = vld [vmem:[#allocation2 + $0x5c] sm:$0x1]  ;;  %v13695_v43 = vcombine.low %v1328_v24, %v1338_v37  ;;  %v1356_v44 = vor.u32 %v1355_v34, %v1351_v32  ;;  %v15953_v45 = vld [vmem:[#allocation2 + $0x54] sm:$0xff]   ;;  %s16234_s6 = smov [#allocation4]  }
  0x61   : > { %v694_v47 = vsel %vm16350_vm2, %v442_v0, %v693_v41  ;;  %v1361_v51 = vrot.slane %v1359_v40, 5  ;;  %v1166_v52 = vld [vmem:[#allocation2 + $0x58] sm:$0xf]  ;;  %v1364_v53 = vshrl.u32 %v1165_v48, 16  ;;  %v1367_v54 = vshll.u32 %v1165_v48, 16  ;;  %15049 = vmatmul.mubr.bf16.gmra.mxu0 %v15953_v45  ;;  %s16174_s8 = sshll.u32 %s16234_s6, 4  ;;  %s16175_s8 = int_to_ptr.vmem [resolvable:$false] %s16174_s8 }
  0x62   : > { %v1346_v26 = vor.u32 %v1345_v39, %v1342_v38  ;;  %695 = vst [vmem:[#allocation2 + $0x5c] sm:$0x1] %v694_v47  ;;  %15093 = vmatmul.mubr.bf16.gmra.mxu1 %v13695_v43  ;;  %v1357_v57 = vrot.slane %v1356_v44, 4  ;;  %v1373_v58 = vshll.u32 %v1166_v52, 16  ;;  %v1377_v59 = vshrl.u32 %v1166_v52, 16  ;;  %s16176_s9 = scalar_lea.vmem %s16175_s8, 2048 }
  0x63   : > { %v696_v62 = vld [vmem:[#allocation2 + $0x60] sm:$0xf]  ;;  %v1366_v0 = vrot.slane %v1364_v53, 4  ;;  %v1369_v1 = vrot.slane %v1367_v54, 5  ;;  %v307_v8 = vld [vmem:[%s16346_s7 + $0x44] sm:$0xf] }
  0x64   : > { %v1347_v63 = vrot.slane %v1346_v26, 4  ;;  %v1362_v4 = vsel %vm16415_vm11, %v1357_v57, %v1361_v51  ;;  %v1375_v5 = vrot.slane %v1373_v58, 5  ;;  %v1379_v6 = vrot.slane %v1377_v59, 4  ;;  %699 = vst [vmem:[#allocation2 + $0x64] sm:$0xf] %v458_v7 }
  0x65   : > { %v1370_v10 = vor.u32 %v1369_v1, %v1366_v0  ;;  %v697_v11 = vsel %vm16399_vm10, %v449_v35, %v696_v62  ;;  %v261_v22 = vsel %vm16361_vm4, 0, %v260_v50  ;;  %v263_v12 = vld [vmem:[#allocation2 + $0x74] sm:$0x1]  ;;  %v210_v13 = vld [vmem:[#allocation2 + $0x78] sm:$0x1]  ;;  %v461_v17 = vshrl.u32 %v306_v56, 16 }
  0x66   : > { %v1352_v9 = vsel %vm16415_vm11, %v1347_v63, %v1351_v32  ;;  %v1380_v16 = vor.u32 %v1379_v6, %v1375_v5  ;;  %698 = vst [vmem:[#allocation2 + $0x60] sm:$0xf] %v697_v11  ;;  %262 = vst [vmem:[#allocation2 + $0x68] sm:$0x1] %v261_v22  ;;  %v308_v18 = vld [vmem:[%s16346_s7 + $0x48] sm:$0xf] }
  0x67   : > { %v13696_v15 = vcombine.low %v1352_v9, %v1362_v4  ;;  %v1371_v20 = vrot.slane %v1370_v10, 4  ;;  %209 = vst [vmem:[#allocation2 + $0x6c] sm:$0x1] %v208_v60  ;;  %v464_v21 = vshll.u32 %v306_v56, 16  ;;  %v469_v23 = vshrl.u32 %v307_v8, 16 }
  0x68   : > { %v472_v24 = vshll.u32 %v307_v8, 16  ;;  %v309_v25 = vld [vmem:[%s16346_s7 + $0x4c] sm:$0xf]  ;;  %v1381_v28 = vrot.slane %v1380_v16, 4  ;;  %v463_v29 = vrot.slane %v461_v17, 7  ;;  %v264_v30 = vsel %vm16361_vm4, 0, %v263_v12 }
  0x69   : > { %15096 = vmatprep.mubr.bf16.mxu1 %v13696_v15  ;;  %v1167_v27 = vld [vmem:[#allocation2 + $0x5c] sm:$0x1]  ;;  %v211_v31 = vsel %vm16350_vm2, 0, %v210_v13  ;;  %v1376_v32 = vsel %vm16415_vm11, %v1371_v20, %v1375_v5  ;;  %v471_v34 = vrot.slane %v469_v23, 7  ;;  %265 = vst [vmem:[#allocation2 + $0x74] sm:$0x1] %v264_v30 }
  0x6a   : > { %v1383_v33 = vshll.u32 %v1167_v27, 16  ;;  %212 = vst [vmem:[#allocation2 + $0x78] sm:$0x1] %v211_v31  ;;  %v478_v35 = vshrl.u32 %v308_v18, 16  ;;  %v466_v36 = vor.u32 %v464_v21, %v463_v29  ;;  %v467_v37 = vrot.slane %v463_v29, 4 }
  0x6b   : > { %v481_v38 = vshll.u32 %v308_v18, 16  ;;  %v486_v39 = vshrl.u32 %v309_v25, 16  ;;  %v474_v41 = vor.u32 %v472_v24, %v471_v34  ;;  %v476_v43 = vrot.slane %v471_v34, 4  ;;  %v1169_v45 = vld [vmem:[#allocation2 + $0x64] sm:$0xf] }
  0x6c   : > { %v1385_v40 = vrot.slane %v1383_v33, 5  ;;  %v480_v44 = vrot.slane %v478_v35, 7  ;;  %v489_v48 = vshll.u32 %v309_v25, 16  ;;  %v1397_v51 = vshll.u32 %v1169_v45, 16  ;;  %v266_v54 = vld [vmem:[#allocation2 + $0x80] sm:$0x1] }
  0x6d   : > { %v16645_v47 = vrot.slane %v486_v39, 7  ;;  %v15955_v50 = vld [vmem:[#allocation2 + $0x60] sm:$0xff]   ;;  %v700_v26 = vld [vmem:[#allocation2 + $0x68] sm:$0x1]  ;;  %v475_v52 = vsel %vm16389_vm9, %v467_v37, %v474_v41  ;;  %v1401_v59 = vshrl.u32 %v1169_v45, 16  ;;  %v267_v17 = vsel %vm16361_vm4, 0, %v266_v54 }
  0x6e   : > { %v1386_v49 = vsel %vm16415_vm11, %v1381_v28, %v1385_v40  ;;  %v483_v53 = vor.u32 %v481_v38, %v480_v44  ;;  %v213_v55 = vld [vmem:[#allocation2 + $0x84] sm:$0x1]  ;;  %v701_v57 = vsel %vm16350_vm2, %v459_v2, %v700_v26  ;;  %v1168_v58 = vld [vmem:[#allocation2 + $0x60] sm:$0xf]  ;;  %v703_v61 = vld [vmem:[#allocation2 + $0x6c] sm:$0xf]  ;;  %15052 = vmatprep.mubr.bf16.mxu0 %v15955_v50 }
  0x6f   : > { %v13697_v56 = vcombine.low %v1376_v32, %v1386_v49  ;;  %706 = vst [vmem:[#allocation2 + $0x70] sm:$0xf] %v475_v52  ;;  %v484_v62 = vrot.slane %v480_v44, 4  ;;  %v16654_v63 = vld [vmem:[%s16346_s7 + $0x50] sm:$0xf]  ;;  %v1388_v1 = vshrl.u32 %v1168_v58, 16  ;;  %v704_v6 = vsel %vm16399_vm10, %v466_v36, %v703_v61 }
  0x70   : > { %v311_v0 = vld [vmem:[%s16346_s7 + $0x54] sm:$0xf]  ;;  %702 = vst [vmem:[#allocation2 + $0x68] sm:$0x1] %v701_v57  ;;  %v1391_v4 = vshll.u32 %v1168_v58, 16  ;;  %v16657_v5 = vrot.slane %v1397_v51, 5  ;;  %v491_v9 = vor.u32 %v489_v48, %v16645_v47 }
  0x71   : > { %v269_v7 = vld [vmem:[#allocation2 + $0x8c] sm:$0x1]  ;;  %15097 = vmatmul.mubr.bf16.gmra.mxu1 %v13697_v56  ;;  %v1403_v2 = vrot.slane %v1401_v59, 4  ;;  %705 = vst [vmem:[#allocation2 + $0x6c] sm:$0xf] %v704_v6  ;;  %v493_v10 = vrot.slane %v16645_v47, 4 }
  0x72   : > { %v707_v8 = vld [vmem:[#allocation2 + $0x74] sm:$0x1]  ;;  %v710_v11 = vld [vmem:[#allocation2 + $0x78] sm:$0xf]  ;;  %v1390_v22 = vrot.slane %v1388_v1, 4  ;;  %v1393_v12 = vrot.slane %v1391_v4, 5  ;;  %v492_v60 = vsel %vm16389_vm9, %v484_v62, %v491_v9 }
  0x73   : > { %v708_v13 = vsel %vm16350_vm2, %v476_v43, %v707_v8  ;;  %v711_v15 = vsel %vm16399_vm10, %v483_v53, %v710_v11  ;;  %v1404_v16 = vor.u32 %v1403_v2, %v16657_v5  ;;  %v214_v18 = vsel %vm16350_vm2, 0, %v213_v55  ;;  %713 = vst [vmem:[#allocation2 + $0x7c] sm:$0xf] %v492_v60  ;;  %268 = vst [vmem:[#allocation2 + $0x80] sm:$0x1] %v267_v17 }
  0x74   : > { %709 = vst [vmem:[#allocation2 + $0x74] sm:$0x1] %v708_v13  ;;  %712 = vst [vmem:[#allocation2 + $0x78] sm:$0xf] %v711_v15  ;;  %v1394_v20 = vor.u32 %v1393_v12, %v1390_v22  ;;  %v495_v21 = vshrl.u32 %v16654_v63, 16  ;;  %v498_v23 = vshll.u32 %v16654_v63, 16 }
  0x75   : > { %215 = vst [vmem:[#allocation2 + $0x84] sm:$0x1] %v214_v18  ;;  %v503_v24 = vshrl.u32 %v311_v0, 16  ;;  %v216_v25 = vld [vmem:[#allocation2 + $0x90] sm:$0x1]  ;;  %v1405_v27 = vrot.slane %v1404_v16, 4 }
  0x76   : > { %v506_v28 = vshll.u32 %v311_v0, 16  ;;  %v270_v29 = vsel %vm16361_vm4, 0, %v269_v7  ;;  %v217_v30 = vsel %vm16350_vm2, 0, %v216_v25  ;;  %v16681_v31 = vld [vmem:[%s16346_s7 + $0x58] sm:$0xf]  ;;  %v1395_v32 = vrot.slane %v1394_v20, 4 }
  0x77   : > { %v1172_v33 = vld [vmem:[#allocation2 + $0x70] sm:$0xf]  ;;  %v497_v34 = vrot.slane %v495_v21, 7  ;;  %271 = vst [vmem:[#allocation2 + $0x8c] sm:$0x1] %v270_v29  ;;  %v505_v38 = vrot.slane %v503_v24, 7 }
  0x78   : > { %218 = vst [vmem:[#allocation2 + $0x90] sm:$0x1] %v217_v30  ;;  %v1170_v35 = vld [vmem:[#allocation2 + $0x68] sm:$0x1]  ;;  %v1421_v36 = vshll.u32 %v1172_v33, 16  ;;  %v1425_v37 = vshrl.u32 %v1172_v33, 16  ;;  %v1400_v50 = vsel %vm16415_vm11, %v1395_v32, %v16657_v5 }
  0x79   : > { %v512_v39 = vshrl.u32 %v16681_v31, 16  ;;  %v1407_v40 = vshll.u32 %v1170_v35, 16  ;;  %v15956_v41 = vld [vmem:[#allocation2 + $0x6c] sm:$0xff]   ;;  %v501_v52 = vrot.slane %v497_v34, 4  ;;  %v508_v53 = vor.u32 %v506_v28, %v505_v38  ;;  %v313_v17 = vld [vmem:[%s16346_s7 + $0x5c] sm:$0xf] }
  0x7a   : > { %v1171_v43 = vld [vmem:[#allocation2 + $0x6c] sm:$0xf]  ;;  %v1423_v48 = vrot.slane %v1421_v36, 5  ;;  %v1427_v49 = vrot.slane %v1425_v37, 4  ;;  %15053 = vmatmul.mubr.bf16.gmra.mxu0 %v15956_v41  ;;  %v714_v61 = vld [vmem:[#allocation2 + $0x80] sm:$0x1]  ;;  %v500_v0 = vor.u32 %v498_v23, %v497_v34 }
  0x7b   : > { %v1412_v44 = vshrl.u32 %v1171_v43, 16  ;;  %v1415_v45 = vshll.u32 %v1171_v43, 16  ;;  %v1409_v26 = vrot.slane %v1407_v40, 5  ;;  %v1173_v51 = vld [vmem:[#allocation2 + $0x74] sm:$0x1]  ;;  %v15960_v58 = vld [vmem:[#allocation2 + $0x78] sm:$0xff]   ;;  %v509_v1 = vsel %vm16389_vm9, %v501_v52, %v508_v53 }
  0x7c   : > { %v1428_v56 = vor.u32 %v1427_v49, %v1423_v48  ;;  %v1431_v57 = vshll.u32 %v1173_v51, 16  ;;  %v1174_v62 = vld [vmem:[#allocation2 + $0x78] sm:$0xf]  ;;  %v1175_v63 = vld [vmem:[#allocation2 + $0x7c] sm:$0xf]  ;;  %15056 = vmatprep.mubr.bf16.mxu0 %v15960_v58  ;;  %v715_v8 = vsel %vm16350_vm2, %v493_v10, %v714_v61  ;;  %v510_v60 = vrot.slane %v505_v38, 4 }
  0x7d   : > { %v1414_v54 = vrot.slane %v1412_v44, 4  ;;  %v1417_v55 = vrot.slane %v1415_v45, 5  ;;  %v1410_v59 = vsel %vm16415_vm11, %v1405_v27, %v1409_v26  ;;  %v717_v2 = vld [vmem:[#allocation2 + $0x84] sm:$0xf]  ;;  %720 = vst [vmem:[#allocation2 + $0x88] sm:$0xf] %v509_v1 }
  0x7e   : > { %v13698_v4 = vcombine.low %v1400_v50, %v1410_v59  ;;  %v1429_v6 = vrot.slane %v1428_v56, 4  ;;  %v1433_v7 = vrot.slane %v1431_v57, 5  ;;  %v1436_v9 = vshrl.u32 %v1174_v62, 16  ;;  %v721_v12 = vld [vmem:[#allocation2 + $0x8c] sm:$0x1] }
  0x7f   : > { %v1418_v5 = vor.u32 %v1417_v55, %v1414_v54  ;;  %v1439_v11 = vshll.u32 %v1174_v62, 16  ;;  %v1445_v22 = vshll.u32 %v1175_v63, 16  ;;  %716 = vst [vmem:[#allocation2 + $0x80] sm:$0x1] %v715_v8  ;;  %v1449_v16 = vshrl.u32 %v1175_v63, 16  ;;  %v16719_v54 = vld [vmem:[%s20316_s1 + $0x178] sm:$0xff]  }
  0x80   : > { %15100 = vmatprep.mubr.bf16.mxu1 %v13698_v4  ;;  %v1434_v15 = vsel %vm16415_vm11, %v1429_v6, %v1433_v7  ;;  %v1438_v18 = vrot.slane %v1436_v9, 4  ;;  %v718_v10 = vsel %vm16399_vm10, %v500_v0, %v717_v2  ;;  %v272_v21 = vld [vmem:[#allocation2 + $0x98] sm:$0x1]  ;;  %v722_v25 = vsel %vm16350_vm2, %v510_v60, %v721_v12  ;;  %v724_v28 = vld [vmem:[#allocation2 + $0x90] sm:$0xf]  ;;  %15260 = vmatprep.subr.bf16.mxu1 %v16719_v54 }
  0x81   : > { %v1419_v13 = vrot.slane %v1418_v5, 4  ;;  %v1441_v20 = vrot.slane %v1439_v11, 5  ;;  %v16698_v47 = vrot.slane %v1445_v22, 5  ;;  %v1451_v24 = vrot.slane %v1449_v16, 4  ;;  %719 = vst [vmem:[#allocation2 + $0x84] sm:$0xf] %v718_v10 }
  0x82   : > { %v514_v27 = vrot.slane %v512_v39, 7  ;;  %v219_v29 = vld [vmem:[#allocation2 + $0x9c] sm:$0x1]  ;;  %723 = vst [vmem:[#allocation2 + $0x8c] sm:$0x1] %v722_v25  ;;  %v515_v33 = vshll.u32 %v16681_v31, 16 }
  0x83   : > { %v1424_v23 = vsel %vm16415_vm11, %v1419_v13, %v1423_v48  ;;  %v1442_v32 = vor.u32 %v1441_v20, %v1438_v18  ;;  %v520_v34 = vshrl.u32 %v313_v17, 16  ;;  %v314_v35 = vld [vmem:[%s16346_s7 + $0x60] sm:$0xf]  ;;  %v1452_v36 = vor.u32 %v1451_v24, %v16698_v47  ;;  %v315_v50 = vld [vmem:[%s16346_s7 + $0x64] sm:$0xf] }
  0x84   : > { %v13699_v30 = vcombine.low %v1424_v23, %v1434_v15  ;;  %v518_v37 = vrot.slane %v514_v27, 4  ;;  %v523_v38 = vshll.u32 %v313_v17, 16  ;;  %v273_v40 = vsel %vm16361_vm4, 0, %v272_v21  ;;  %v1178_v39 = vld [vmem:[#allocation2 + $0x88] sm:$0xf] }
  0x85   : > { %v1443_v41 = vrot.slane %v1442_v32, 4  ;;  %v517_v43 = vor.u32 %v515_v33, %v514_v27  ;;  %v522_v44 = vrot.slane %v520_v34, 7  ;;  %274 = vst [vmem:[#allocation2 + $0x98] sm:$0x1] %v273_v40  ;;  %v1453_v45 = vrot.slane %v1452_v36, 4 }
  0x86   : > { %15101 = vmatmul.mubr.bf16.gmra.mxu1 %v13699_v30  ;;  %v1469_v48 = vshll.u32 %v1178_v39, 16  ;;  %v1473_v49 = vshrl.u32 %v1178_v39, 16  ;;  %v220_v31 = vsel %vm16350_vm2, 0, %v219_v29  ;;  %v1176_v26 = vld [vmem:[#allocation2 + $0x80] sm:$0x1]  ;;  %v529_v58 = vshrl.u32 %v314_v35, 16 }
  0x87   : > { %v525_v51 = vor.u32 %v523_v38, %v522_v44  ;;  %v527_v52 = vrot.slane %v522_v44, 4  ;;  %v725_v53 = vsel %vm16399_vm10, %v517_v43, %v724_v28  ;;  %221 = vst [vmem:[#allocation2 + $0x9c] sm:$0x1] %v220_v31  ;;  %v1455_v55 = vshll.u32 %v1176_v26, 16  ;;  %v275_v1 = vld [vmem:[#allocation2 + $0xa4] sm:$0x1] }
  0x88   : > { %v1471_v56 = vrot.slane %v1469_v48, 5  ;;  %v1475_v57 = vrot.slane %v1473_v49, 4  ;;  %726 = vst [vmem:[#allocation2 + $0x90] sm:$0xf] %v725_v53  ;;  %v1448_v59 = vsel %vm16415_vm11, %v1443_v41, %v16698_v47  ;;  %v15961_v61 = vld [vmem:[#allocation2 + $0x84] sm:$0xff]   ;;  %v532_v0 = vshll.u32 %v314_v35, 16 }
  0x89   : > { %v1177_v62 = vld [vmem:[#allocation2 + $0x84] sm:$0xf]  ;;  %v526_v63 = vsel %vm16389_vm9, %v518_v37, %v525_v51  ;;  %v1457_v4 = vrot.slane %v1455_v55, 5  ;;  %v1179_v5 = vld [vmem:[#allocation2 + $0x8c] sm:$0x1]  ;;  %15057 = vmatmul.mubr.bf16.gmra.mxu0 %v15961_v61  ;;  %v531_v9 = vrot.slane %v529_v58, 7 }
  0x8a   : > { %v1460_v6 = vshrl.u32 %v1177_v62, 16  ;;  %v1463_v7 = vshll.u32 %v1177_v62, 16  ;;  %v1476_v2 = vor.u32 %v1475_v57, %v1471_v56  ;;  %727 = vst [vmem:[#allocation2 + $0x94] sm:$0xf] %v526_v63  ;;  %v1479_v8 = vshll.u32 %v1179_v5, 16 }
  0x8b   : > { %v537_v11 = vshrl.u32 %v315_v50, 16  ;;  %v540_v22 = vshll.u32 %v315_v50, 16  ;;  %v1458_v12 = vsel %vm16415_vm11, %v1453_v45, %v1457_v4  ;;  %v534_v47 = vor.u32 %v532_v0, %v531_v9  ;;  %v222_v10 = vld [vmem:[#allocation2 + $0xa8] sm:$0x1]  ;;  %v317_v40 = vld [vmem:[%s16346_s7 + $0x6c] sm:$0xf] }
  0x8c   : > { %v1462_v13 = vrot.slane %v1460_v6, 4  ;;  %v1465_v15 = vrot.slane %v1463_v7, 5  ;;  %v1477_v16 = vrot.slane %v1476_v2, 4  ;;  %v728_v60 = vld [vmem:[#allocation2 + $0x98] sm:$0x1]  ;;  %v13700_v17 = vcombine.low %v1448_v59, %v1458_v12 }
  0x8d   : > { %v1481_v18 = vrot.slane %v1479_v8, 5  ;;  %v729_v20 = vsel %vm16350_vm2, %v527_v52, %v728_v60  ;;  %v316_v21 = vld [vmem:[%s16346_s7 + $0x68] sm:$0xf]  ;;  %v535_v24 = vrot.slane %v531_v9, 4  ;;  %v539_v25 = vrot.slane %v537_v11, 7 }
  0x8e   : > { %v1466_v23 = vor.u32 %v1465_v15, %v1462_v13  ;;  %730 = vst [vmem:[#allocation2 + $0x98] sm:$0x1] %v729_v20  ;;  %v731_v27 = vld [vmem:[#allocation2 + $0x9c] sm:$0xf]  ;;  %v276_v28 = vsel %vm16361_vm4, 0, %v275_v1  ;;  %15104 = vmatprep.mubr.bf16.mxu1 %v13700_v17  ;;  %v223_v33 = vsel %vm16350_vm2, 0, %v222_v10 }
  0x8f   : > { %v1482_v29 = vsel %vm16415_vm11, %v1477_v16, %v1481_v18  ;;  %v1180_v30 = vld [vmem:[#allocation2 + $0x90] sm:$0xf]  ;;  %v732_v32 = vsel %vm16399_vm10, %v534_v47, %v731_v27  ;;  %277 = vst [vmem:[#allocation2 + $0xa4] sm:$0x1] %v276_v28  ;;  %v546_v34 = vshrl.u32 %v316_v21, 16  ;;  %v542_v38 = vor.u32 %v540_v22, %v539_v25 }
  0x90   : > { %v1467_v35 = vrot.slane %v1466_v23, 4  ;;  %v1484_v36 = vshrl.u32 %v1180_v30, 16  ;;  %v1487_v37 = vshll.u32 %v1180_v30, 16  ;;  %733 = vst [vmem:[#allocation2 + $0x9c] sm:$0xf] %v732_v32  ;;  %v544_v43 = vrot.slane %v539_v25, 4 }
  0x91   : > { %224 = vst [vmem:[#allocation2 + $0xa8] sm:$0x1] %v223_v33  ;;  %v15965_v41 = vld [vmem:[#allocation2 + $0x90] sm:$0xff]   ;;  %v543_v51 = vsel %vm16389_vm9, %v535_v24, %v542_v38  ;;  %v548_v52 = vrot.slane %v546_v34, 7  ;;  %v549_v57 = vshll.u32 %v316_v21, 16  ;;  %v554_v58 = vshrl.u32 %v317_v40, 16 }
  0x92   : > { %v1181_v39 = vld [vmem:[#allocation2 + $0x94] sm:$0xf]  ;;  %v1472_v44 = vsel %vm16415_vm11, %v1467_v35, %v1471_v56  ;;  %v1486_v45 = vrot.slane %v1484_v36, 4  ;;  %v1489_v48 = vrot.slane %v1487_v37, 5  ;;  %v278_v31 = vld [vmem:[#allocation2 + $0xb0] sm:$0x1]  ;;  %15060 = vmatprep.mubr.bf16.mxu0 %v15965_v41 }
  0x93   : > { %v1493_v49 = vshll.u32 %v1181_v39, 16  ;;  %v13701_v50 = vcombine.low %v1472_v44, %v1482_v29  ;;  %v1497_v26 = vshrl.u32 %v1181_v39, 16  ;;  %734 = vst [vmem:[#allocation2 + $0xa0] sm:$0xf] %v543_v51  ;;  %v552_v61 = vrot.slane %v548_v52, 4 }
  0x94   : > { %v1490_v53 = vor.u32 %v1489_v48, %v1486_v45  ;;  %v557_v62 = vshll.u32 %v317_v40, 16  ;;  %v279_v63 = vsel %vm16361_vm4, 0, %v278_v31  ;;  %v225_v0 = vld [vmem:[#allocation2 + $0xb4] sm:$0x1]  ;;  %v318_v1 = vld [vmem:[%s16346_s7 + $0x70] sm:$0xf]  ;;  %v551_v7 = vor.u32 %v549_v57, %v548_v52 }
  0x95   : > { %v1495_v55 = vrot.slane %v1493_v49, 5  ;;  %15105 = vmatmul.mubr.bf16.gmra.mxu1 %v13701_v50  ;;  %v1182_v59 = vld [vmem:[#allocation2 + $0x98] sm:$0x1]  ;;  %v1499_v56 = vrot.slane %v1497_v26, 4  ;;  %v556_v2 = vrot.slane %v554_v58, 7  ;;  %v226_v24 = vsel %vm16350_vm2, 0, %v225_v0 }
  0x96   : > { %v1491_v4 = vrot.slane %v1490_v53, 4  ;;  %v1503_v5 = vshll.u32 %v1182_v59, 16  ;;  %v735_v6 = vld [vmem:[#allocation2 + $0xa4] sm:$0x1]  ;;  %280 = vst [vmem:[#allocation2 + $0xb0] sm:$0x1] %v279_v63 }
  0x97   : > { %v1500_v8 = vor.u32 %v1499_v56, %v1495_v55  ;;  %v736_v9 = vsel %vm16350_vm2, %v544_v43, %v735_v6  ;;  %v1183_v11 = vld [vmem:[#allocation2 + $0x9c] sm:$0xf]  ;;  %v319_v60 = vld [vmem:[%s16346_s7 + $0x74] sm:$0xf]  ;;  %v559_v20 = vor.u32 %v557_v62, %v556_v2  ;;  %v561_v47 = vrot.slane %v556_v2, 4 }
  0x98   : > { %v738_v22 = vld [vmem:[#allocation2 + $0xa8] sm:$0xf]  ;;  %v1496_v12 = vsel %vm16415_vm11, %v1491_v4, %v1495_v55  ;;  %v1505_v13 = vrot.slane %v1503_v5, 5  ;;  %737 = vst [vmem:[#allocation2 + $0xa4] sm:$0x1] %v736_v9  ;;  %v1508_v15 = vshrl.u32 %v1183_v11, 16 }
  0x99   : > { %v1511_v16 = vshll.u32 %v1183_v11, 16  ;;  %v281_v17 = vld [vmem:[#allocation2 + $0xbc] sm:$0x1]  ;;  %v1501_v18 = vrot.slane %v1500_v8, 4  ;;  %v739_v10 = vsel %vm16399_vm10, %v551_v7, %v738_v22  ;;  %v563_v25 = vshrl.u32 %v318_v1, 16 }
  0x9a   : > { %v1510_v21 = vrot.slane %v1508_v15, 4  ;;  %740 = vst [vmem:[#allocation2 + $0xa8] sm:$0xf] %v739_v10  ;;  %v15966_v28 = vld [vmem:[#allocation2 + $0x9c] sm:$0xff]   ;;  %v560_v30 = vsel %vm16389_vm9, %v552_v61, %v559_v20  ;;  %227 = vst [vmem:[#allocation2 + $0xb4] sm:$0x1] %v226_v24 }
  0x9b   : > { %v1513_v23 = vrot.slane %v1511_v16, 5  ;;  %v1506_v27 = vsel %vm16415_vm11, %v1501_v18, %v1505_v13  ;;  %v1184_v29 = vld [vmem:[#allocation2 + $0xa0] sm:$0xf]  ;;  %v566_v32 = vshll.u32 %v318_v1, 16  ;;  %741 = vst [vmem:[#allocation2 + $0xac] sm:$0xf] %v560_v30  ;;  %15061 = vmatmul.mubr.bf16.gmra.mxu0 %v15966_v28 }
  0x9c   : > { %v13702_v33 = vcombine.low %v1496_v12, %v1506_v27  ;;  %v1517_v35 = vshll.u32 %v1184_v29, 16  ;;  %v1521_v36 = vshrl.u32 %v1184_v29, 16  ;;  %v565_v38 = vrot.slane %v563_v25, 7  ;;  %v1965_v51 = vld [vmem:[#allocation2] sm:$0xe] }
  0x9d   : > { %v1514_v34 = vor.u32 %v1513_v23, %v1510_v21  ;;  %v742_v37 = vld [vmem:[#allocation2 + $0xb0] sm:$0x1]  ;;  %v571_v40 = vshrl.u32 %v319_v60, 16  ;;  %v574_v41 = vshll.u32 %v319_v60, 16  ;;  %v282_v39 = vsel %vm16361_vm4, 0, %v281_v17 }
  0x9e   : > { %15108 = vmatprep.mubr.bf16.mxu1 %v13702_v33  ;;  %v1519_v44 = vrot.slane %v1517_v35, 5  ;;  %v1523_v45 = vrot.slane %v1521_v36, 4  ;;  %v743_v48 = vsel %vm16350_vm2, %v561_v47, %v742_v37  ;;  %283 = vst [vmem:[#allocation2 + $0xbc] sm:$0x1] %v282_v39  ;;  %v568_v31 = vor.u32 %v566_v32, %v565_v38  ;;  %v1966_v55 = vld [vmem:[#allocation2 + $0x4] sm:$0xf] }
  0x9f   : > { %v1515_v43 = vrot.slane %v1514_v34, 4  ;;  %v1185_v49 = vld [vmem:[#allocation2 + $0xa4] sm:$0x1]  ;;  %744 = vst [vmem:[#allocation2 + $0xb0] sm:$0x1] %v743_v48  ;;  %v569_v50 = vrot.slane %v565_v38, 4 }
  0xa0   : > { %v573_v26 = vrot.slane %v571_v40, 7  ;;  %v1524_v52 = vor.u32 %v1523_v45, %v1519_v44  ;;  %v1527_v53 = vshll.u32 %v1185_v49, 16  ;;  %v1967_v57 = vld [vmem:[#allocation2 + $0x8] sm:$0x1]  ;;  %vm2062_vm13 = vcmask 1046532  }
  0xa1   : > { %v1520_v58 = vsel %vm16415_vm11, %v1515_v43, %v1519_v44  ;;  %v1186_v59 = vld [vmem:[#allocation2 + $0xa8] sm:$0xf]  ;;  %v745_v4 = vld [vmem:[#allocation2 + $0xb4] sm:$0xf]  ;;  %v13714_v8 = vrot.slane %v1965_v51, 9  ;;  %vm16775_vm14 = vmor %vm2061_vm12, %vm2062_vm13  ;;  %v20346_v13 = vmov 0 }
  0xa2   : > { %v576_v56 = vor.u32 %v574_v41, %v573_v26  ;;  %v578_v61 = vrot.slane %v573_v26, 4  ;;  %v1525_v62 = vrot.slane %v1524_v52, 4  ;;  %v1529_v63 = vrot.slane %v1527_v53, 5  ;;  %v15970_v5 = vld [vmem:[#allocation2 + $0xa8] sm:$0xff]   ;;  %v1969_v24 = vld [vmem:[#allocation2 + $0x10] sm:$0xf] }
  0xa3   : > { %v1532_v0 = vshrl.u32 %v1186_v59, 16  ;;  %v1535_v1 = vshll.u32 %v1186_v59, 16  ;;  %v1187_v6 = vld [vmem:[#allocation2 + $0xac] sm:$0xf]  ;;  %v746_v2 = vsel %vm16399_vm10, %v568_v31, %v745_v4  ;;  %v20347_v13 = vsel %vm16775_vm14, 4294967295, %v20346_v13  ;;  %15064 = vmatprep.mubr.bf16.mxu0 %v15970_v5 }
  0xa4   : > { %v577_v7 = vsel %vm16389_vm9, %v569_v50, %v576_v56  ;;  %v1530_v9 = vsel %vm16415_vm11, %v1525_v62, %v1529_v63  ;;  %v1541_v12 = vshll.u32 %v1187_v6, 16  ;;  %747 = vst [vmem:[#allocation2 + $0xb4] sm:$0xf] %v746_v2  ;;  %20348 = vst [vmem:[#allocation11_spill] sm:$0xff] %v20347_v13  ;;  %v1968_v15 = vld [vmem:[#allocation2 + $0xc] sm:$0xe] }
  0xa5   : > { %v1534_v11 = vrot.slane %v1532_v0, 4  ;;  %v1537_v22 = vrot.slane %v1535_v1, 5  ;;  %748 = vst [vmem:[#allocation2 + $0xb8] sm:$0xf] %v577_v7  ;;  %v13703_v16 = vcombine.low %v1520_v58, %v1530_v9  ;;  %v1545_v60 = vshrl.u32 %v1187_v6, 16 }
  0xa6   : > { %v749_v17 = vld [vmem:[#allocation2 + $0xbc] sm:$0x1]  ;;  %v2066_v18 = vrot.slane %v1966_v55, 5  ;;  %v2069_v20 = vrot.slane %v1967_v57, 5  ;;  %v1188_v47 = vld [vmem:[#allocation2 + $0xb0] sm:$0x1] }
  0xa7   : > { %v1538_v10 = vor.u32 %v1537_v22, %v1534_v11  ;;  %v1543_v21 = vrot.slane %v1541_v12, 5  ;;  %v750_v23 = vsel %vm16350_vm2, %v578_v61, %v749_v17  ;;  %15109 = vmatmul.mubr.bf16.gmra.mxu1 %v13703_v16  ;;  %v1547_v25 = vrot.slane %v1545_v60, 4  ;;  %v1970_v30 = vld [vmem:[#allocation2 + $0x14] sm:$0x1]  ;;  %v1971_v52 = vld [vmem:[#allocation2 + $0x18] sm:$0xe] }
  0xa8   : > { %v1551_v27 = vshll.u32 %v1188_v47, 16  ;;  %751 = vst [vmem:[#allocation2 + $0xbc] sm:$0x1] %v750_v23  ;;  %v2067_v28 = vsel %vm16775_vm14, %v13714_v8, %v2066_v18  ;;  %v2068_v29 = vrot.slane %v2066_v18, 4  ;;  %v13715_v33 = vrot.slane %v1968_v15, 9  ;;  %v15978_v15 = vld [vmem:[%s20316_s1 + $0x130] sm:$0xff]  }
  0xa9   : > { %v1539_v32 = vrot.slane %v1538_v10, 4  ;;  %v2073_v34 = vrot.slane %v1969_v24, 5  ;;  %v1548_v35 = vor.u32 %v1547_v25, %v1543_v21  ;;  %v2076_v41 = vrot.slane %v1970_v30, 5  ;;  %v1972_v59 = vld [vmem:[#allocation2 + $0x1c] sm:$0xf] }
  0xaa   : > { %v1553_v36 = vrot.slane %v1551_v27, 5  ;;  %v2070_v37 = vsel %vm16775_vm14, %v2068_v29, %v2069_v20  ;;  %v13716_v56 = vrot.slane %v1971_v52, 9  ;;  %v1973_v1 = vld [vmem:[#allocation2 + $0x20] sm:$0x1]  ;;  %v2080_v5 = vrot.slane %v1972_v59, 5 }
  0xab   : > { %v13746_v38 = vcombine.low %v2067_v28, %v2070_v37  ;;  %v2075_v40 = vrot.slane %v2073_v34, 4  ;;  %v1544_v39 = vsel %vm16415_vm11, %v1539_v32, %v1543_v21  ;;  %v1549_v43 = vrot.slane %v1548_v35, 4  ;;  %v1189_v45 = vld [vmem:[#allocation2 + $0xb4] sm:$0xf]  ;;  %v1974_v7 = vld [vmem:[#allocation2 + $0x24] sm:$0xe] }
  0xac   : > { %v15971_v44 = vld [vmem:[#allocation2 + $0xb4] sm:$0xff]   ;;  %v2074_v49 = vsel %vm16775_vm14, %v13715_v33, %v2073_v34  ;;  %v1556_v50 = vshrl.u32 %v1189_v45, 16  ;;  %v1559_v26 = vshll.u32 %v1189_v45, 16  ;;  %v2083_v6 = vrot.slane %v1973_v1, 5  ;;  %v1975_v11 = vld [vmem:[#allocation2 + $0x28] sm:$0xf] }
  0xad   : > { %v1190_v48 = vld [vmem:[#allocation2 + $0xb8] sm:$0xf]  ;;  %v1554_v31 = vsel %vm16415_vm11, %v1549_v43, %v1553_v36  ;;  %15065 = vmatmul.mubr.bf16.gmra.mxu0 %v15971_v44  ;;  %v2077_v58 = vsel %vm16775_vm14, %v2075_v40, %v2076_v41  ;;  %v1976_v22 = vld [vmem:[#allocation2 + $0x2c] sm:$0x1]  ;;  %v13717_v12 = vrot.slane %v1974_v7, 9  ;;  %v2081_v60 = vsel %vm16775_vm14, %v13716_v56, %v2080_v5  ;;  %v15984_v56 = vld [vmem:[%s20316_s1 + $0x120] sm:$0xff]  }
  0xae   : > { %v1565_v51 = vshll.u32 %v1190_v48, 16  ;;  %v13704_v53 = vcombine.low %v1544_v39, %v1554_v31  ;;  %v1569_v57 = vshrl.u32 %v1190_v48, 16  ;;  %15132 = vmatprep.mubr.bf16.mxu0 %v13746_v38  ;;  %v1558_v61 = vrot.slane %v1556_v50, 4  ;;  %v15976_v21 = vld [vmem:[#allocation2 + $0xc] sm:$0xff]   ;;  %v1978_v30 = vld [vmem:[#allocation2 + $0x34] sm:$0xf] }
  0xaf   : > { %v1191_v55 = vld [vmem:[#allocation2 + $0xbc] sm:$0x1]  ;;  %v1561_v62 = vrot.slane %v1559_v26, 5  ;;  %v13747_v9 = vcombine.low %v2074_v49, %v2077_v58  ;;  %v2082_v17 = vrot.slane %v2080_v5, 4  ;;  %v2087_v18 = vrot.slane %v1975_v11, 5  ;;  %v15981_v44 = vld [vmem:[%s20316_s1 + $0x128] sm:$0xff]  }
  0xb0   : > { %v1567_v63 = vrot.slane %v1565_v51, 5  ;;  %v1575_v0 = vshll.u32 %v1191_v55, 16  ;;  %15112 = vmatprep.mubr.bf16.mxu1 %v13704_v53  ;;  %v1571_v4 = vrot.slane %v1569_v57, 4  ;;  %v2090_v47 = vrot.slane %v1976_v22, 5  ;;  %v1977_v29 = vld [vmem:[#allocation2 + $0x30] sm:$0xe] }
  0xb1   : > { %v1562_v2 = vor.u32 %v1561_v62, %v1558_v61  ;;  %v2084_v23 = vsel %vm16775_vm14, %v2082_v17, %v2083_v6  ;;  %v2089_v24 = vrot.slane %v2087_v18, 4  ;;  %v2088_v28 = vsel %vm16775_vm14, %v13717_v12, %v2087_v18  ;;  %v1979_v32 = vld [vmem:[#allocation2 + $0x38] sm:$0x1]  ;;  %v1980_v38 = vld [vmem:[#allocation2 + $0x3c] sm:$0xe]  ;;  %v15979_v62 = vld [vmem:[#allocation2 + $0x24] sm:$0xff]  }
  0xb2   : > { %v1577_v8 = vrot.slane %v1575_v0, 5  ;;  %v1572_v16 = vor.u32 %v1571_v4, %v1567_v63  ;;  %v13748_v27 = vcombine.low %v2081_v60, %v2084_v23  ;;  %v16167_v34 = vld [vmem:[%s20316_s1 + $0x138] sm:$0xff]   ;;  %v13718_v36 = vrot.slane %v1977_v29, 9  ;;  %v1981_v40 = vld [vmem:[#allocation2 + $0x40] sm:$0xf] }
  0xb3   : > { %v1563_v20 = vrot.slane %v1562_v2, 4  ;;  %v2091_v35 = vsel %vm16775_vm14, %v2089_v24, %v2090_v47  ;;  %v2094_v37 = vrot.slane %v1978_v30, 5  ;;  %v2097_v39 = vrot.slane %v1979_v32, 5  ;;  %v1982_v43 = vld [vmem:[#allocation2 + $0x44] sm:$0x1]  ;;  %v15977_v61 = vld [vmem:[#allocation2 + $0x18] sm:$0xff]  }
  0xb4   : > { %v1573_v10 = vrot.slane %v1572_v16, 4  ;;  %v13719_v49 = vrot.slane %v1980_v38, 9  ;;  %v2101_v31 = vrot.slane %v1981_v40, 5  ;;  %v13749_v50 = vcombine.low %v2088_v28, %v2091_v35  ;;  %v1983_v53 = vld [vmem:[#allocation2 + $0x48] sm:$0xe]  ;;  %v15987_v5 = vld [vmem:[%s20316_s1 + $0x118] sm:$0xff]  }
  0xb5   : > { %v1568_v25 = vsel %vm16415_vm11, %v1563_v20, %v1567_v63  ;;  %15133 = vmatmul.mubr.bf16.vlgmr.msra.gmra.mxu0 %v13747_v9  ;;  %v2095_v45 = vsel %vm16775_vm14, %v13718_v36, %v2094_v37  ;;  %v2096_v48 = vrot.slane %v2094_v37, 4  ;;  %v2104_v52 = vrot.slane %v1982_v43, 5  ;;  %v1984_v57 = vld [vmem:[#allocation2 + $0x4c] sm:$0xf]  ;;  %v1985_v58 = vld [vmem:[#allocation2 + $0x50] sm:$0x1] }
  0xb6   : > { %v1578_v33 = vsel %vm16415_vm11, %v1573_v10, %v1577_v8  ;;  %15213 = vmatpush3.bf16.msra.mxu0 %v16167_v34  ;;  %15136 = vmatprep.mubr.bf16.mxu0 %v13748_v27  ;;  %v2103_v51 = vrot.slane %v2101_v31, 4  ;;  %v13720_v59 = vrot.slane %v1983_v53, 9  ;;  %v2108_v63 = vrot.slane %v1984_v57, 5  ;;  %v1987_v1 = vld [vmem:[#allocation2 + $0x58] sm:$0xf]  ;;  %v15991_v9 = vld [vmem:[%s20316_s1 + $0x170] sm:$0xff]  }
  0xb7   : > { %v13705_v41 = vcombine.low %v1568_v25, %v1578_v33  ;;  %15214 = vmatprep.subr.bf16.mxu0 %v15978_v15  ;;  %v2098_v26 = vsel %vm16775_vm14, %v2096_v48, %v2097_v39  ;;  %v2111_v0 = vrot.slane %v1985_v58, 5  ;;  %v1986_v4 = vld [vmem:[#allocation2 + $0x54] sm:$0xe]  ;;  %v2102_v6 = vsel %vm16775_vm14, %v13719_v49, %v2101_v31  ;;  %v1988_v22 = vld [vmem:[#allocation2 + $0x5c] sm:$0x1]  ;;  %v15995_v27 = vld [vmem:[%s20316_s1 + $0x168] sm:$0xff]  }
  0xb8   : > { %v13750_v55 = vcombine.low %v2095_v45, %v2098_v26  ;;  %v2105_v7 = vsel %vm16775_vm14, %v2103_v51, %v2104_v52  ;;  %v2110_v2 = vrot.slane %v2108_v63, 4  ;;  %v2115_v8 = vrot.slane %v1987_v1, 5  ;;  %v1990_v16 = vld [vmem:[#allocation2 + $0x64] sm:$0xf]  ;;  %v1991_v18 = vld [vmem:[#allocation2 + $0x68] sm:$0x1] }
  0xb9   : > { %15113 = vmatmul.mubr.bf16.gmra.mxu1 %v13705_v41  ;;  %v2109_v11 = vsel %vm16775_vm14, %v13720_v59, %v2108_v63  ;;  %v13751_v60 = vcombine.low %v2102_v6, %v2105_v7  ;;  %v13721_v17 = vrot.slane %v1986_v4, 9  ;;  %v2122_v20 = vrot.slane %v1990_v16, 5  ;;  %v15992_v47 = vld [vmem:[%s20316_s1 + $0x110] sm:$0xff]   ;;  %v1992_v32 = vld [vmem:[#allocation2 + $0x6c] sm:$0xe]  ;;  %v15982_v34 = vld [vmem:[#allocation2 + $0x3c] sm:$0xff]  }
  0xba   : > { %15180 = vmatprep.mubr.bf16.mxu1 %v15976_v21  ;;  %15215 = vmatpush3.bf16.msra.mxu0 %v15978_v15  ;;  %v2112_v12 = vsel %vm16775_vm14, %v2110_v2, %v2111_v0  ;;  %v1989_v15 = vld [vmem:[#allocation2 + $0x60] sm:$0xe]  ;;  %v2117_v21 = vrot.slane %v2115_v8, 4  ;;  %v2118_v23 = vrot.slane %v1988_v22, 5  ;;  %v1993_v25 = vld [vmem:[#allocation2 + $0x70] sm:$0xf] }
  0xbb   : > { %15216 = vmatprep.subr.bf16.mxu0 %v15981_v44  ;;  %v13752_v10 = vcombine.low %v2109_v11, %v2112_v12  ;;  %v13722_v24 = vrot.slane %v1989_v15, 9  ;;  %v15980_v28 = vld [vmem:[#allocation2 + $0x30] sm:$0xff]   ;;  %v2124_v29 = vrot.slane %v2122_v20, 4  ;;  %v2125_v30 = vrot.slane %v1991_v18, 5  ;;  %v15997_v36 = vld [vmem:[%s20316_s1 + $0x108] sm:$0xff]   ;;  %v15996_v49 = vld [vmem:[%s20316_s1 + $0x160] sm:$0xff]  }
  0xbc   : > { %v1994_v33 = vld [vmem:[#allocation2 + $0x74] sm:$0x1]  ;;  %v2129_v35 = vrot.slane %v1993_v25, 5  ;;  %v2116_v37 = vsel %vm16775_vm14, %v13721_v17, %v2115_v8  ;;  %v2119_v38 = vsel %vm16775_vm14, %v2117_v21, %v2118_v23  ;;  %v1995_v41 = vld [vmem:[#allocation2 + $0x78] sm:$0xe]  ;;  %v13723_v43 = vrot.slane %v1992_v32, 9 }
  0xbd   : > { %15137 = vmatmul.mubr.bf16.gmra.mxu0 %v13749_v50  ;;  %v2123_v40 = vsel %vm16775_vm14, %v13722_v24, %v2122_v20  ;;  %v1996_v39 = vld [vmem:[#allocation2 + $0x7c] sm:$0xf]  ;;  %v1997_v45 = vld [vmem:[#allocation2 + $0x80] sm:$0x1]  ;;  %v13753_v31 = vcombine.low %v2116_v37, %v2119_v38  ;;  %v13724_v26 = vrot.slane %v1995_v41, 9  ;;  %v16001_v2 = vld [vmem:[%s20316_s1 + $0x150] sm:$0xff]  }
  0xbe   : > { %15140 = vmatprep.mubr.bf16.mxu0 %v13750_v55  ;;  %15217 = vmatpush3.bf16.msra.mxu0 %v15981_v44  ;;  %v2132_v44 = vrot.slane %v1994_v33, 5  ;;  %v2136_v48 = vrot.slane %v1996_v39, 5  ;;  %v2131_v50 = vrot.slane %v2129_v35, 4  ;;  %v1998_v51 = vld [vmem:[#allocation2 + $0x84] sm:$0xe]  ;;  %v2139_v58 = vrot.slane %v1997_v45, 5 }
  0xbf   : > { %15218 = vmatprep.subr.bf16.mxu0 %v15984_v56  ;;  %v1999_v52 = vld [vmem:[#allocation2 + $0x88] sm:$0xf]  ;;  %v16002_v53 = vld [vmem:[%s20316_s1 + $0x100] sm:$0xff]   ;;  %v2000_v59 = vld [vmem:[#allocation2 + $0x8c] sm:$0x1]  ;;  %v13725_v63 = vrot.slane %v1998_v51, 9  ;;  %v2130_v1 = vsel %vm16775_vm14, %v13723_v43, %v2129_v35 }
  0xc0   : > { %v2138_v57 = vrot.slane %v2136_v48, 4  ;;  %v2143_v0 = vrot.slane %v1999_v52, 5  ;;  %v2133_v4 = vsel %vm16775_vm14, %v2131_v50, %v2132_v44  ;;  %v2001_v6 = vld [vmem:[#allocation2 + $0x90] sm:$0xe]  ;;  %v2002_v7 = vld [vmem:[#allocation2 + $0x94] sm:$0xf]  ;;  %v2137_v8 = vsel %vm16775_vm14, %v13724_v26, %v2136_v48 }
  0xc1   : > { %15181 = vmatmul.mubr.bf16.vlgmr.msra.gmra.mxu1 %v15977_v61  ;;  %v15983_v61 = vld [vmem:[#allocation2 + $0x48] sm:$0xff]   ;;  %v2146_v11 = vrot.slane %v2000_v59, 5  ;;  %v2003_v22 = vld [vmem:[#allocation2 + $0x98] sm:$0x1]  ;;  %v2150_v12 = vrot.slane %v2002_v7, 5  ;;  %v13755_v16 = vcombine.low %v2130_v1, %v2133_v4  ;;  %v13726_v17 = vrot.slane %v2001_v6, 9 }
  0xc2   : > { %15184 = vmatprep.mubr.bf16.mxu1 %v15979_v62  ;;  %15219 = vmatpush3.bf16.msra.mxu0 %v15984_v56  ;;  %v16000_v56 = vld [vmem:[%s20316_s1 + $0x158] sm:$0xff]   ;;  %v2005_v18 = vld [vmem:[#allocation2 + $0xa0] sm:$0xf]  ;;  %v2006_v20 = vld [vmem:[#allocation2 + $0xa4] sm:$0x1]  ;;  %v2144_v32 = vsel %vm16775_vm14, %v13725_v63, %v2143_v0  ;;  %vm13488_vm15 = vcmask 1041409  }
  0xc3   : > { %15220 = vmatprep.subr.bf16.mxu0 %v15987_v5  ;;  %15261 = vmatpush3.bf16.msra.mxu1 %v16719_v54  ;;  %v2126_v54 = vsel %vm16775_vm14, %v2124_v29, %v2125_v30  ;;  %v15985_v62 = vld [vmem:[#allocation2 + $0x54] sm:$0xff]   ;;  %v2004_v15 = vld [vmem:[#allocation2 + $0x9c] sm:$0xe]  ;;  %v2157_v23 = vrot.slane %v2005_v18, 5  ;;  %v16005_v25 = vld [vmem:[%s20316_s1 + $0x148] sm:$0xff]   ;;  %v2160_v29 = vrot.slane %v2006_v20, 5 }
  0xc4   : > { %15262 = vmatprep.subr.bf16.mxu1 %v15991_v9  ;;  %v13754_v55 = vcombine.low %v2123_v40, %v2126_v54  ;;  %v13727_v21 = vrot.slane %v2004_v15, 9  ;;  %v15988_v30 = vld [vmem:[#allocation2 + $0x6c] sm:$0xff]   ;;  %v2010_v41 = vld [vmem:[#allocation2 + $0xb4] sm:$0xe]  ;;  %v2011_v43 = vld [vmem:[#allocation2 + $0xb8] sm:$0xf] }
  0xc5   : > { %15141 = vmatmul.mubr.bf16.gmra.mxu0 %v13751_v60  ;;  %v2145_v60 = vrot.slane %v2143_v0, 4  ;;  %v2008_v35 = vld [vmem:[#allocation2 + $0xac] sm:$0xf]  ;;  %v2009_v38 = vld [vmem:[#allocation2 + $0xb0] sm:$0x1]  ;;  %v2171_v48 = vrot.slane %v2011_v43, 5 }
  0xc6   : > { %15144 = vmatprep.mubr.bf16.mxu0 %v13752_v10  ;;  %15221 = vmatpush3.bf16.msra.mxu0 %v15987_v5  ;;  %v16869_v5 = vld [vmem:[%s20316_s1 + $0x1b8] sm:$0xff]   ;;  %v2153_v10 = vrot.slane %v2003_v22, 5  ;;  %v2164_v54 = vrot.slane %v2008_v35, 5  ;;  %v2167_v39 = vrot.slane %v2009_v38, 5  ;;  %v16895_v26 = vsel %vm16775_vm14, %v13727_v21, %v2157_v23  ;;  %v3012_v15 = vld [vmem:[#allocation2 + $0xc] sm:$0xf] }
  0xc7   : > { %15263 = vmatpush3.bf16.msra.mxu1 %v15991_v9  ;;  %15222 = vmatprep.subr.bf16.mxu0 %v15992_v47  ;;  %v2140_v9 = vsel %vm16775_vm14, %v2138_v57, %v2139_v58  ;;  %v2147_v33 = vsel %vm16775_vm14, %v2145_v60, %v2146_v11  ;;  %v2012_v44 = vld [vmem:[#allocation2 + $0xbc] sm:$0x1]  ;;  %v228_v58 = vld [vmem:[#allocation2 + $0xc0] sm:$0x1]  ;;  %v320_v59 = vld [vmem:[%s16346_s7 + $0x78] sm:$0xf] }
  0xc8   : > { %15264 = vmatprep.subr.bf16.mxu1 %v15995_v27  ;;  %v13756_v24 = vcombine.low %v2137_v8, %v2140_v9  ;;  %v2166_v45 = vrot.slane %v2164_v54, 4  ;;  %v2174_v57 = vrot.slane %v2012_v44, 5  ;;  %v321_v63 = vld [vmem:[%s16346_s7 + $0x7c] sm:$0xf]  ;;  %v580_v0 = vshrl.u32 %v320_v59, 16  ;;  %v15993_v8 = vld [vmem:[#allocation2 + $0x84] sm:$0xff]  }
  0xc9   : > { %15185 = vmatmul.mubr.bf16.gmra.mxu1 %v15980_v28  ;;  %v2159_v28 = vrot.slane %v2157_v23, 4  ;;  %v583_v1 = vshll.u32 %v320_v59, 16  ;;  %v588_v4 = vshrl.u32 %v321_v63, 16  ;;  %v591_v6 = vshll.u32 %v321_v63, 16  ;;  %v15989_v7 = vld [vmem:[#allocation2 + $0x78] sm:$0xff]   ;;  %v15994_v38 = vld [vmem:[#allocation2 + $0x90] sm:$0xff]  }
  0xca   : > { %15188 = vmatprep.mubr.bf16.mxu1 %v15982_v34  ;;  %15223 = vmatpush3.bf16.msra.mxu0 %v15992_v47  ;;  %v2152_v47 = vrot.slane %v2150_v12, 4  ;;  %v2007_v34 = vld [vmem:[#allocation2 + $0xa8] sm:$0xe]  ;;  %v3014_v18 = vld [vmem:[#allocation2 + $0x14] sm:$0x1]  ;;  %v3061_v20 = vshrl.u32 %v3012_v15, 16 }
  0xcb   : > { %15265 = vmatpush3.bf16.msra.mxu1 %v15995_v27  ;;  %15224 = vmatprep.subr.bf16.mxu0 %v15997_v36  ;;  %v15986_v27 = vld [vmem:[#allocation2 + $0x60] sm:$0xff]   ;;  %v13728_v40 = vrot.slane %v2007_v34, 9  ;;  %v16899_v51 = vsel %vm16775_vm14, %v2159_v28, %v2160_v29  ;;  %v3080_v29 = vshll.u32 %v3014_v18, 16  ;;  %v3831_v59 = vld [vmem:[#allocation2 + $0x10] sm:$0xf]  ;;  %vm13490_vm0 = vcmask 1042434  }
  0xcc   : > { %15266 = vmatprep.subr.bf16.mxu1 %v15996_v49  ;;  %v2154_v37 = vsel %vm16775_vm14, %v2152_v47, %v2153_v10  ;;  %v13759_v9 = vcombine.low %v16895_v26, %v16899_v51  ;;  %v3064_v47 = vshll.u32 %v3012_v15, 16  ;;  %v3019_v18 = vld [vmem:[#allocation2 + $0x28] sm:$0xf]  ;;  %vm13492_vm1 = vcmask 1043459   ;;  %s20065_s7 = scalar_lea.vmem [#allocation4], %s13647_s26 }
  0xcd   : > { %15145 = vmatmul.mubr.bf16.gmra.mxu0 %v13753_v31  ;;  %v13757_v31 = vcombine.low %v2144_v32, %v2147_v33  ;;  %v16903_v52 = vsel %vm16775_vm14, %v13728_v40, %v2164_v54  ;;  %vm13496_vm3 = vcmask 1045509   ;;  %vm13500_vm5 = vcmask 1047559   ;;  %s13581_s28 = sshll.u32 %s20065_s7, 4  ;;  %s20268_s28 = int_to_ptr.vmem [resolvable:$true] %s13581_s28 }
  0xce   : > { %15148 = vmatprep.mubr.bf16.mxu0 %v13754_v55  ;;  %15225 = vmatpush3.bf16.msra.mxu0 %v15997_v36  ;;  %v2151_v36 = vsel %vm16775_vm14, %v13726_v17, %v2150_v12  ;;  %v13729_v55 = vrot.slane %v2010_v41, 9  ;;  %v16926_v12 = vrot.slane %v588_v4, 7  ;;  %v3066_v28 = vrot.slane %v3064_v47, 5  ;;  %v3833_v4 = vld [vmem:[#allocation2 + $0x18] sm:$0xe]  ;;  %s16170_s5 = scalar_lea.vmem %s20268_s28, 1024  ;;  %p16177_p0 = scmp.lt.s32.totalorder %s20268_s28, %s16175_s8 }
  0xcf   : > { %15267 = vmatpush3.bf16.msra.mxu1 %v15996_v49  ;;  %15226 = vmatprep.subr.bf16.mxu0 %v16002_v53  ;;  %v16006_v49 = vld [vmem:[%s20316_s1 + $0x140] sm:$0xff]   ;;  %v13758_v50 = vcombine.low %v2151_v36, %v2154_v37  ;;  %v3082_v41 = vrot.slane %v3080_v29, 5  ;;  %p16171_p11 = scmp.ne.s32.totalorder %s20268_s28, %s16170_s5  ;;  %p16178_p1 = scmp.lt.s32.totalorder %s16176_s9, %s16170_s5 }
  0xd0   : > { %15268 = vmatprep.subr.bf16.mxu1 %v16000_v56  ;;  %v16924_v22 = vsel %vm16775_vm14, %v13729_v55, %v2171_v48  ;;  %v593_v21 = vor.u32 %v591_v6, %v16926_v12  ;;  %v3017_v36 = vld [vmem:[#allocation2 + $0x20] sm:$0x1] }
  0xd1   : > { %15189 = vmatmul.mubr.bf16.gmra.mxu1 %v15983_v61  ;;  %v2173_v61 = vrot.slane %v2171_v48, 4  ;;  %v3104_v51 = vshll.u32 %v3017_v36, 16  ;;  %p16172_p12 = pnand %p16171_p11, %p16295_p5  ;;  %p16179_p2 = por %p16178_p1, %p16177_p0 }
  0xd2   : > { %15192 = vmatprep.mubr.bf16.mxu1 %v15985_v62  ;;  %15227 = vmatpush3.bf16.msra.mxu0 %v16002_v53  ;;  %v16907_v53 = vsel %vm16775_vm14, %v2166_v45, %v2167_v39  ;;  %v229_v62 = vsel %vm16350_vm2, 0, %v228_v58 }
  0xd3   : > { %15269 = vmatpush3.bf16.msra.mxu1 %v16000_v56  ;;  %15308 = vmatprep.subr.bf16.mxu0 %v16869_v5  ;;  %v16913_v56 = vld [vmem:[%s20316_s1 + $0x1f8] sm:$0xff]   ;;  %230 = vst [vmem:[#allocation2 + $0xc0] sm:$0x1] %v229_v62  ;;  %v13760_v11 = vcombine.low %v16903_v52, %v16907_v53  ;;  %v16930_v60 = vsel %vm16775_vm14, %v2173_v61, %v2174_v57  ;;  %v3830_v52 = vld [vmem:[#allocation2 + $0xc] sm:$0xe]  ;;  %v3106_v63 = vrot.slane %v3104_v51, 5  ;;  %p16173_p13 = pneg %p16172_p12 }
  0xd4   : > { %15270 = vmatprep.subr.bf16.mxu1 %v16001_v2  ;;  %v13761_v53 = vcombine.low %v16924_v22, %v16930_v60  ;;  %v3832_v61 = vld [vmem:[#allocation2 + $0x14] sm:$0x1]  ;;  %v13851_v60 = vrot.slane %v3833_v4, 9 }
  0xd5   : > { %15149 = vmatmul.mubr.bf16.gmra.mxu0 %v13755_v16  ;;  %v3013_v16 = vld [vmem:[#allocation2 + $0x10] sm:$0xf]  ;;  %p16180_p3 = pnand %p16179_p2, %p16173_p13 }
  0xd6   : > { %15152 = vmatprep.mubr.bf16.mxu0 %v13756_v24  ;;  %v3070_v23 = vshll.u32 %v3013_v16, 16  ;;  %v3074_v24 = vshrl.u32 %v3013_v16, 16  ;;  %v16008_v4 = vld [vmem:[%s20316_s1 + $0x1b0] sm:$0xff]  }
  0xd7   : > { %15271 = vmatpush3.bf16.msra.mxu1 %v16001_v2  ;;  %v582_v2 = vrot.slane %v580_v0, 7  ;;  %v13850_v0 = vrot.slane %v3830_v52, 9 }
  0xd8   : > { %15272 = vmatprep.subr.bf16.mxu1 %v16005_v25  ;;  %v3072_v34 = vrot.slane %v3070_v23, 5  ;;  %v3076_v35 = vrot.slane %v3074_v24, 4  ;;  %v3020_v24 = vld [vmem:[#allocation2 + $0x2c] sm:$0x1] }
  0xd9   : > { %15193 = vmatmul.mubr.bf16.gmra.mxu1 %v15986_v27  ;;  %v586_v17 = vrot.slane %v582_v2, 4  ;;  %v585_v10 = vor.u32 %v583_v1, %v582_v2  ;;  %v3063_v27 = vrot.slane %v3061_v20, 4  ;;  %v3928_v1 = vrot.slane %v3831_v59, 5 }
  0xda   : > { %15196 = vmatprep.mubr.bf16.mxu1 %v15988_v30  ;;  %v3016_v30 = vld [vmem:[#allocation2 + $0x1c] sm:$0xf]  ;;  %v752_v40 = vld [vmem:[#allocation2 + $0xc0] sm:$0xf]  ;;  %v3077_v45 = vor.u32 %v3076_v35, %v3072_v34  ;;  %v15999_v35 = vld [vmem:[#allocation2 + $0xa8] sm:$0xff]  }
  0xdb   : > { %15273 = vmatpush3.bf16.msra.mxu1 %v16005_v25  ;;  %v3015_v25 = vld [vmem:[#allocation2 + $0x18] sm:$0xf]  ;;  %v594_v33 = vsel %vm16389_vm9, %v586_v17, %v593_v21  ;;  %v3067_v54 = vor.u32 %v3066_v28, %v3063_v27  ;;  %v3094_v43 = vshll.u32 %v3016_v30, 16  ;;  %v753_v44 = vsel %vm16399_vm10, %v585_v10, %v752_v40  ;;  %v3018_v17 = vld [vmem:[#allocation2 + $0x24] sm:$0xf] }
  0xdc   : > { %15274 = vmatprep.subr.bf16.mxu1 %v16006_v49  ;;  %v3085_v32 = vshrl.u32 %v3015_v25, 16  ;;  %v3088_v37 = vshll.u32 %v3015_v25, 16  ;;  %755 = vst [vmem:[#allocation2 + $0xc4] sm:$0xf] %v594_v33  ;;  %754 = vst [vmem:[#allocation2 + $0xc0] sm:$0xf] %v753_v44  ;;  %v16946_v15 = vsel %vm16775_vm14, %v13850_v0, %v3928_v1 }
  0xdd   : > { %15153 = vmatmul.mubr.bf16.gmra.mxu0 %v13757_v31  ;;  %v15998_v31 = vld [vmem:[#allocation2 + $0x9c] sm:$0xff]   ;;  %v3096_v26 = vrot.slane %v3094_v43, 5  ;;  %v3078_v55 = vrot.slane %v3077_v45, 4  ;;  %v3930_v16 = vrot.slane %v3928_v1, 4  ;;  %v3109_v25 = vshrl.u32 %v3018_v17, 16 }
  0xde   : > { %15156 = vmatprep.mubr.bf16.mxu0 %v13758_v50  ;;  %v3087_v39 = vrot.slane %v3085_v32, 4  ;;  %v3090_v48 = vrot.slane %v3088_v37, 5  ;;  %v3068_v50 = vrot.slane %v3067_v54, 4  ;;  %v3112_v27 = vshll.u32 %v3018_v17, 16  ;;  %v3022_v54 = vld [vmem:[#allocation2 + $0x34] sm:$0xf] }
  0xdf   : > { %15275 = vmatpush3.bf16.msra.mxu1 %v16006_v49  ;;  %v3098_v49 = vshrl.u32 %v3016_v30, 16  ;;  %v3083_v6 = vsel %vm16415_vm11, %v3078_v55, %v3082_v41  ;;  %v3118_v28 = vshll.u32 %v3019_v18, 16  ;;  %v3111_v37 = vrot.slane %v3109_v25, 4  ;;  %v16003_v41 = vld [vmem:[#allocation2 + $0xb4] sm:$0xff]  }
  0xe0   : > { %15356 = vmatprep.subr.bf16.mxu1 %v16913_v56  ;;  %v3091_v57 = vor.u32 %v3090_v48, %v3087_v39  ;;  %v3073_v62 = vsel %vm16415_vm11, %v3068_v50, %v3072_v34  ;;  %v3021_v34 = vld [vmem:[#allocation2 + $0x30] sm:$0xf]  ;;  %v3122_v43 = vshrl.u32 %v3019_v18, 16  ;;  %v3128_v44 = vshll.u32 %v3020_v24, 16  ;;  %v3023_v45 = vld [vmem:[#allocation2 + $0x38] sm:$0x1] }
  0xe1   : > { %15197 = vmatmul.mubr.bf16.gmra.mxu1 %v15989_v7  ;;  %v3100_v58 = vrot.slane %v3098_v49, 4  ;;  %v13826_v22 = vcombine.low %v3073_v62, %v3083_v6  ;;  %v3120_v40 = vrot.slane %v3118_v28, 5  ;;  %v3133_v48 = vshrl.u32 %v3021_v34, 16  ;;  %v3838_v6 = vld [vmem:[#allocation2 + $0x2c] sm:$0x1] }
  0xe2   : > { %15200 = vmatprep.mubr.bf16.mxu1 %v15993_v8  ;;  %v3092_v7 = vrot.slane %v3091_v57, 4  ;;  %v3931_v8 = vrot.slane %v3832_v61, 5  ;;  %v3136_v50 = vshll.u32 %v3021_v34, 16  ;;  %v3124_v51 = vrot.slane %v3122_v43, 4  ;;  %v3836_v57 = vld [vmem:[#allocation2 + $0x24] sm:$0xe] }
  0xe3   : > { %v3101_v2 = vor.u32 %v3100_v58, %v3096_v26  ;;  %v3130_v52 = vrot.slane %v3128_v44, 5  ;;  %v3146_v55 = vshrl.u32 %v3022_v54, 16  ;;  %v3152_v62 = vshll.u32 %v3023_v45, 16  ;;  %v16004_v24 = vld [vmem:[#allocation2 + $0xc0] sm:$0xff]   ;;  %v3027_v44 = vld [vmem:[#allocation2 + $0x48] sm:$0xf] }
  0xe4   : > { %v3097_v20 = vsel %vm16415_vm11, %v3092_v7, %v3096_v26  ;;  %v16952_v23 = vsel %vm16775_vm14, %v3930_v16, %v3931_v8  ;;  %v3142_v26 = vshll.u32 %v3022_v54, 16  ;;  %v3138_v59 = vrot.slane %v3136_v50, 5  ;;  %v3839_v16 = vld [vmem:[#allocation2 + $0x30] sm:$0xe]  ;;  %v3028_v45 = vld [vmem:[#allocation2 + $0x4c] sm:$0xf] }
  0xe5   : > { %15157 = vmatmul.mubr.bf16.gmra.mxu0 %v13759_v9  ;;  %v3834_v9 = vld [vmem:[#allocation2 + $0x1c] sm:$0xf]  ;;  %v3102_v47 = vrot.slane %v3101_v2, 4  ;;  %v13882_v30 = vcombine.low %v16946_v15, %v16952_v23  ;;  %v3125_v0 = vor.u32 %v3124_v51, %v3120_v40  ;;  %v3148_v1 = vrot.slane %v3146_v55, 4  ;;  %v16010_v15 = vld [vmem:[%s20316_s1 + $0x1a0] sm:$0xff]  }
  0xe6   : > { %15160 = vmatprep.mubr.bf16.mxu0 %v13760_v11  ;;  %v3835_v11 = vld [vmem:[#allocation2 + $0x20] sm:$0x1]  ;;  %v3935_v10 = vrot.slane %v3834_v9, 5  ;;  %v3144_v61 = vrot.slane %v3142_v26, 5  ;;  %v13852_v7 = vrot.slane %v3836_v57, 9 }
  0xe7   : > { %v3938_v21 = vrot.slane %v3835_v11, 5  ;;  %v3107_v29 = vsel %vm16415_vm11, %v3102_v47, %v3106_v63  ;;  %v3837_v63 = vld [vmem:[#allocation2 + $0x28] sm:$0xf]  ;;  %v3154_v11 = vrot.slane %v3152_v62, 5  ;;  %v3126_v17 = vrot.slane %v3125_v0, 4 }
  0xe8   : > { %v16960_v32 = vsel %vm16775_vm14, %v13851_v60, %v3935_v10  ;;  %v3937_v33 = vrot.slane %v3935_v10, 4  ;;  %v13827_v36 = vcombine.low %v3097_v20, %v3107_v29  ;;  %v3942_v2 = vrot.slane %v3837_v63, 5  ;;  %v3840_v60 = vld [vmem:[#allocation2 + $0x34] sm:$0xf]  ;;  %v3841_v10 = vld [vmem:[#allocation2 + $0x38] sm:$0x1] }
  0xe9   : > { %15201 = vmatmul.mubr.bf16.gmra.mxu1 %v15994_v38  ;;  %v3114_v38 = vrot.slane %v3112_v27, 5  ;;  %v3149_v18 = vor.u32 %v3148_v1, %v3144_v61  ;;  %v13853_v27 = vrot.slane %v3839_v16, 9  ;;  %v3949_v28 = vrot.slane %v3840_v60, 5  ;;  %v3029_v57 = vld [vmem:[#allocation2 + $0x50] sm:$0x1] }
  0xea   : > { %15204 = vmatprep.mubr.bf16.mxu1 %v15998_v31  ;;  %v16964_v39 = vsel %vm16775_vm14, %v3937_v33, %v3938_v21  ;;  %v16975_v20 = vsel %vm16775_vm14, %v13852_v7, %v3942_v2  ;;  %v3944_v47 = vrot.slane %v3942_v2, 4  ;;  %v3024_v21 = vld [vmem:[#allocation2 + $0x3c] sm:$0xf]  ;;  %v3952_v29 = vrot.slane %v3841_v10, 5  ;;  %v16009_v33 = vld [vmem:[%s20316_s1 + $0x1a8] sm:$0xff]  }
  0xeb   : > { %v13883_v49 = vcombine.low %v16960_v32, %v16964_v39  ;;  %v3115_v31 = vor.u32 %v3114_v38, %v3111_v37  ;;  %v3131_v34 = vsel %vm16415_vm11, %v3126_v17, %v3130_v52  ;;  %v3025_v38 = vld [vmem:[#allocation2 + $0x40] sm:$0xf]  ;;  %v3160_v26 = vshll.u32 %v3024_v21, 16  ;;  %v3842_v63 = vld [vmem:[#allocation2 + $0x3c] sm:$0xe] }
  0xec   : > { %v3166_v52 = vshll.u32 %v3025_v38, 16  ;;  %v3184_v62 = vshll.u32 %v3027_v44, 16  ;;  %v3843_v2 = vld [vmem:[#allocation2 + $0x40] sm:$0xf]  ;;  %v3200_v16 = vshll.u32 %v3029_v57, 16  ;;  %v13854_v60 = vrot.slane %v3842_v63, 9 }
  0xed   : > { %15161 = vmatmul.mubr.bf16.gmra.mxu0 %v13761_v53  ;;  %v3135_v53 = vrot.slane %v3133_v48, 4  ;;  %v3116_v58 = vrot.slane %v3115_v31, 4  ;;  %v3951_v31 = vrot.slane %v3949_v28, 4  ;;  %v3845_v17 = vld [vmem:[#allocation2 + $0x48] sm:$0xe] }
  0xee   : > { %15228 = vmatprep.mubr.bf16.mxu0 %v13826_v22  ;;  %v3945_v22 = vrot.slane %v3838_v6, 5  ;;  %v3168_v1 = vrot.slane %v3166_v52, 5 }
  0xef   : > { %v3121_v8 = vsel %vm16415_vm11, %v3116_v58, %v3120_v40  ;;  %v3139_v9 = vor.u32 %v3138_v59, %v3135_v53  ;;  %v3157_v40 = vshrl.u32 %v3024_v21, 16  ;;  %v3170_v53 = vshrl.u32 %v3025_v38, 16  ;;  %v3847_v38 = vld [vmem:[#allocation2 + $0x50] sm:$0x1] }
  0xf0   : > { %v16985_v37 = vsel %vm16775_vm14, %v3944_v47, %v3945_v22  ;;  %v13828_v54 = vcombine.low %v3121_v8, %v3131_v34  ;;  %v17002_v58 = vsel %vm16775_vm14, %v3951_v31, %v3952_v29  ;;  %v3162_v59 = vrot.slane %v3160_v26, 5  ;;  %v3031_v26 = vld [vmem:[#allocation2 + $0x58] sm:$0xf] }
  0xf1   : > { %15205 = vmatmul.mubr.bf16.gmra.mxu1 %v15999_v35  ;;  %v3140_v25 = vrot.slane %v3139_v9, 4  ;;  %v3150_v35 = vrot.slane %v3149_v18, 4  ;;  %v13884_v43 = vcombine.low %v16975_v20, %v16985_v37  ;;  %v3159_v50 = vrot.slane %v3157_v40, 4  ;;  %v3844_v9 = vld [vmem:[#allocation2 + $0x44] sm:$0x1]  ;;  %v16014_v20 = vld [vmem:[%s20316_s1 + $0x190] sm:$0xff]  }
  0xf2   : > { %15208 = vmatprep.mubr.bf16.mxu1 %v16003_v41  ;;  %v3172_v6 = vrot.slane %v3170_v53, 4  ;;  %v3190_v8 = vshll.u32 %v3028_v45, 16  ;;  %v3194_v22 = vshrl.u32 %v3028_v45, 16  ;;  %v3202_v34 = vrot.slane %v3200_v16, 5 }
  0xf3   : > { %v3145_v41 = vsel %vm16415_vm11, %v3140_v25, %v3144_v61  ;;  %v3155_v48 = vsel %vm16415_vm11, %v3150_v35, %v3154_v11  ;;  %v3181_v61 = vshrl.u32 %v3027_v44, 16  ;;  %v3163_v23 = vor.u32 %v3162_v59, %v3159_v50  ;;  %v3846_v25 = vld [vmem:[#allocation2 + $0x4c] sm:$0xf]  ;;  %v16013_v44 = vld [vmem:[%s20316_s1 + $0x1f0] sm:$0xff]  }
  0xf4   : > { %v13829_v51 = vcombine.low %v3145_v41, %v3155_v48  ;;  %v3173_v11 = vor.u32 %v3172_v6, %v3168_v1  ;;  %v17009_v18 = vpop.f32.mrf.mxu0  ;;  %v3192_v21 = vrot.slane %v3190_v8, 5  ;;  %v3196_v29 = vrot.slane %v3194_v22, 4  ;;  %v3030_v41 = vld [vmem:[#allocation2 + $0x54] sm:$0xf]  ;;  %v16015_v6 = vld [vmem:[%s20316_s1 + $0x1e8] sm:$0xff]  }
  0xf5   : > { %15229 = vmatmul.mubr.bf16.vlgmr.msra.gmra.mxu0 %v13827_v36  ;;  %v3026_v36 = vld [vmem:[#allocation2 + $0x44] sm:$0x1]  ;;  %v3164_v47 = vrot.slane %v3163_v23, 4  ;;  %v3959_v35 = vrot.slane %v3844_v9, 5  ;;  %v13855_v31 = vrot.slane %v3845_v17, 9  ;;  %v3963_v50 = vrot.slane %v3846_v25, 5 }
  0xf6   : > { %15309 = vmatpush3.bf16.msra.mxu0 %v16869_v5  ;;  %v16993_v5 = vsel %vm16775_vm14, %v13853_v27, %v3949_v28  ;;  %15232 = vmatprep.mubr.bf16.mxu0 %v13828_v54  ;;  %v3176_v55 = vshll.u32 %v3026_v36, 16  ;;  %v16011_v27 = vld [vmem:[%s20316_s1 + $0x198] sm:$0xff]   ;;  %v3174_v28 = vrot.slane %v3173_v11, 4  ;;  %v3197_v48 = vor.u32 %v3196_v29, %v3192_v21  ;;  %v17028_v52 = vpop.f32.mrf.mxu0  ;;  %v3035_v23 = vld [vmem:[#allocation2 + $0x68] sm:$0x1] }
  0xf7   : > { %15310 = vmatprep.subr.bf16.mxu0 %v16008_v4  ;;  %v13885_v0 = vcombine.low %v16993_v5, %v17002_v58  ;;  %v3169_v36 = vsel %vm16415_vm11, %v3164_v47, %v3168_v1  ;;  %v3966_v39 = vrot.slane %v3847_v38, 5  ;;  %v3205_v37 = vshrl.u32 %v3030_v41, 16  ;;  %v3849_v17 = vld [vmem:[#allocation2 + $0x58] sm:$0xf]  ;;  %v3850_v25 = vld [vmem:[#allocation2 + $0x5c] sm:$0x1] }
  0xf8   : > { %v3178_v7 = vrot.slane %v3176_v55, 5  ;;  %v3198_v57 = vrot.slane %v3197_v48, 4  ;;  %v3214_v63 = vshll.u32 %v3031_v26, 16  ;;  %v3218_v1 = vshrl.u32 %v3031_v26, 16  ;;  %v17060_v8 = vpop.f32.mrf.mxu0  ;;  %v3851_v38 = vld [vmem:[#allocation2 + $0x60] sm:$0xe] }
  0xf9   : > { %15209 = vmatmul.mubr.bf16.gmra.mxu1 %v16004_v24  ;;  %v3956_v24 = vrot.slane %v3843_v2, 5  ;;  %v3207_v22 = vrot.slane %v3205_v37, 4 }
  0xfa   : > { %15276 = vmatprep.mubr.bf16.mxu1 %v13882_v30  ;;  %15311 = vmatpush3.bf16.msra.mxu0 %v16008_v4  ;;  %v3183_v30 = vrot.slane %v3181_v61, 4  ;;  %v3186_v4 = vrot.slane %v3184_v62, 5  ;;  %v3179_v45 = vsel %vm16415_vm11, %v3174_v28, %v3178_v7  ;;  %v17040_v61 = vsel %vm16775_vm14, %v13855_v31, %v3963_v50 }
  0xfb   : > { %15312 = vmatprep.subr.bf16.mxu0 %v16009_v33  ;;  %v17018_v54 = vsel %vm16775_vm14, %v13854_v60, %v3956_v24  ;;  %v13830_v53 = vcombine.low %v3169_v36, %v3179_v45  ;;  %v3965_v62 = vrot.slane %v3963_v50, 4  ;;  %v3203_v7 = vsel %vm16415_vm11, %v3198_v57, %v3202_v34  ;;  %v3848_v60 = vld [vmem:[#allocation2 + $0x54] sm:$0xe]  ;;  %v16016_v36 = vld [vmem:[%s20316_s1 + $0x1e0] sm:$0xff]   ;;  %v17072_v45 = vpop.f32.mrf.mxu0 }
  0xfc   : > { %v3187_v10 = vor.u32 %v3186_v4, %v3183_v30  ;;  %v17058_v4 = vld [vmem:[%s20316_s1 + $0x188] sm:$0xff]   ;;  %v3216_v47 = vrot.slane %v3214_v63, 5  ;;  %20349 = vst [vmem:[#allocation12_spill] sm:$0xff] %v17072_v45 }
  0xfd   : > { %15233 = vmatmul.mubr.bf16.gmra.mxu0 %v13829_v51  ;;  %v3032_v51 = vld [vmem:[#allocation2 + $0x5c] sm:$0x1] }
  0xfe   : > { %15313 = vmatpush3.bf16.msra.mxu0 %v16009_v33  ;;  %v3188_v40 = vrot.slane %v3187_v10, 4  ;;  %v3958_v33 = vrot.slane %v3956_v24, 4  ;;  %15236 = vmatprep.mubr.bf16.mxu0 %v13830_v53  ;;  %v3224_v2 = vshll.u32 %v3032_v51, 16  ;;  %v3220_v10 = vrot.slane %v3218_v1, 4  ;;  %v3853_v51 = vld [vmem:[#allocation2 + $0x68] sm:$0x1] }
  0xff   : > { %15314 = vmatprep.subr.bf16.mxu0 %v16010_v15  ;;  %v3980_v1 = vrot.slane %v3853_v51, 5 }
 0x100   : > { %v3193_v55 = vsel %vm16415_vm11, %v3188_v40, %v3192_v21  ;;  %v3960_v32 = vsel %vm16775_vm14, %v3958_v33, %v3959_v35  ;;  %v3226_v21 = vrot.slane %v3224_v2, 5  ;;  %v3248_v40 = vshll.u32 %v3035_v23, 16 }
 0x101   : > { %15277 = vmatmul.mubr.bf16.vlgmr.msra.gmra.mxu1 %v13883_v49  ;;  %v3033_v49 = vld [vmem:[#allocation2 + $0x60] sm:$0xf]  ;;  %v13886_v59 = vcombine.low %v17018_v54, %v3960_v32  ;;  %v13831_v9 = vcombine.low %v3193_v55, %v3203_v7  ;;  %v13856_v54 = vrot.slane %v3848_v60, 9  ;;  %v3970_v33 = vrot.slane %v3849_v17, 5  ;;  %v17089_v7 = vpop.f32.mrf.mxu0 }
 0x102   : > { %15280 = vmatprep.mubr.bf16.mxu1 %v13884_v43  ;;  %15315 = vmatpush3.bf16.msra.mxu0 %v16010_v15  ;;  %v3208_v43 = vshll.u32 %v3030_v41, 16  ;;  %v3034_v15 = vld [vmem:[#allocation2 + $0x64] sm:$0xf]  ;;  %v3229_v30 = vshrl.u32 %v3033_v49, 16  ;;  %v3232_v29 = vshll.u32 %v3033_v49, 16  ;;  %v3250_v55 = vrot.slane %v3248_v40, 5 }
 0x103   : > { %15316 = vmatprep.subr.bf16.mxu0 %v16011_v27  ;;  %15357 = vmatpush3.bf16.msra.mxu1 %v16913_v56  ;;  %v17053_v56 = vsel %vm16775_vm14, %v3965_v62, %v3966_v39  ;;  %v3238_v34 = vshll.u32 %v3034_v15, 16  ;;  %v3242_v35 = vshrl.u32 %v3034_v15, 16  ;;  %v3852_v41 = vld [vmem:[#allocation2 + $0x64] sm:$0xf]  ;;  %v3971_v5 = vsel %vm16775_vm14, %v13856_v54, %v3970_v33  ;;  %v3037_v62 = vld [vmem:[#allocation2 + $0x70] sm:$0xf] }
 0x104   : > { %15358 = vmatprep.subr.bf16.mxu1 %v16013_v44  ;;  %v13887_v11 = vcombine.low %v17040_v61, %v17053_v56  ;;  %v3210_v16 = vrot.slane %v3208_v43, 5  ;;  %v3231_v24 = vrot.slane %v3229_v30, 4  ;;  %v3234_v31 = vrot.slane %v3232_v29, 5  ;;  %v16020_v32 = vld [vmem:[%s20316_s1 + $0x180] sm:$0xff]   ;;  %v3040_v29 = vld [vmem:[#allocation2 + $0x7c] sm:$0xf] }
 0x105   : > { %15237 = vmatmul.mubr.bf16.gmra.mxu0 %v13831_v9  ;;  %v3240_v50 = vrot.slane %v3238_v34, 5  ;;  %v3244_v26 = vrot.slane %v3242_v35, 4  ;;  %v3972_v58 = vrot.slane %v3970_v33, 4  ;;  %v13857_v43 = vrot.slane %v3851_v38, 9  ;;  %v17097_v9 = vld [vmem:[%s20316_s1 + $0x1d0] sm:$0xff]   ;;  %v17119_v33 = vpop.f32.mrf.mxu0 }
 0x106   : > { %15317 = vmatpush3.bf16.msra.mxu0 %v16011_v27  ;;  %v3211_v28 = vor.u32 %v3210_v16, %v3207_v22  ;;  %v3221_v27 = vor.u32 %v3220_v10, %v3216_v47  ;;  %v3235_v49 = vor.u32 %v3234_v31, %v3231_v24  ;;  %v3977_v63 = vrot.slane %v3852_v41, 5  ;;  %v17102_v22 = vld [vmem:[%s20316_s1 + $0x238] sm:$0xff]   ;;  %v3041_v34 = vld [vmem:[#allocation2 + $0x80] sm:$0x1]  ;;  %v3854_v40 = vld [vmem:[#allocation2 + $0x6c] sm:$0xe] }
 0x107   : > { %15359 = vmatpush3.bf16.msra.mxu1 %v16013_v44  ;;  %15318 = vmatprep.subr.bf16.mxu0 %v16014_v20  ;;  %v17070_v44 = vpop.f32.mrf.mxu1  ;;  %v3245_v57 = vor.u32 %v3244_v26, %v3240_v50  ;;  %v3855_v26 = vld [vmem:[#allocation2 + $0x70] sm:$0xf]  ;;  %v3856_v61 = vld [vmem:[#allocation2 + $0x74] sm:$0x1] }
 0x108   : > { %15360 = vmatprep.subr.bf16.mxu1 %v16015_v6  ;;  %v3212_v48 = vrot.slane %v3211_v28, 4  ;;  %v3222_v53 = vrot.slane %v3221_v27, 4  ;;  %v3236_v15 = vrot.slane %v3235_v49, 4  ;;  %v17106_v60 = vsel %vm16775_vm14, %v13857_v43, %v3977_v63  ;;  %v16021_v49 = vld [vmem:[%s20316_s1 + $0x1c8] sm:$0xff]  }
 0x109   : > { %15281 = vmatmul.mubr.bf16.gmra.mxu1 %v13885_v0  ;;  %v3036_v0 = vld [vmem:[#allocation2 + $0x6c] sm:$0xf]  ;;  %v3246_v23 = vrot.slane %v3245_v57, 4  ;;  %v3979_v17 = vrot.slane %v3977_v63, 4  ;;  %v3262_v28 = vshll.u32 %v3037_v62, 16  ;;  %v3266_v27 = vshrl.u32 %v3037_v62, 16 }
 0x10a   : > { %15284 = vmatprep.mubr.bf16.mxu1 %v13886_v59  ;;  %15319 = vmatpush3.bf16.msra.mxu0 %v16014_v20  ;;  %v3217_v39 = vsel %vm16415_vm11, %v3212_v48, %v3216_v47  ;;  %v3973_v59 = vrot.slane %v3850_v25, 5  ;;  %v16018_v20 = vld [vmem:[%s20316_s1 + $0x1d8] sm:$0xff]   ;;  %v3227_v37 = vsel %vm16415_vm11, %v3222_v53, %v3226_v21  ;;  %v3038_v47 = vld [vmem:[#allocation2 + $0x74] sm:$0x1]  ;;  %v3253_v10 = vshrl.u32 %v3036_v0, 16 }
 0x10b   : > { %15361 = vmatpush3.bf16.msra.mxu1 %v16015_v6  ;;  %15320 = vmatprep.subr.bf16.mxu0 %v17058_v4  ;;  %v17087_v6 = vpop.f32.mrf.mxu1  ;;  %v13832_v2 = vcombine.low %v3217_v39, %v3227_v37  ;;  %v3039_v21 = vld [vmem:[#allocation2 + $0x78] sm:$0xf]  ;;  %v3251_v24 = vsel %vm16415_vm11, %v3246_v23, %v3250_v55  ;;  %v3256_v25 = vshll.u32 %v3036_v0, 16  ;;  %v3981_v38 = vsel %vm16775_vm14, %v3979_v17, %v3980_v1  ;;  %v3858_v37 = vld [vmem:[#allocation2 + $0x7c] sm:$0xf] }
 0x10c   : > { %15362 = vmatprep.subr.bf16.mxu1 %v16016_v36  ;;  %v3974_v30 = vsel %vm16775_vm14, %v3972_v58, %v3973_v59  ;;  %v13889_v41 = vcombine.low %v17106_v60, %v3981_v38  ;;  %v3264_v31 = vrot.slane %v3262_v28, 5  ;;  %v3268_v56 = vrot.slane %v3266_v27, 4  ;;  %v3857_v39 = vld [vmem:[#allocation2 + $0x78] sm:$0xe]  ;;  %v3859_v17 = vld [vmem:[#allocation2 + $0x80] sm:$0x1] }
 0x10d   : > { %v13888_v16 = vcombine.low %v3971_v5, %v3974_v30  ;;  %15240 = vmatprep.mubr.bf16.mxu0 %v13832_v2  ;;  %v17117_v54 = vpop.f32.mrf.mxu1  ;;  %v3258_v48 = vrot.slane %v3256_v25, 5  ;;  %v3280_v51 = vshll.u32 %v3039_v21, 16  ;;  %v3286_v53 = vshll.u32 %v3040_v29, 16  ;;  %v3042_v25 = vld [vmem:[#allocation2 + $0x84] sm:$0xf] }
 0x10e   : > { %15321 = vmatpush3.bf16.msra.mxu0 %v17058_v4  ;;  %v3241_v4 = vsel %vm16415_vm11, %v3236_v15, %v3240_v50  ;;  %v3272_v50 = vshll.u32 %v3038_v47, 16  ;;  %v3290_v58 = vshrl.u32 %v3040_v29, 16  ;;  %v3296_v0 = vshll.u32 %v3041_v34, 16  ;;  %v16022_v47 = vld [vmem:[%s20316_s1 + $0x1c0] sm:$0xff]   ;;  %v3043_v28 = vld [vmem:[#allocation2 + $0x88] sm:$0xf] }
 0x10f   : > { %15363 = vmatpush3.bf16.msra.mxu1 %v16016_v36  ;;  %15322 = vmatprep.subr.bf16.mxu0 %v16020_v32  ;;  %v13833_v35 = vcombine.low %v3241_v4, %v3251_v24  ;;  %v3255_v36 = vrot.slane %v3253_v10, 4  ;;  %v3282_v59 = vrot.slane %v3280_v51, 5  ;;  %v3288_v62 = vrot.slane %v3286_v53, 5  ;;  %v17127_v43 = vpop.f32.mrf.mxu1 }
 0x110   : > { %15364 = vmatprep.subr.bf16.mxu1 %v16018_v20  ;;  %v3274_v5 = vrot.slane %v3272_v50, 5  ;;  %20350 = vst [vmem:[#allocation13_spill] sm:$0xff] %v17127_v43  ;;  %v3292_v1 = vrot.slane %v3290_v58, 4  ;;  %v3298_v2 = vrot.slane %v3296_v0, 5  ;;  %v13858_v15 = vrot.slane %v3854_v40, 9 }
 0x111   : > { %15285 = vmatmul.mubr.bf16.gmra.mxu1 %v13887_v11  ;;  %15241 = vmatmul.mubr.bf16.gmra.mxu0 %v13833_v35  ;;  %v3277_v11 = vshrl.u32 %v3039_v21, 16  ;;  %v3259_v55 = vor.u32 %v3258_v48, %v3255_v36  ;;  %v3987_v60 = vrot.slane %v3856_v61, 5  ;;  %v13859_v4 = vrot.slane %v3857_v39, 9  ;;  %v17141_v38 = vpop.f32.mrf.mxu1  ;;  %v3044_v61 = vld [vmem:[#allocation2 + $0x8c] sm:$0x1] }
 0x112   : > { %15288 = vmatprep.mubr.bf16.mxu1 %v13888_v16  ;;  %15323 = vmatpush3.bf16.msra.mxu0 %v16020_v32  ;;  %v3269_v32 = vor.u32 %v3268_v56, %v3264_v31  ;;  %v3984_v16 = vrot.slane %v3855_v26, 5  ;;  %v3293_v21 = vor.u32 %v3292_v1, %v3288_v62  ;;  %v3991_v24 = vrot.slane %v3858_v37, 5  ;;  %v3046_v58 = vld [vmem:[#allocation2 + $0x94] sm:$0xf]  ;;  %v3047_v0 = vld [vmem:[#allocation2 + $0x98] sm:$0x1] }
 0x113   : > { %15365 = vmatpush3.bf16.msra.mxu1 %v16018_v20  ;;  %15404 = vmatprep.subr.bf16.mxu0 %v17102_v22  ;;  %v3279_v57 = vrot.slane %v3277_v11, 4  ;;  %v17129_v20 = vpop.f32.mrf.mxu0  ;;  %v3260_v63 = vrot.slane %v3259_v55, 4  ;;  %v3994_v26 = vrot.slane %v3859_v17, 5  ;;  %v3301_v56 = vshrl.u32 %v3042_v25, 16  ;;  %v3045_v11 = vld [vmem:[#allocation2 + $0x90] sm:$0xf]  ;;  %v17155_v37 = vpop.f32.mrf.mxu1 }
 0x114   : > { %15366 = vmatprep.subr.bf16.mxu1 %v17097_v9  ;;  %v3270_v23 = vrot.slane %v3269_v32, 4  ;;  %v3986_v35 = vrot.slane %v3984_v16, 4  ;;  %v3294_v40 = vrot.slane %v3293_v21, 4  ;;  %v3992_v48 = vsel %vm16775_vm14, %v13859_v4, %v3991_v24 }
 0x115   : > { %v3283_v30 = vor.u32 %v3282_v59, %v3279_v57  ;;  %v3265_v10 = vsel %vm16415_vm11, %v3260_v63, %v3264_v31  ;;  %v17143_v36 = vpop.f32.mrf.mxu0  ;;  %v3993_v31 = vrot.slane %v3991_v24, 4  ;;  %v3304_v55 = vshll.u32 %v3042_v25, 16 }
 0x116   : > { %v3275_v29 = vsel %vm16415_vm11, %v3270_v23, %v3274_v5  ;;  %20351 = vst [vmem:[#allocation14_spill] sm:$0xff] %v17143_v36  ;;  %v3988_v50 = vsel %vm16775_vm14, %v3986_v35, %v3987_v60  ;;  %v3299_v51 = vsel %vm16415_vm11, %v3294_v40, %v3298_v2  ;;  %v3310_v5 = vshll.u32 %v3043_v28, 16  ;;  %v3861_v23 = vld [vmem:[#allocation2 + $0x88] sm:$0xf]  ;;  %v17159_v40 = vpop.f32.mrf.mxu1 }
 0x117   : > { %15367 = vmatpush3.bf16.msra.mxu1 %v17097_v9  ;;  %v3284_v34 = vrot.slane %v3283_v30, 4  ;;  %v3985_v9 = vsel %vm16775_vm14, %v13858_v15, %v3984_v16  ;;  %v13834_v27 = vcombine.low %v3265_v10, %v3275_v29  ;;  %v3995_v32 = vsel %vm16775_vm14, %v3993_v31, %v3994_v26  ;;  %v3862_v30 = vld [vmem:[#allocation2 + $0x8c] sm:$0x1]  ;;  %20352 = vst [vmem:[#allocation15_spill] sm:$0xff] %v17159_v40 }
 0x118   : > { %15368 = vmatprep.subr.bf16.mxu1 %v16021_v49  ;;  %v13890_v53 = vcombine.low %v3985_v9, %v3988_v50  ;;  %v3303_v57 = vrot.slane %v3301_v56, 4  ;;  %v3314_v59 = vshrl.u32 %v3043_v28, 16  ;;  %v13891_v63 = vcombine.low %v3992_v48, %v3995_v32  ;;  %v3863_v28 = vld [vmem:[#allocation2 + $0x90] sm:$0xe] }
 0x119   : > { %15289 = vmatmul.mubr.bf16.gmra.mxu1 %v13889_v41  ;;  %v3289_v41 = vsel %vm16415_vm11, %v3284_v34, %v3288_v62  ;;  %15244 = vmatprep.mubr.bf16.mxu0 %v13834_v27  ;;  %v3860_v62 = vld [vmem:[#allocation2 + $0x84] sm:$0xe]  ;;  %v3306_v1 = vrot.slane %v3304_v55, 5  ;;  %v3312_v2 = vrot.slane %v3310_v5, 5  ;;  %v3320_v15 = vshll.u32 %v3044_v61, 16 }
 0x11a   : > { %v13835_v39 = vcombine.low %v3289_v41, %v3299_v51  ;;  %15292 = vmatprep.mubr.bf16.mxu1 %v13890_v53  ;;  %v3316_v16 = vrot.slane %v3314_v59, 4  ;;  %v3325_v60 = vshrl.u32 %v3045_v11, 16  ;;  %v3328_v17 = vshll.u32 %v3045_v11, 16  ;;  %v3864_v27 = vld [vmem:[#allocation2 + $0x94] sm:$0xf] }
 0x11b   : > { %15369 = vmatpush3.bf16.msra.mxu1 %v16021_v49  ;;  %v17157_v49 = vpop.f32.mrf.mxu0  ;;  %v3334_v10 = vshll.u32 %v3046_v58, 16  ;;  %v3307_v21 = vor.u32 %v3306_v1, %v3303_v57  ;;  %v3322_v4 = vrot.slane %v3320_v15, 5  ;;  %v3338_v24 = vshrl.u32 %v3046_v58, 16  ;;  %v3865_v51 = vld [vmem:[#allocation2 + $0x98] sm:$0x1] }
 0x11c   : > { %15370 = vmatprep.subr.bf16.mxu1 %v16022_v47  ;;  %15245 = vmatmul.mubr.bf16.gmra.mxu0 %v13835_v39  ;;  %v3344_v25 = vshll.u32 %v3047_v0, 16  ;;  %v3317_v29 = vor.u32 %v3316_v16, %v3312_v2  ;;  %v3327_v34 = vrot.slane %v3325_v60, 4  ;;  %v3330_v9 = vrot.slane %v3328_v17, 5  ;;  %v3048_v0 = vld [vmem:[#allocation2 + $0x9c] sm:$0xf] }
 0x11d   : > { %v3336_v35 = vrot.slane %v3334_v10, 5  ;;  %v17161_v48 = vpop.f32.mrf.mxu0  ;;  %v3308_v31 = vrot.slane %v3307_v21, 4  ;;  %v3340_v41 = vrot.slane %v3338_v24, 4  ;;  %v13860_v26 = vrot.slane %v3860_v62, 9  ;;  %v3049_v39 = vld [vmem:[#allocation2 + $0xa0] sm:$0xf] }
 0x11e   : > { %v3346_v50 = vrot.slane %v3344_v25, 5  ;;  %v3331_v61 = vor.u32 %v3330_v9, %v3327_v34  ;;  %v3998_v56 = vrot.slane %v3861_v23, 5  ;;  %v4001_v11 = vrot.slane %v3862_v30, 5  ;;  %v3050_v10 = vld [vmem:[#allocation2 + $0xa4] sm:$0x1] }
 0x11f   : > { %15371 = vmatpush3.bf16.msra.mxu1 %v16022_v47  ;;  %v3318_v47 = vrot.slane %v3317_v29, 4  ;;  %v3313_v53 = vsel %vm16415_vm11, %v3308_v31, %v3312_v2  ;;  %v3341_v55 = vor.u32 %v3340_v41, %v3336_v35  ;;  %v13861_v5 = vrot.slane %v3863_v28, 9  ;;  %v17171_v1 = vpop.f32.mrf.mxu0  ;;  %v3052_v34 = vld [vmem:[#allocation2 + $0xac] sm:$0xf]  ;;  %v3053_v9 = vld [vmem:[#allocation2 + $0xb0] sm:$0x1] }
 0x120   : > { %v4005_v58 = vrot.slane %v3864_v27, 5  ;;  %v3332_v57 = vrot.slane %v3331_v61, 4  ;;  %v3999_v59 = vsel %vm16775_vm14, %v13860_v26, %v3998_v56  ;;  %v4000_v62 = vrot.slane %v3998_v56, 4  ;;  %v3866_v26 = vld [vmem:[#allocation2 + $0x9c] sm:$0xe] }
 0x121   : > { %15293 = vmatmul.mubr.bf16.gmra.mxu1 %v13891_v63  ;;  %v3323_v32 = vsel %vm16415_vm11, %v3318_v47, %v3322_v4  ;;  %v17169_v63 = vpop.f32.mrf.mxu1  ;;  %v3342_v23 = vrot.slane %v3341_v55, 4  ;;  %v4008_v17 = vrot.slane %v3865_v51, 5  ;;  %v3349_v21 = vshrl.u32 %v3048_v0, 16  ;;  %v3051_v4 = vld [vmem:[#allocation2 + $0xa8] sm:$0xf]  ;;  %v17185_v61 = vpop.f32.mrf.mxu0 }
 0x122   : > { %20353 = vst [vmem:[#allocation16_spill] sm:$0xff] %v17169_v63  ;;  %v13836_v15 = vcombine.low %v3313_v53, %v3323_v32  ;;  %v4006_v2 = vsel %vm16775_vm14, %v13861_v5, %v4005_v58  ;;  %v4007_v30 = vrot.slane %v4005_v58, 4  ;;  %v3337_v16 = vsel %vm16415_vm11, %v3332_v57, %v3336_v35  ;;  %20354 = vst [vmem:[#allocation17_spill] sm:$0xff] %v17185_v61  ;;  %v3867_v53 = vld [vmem:[#allocation2 + $0xa0] sm:$0xf] }
 0x123   : > { %v4002_v60 = vsel %vm16775_vm14, %v4000_v62, %v4001_v11  ;;  %v3347_v24 = vsel %vm16415_vm11, %v3342_v23, %v3346_v50  ;;  %v3352_v28 = vshll.u32 %v3048_v0, 16  ;;  %v3358_v29 = vshll.u32 %v3049_v39, 16  ;;  %v17183_v47 = vpop.f32.mrf.mxu1  ;;  %v3868_v55 = vld [vmem:[#allocation2 + $0xa4] sm:$0x1]  ;;  %v4881_v63 = vld [vmem:[#allocation2 + $0x30] sm:$0xf] }
 0x124   : > { %15248 = vmatprep.mubr.bf16.mxu0 %v13836_v15  ;;  %v13892_v25 = vcombine.low %v3999_v59, %v4002_v60  ;;  %v13837_v27 = vcombine.low %v3337_v16, %v3347_v24  ;;  %v4009_v35 = vsel %vm16775_vm14, %v4007_v30, %v4008_v17  ;;  %v3351_v31 = vrot.slane %v3349_v21, 4  ;;  %v3869_v15 = vld [vmem:[#allocation2 + $0xa8] sm:$0xe]  ;;  %v3870_v60 = vld [vmem:[#allocation2 + $0xac] sm:$0xf] }
 0x125   : > { %v3362_v41 = vshrl.u32 %v3049_v39, 16  ;;  %v13893_v56 = vcombine.low %v4006_v2, %v4009_v35  ;;  %v3354_v11 = vrot.slane %v3352_v28, 5  ;;  %v3360_v50 = vrot.slane %v3358_v29, 5  ;;  %v17187_v17 = vpop.f32.mrf.mxu1 }
 0x126   : > { %15296 = vmatprep.mubr.bf16.mxu1 %v13892_v25  ;;  %v3368_v51 = vshll.u32 %v3050_v10, 16  ;;  %15249 = vmatmul.mubr.bf16.gmra.mxu0 %v13837_v27  ;;  %v3373_v58 = vshrl.u32 %v3051_v4, 16  ;;  %v3376_v0 = vshll.u32 %v3051_v4, 16  ;;  %v3382_v32 = vshll.u32 %v3052_v34, 16  ;;  %v17189_v10 = vpop.f32.mrf.mxu0 }
 0x127   : > { %v3364_v5 = vrot.slane %v3362_v41, 4  ;;  %v3355_v57 = vor.u32 %v3354_v11, %v3351_v31  ;;  %v3386_v59 = vshrl.u32 %v3052_v34, 16  ;;  %v3392_v62 = vshll.u32 %v3053_v9, 16  ;;  %v3871_v34 = vld [vmem:[#allocation2 + $0xb0] sm:$0x1] }
 0x128   : > { %v3370_v39 = vrot.slane %v3368_v51, 5  ;;  %v3375_v30 = vrot.slane %v3373_v58, 4  ;;  %v3378_v16 = vrot.slane %v3376_v0, 5  ;;  %v3384_v2 = vrot.slane %v3382_v32, 5  ;;  %v3054_v11 = vld [vmem:[#allocation2 + $0xb4] sm:$0xf]  ;;  %v17197_v32 = vpop.f32.mrf.mxu1 }
 0x129   : > { %15297 = vmatmul.mubr.bf16.gmra.mxu1 %v13893_v56  ;;  %v3365_v23 = vor.u32 %v3364_v5, %v3360_v50  ;;  %v3356_v21 = vrot.slane %v3355_v57, 4  ;;  %v3388_v24 = vrot.slane %v3386_v59, 4  ;;  %v3394_v25 = vrot.slane %v3392_v62, 5  ;;  %v3055_v51 = vld [vmem:[#allocation2 + $0xb8] sm:$0xf] }
 0x12a   : > { %v13862_v4 = vrot.slane %v3866_v26, 9  ;;  %v3379_v29 = vor.u32 %v3378_v16, %v3375_v30  ;;  %v4012_v27 = vrot.slane %v3867_v53, 5  ;;  %v4015_v35 = vrot.slane %v3868_v55, 5  ;;  %v17199_v53 = vpop.f32.mrf.mxu0  ;;  %v3056_v62 = vld [vmem:[#allocation2 + $0xbc] sm:$0x1] }
 0x12b   : > { %v3366_v28 = vrot.slane %v3365_v23, 4  ;;  %v3361_v9 = vsel %vm16415_vm11, %v3356_v21, %v3360_v50  ;;  %v3389_v31 = vor.u32 %v3388_v24, %v3384_v2  ;;  %v13863_v41 = vrot.slane %v3869_v15, 9  ;;  %v284_v15 = vld [vmem:[#allocation2 + $0xc8] sm:$0x1]  ;;  %v3058_v21 = vld [vmem:[#allocation2 + $0xc4] sm:$0xf] }
 0x12c   : > { %v4019_v56 = vrot.slane %v3870_v60, 5  ;;  %v3380_v58 = vrot.slane %v3379_v29, 4  ;;  %v4013_v26 = vsel %vm16775_vm14, %v13862_v4, %v4012_v27  ;;  %v4014_v0 = vrot.slane %v4012_v27, 4  ;;  %v3057_v60 = vld [vmem:[#allocation2 + $0xc0] sm:$0xf] }
 0x12d   : > { %v3371_v5 = vsel %vm16415_vm11, %v3366_v28, %v3370_v39  ;;  %v3390_v57 = vrot.slane %v3389_v31, 4  ;;  %v4022_v30 = vrot.slane %v3871_v34, 5  ;;  %v3397_v16 = vshrl.u32 %v3054_v11, 16  ;;  %v3872_v27 = vld [vmem:[#allocation2 + $0xb4] sm:$0xe]  ;;  %v17213_v34 = vpop.f32.mrf.mxu0 }
 0x12e   : > { %v13838_v55 = vcombine.low %v3361_v9, %v3371_v5  ;;  %v4020_v50 = vsel %vm16775_vm14, %v13863_v41, %v4019_v56  ;;  %v4021_v59 = vrot.slane %v4019_v56, 4  ;;  %v3385_v39 = vsel %vm16415_vm11, %v3380_v58, %v3384_v2  ;;  %v3873_v56 = vld [vmem:[#allocation2 + $0xb8] sm:$0xf] }
 0x12f   : > { %v4016_v23 = vsel %vm16775_vm14, %v4014_v0, %v4015_v35  ;;  %v3395_v24 = vsel %vm16415_vm11, %v3390_v57, %v3394_v25  ;;  %v3400_v28 = vshll.u32 %v3054_v11, 16  ;;  %v3406_v29 = vshll.u32 %v3055_v51, 16  ;;  %v17211_v35 = vpop.f32.mrf.mxu1 }
 0x130   : > { %15252 = vmatprep.mubr.bf16.mxu0 %v13838_v55  ;;  %v13894_v4 = vcombine.low %v4013_v26, %v4016_v23  ;;  %v13839_v9 = vcombine.low %v3385_v39, %v3395_v24  ;;  %v4023_v31 = vsel %vm16775_vm14, %v4021_v59, %v4022_v30  ;;  %v3399_v2 = vrot.slane %v3397_v16, 4  ;;  %20355 = vst [vmem:[#allocation18_spill] sm:$0xff] %v17211_v35  ;;  %v3874_v26 = vld [vmem:[#allocation2 + $0xbc] sm:$0x1]  ;;  %v17217_v16 = vld [vmem:[#allocation2 + $0xc0] sm:$0xe] }
 0x131   : > { %v3410_v41 = vshrl.u32 %v3055_v51, 16  ;;  %v13895_v5 = vcombine.low %v4020_v50, %v4023_v31  ;;  %v3402_v58 = vrot.slane %v3400_v28, 5  ;;  %v3408_v0 = vrot.slane %v3406_v29, 5  ;;  %v17219_v28 = vpop.f32.mrf.mxu1  ;;  %v17221_v29 = vpop.f32.mrf.mxu0 }
 0x132   : > { %15300 = vmatprep.mubr.bf16.mxu1 %v13894_v4  ;;  %v3416_v25 = vshll.u32 %v3056_v62, 16  ;;  %15253 = vmatmul.mubr.bf16.gmra.mxu0 %v13839_v9  ;;  %v285_v55 = vsel %vm16361_vm4, 0, %v284_v15  ;;  %v3421_v57 = vshrl.u32 %v3057_v60, 16  ;;  %v3424_v59 = vshll.u32 %v3057_v60, 16  ;;  %20356 = vst [vmem:[#allocation19_spill] sm:$0xff] %v17221_v29 }
 0x133   : > { %v3412_v11 = vrot.slane %v3410_v41, 4  ;;  %15301 = vmatmul.mubr.bf16.gmra.mxu1 %v13895_v5  ;;  %v3403_v51 = vor.u32 %v3402_v58, %v3399_v2  ;;  %286 = vst [vmem:[#allocation2 + $0xc8] sm:$0x1] %v285_v55  ;;  %v3430_v23 = vshll.u32 %v3058_v21, 16  ;;  %v3434_v30 = vshrl.u32 %v3058_v21, 16 }
 0x134   : > { %v3418_v39 = vrot.slane %v3416_v25, 5  ;;  %v3423_v24 = vrot.slane %v3421_v57, 4  ;;  %v3426_v4 = vrot.slane %v3424_v59, 5  ;;  %v13864_v62 = vrot.slane %v3872_v27, 9  ;;  %v3876_v57 = vld [vmem:[#allocation2 + $0xc4] sm:$0xf] }
 0x135   : > { %v3413_v50 = vor.u32 %v3412_v11, %v3408_v0  ;;  %v3404_v9 = vrot.slane %v3403_v51, 4  ;;  %v17223_v15 = vrot.slane %v3430_v23, 5  ;;  %v4026_v60 = vrot.slane %v3873_v56, 5  ;;  %v4875_v11 = vld [vmem:[#allocation2 + $0x18] sm:$0xf]  ;;  %v17233_v51 = vpop.f32.mrf.mxu1 }
 0x136   : > { %v3427_v2 = vor.u32 %v3426_v4, %v3423_v24  ;;  %v3436_v41 = vrot.slane %v3434_v30, 4  ;;  %v4029_v5 = vrot.slane %v3874_v26, 5  ;;  %v595_v21 = vrot.slane %v16926_v12, 4  ;;  %v4876_v59 = vld [vmem:[#allocation2 + $0x1c] sm:$0xf] }
 0x137   : > { %v3414_v31 = vrot.slane %v3413_v50, 4  ;;  %v3409_v58 = vsel %vm16415_vm11, %v3404_v9, %v3408_v0  ;;  %v4027_v27 = vsel %vm16775_vm14, %v13864_v62, %v4026_v60  ;;  %v4028_v25 = vrot.slane %v4026_v60, 4  ;;  %v4877_v30 = vld [vmem:[#allocation2 + $0x20] sm:$0x1]  ;;  %v4878_v24 = vld [vmem:[#allocation2 + $0x24] sm:$0xf]  ;;  %v17244_v46 = vpop.f32.mrf.mxu1 }
 0x138   : > { %v13865_v56 = vrot.slane %v17217_v16, 9  ;;  %v17237_v23 = vrot.slane %v3427_v2, 4  ;;  %v4924_v50 = vshrl.u32 %v4875_v11, 16  ;;  %v4879_v9 = vld [vmem:[#allocation2 + $0x28] sm:$0xf]  ;;  %v4933_v2 = vshll.u32 %v4876_v59, 16 }
 0x139   : > { %v3419_v55 = vsel %vm16415_vm11, %v3414_v31, %v3418_v39  ;;  %v4030_v0 = vsel %vm16775_vm14, %v4028_v25, %v4029_v5  ;;  %v3437_v39 = vor.u32 %v3436_v41, %v17223_v15  ;;  %v4880_v16 = vld [vmem:[#allocation2 + $0x2c] sm:$0x1]  ;;  %v4937_v5 = vshrl.u32 %v4876_v59, 16  ;;  %v17250_v36 = vpop.f32.mrf.mxu1 }
 0x13a   : > { %v17235_v26 = vpop.f32.mrf.mxu0  ;;  %v13840_v12 = vcombine.low %v3409_v58, %v3419_v55  ;;  %v756_v4 = vld [vmem:[#allocation2 + $0xc8] sm:$0x1]  ;;  %v13896_v62 = vcombine.low %v4027_v27, %v4030_v0  ;;  %v4926_v31 = vrot.slane %v4924_v50, 4  ;;  %v4927_v58 = vshll.u32 %v4875_v11, 16  ;;  %20357 = vst [vmem:[#allocation20_spill] sm:$0xff] %v17250_v36 }
 0x13b   : > { %v757_v60 = vsel %vm16350_vm2, %v595_v21, %v756_v4  ;;  %v4033_v55 = vrot.slane %v3876_v57, 5  ;;  %v4943_v25 = vshll.u32 %v4877_v30, 16  ;;  %v4948_v42 = vshrl.u32 %v4878_v24, 16 }
 0x13c   : > { %15256 = vmatprep.mubr.bf16.mxu0 %v13840_v12  ;;  %758 = vst [vmem:[#allocation2 + $0xc8] sm:$0x1] %v757_v60  ;;  %15304 = vmatprep.mubr.bf16.mxu1 %v13896_v62  ;;  %v17246_v29 = vpop.f32.mrf.mxu0  ;;  %v4929_v41 = vrot.slane %v4927_v58, 5  ;;  %v4935_v27 = vrot.slane %v4933_v2, 5  ;;  %v4951_v0 = vshll.u32 %v4878_v24, 16  ;;  %v4957_v12 = vshll.u32 %v4879_v9, 16 }
 0x13d   : > { %v3438_v35 = vrot.slane %v3437_v39, 4  ;;  %v4939_v61 = vrot.slane %v4937_v5, 4  ;;  %v4950_v21 = vrot.slane %v4948_v42, 4  ;;  %v4961_v50 = vshrl.u32 %v4879_v9, 16  ;;  %v4882_v5 = vld [vmem:[#allocation2 + $0x34] sm:$0xf] }
 0x13e   : > { %v4930_v11 = vor.u32 %v4929_v41, %v4926_v31  ;;  %v4953_v4 = vrot.slane %v4951_v0, 5  ;;  %v17248_v60 = vrot.slane %v4957_v12, 5  ;;  %v4967_v57 = vshll.u32 %v4880_v16, 16  ;;  %v17252_v43 = vpop.f32.mrf.mxu0 }
 0x13f   : > { %v4940_v59 = vor.u32 %v4939_v61, %v4935_v27  ;;  %v4945_v30 = vrot.slane %v4943_v25, 5  ;;  %v4963_v62 = vrot.slane %v4961_v50, 4  ;;  %v4035_v58 = vrot.slane %v4033_v55, 4  ;;  %v4883_v50 = vld [vmem:[#allocation2 + $0x38] sm:$0x1] }
 0x140   : > { %v4931_v24 = vrot.slane %v4930_v11, 4  ;;  %v4954_v2 = vor.u32 %v4953_v4, %v4950_v21  ;;  %v4969_v39 = vrot.slane %v4967_v57, 5  ;;  %v4972_v31 = vshrl.u32 %v4881_v63, 16 }
 0x141   : > { %v4941_v42 = vrot.slane %v4940_v59, 4  ;;  %v4964_v9 = vor.u32 %v4963_v62, %v17248_v60  ;;  %v4975_v41 = vshll.u32 %v4881_v63, 16  ;;  %v4034_v61 = vsel %vm16775_vm14, %v13865_v56, %v4033_v55  ;;  %v4884_v59 = vld [vmem:[#allocation2 + $0x3c] sm:$0xf]  ;;  %v17263_v63 = vpop.f32.mrf.mxu0 }
 0x142   : > { %v4936_v25 = vsel %vm16415_vm11, %v4931_v24, %v4935_v27  ;;  %v4955_v12 = vrot.slane %v4954_v2, 4  ;;  %v4981_v36 = vshll.u32 %v4882_v5, 16  ;;  %20358 = vst [vmem:[#allocation21_spill] sm:$0xff] %v17263_v63  ;;  %v3433_v56 = vsel %vm16415_vm11, %v17237_v23, %v17223_v15  ;;  %v4885_v2 = vld [vmem:[#allocation2 + $0x40] sm:$0xf] }
 0x143   : > { %v3059_v0 = vld [vmem:[#allocation2 + $0xc8] sm:$0x1]  ;;  %v4946_v4 = vsel %vm16415_vm11, %v4941_v42, %v4945_v30  ;;  %v4965_v57 = vrot.slane %v4964_v9, 4  ;;  %v4974_v27 = vrot.slane %v4972_v31, 4  ;;  %v4977_v24 = vrot.slane %v4975_v41, 5  ;;  %v16023_v31 = vld [vmem:[#allocation2 + $0x18] sm:$0xff]  }
 0x144   : > { %v3877_v16 = vld [vmem:[#allocation2 + $0xc8] sm:$0x1]  ;;  %v3440_v11 = vshll.u32 %v3059_v0, 16  ;;  %v13962_v55 = vcombine.low %v4936_v25, %v4946_v4  ;;  %v4960_v30 = vsel %vm16415_vm11, %v4955_v12, %v17248_v60  ;;  %v4886_v9 = vld [vmem:[#allocation2 + $0x44] sm:$0x1]  ;;  %v4983_v40 = vrot.slane %v4981_v36, 5 }
 0x145   : > { %v4036_v21 = vrot.slane %v3877_v16, 5  ;;  %v4970_v42 = vsel %vm16415_vm11, %v4965_v57, %v4969_v39  ;;  %v4978_v45 = vor.u32 %v4977_v24, %v4974_v27  ;;  %v4985_v15 = vshrl.u32 %v4882_v5, 16  ;;  %v4887_v57 = vld [vmem:[#allocation2 + $0x48] sm:$0xf] }
 0x146   : > { %v17261_v62 = vpop.f32.mrf.mxu1  ;;  %v3442_v0 = vrot.slane %v3440_v11, 5  ;;  %v4991_v41 = vshll.u32 %v4883_v50, 16  ;;  %v4996_v25 = vshrl.u32 %v4884_v59, 16  ;;  %v4999_v11 = vshll.u32 %v4884_v59, 16  ;;  %v4888_v59 = vld [vmem:[#allocation2 + $0x4c] sm:$0xf] }
 0x147   : > { %v4037_v16 = vsel %vm16775_vm14, %v4035_v58, %v4036_v21  ;;  %v4979_v12 = vrot.slane %v4978_v45, 4  ;;  %v4987_v39 = vrot.slane %v4985_v15, 4  ;;  %v5005_v4 = vshll.u32 %v4885_v2, 16 }
 0x148   : > { %v13897_v63 = vcombine.low %v4034_v61, %v4037_v16  ;;  %v3443_v23 = vsel %vm16415_vm11, %v3438_v35, %v3442_v0  ;;  %v17278_v58 = vpop.f32.mrf.mxu1  ;;  %v4998_v61 = vrot.slane %v4996_v25, 4  ;;  %v5001_v36 = vrot.slane %v4999_v11, 5  ;;  %v4889_v16 = vld [vmem:[#allocation2 + $0x50] sm:$0x1]  ;;  %v4890_v25 = vld [vmem:[#allocation2 + $0x54] sm:$0xf] }
 0x149   : > { %v17280_v21 = vpop.f32.mrf.mxu0  ;;  %v13841_v60 = vcombine.low %v3433_v56, %v3443_v23  ;;  %v5009_v5 = vshrl.u32 %v4885_v2, 16  ;;  %v4988_v35 = vor.u32 %v4987_v39, %v4983_v40  ;;  %v4993_v27 = vrot.slane %v4991_v41, 5 }
 0x14a   : > { %15305 = vmatmul.mubr.bf16.gmra.mxu1 %v13897_v63  ;;  %v5007_v50 = vrot.slane %v5005_v4, 5  ;;  %v5015_v24 = vshll.u32 %v4886_v9, 16  ;;  %v13963_v0 = vcombine.low %v4960_v30, %v4970_v42  ;;  %v4984_v56 = vsel %vm16415_vm11, %v4979_v12, %v4983_v40  ;;  %v17284_v15 = vpop.f32.mrf.mxu1  ;;  %v16026_v12 = vld [vmem:[#allocation2 + $0x30] sm:$0xff]  }
 0x14b   : > { %15372 = vmatprep.mubr.bf16.mxu1 %v13962_v55  ;;  %15257 = vmatmul.mubr.bf16.gmra.mxu0 %v13841_v60  ;;  %v5002_v63 = vor.u32 %v5001_v36, %v4998_v61  ;;  %v5011_v45 = vrot.slane %v5009_v5, 4  ;;  %v17286_v55 = vpop.f32.mrf.mxu0  ;;  %v4989_v2 = vrot.slane %v4988_v35, 4  ;;  %v17290_v41 = vadd.f32 %v17183_v47, %v17157_v49  ;;  %v4891_v60 = vld [vmem:[#allocation2 + $0x58] sm:$0xf]  ;;  %v4892_v5 = vld [vmem:[#allocation2 + $0x5c] sm:$0x1] }
 0x14c   : > { %15324 = vmatprep.mubr.bf16.mxu0 %v16023_v31  ;;  %v5017_v23 = vrot.slane %v5015_v24, 5  ;;  %v5020_v9 = vshrl.u32 %v4887_v57, 16  ;;  %v16024_v31 = vld [vmem:[#allocation2 + $0x24] sm:$0xff]   ;;  %v5023_v11 = vshll.u32 %v4887_v57, 16  ;;  %v5029_v40 = vshll.u32 %v4888_v59, 16  ;;  %v16028_v57 = vld [vmem:[%s20316_s1 + $0x230] sm:$0xff]  }
 0x14d   : > { %20359 = vst [vmem:[#allocation22_spill] sm:$0xff] %v17290_v41  ;;  %v5003_v30 = vrot.slane %v5002_v63, 4  ;;  %v5012_v42 = vor.u32 %v5011_v45, %v5007_v50  ;;  %v4994_v39 = vsel %vm16415_vm11, %v4989_v2, %v4993_v27  ;;  %v5033_v61 = vshrl.u32 %v4888_v59, 16  ;;  %v17296_v41 = vpop.f32.mrf.mxu1  ;;  %v17298_v63 = vpop.f32.mrf.mxu0 }
 0x14e   : > { %v5022_v4 = vrot.slane %v5020_v9, 4  ;;  %v5039_v36 = vshll.u32 %v4889_v16, 16  ;;  %v13964_v35 = vcombine.low %v4984_v56, %v4994_v39  ;;  %v5025_v24 = vrot.slane %v5023_v11, 5  ;;  %20360 = vst [vmem:[#allocation23_spill] sm:$0xff] %v17296_v41  ;;  %v4893_v39 = vld [vmem:[#allocation2 + $0x60] sm:$0xf] }
 0x14f   : > { %v5008_v49 = vsel %vm16415_vm11, %v5003_v30, %v5007_v50  ;;  %v5013_v47 = vrot.slane %v5012_v42, 4  ;;  %v5031_v27 = vrot.slane %v5029_v40, 5  ;;  %v5035_v45 = vrot.slane %v5033_v61, 4 }
 0x150   : > { %v5041_v59 = vrot.slane %v5039_v36, 5  ;;  %v17305_v56 = vadd.f32 %v17187_v17, %v17161_v48  ;;  %v5026_v16 = vor.u32 %v5025_v24, %v5022_v4  ;;  %v5044_v2 = vshrl.u32 %v4890_v25, 16  ;;  %v4894_v36 = vld [vmem:[#allocation2 + $0x64] sm:$0xf] }
 0x151   : > { %v5018_v50 = vsel %vm16415_vm11, %v5013_v47, %v5017_v23  ;;  %v5047_v9 = vshll.u32 %v4890_v25, 16  ;;  %v5036_v30 = vor.u32 %v5035_v45, %v5031_v27  ;;  %v5053_v42 = vshll.u32 %v4891_v60, 16  ;;  %v17312_v23 = vpop.f32.mrf.mxu0  ;;  %v16031_v25 = vld [vmem:[%s20316_s1 + $0x228] sm:$0xff]  }
 0x152   : > { %15373 = vmatmul.mubr.bf16.vlgmr.msra.gmra.mxu1 %v13963_v0  ;;  %v13965_v0 = vcombine.low %v5008_v49, %v5018_v50  ;;  %v5057_v11 = vshrl.u32 %v4891_v60, 16  ;;  %v5027_v40 = vrot.slane %v5026_v16, 4  ;;  %v5046_v61 = vrot.slane %v5044_v2, 4  ;;  %20361 = vst [vmem:[#allocation24_spill] sm:$0xff] %v17312_v23  ;;  %v16027_v49 = vld [vmem:[#allocation2 + $0x3c] sm:$0xff]   ;;  %v16029_v50 = vld [vmem:[#allocation2 + $0x48] sm:$0xff]  }
 0x153   : > { %15376 = vmatprep.mubr.bf16.mxu1 %v13964_v35  ;;  %15325 = vmatmul.mubr.bf16.vlgmr.msra.gmra.mxu0 %v16024_v31  ;;  %v5049_v48 = vrot.slane %v5047_v9, 5  ;;  %v5063_v17 = vshll.u32 %v4892_v5, 16  ;;  %v5037_v31 = vrot.slane %v5036_v30, 4  ;;  %v5055_v60 = vrot.slane %v5053_v42, 5  ;;  %v4896_v45 = vld [vmem:[#allocation2 + $0x6c] sm:$0xf] }
 0x154   : > { %15405 = vmatpush3.bf16.msra.mxu0 %v17102_v22  ;;  %15328 = vmatprep.mubr.bf16.mxu0 %v16026_v12  ;;  %v5059_v4 = vrot.slane %v5057_v11, 4  ;;  %v17319_v22 = vadd.f32 %v17197_v32, %v17171_v1  ;;  %v4895_v12 = vld [vmem:[#allocation2 + $0x68] sm:$0x1]  ;;  %v5032_v5 = vsel %vm16415_vm11, %v5027_v40, %v5031_v27  ;;  %v17327_v9 = vadd.f32 %v17219_v28, %v17189_v10  ;;  %v4897_v1 = vld [vmem:[#allocation2 + $0x70] sm:$0xf]  ;;  %v16034_v27 = vld [vmem:[%s20316_s1 + $0x220] sm:$0xff]  }
 0x155   : > { %v17310_v35 = vpop.f32.mrf.mxu1  ;;  %15406 = vmatprep.subr.bf16.mxu0 %v16028_v57  ;;  %v5050_v47 = vor.u32 %v5049_v48, %v5046_v61  ;;  %v5065_v24 = vrot.slane %v5063_v17, 5  ;;  %v5042_v16 = vsel %vm16415_vm11, %v5037_v31, %v5041_v59  ;;  %v5068_v30 = vshrl.u32 %v4893_v39, 16  ;;  %v4903_v23 = vld [vmem:[#allocation2 + $0x88] sm:$0xf] }
 0x156   : > { %v5060_v2 = vor.u32 %v5059_v4, %v5055_v60  ;;  %v13966_v32 = vcombine.low %v5032_v5, %v5042_v16  ;;  %v5071_v11 = vshll.u32 %v4893_v39, 16  ;;  %v5077_v40 = vshll.u32 %v4894_v36, 16  ;;  %v4898_v5 = vld [vmem:[#allocation2 + $0x74] sm:$0x1] }
 0x157   : > { %v5051_v42 = vrot.slane %v5050_v47, 4  ;;  %v17332_v61 = vpop.f32.mrf.mxu1  ;;  %v5070_v10 = vrot.slane %v5068_v30, 4  ;;  %v5081_v28 = vshrl.u32 %v4894_v36, 16  ;;  %v5087_v17 = vshll.u32 %v4895_v12, 16 }
 0x158   : > { %15407 = vmatpush3.bf16.msra.mxu0 %v16028_v57  ;;  %v5061_v59 = vrot.slane %v5060_v2, 4  ;;  %v5073_v31 = vrot.slane %v5071_v11, 5  ;;  %v5079_v4 = vrot.slane %v5077_v40, 5  ;;  %v17340_v39 = vadd.f32 %v17233_v51, %v17199_v53 }
 0x159   : > { %15408 = vmatprep.subr.bf16.mxu0 %v16031_v25  ;;  %v5056_v57 = vsel %vm16415_vm11, %v5051_v42, %v5055_v60  ;;  %v5083_v47 = vrot.slane %v5081_v28, 4  ;;  %v5089_v16 = vrot.slane %v5087_v17, 5  ;;  %v5092_v2 = vshrl.u32 %v4896_v45, 16  ;;  %v17344_v42 = vpop.f32.mrf.mxu1  ;;  %v4901_v28 = vld [vmem:[#allocation2 + $0x80] sm:$0x1]  ;;  %v16030_v17 = vld [vmem:[#allocation2 + $0x54] sm:$0xff]  }
 0x15a   : > { %15377 = vmatmul.mubr.bf16.gmra.mxu1 %v13965_v0  ;;  %v5066_v0 = vsel %vm16415_vm11, %v5061_v59, %v5065_v24  ;;  %v5074_v12 = vor.u32 %v5073_v31, %v5070_v10  ;;  %v5095_v30 = vshll.u32 %v4896_v45, 16  ;;  %v5101_v60 = vshll.u32 %v4897_v1, 16  ;;  %v16037_v24 = vld [vmem:[%s20316_s1 + $0x218] sm:$0xff]  }
 0x15b   : > { %v17334_v48 = vpop.f32.mrf.mxu0  ;;  %15380 = vmatprep.mubr.bf16.mxu1 %v13966_v32  ;;  %15329 = vmatmul.mubr.bf16.gmra.mxu0 %v16027_v49  ;;  %v13967_v36 = vcombine.low %v5056_v57, %v5066_v0  ;;  %v4899_v32 = vld [vmem:[#allocation2 + $0x78] sm:$0xf]  ;;  %v5084_v53 = vor.u32 %v5083_v47, %v5079_v4  ;;  %v5094_v51 = vrot.slane %v5092_v2, 4  ;;  %v5105_v49 = vshrl.u32 %v4897_v1, 16  ;;  %v4902_v47 = vld [vmem:[#allocation2 + $0x84] sm:$0xf] }
 0x15c   : > { %15332 = vmatprep.mubr.bf16.mxu0 %v16029_v50  ;;  %15409 = vmatpush3.bf16.msra.mxu0 %v16031_v25  ;;  %v5111_v40 = vshll.u32 %v4898_v5, 16  ;;  %v4900_v50 = vld [vmem:[#allocation2 + $0x7c] sm:$0xf]  ;;  %v5075_v25 = vrot.slane %v5074_v12, 4  ;;  %v5097_v59 = vrot.slane %v5095_v30, 5  ;;  %v5103_v10 = vrot.slane %v5101_v60, 5  ;;  %v17361_v60 = vpop.f32.mrf.mxu1 }
 0x15d   : > { %v17346_v11 = vpop.f32.mrf.mxu0  ;;  %15410 = vmatprep.subr.bf16.mxu0 %v16034_v27  ;;  %v17353_v45 = vadd.f32 %v17244_v46, %v17213_v34  ;;  %v5085_v57 = vrot.slane %v5084_v53, 4  ;;  %v5107_v31 = vrot.slane %v5105_v49, 4  ;;  %v16032_v1 = vld [vmem:[#allocation2 + $0x60] sm:$0xff]   ;;  %v17359_v12 = vadd.f32 %v17261_v62, %v17235_v26  ;;  %20362 = vst [vmem:[#allocation25_spill] sm:$0xff] %v17361_v60  ;;  %v16040_v26 = vld [vmem:[%s20316_s1 + $0x210] sm:$0xff]  }
 0x15e   : > { %v5113_v0 = vrot.slane %v5111_v40, 5  ;;  %v5080_v5 = vsel %vm16415_vm11, %v5075_v25, %v5079_v4  ;;  %v5098_v2 = vor.u32 %v5097_v59, %v5094_v51  ;;  %v5116_v30 = vshrl.u32 %v4899_v32, 16 }
 0x15f   : > { %v17363_v46 = vpop.f32.mrf.mxu0  ;;  %v5090_v34 = vsel %vm16415_vm11, %v5085_v57, %v5089_v16  ;;  %v5108_v53 = vor.u32 %v5107_v31, %v5103_v10  ;;  %v5119_v49 = vshll.u32 %v4899_v32, 16  ;;  %v5125_v40 = vshll.u32 %v4900_v50, 16 }
 0x160   : > { %15411 = vmatpush3.bf16.msra.mxu0 %v16034_v27  ;;  %v13968_v4 = vcombine.low %v5080_v5, %v5090_v34  ;;  %v5099_v27 = vrot.slane %v5098_v2, 4  ;;  %v5118_v51 = vrot.slane %v5116_v30, 4  ;;  %v5129_v25 = vshrl.u32 %v4900_v50, 16  ;;  %v4904_v50 = vld [vmem:[#allocation2 + $0x8c] sm:$0x1] }
 0x161   : > { %15412 = vmatprep.subr.bf16.mxu0 %v16037_v24  ;;  %v5109_v62 = vrot.slane %v5108_v53, 4  ;;  %v5121_v59 = vrot.slane %v5119_v49, 5  ;;  %v5127_v60 = vrot.slane %v5125_v40, 5  ;;  %v17374_v57 = vadd.f32 %v17278_v58, %v17246_v29  ;;  %v16033_v2 = vld [vmem:[#allocation2 + $0x6c] sm:$0xff]   ;;  %v16035_v53 = vld [vmem:[#allocation2 + $0x78] sm:$0xff]  }
 0x162   : > { %15381 = vmatmul.mubr.bf16.gmra.mxu1 %v13967_v36  ;;  %v5135_v36 = vshll.u32 %v4901_v28, 16  ;;  %v5104_v16 = vsel %vm16415_vm11, %v5099_v27, %v5103_v10  ;;  %v5131_v32 = vrot.slane %v5129_v25, 4  ;;  %v5140_v31 = vshrl.u32 %v4902_v47, 16  ;;  %v4905_v10 = vld [vmem:[#allocation2 + $0x90] sm:$0xf]  ;;  %v16043_v29 = vld [vmem:[%s20316_s1 + $0x208] sm:$0xff]  }
 0x163   : > { %15333 = vmatmul.mubr.bf16.gmra.mxu0 %v16030_v17  ;;  %15384 = vmatprep.mubr.bf16.mxu1 %v13968_v4  ;;  %v17378_v17 = vpop.f32.mrf.mxu0  ;;  %v5114_v28 = vsel %vm16415_vm11, %v5109_v62, %v5113_v0  ;;  %v5143_v34 = vshll.u32 %v4902_v47, 16  ;;  %v5149_v4 = vshll.u32 %v4903_v23, 16  ;;  %v4906_v27 = vld [vmem:[#allocation2 + $0x94] sm:$0xf]  ;;  %v5153_v41 = vshrl.u32 %v4903_v23, 16 }
 0x164   : > { %15336 = vmatprep.mubr.bf16.mxu0 %v16032_v1  ;;  %20363 = vst [vmem:[#allocation26_spill] sm:$0xff] %v17378_v17  ;;  %v5122_v1 = vor.u32 %v5121_v59, %v5118_v51  ;;  %v5137_v30 = vrot.slane %v5135_v36, 5  ;;  %15413 = vmatpush3.bf16.msra.mxu0 %v16037_v24  ;;  %v13969_v58 = vcombine.low %v5104_v16, %v5114_v28  ;;  %v5142_v40 = vrot.slane %v5140_v31, 4  ;;  %v4907_v31 = vld [vmem:[#allocation2 + $0x98] sm:$0x1]  ;;  %v16046_v28 = vld [vmem:[%s20316_s1 + $0x200] sm:$0xff]  }
 0x165   : > { %v5132_v49 = vor.u32 %v5131_v32, %v5127_v60  ;;  %15414 = vmatprep.subr.bf16.mxu0 %v16040_v26  ;;  %v5145_v17 = vrot.slane %v5143_v34, 5  ;;  %v5159_v0 = vshll.u32 %v4904_v50, 16  ;;  %v17387_v24 = vadd.f32 %v17070_v44, %v17009_v18  ;;  %v4908_v34 = vld [vmem:[#allocation2 + $0x9c] sm:$0xf] }
 0x166   : > { %v5123_v25 = vrot.slane %v5122_v1, 4  ;;  %v5151_v51 = vrot.slane %v5149_v4, 5  ;;  %v17391_v62 = vadd.f32 %v17284_v15, %v17252_v43  ;;  %v5155_v32 = vrot.slane %v5153_v41, 4 }
 0x167   : > { %v17376_v5 = vpop.f32.mrf.mxu1  ;;  %v5133_v47 = vrot.slane %v5132_v49, 4  ;;  %v5146_v23 = vor.u32 %v5145_v17, %v5142_v40  ;;  %v5161_v50 = vrot.slane %v5159_v0, 5  ;;  %v17403_v44 = vadd.f32 %v17310_v35, %v17280_v21  ;;  %v4909_v49 = vld [vmem:[#allocation2 + $0xa0] sm:$0xf] }
 0x168   : > { %v5128_v16 = vsel %vm16415_vm11, %v5123_v25, %v5127_v60  ;;  %15415 = vmatpush3.bf16.msra.mxu0 %v16040_v26  ;;  %v5164_v43 = vshrl.u32 %v4905_v10, 16  ;;  %v5167_v15 = vshll.u32 %v4905_v10, 16  ;;  %v5156_v26 = vor.u32 %v5155_v32, %v5151_v51 }
 0x169   : > { %v17393_v59 = vpop.f32.mrf.mxu1  ;;  %v5138_v18 = vsel %vm16415_vm11, %v5133_v47, %v5137_v30  ;;  %15416 = vmatprep.subr.bf16.mxu0 %v16043_v29  ;;  %v5147_v17 = vrot.slane %v5146_v23, 4  ;;  %v5173_v1 = vshll.u32 %v4906_v27, 16  ;;  %v5177_v21 = vshrl.u32 %v4906_v27, 16  ;;  %v4910_v23 = vld [vmem:[#allocation2 + $0xa4] sm:$0x1] }
 0x16a   : > { %15385 = vmatmul.mubr.bf16.gmra.mxu1 %v13969_v58  ;;  %v13970_v41 = vcombine.low %v5128_v16, %v5138_v18  ;;  %v5166_v30 = vrot.slane %v5164_v43, 4  ;;  %v5169_v58 = vrot.slane %v5167_v15, 5  ;;  %v5183_v35 = vshll.u32 %v4907_v31, 16 }
 0x16b   : > { %15337 = vmatmul.mubr.bf16.gmra.mxu0 %v16033_v2  ;;  %v17410_v10 = vpop.f32.mrf.mxu1  ;;  %v5152_v4 = vsel %vm16415_vm11, %v5147_v17, %v5151_v51  ;;  %v5157_v2 = vrot.slane %v5156_v26, 4  ;;  %v5175_v25 = vrot.slane %v5173_v1, 5  ;;  %v17418_v0 = vadd.f32 %v17332_v61, %v17286_v55  ;;  %v16038_v51 = vld [vmem:[#allocation2 + $0x90] sm:$0xff]   ;;  %v4911_v17 = vld [vmem:[#allocation2 + $0xa8] sm:$0xf] }
 0x16c   : > { %15340 = vmatprep.mubr.bf16.mxu0 %v16035_v53  ;;  %15388 = vmatprep.mubr.bf16.mxu1 %v13970_v41  ;;  %v16036_v53 = vld [vmem:[#allocation2 + $0x84] sm:$0xff]   ;;  %v5170_v47 = vor.u32 %v5169_v58, %v5166_v30  ;;  %v5179_v27 = vrot.slane %v5177_v21, 4  ;;  %v5185_v16 = vrot.slane %v5183_v35, 5  ;;  %v5188_v32 = vshrl.u32 %v4908_v34, 16 }
 0x16d   : > { %v17395_v36 = vpop.f32.mrf.mxu0  ;;  %20364 = vst [vmem:[#allocation27_spill] sm:$0xff] %v17418_v0  ;;  %15417 = vmatpush3.bf16.msra.mxu0 %v16043_v29  ;;  %v5162_v18 = vsel %vm16415_vm11, %v5157_v2, %v5161_v50  ;;  %v5191_v43 = vshll.u32 %v4908_v34, 16  ;;  %v5197_v15 = vshll.u32 %v4909_v49, 16  ;;  %v5201_v41 = vshrl.u32 %v4909_v49, 16  ;;  %v17424_v1 = vpop.f32.mrf.mxu1  ;;  %v4912_v0 = vld [vmem:[#allocation2 + $0xac] sm:$0xf] }
 0x16e   : > { %15418 = vmatprep.subr.bf16.mxu0 %v16046_v28  ;;  %v13971_v55 = vcombine.low %v5152_v4, %v5162_v18  ;;  %v5171_v61 = vrot.slane %v5170_v47, 4  ;;  %v5180_v29 = vor.u32 %v5179_v27, %v5175_v25  ;;  %v5190_v26 = vrot.slane %v5188_v32, 4  ;;  %20366 = vst [vmem:[#allocation29_spill] sm:$0xff] %v17424_v1 }
 0x16f   : > { %v17408_v60 = vpop.f32.mrf.mxu0  ;;  %v5193_v58 = vrot.slane %v5191_v43, 5  ;;  %v5199_v21 = vrot.slane %v5197_v15, 5  ;;  %v5203_v35 = vrot.slane %v5201_v41, 4  ;;  %v17430_v50 = vadd.f32 %v17087_v6, %v17028_v52  ;;  %v4913_v52 = vld [vmem:[#allocation2 + $0xb0] sm:$0x1] }
 0x170   : > { %v5176_v34 = vsel %vm16415_vm11, %v5171_v61, %v5175_v25  ;;  %v5181_v49 = vrot.slane %v5180_v29, 4  ;;  %v17436_v4 = vadd.f32 %v17344_v42, %v17298_v63  ;;  %v5212_v25 = vshrl.u32 %v4911_v17, 16  ;;  %v4915_v29 = vld [vmem:[#allocation2 + $0xb8] sm:$0xf] }
 0x171   : > { %v17412_v40 = vpop.f32.mrf.mxu0  ;;  %15419 = vmatpush3.bf16.msra.mxu0 %v16046_v28  ;;  %v5194_v47 = vor.u32 %v5193_v58, %v5190_v26  ;;  %v5204_v27 = vor.u32 %v5203_v35, %v5199_v21  ;;  %v17442_v28 = vadd.f32 %v17376_v5, %v17334_v48  ;;  %v5215_v32 = vshll.u32 %v4911_v17, 16 }
 0x172   : > { %15389 = vmatmul.mubr.bf16.gmra.mxu1 %v13971_v55  ;;  %v5186_v6 = vsel %vm16415_vm11, %v5181_v49, %v5185_v16  ;;  %v5221_v18 = vshll.u32 %v4912_v0, 16  ;;  %v5225_v41 = vshrl.u32 %v4912_v0, 16  ;;  %v5214_v55 = vrot.slane %v5212_v25, 4  ;;  %v16039_v16 = vld [vmem:[#allocation2 + $0x9c] sm:$0xff]  }
 0x173   : > { %v17420_v31 = vpop.f32.mrf.mxu0  ;;  %15341 = vmatmul.mubr.bf16.gmra.mxu0 %v16036_v53  ;;  %v13972_v43 = vcombine.low %v5176_v34, %v5186_v6  ;;  %v5195_v53 = vrot.slane %v5194_v47, 4  ;;  %v5205_v15 = vrot.slane %v5204_v27, 4  ;;  %v5217_v61 = vrot.slane %v5215_v32, 5  ;;  %v4916_v34 = vld [vmem:[#allocation2 + $0xbc] sm:$0x1]  ;;  %v16041_v47 = vld [vmem:[#allocation2 + $0xa8] sm:$0xff]  }
 0x174   : > { %20365 = vst [vmem:[#allocation28_spill] sm:$0xff] %v17420_v31  ;;  %v5207_v31 = vshll.u32 %v4910_v23, 16  ;;  %15344 = vmatprep.mubr.bf16.mxu0 %v16038_v51  ;;  %v5223_v48 = vrot.slane %v5221_v18, 5  ;;  %v5231_v5 = vshll.u32 %v4913_v52, 16  ;;  %v5227_v35 = vrot.slane %v5225_v41, 4 }
 0x175   : > { %v17426_v30 = vpop.f32.mrf.mxu0  ;;  %15392 = vmatprep.mubr.bf16.mxu1 %v13972_v43  ;;  %v5200_v17 = vsel %vm16415_vm11, %v5195_v53, %v5199_v21  ;;  %v17458_v0 = vadd.f32 %v17393_v59, %v17346_v11  ;;  %v5218_v27 = vor.u32 %v5217_v61, %v5214_v55  ;;  %v5245_v43 = vshll.u32 %v4915_v29, 16  ;;  %v4917_v55 = vld [vmem:[#allocation2 + $0xc0] sm:$0xf] }
 0x176   : > { %v5209_v23 = vrot.slane %v5207_v31, 5  ;;  %v4914_v31 = vld [vmem:[#allocation2 + $0xb4] sm:$0xf]  ;;  %v5233_v52 = vrot.slane %v5231_v5, 5  ;;  %v5228_v18 = vor.u32 %v5227_v35, %v5223_v48  ;;  %v5249_v53 = vshrl.u32 %v4915_v29, 16 }
 0x177   : > { %v17438_v2 = vpop.f32.mrf.mxu0  ;;  %v5236_v6 = vshrl.u32 %v4914_v31, 16  ;;  %v5239_v21 = vshll.u32 %v4914_v31, 16  ;;  %v5255_v11 = vshll.u32 %v4916_v34, 16  ;;  %v17466_v59 = vadd.f32 %v17410_v10, %v17363_v46  ;;  %v4918_v29 = vld [vmem:[#allocation2 + $0xc4] sm:$0xf] }
 0x178   : > { %v5210_v58 = vsel %vm16415_vm11, %v5205_v15, %v5209_v23  ;;  %v231_v23 = vld [vmem:[#allocation2 + $0xcc] sm:$0x1]  ;;  %v5219_v15 = vrot.slane %v5218_v27, 4  ;;  %v5247_v31 = vrot.slane %v5245_v43, 5  ;;  %v5251_v35 = vrot.slane %v5249_v53, 4 }
 0x179   : > { %v15114_v63 = vpop.f32.mrf.mxu1  ;;  %v17446_v42 = vpop.f32.mrf.mxu0  ;;  %v13973_v49 = vcombine.low %v5200_v17, %v5210_v58  ;;  %v5238_v41 = vrot.slane %v5236_v6, 4  ;;  %v5229_v17 = vrot.slane %v5228_v18, 4  ;;  %v5241_v58 = vrot.slane %v5239_v21, 5  ;;  %v4919_v27 = vld [vmem:[#allocation2 + $0xc8] sm:$0x1] }
 0x17a   : > { %v5224_v46 = vsel %vm16415_vm11, %v5219_v15, %v5223_v48  ;;  %v5257_v10 = vrot.slane %v5255_v11, 5  ;;  %v17479_v34 = vadd.f32 %v15114_v63, %v17395_v36  ;;  %v5252_v43 = vor.u32 %v5251_v35, %v5247_v31  ;;  %v287_v63 = vld [vmem:[#allocation2 + $0xd4] sm:$0x1] }
 0x17b   : > { %v17448_v51 = vpop.f32.mrf.mxu1  ;;  %v17450_v26 = vpop.f32.mrf.mxu0  ;;  %15393 = vmatmul.mubr.bf16.gmra.mxu1 %v13973_v49  ;;  %15345 = vmatmul.mubr.bf16.gmra.mxu0 %v16039_v16  ;;  %v17474_v49 = vadd.f32 %v17117_v54, %v17060_v8  ;;  %v5234_v18 = vsel %vm16415_vm11, %v5229_v17, %v5233_v52  ;;  %v5242_v21 = vor.u32 %v5241_v58, %v5238_v41  ;;  %v232_v8 = vsel %vm16350_vm2, 0, %v231_v23  ;;  %v16042_v54 = vld [vmem:[#allocation2 + $0xb4] sm:$0xff]   ;;  %v4921_v41 = vld [vmem:[#allocation2 + $0xd0] sm:$0xf]  ;;  %v16044_v17 = vld [vmem:[#allocation2 + $0xc0] sm:$0xff]  }
 0x17c   : > { %20367 = vst [vmem:[#allocation30_spill] sm:$0xff] %v17450_v26  ;;  %15348 = vmatprep.mubr.bf16.mxu0 %v16041_v47  ;;  %v13974_v47 = vcombine.low %v5224_v46, %v5234_v18  ;;  %233 = vst [vmem:[#allocation2 + $0xcc] sm:$0x1] %v232_v8  ;;  %v5260_v48 = vshrl.u32 %v4917_v55, 16  ;;  %v5263_v53 = vshll.u32 %v4917_v55, 16  ;;  %v5269_v36 = vshll.u32 %v4918_v29, 16 }
 0x17d   : > { %v17460_v25 = vpop.f32.mrf.mxu1  ;;  %v17462_v32 = vpop.f32.mrf.mxu0  ;;  %v5253_v1 = vrot.slane %v5252_v43, 4  ;;  %v5273_v26 = vshrl.u32 %v4918_v29, 16  ;;  %v5279_v52 = vshll.u32 %v4919_v27, 16  ;;  %v17495_v46 = vadd.f32 %v17448_v51, %v17408_v60  ;;  %v5693_v8 = vld [vmem:[#allocation2 + $0x18] sm:$0xe] }
 0x17e   : > { %15396 = vmatprep.mubr.bf16.mxu1 %v13974_v47  ;;  %v5262_v58 = vrot.slane %v5260_v48, 4  ;;  %v5265_v23 = vrot.slane %v5263_v53, 5  ;;  %v5271_v35 = vrot.slane %v5269_v36, 5  ;;  %v5694_v47 = vld [vmem:[#allocation2 + $0x1c] sm:$0xf]  ;;  %v288_v51 = vsel %vm16361_vm4, 0, %v287_v63 }
 0x17f   : > { %v17468_v61 = vpop.f32.mrf.mxu1  ;;  %v17470_v5 = vpop.f32.mrf.mxu0  ;;  %v5258_v27 = vsel %vm16415_vm11, %v5253_v1, %v5257_v10  ;;  %v5275_v43 = vrot.slane %v5273_v26, 4  ;;  %v5293_v53 = vshll.u32 %v4921_v41, 16  ;;  %289 = vst [vmem:[#allocation2 + $0xd4] sm:$0x1] %v288_v51  ;;  %v17517_v1 = vadd.f32 %v17460_v25, %v17412_v40  ;;  %v5695_v26 = vld [vmem:[#allocation2 + $0x20] sm:$0x1] }
 0x180   : > { %20368 = vst [vmem:[#allocation31_spill] sm:$0xff] %v17468_v61  ;;  %v5243_v61 = vrot.slane %v5242_v21, 4  ;;  %v17503_v21 = vadd.f32 %v17141_v38, %v17089_v7  ;;  %v5266_v60 = vor.u32 %v5265_v23, %v5262_v58  ;;  %v5281_v38 = vrot.slane %v5279_v52, 5  ;;  %v5696_v58 = vld [vmem:[#allocation2 + $0x24] sm:$0xe] }
 0x181   : > { %v17481_v6 = vpop.f32.mrf.mxu1  ;;  %v17483_v16 = vpop.f32.mrf.mxu0  ;;  %v5276_v7 = vor.u32 %v5275_v43, %v5271_v35  ;;  %20371 = vst [vmem:[#allocation34_spill] sm:$0xff] %v17517_v1  ;;  %v17519_v19 = vrot.slane %v5293_v53, 5  ;;  %v13986_v10 = vrot.slane %v5693_v8, 9  ;;  %v5791_v63 = vrot.slane %v5694_v47, 5  ;;  %v5697_v23 = vld [vmem:[#allocation2 + $0x28] sm:$0xf] }
 0x182   : > { %v5248_v29 = vsel %vm16415_vm11, %v5243_v61, %v5247_v31  ;;  %v5297_v61 = vshrl.u32 %v4921_v41, 16  ;;  %v5267_v31 = vrot.slane %v5266_v60, 4  ;;  %v2500_v40 = vadd.f32 %v17426_v30, %v17387_v24 }
 0x183   : > { %v17489_v15 = vpop.f32.mrf.mxu1  ;;  %v17491_v11 = vpop.f32.mrf.mxu0  ;;  %v13975_v48 = vcombine.low %v5248_v29, %v5258_v27  ;;  %15349 = vmatmul.mubr.bf16.gmra.mxu0 %v16042_v54  ;;  %v5277_v52 = vrot.slane %v5276_v7, 4  ;;  %v4920_v41 = vld [vmem:[#allocation2 + $0xcc] sm:$0xf]  ;;  %v2498_v25 = vadd.f32 %v17438_v2, %v17430_v50  ;;  %v5792_v30 = vsel %vm16775_vm14, %v13986_v10, %v5791_v63 }
 0x184   : > { %20369 = vst [vmem:[#allocation32_spill] sm:$0xff] %v17491_v11  ;;  %15352 = vmatprep.mubr.bf16.mxu0 %v16044_v17  ;;  %v2501_v17 = vadd.f32 %v17446_v42, %v17474_v49  ;;  %v5272_v27 = vsel %vm16415_vm11, %v5267_v31, %v5271_v35  ;;  %v5284_v43 = vshrl.u32 %v4920_v41, 16  ;;  %v5287_v8 = vshll.u32 %v4920_v41, 16  ;;  %v16045_v53 = vld [vmem:[#allocation2 + $0xcc] sm:$0xff]   ;;  %v5700_v11 = vld [vmem:[#allocation2 + $0x34] sm:$0xf] }
 0x185   : > { %v17497_v55 = vpop.f32.mrf.mxu1  ;;  %v17499_v18 = vpop.f32.mrf.mxu0  ;;  %15397 = vmatmul.mubr.bf16.gmra.mxu1 %v13975_v48  ;;  %v5299_v47 = vrot.slane %v5297_v61, 4  ;;  %v5698_v48 = vld [vmem:[#allocation2 + $0x2c] sm:$0x1]  ;;  %v5282_v24 = vsel %vm16415_vm11, %v5277_v52, %v5281_v38  ;;  %v5793_v50 = vrot.slane %v5791_v63, 4  ;;  %v5794_v2 = vrot.slane %v5695_v26, 5 }
 0x186   : > { %v13976_v42 = vcombine.low %v5272_v27, %v5282_v24  ;;  %v5286_v49 = vrot.slane %v5284_v43, 4  ;;  %v5289_v35 = vrot.slane %v5287_v8, 5  ;;  %v5699_v61 = vld [vmem:[#allocation2 + $0x30] sm:$0xe]  ;;  %v5798_v38 = vrot.slane %v5697_v23, 5 }
 0x187   : > { %v17511_v36 = vpop.f32.mrf.mxu1  ;;  %v17513_v14 = vpop.f32.mrf.mxu0  ;;  %v5300_v7 = vor.u32 %v5299_v47, %v17519_v19  ;;  %v5801_v52 = vrot.slane %v5698_v48, 5  ;;  %v4922_v10 = vld [vmem:[#allocation2 + $0xd4] sm:$0x1]  ;;  %v17549_v43 = vadd.f32 %v17481_v6, %v2500_v40  ;;  %v5701_v8 = vld [vmem:[#allocation2 + $0x38] sm:$0x1]  ;;  %v17558_v48 = vadd.f32 %v17489_v15, %v2498_v25 }
 0x188   : > { %20370 = vst [vmem:[#allocation33_spill] sm:$0xff] %v17511_v36  ;;  %v5795_v36 = vsel %vm16775_vm14, %v5793_v50, %v5794_v2  ;;  %15400 = vmatprep.mubr.bf16.mxu1 %v13976_v42  ;;  %v5290_v26 = vor.u32 %v5289_v35, %v5286_v49  ;;  %v5303_v1 = vshll.u32 %v4922_v10, 16  ;;  %v5800_v23 = vrot.slane %v5798_v38, 4  ;;  %v5702_v50 = vld [vmem:[#allocation2 + $0x3c] sm:$0xe] }
 0x189   : > { %v17521_v29 = vpop.f32.mrf.mxu1  ;;  %v17523_v54 = vpop.f32.mrf.mxu0  ;;  %v5301_v63 = vrot.slane %v5300_v7, 4  ;;  %v14018_v27 = vcombine.low %v5792_v30, %v5795_v36  ;;  %v1905_v36 = vadd.f32 %v17155_v37, %v17119_v33  ;;  %v17563_v6 = vadd.f32 %v17497_v55, %v2501_v17  ;;  %v5703_v2 = vld [vmem:[#allocation2 + $0x40] sm:$0xf]  ;;  %v5704_v35 = vld [vmem:[#allocation2 + $0x44] sm:$0x1]  ;;  %v20374_v33 = vld [vmem:[#allocation15_spill] sm:$0xff] }
 0x18a   : > { %v5291_v30 = vrot.slane %v5290_v26, 4  ;;  %v13988_v40 = vrot.slane %v5699_v61, 9  ;;  %v5305_v49 = vrot.slane %v5303_v1, 5  ;;  %v5805_v15 = vrot.slane %v5700_v11, 5 }
 0x18b   : > { %v17533_v60 = vpop.f32.mrf.mxu1  ;;  %v17535_v51 = vpop.f32.mrf.mxu0  ;;  %15353 = vmatmul.mubr.bf16.gmra.mxu0 %v16045_v53  ;;  %v5808_v25 = vrot.slane %v5701_v8, 5  ;;  %v1908_v37 = vadd.f32 %v20374_v33, %v17129_v20  ;;  %v2504_v7 = vadd.f32 %v17462_v32, %v17503_v21  ;;  %v13989_v10 = vrot.slane %v5702_v50, 9  ;;  %v5705_v20 = vld [vmem:[#allocation2 + $0x48] sm:$0xe]  ;;  %v5708_v50 = vld [vmem:[#allocation2 + $0x54] sm:$0xe] }
 0x18c   : > { %20372 = vst [vmem:[#allocation35_spill] sm:$0xff] %v17535_v51  ;;  %v13987_v51 = vrot.slane %v5696_v58, 9  ;;  %15420 = vmatprep.mubr.bf16.mxu0 %v14018_v27  ;;  %v5296_v55 = vsel %vm16415_vm11, %v5291_v30, %v17519_v19  ;;  %v5306_v1 = vsel %vm16415_vm11, %v5301_v63, %v5305_v49  ;;  %v5806_v11 = vsel %vm16775_vm14, %v13988_v40, %v5805_v15 }
 0x18d   : > { %v17542_v31 = vpop.f32.mrf.mxu1  ;;  %v17544_v41 = vpop.f32.mrf.mxu0  ;;  %v13977_v26 = vcombine.low %v5296_v55, %v5306_v1  ;;  %v5812_v27 = vrot.slane %v5703_v2, 5  ;;  %v5815_v8 = vrot.slane %v5704_v35, 5  ;;  %v2502_v19 = vadd.f32 %v17470_v5, %v1905_v36  ;;  %v5709_v5 = vld [vmem:[#allocation2 + $0x58] sm:$0xf]  ;;  %v5710_v36 = vld [vmem:[#allocation2 + $0x5c] sm:$0x1] }
 0x18e   : > { %v5799_v58 = vsel %vm16775_vm14, %v13987_v51, %v5798_v38  ;;  %v5802_v51 = vsel %vm16775_vm14, %v5800_v23, %v5801_v52  ;;  %v5807_v52 = vrot.slane %v5805_v15, 4  ;;  %v5707_v23 = vld [vmem:[#allocation2 + $0x50] sm:$0x1]  ;;  %v17588_v63 = vadd.f32 %v17521_v29, %v2504_v7 }
 0x18f   : > { %v17551_v47 = vpop.f32.mrf.mxu1  ;;  %v17553_v24 = vpop.f32.mrf.mxu0  ;;  %v14019_v17 = vcombine.low %v5799_v58, %v5802_v51  ;;  %v5706_v58 = vld [vmem:[#allocation2 + $0x4c] sm:$0xf]  ;;  %v2505_v40 = vadd.f32 %v17483_v16, %v1908_v37  ;;  %15401 = vmatmul.mubr.bf16.gmra.mxu1 %v13977_v26  ;;  %v5814_v2 = vrot.slane %v5812_v27, 4  ;;  %v17592_v51 = vadd.f32 %v17533_v60, %v2502_v19  ;;  %v5711_v37 = vld [vmem:[#allocation2 + $0x60] sm:$0xe]  ;;  %v20376_v7 = vld [vmem:[#allocation22_spill] sm:$0xff] }
 0x190   : > { %20373 = vst [vmem:[#allocation36_spill] sm:$0xff] %v17551_v47  ;;  %v5809_v30 = vsel %vm16775_vm14, %v5807_v52, %v5808_v25  ;;  %v13990_v29 = vrot.slane %v5705_v20, 9  ;;  %v5819_v33 = vrot.slane %v5706_v58, 5  ;;  %v5822_v16 = vrot.slane %v5707_v23, 5  ;;  %v5713_v52 = vld [vmem:[#allocation2 + $0x68] sm:$0x1] }
 0x191   : > { %v15190_v53 = vpop.f32.mrf.mxu1  ;;  %v17565_v42 = vpop.f32.mrf.mxu0  ;;  %v14020_v49 = vcombine.low %v5806_v11, %v5809_v30  ;;  %v17599_v25 = vadd.f32 %v17542_v31, %v2505_v40  ;;  %v5813_v55 = vsel %vm16775_vm14, %v13989_v10, %v5812_v27  ;;  %v5816_v60 = vsel %vm16775_vm14, %v5814_v2, %v5815_v8  ;;  %v5712_v11 = vld [vmem:[#allocation2 + $0x64] sm:$0xf]  ;;  %v17611_v58 = vld [vmem:[#allocation2 + $0x70] sm:$0xf] }
 0x192   : > { %v2508_v1 = vadd.f32 %v17499_v18, %v20376_v7  ;;  %v5820_v31 = vsel %vm16775_vm14, %v13990_v29, %v5819_v33  ;;  %v5821_v20 = vrot.slane %v5819_v33, 4  ;;  %v5826_v19 = vrot.slane %v5709_v5, 5  ;;  %v5714_v29 = vld [vmem:[#allocation2 + $0x6c] sm:$0xe] }
 0x193   : > { %v2821_v61 = vpop.f32.mrf.mxu1  ;;  %v17576_v38 = vpop.f32.mrf.mxu0  ;;  %15421 = vmatmul.mubr.bf16.vlgmr.msra.gmra.mxu0 %v14019_v17  ;;  %v13991_v23 = vrot.slane %v5708_v50, 9  ;;  %v2506_v10 = vadd.f32 %v17513_v14, %v17305_v56  ;;  %v2509_v18 = vadd.f32 %v17523_v54, %v17319_v22  ;;  %v14021_v40 = vcombine.low %v5813_v55, %v5816_v60  ;;  %v5716_v56 = vld [vmem:[#allocation2 + $0x74] sm:$0x1]  ;;  %v5718_v60 = vld [vmem:[#allocation2 + $0x7c] sm:$0xf] }
 0x194   : > { %15424 = vmatprep.mubr.bf16.mxu0 %v14020_v49  ;;  %v17615_v27 = vadd.f32 %v15190_v53, %v2508_v1  ;;  %v5823_v49 = vsel %vm16775_vm14, %v5821_v20, %v5822_v16  ;;  %v5828_v2 = vrot.slane %v5826_v19, 4  ;;  %v5829_v5 = vrot.slane %v5710_v36, 5  ;;  %v5717_v20 = vld [vmem:[#allocation2 + $0x78] sm:$0xe] }
 0x195   : > { %v15191_v32 = vpop.f32.mrf.mxu1  ;;  %v17583_v21 = vpop.f32.mrf.mxu0  ;;  %v14022_v33 = vcombine.low %v5820_v31, %v5823_v49  ;;  %v17623_v50 = vadd.f32 %v2821_v61, %v2506_v10  ;;  %v13992_v14 = vrot.slane %v5711_v37, 9  ;;  %v5833_v22 = vrot.slane %v5712_v11, 5  ;;  %v5719_v11 = vld [vmem:[#allocation2 + $0x80] sm:$0x1] }
 0x196   : > { %v17625_v7 = vadd.f32 %v15191_v32, %v2509_v18  ;;  %v5836_v54 = vrot.slane %v5713_v52, 5  ;;  %v2512_v55 = vadd.f32 %v17544_v41, %v17327_v9  ;;  %v5840_v16 = vrot.slane %v17611_v58, 5  ;;  %v5721_v52 = vld [vmem:[#allocation2 + $0x88] sm:$0xf] }
 0x197   : > { %v17594_v15 = vpop.f32.mrf.mxu1  ;;  %v17596_v35 = vpop.f32.mrf.mxu0  ;;  %v5827_v61 = vsel %vm16775_vm14, %v13991_v23, %v5826_v19  ;;  %v5835_v32 = vrot.slane %v5833_v22, 4  ;;  %v2510_v37 = vadd.f32 %v17553_v24, %v17340_v39  ;;  %v5830_v9 = vsel %vm16775_vm14, %v5828_v2, %v5829_v5 }
 0x198   : > { %20375 = vst [vmem:[#allocation15_spill] sm:$0xff] %v17594_v15  ;;  %v13993_v41 = vrot.slane %v5714_v29, 9  ;;  %v2513_v10 = vadd.f32 %v17565_v42, %v17353_v45  ;;  %v5834_v19 = vsel %vm16775_vm14, %v13992_v14, %v5833_v22  ;;  %v5843_v24 = vrot.slane %v5716_v56, 5 }
 0x199   : > { %v15194_v17 = vpop.f32.mrf.mxu1  ;;  %v17607_v26 = vpop.f32.mrf.mxu0  ;;  %v5837_v39 = vsel %vm16775_vm14, %v5835_v32, %v5836_v54  ;;  %v5842_v49 = vrot.slane %v5840_v16, 4  ;;  %v5847_v2 = vrot.slane %v5718_v60, 5  ;;  %v14023_v45 = vcombine.low %v5827_v61, %v5830_v9  ;;  %v5722_v32 = vld [vmem:[#allocation2 + $0x8c] sm:$0x1] }
 0x19a   : > { %v17638_v58 = vadd.f32 %v15194_v17, %v2512_v55  ;;  %v5720_v17 = vld [vmem:[#allocation2 + $0x84] sm:$0xe]  ;;  %v13994_v42 = vrot.slane %v5717_v20, 9  ;;  %v2516_v55 = vadd.f32 %v17583_v21, %v17359_v12  ;;  %v14024_v14 = vcombine.low %v5834_v19, %v5837_v39  ;;  %v5724_v21 = vld [vmem:[#allocation2 + $0x94] sm:$0xf] }
 0x19b   : > { %v2837_v8 = vpop.f32.mrf.mxu1  ;;  %v17619_v30 = vpop.f32.mrf.mxu0  ;;  %15425 = vmatmul.mubr.bf16.gmra.mxu0 %v14021_v40  ;;  %v5849_v22 = vrot.slane %v5847_v2, 4  ;;  %v5854_v54 = vrot.slane %v5721_v52, 5  ;;  %v5841_v20 = vsel %vm16775_vm14, %v13993_v41, %v5840_v16  ;;  %v5844_v12 = vsel %vm16775_vm14, %v5842_v49, %v5843_v24  ;;  %v17675_v19 = vld [vmem:[#allocation2 + $0xa0] sm:$0xf] }
 0x19c   : > { %15428 = vmatprep.mubr.bf16.mxu0 %v14022_v33  ;;  %v17646_v23 = vadd.f32 %v2837_v8, %v2510_v37  ;;  %v2517_v37 = vadd.f32 %v17607_v26, %v17391_v62  ;;  %v5848_v52 = vsel %vm16775_vm14, %v13994_v42, %v5847_v2  ;;  %v5723_v62 = vld [vmem:[#allocation2 + $0x90] sm:$0xe]  ;;  %v5725_v26 = vld [vmem:[#allocation2 + $0x98] sm:$0x1]  ;;  %v5861_v49 = vrot.slane %v5724_v21, 5 }
 0x19d   : > { %v15195_v53 = vpop.f32.mrf.mxu1  ;;  %v15154_v1 = vpop.f32.mrf.mxu0  ;;  %v5856_v41 = vrot.slane %v5854_v54, 4  ;;  %v14025_v2 = vcombine.low %v5841_v20, %v5844_v12  ;;  %v17699_v21 = vld [vmem:[#allocation2 + $0xa8] sm:$0xe]  ;;  %vm13498_vm4 = vcmask 1046534  }
 0x19e   : > { %v17648_v33 = vadd.f32 %v15195_v53, %v2513_v10  ;;  %v2514_v53 = vadd.f32 %v17596_v35, %v17374_v57  ;;  %v13995_v57 = vrot.slane %v5720_v17, 9  ;;  %v5857_v10 = vrot.slane %v5722_v32, 5  ;;  %v17677_v17 = vld [vmem:[#allocation2 + $0x9c] sm:$0xe]  ;;  %v17693_v32 = vld [vmem:[#allocation2 + $0xb8] sm:$0xf] }
 0x19f   : > { %v17630_v36 = vpop.f32.mrf.mxu1  ;;  %v2419_v31 = vpop.f32.mrf.mxu0 }
 0x1a0   : > { %20377 = vst [vmem:[#allocation22_spill] sm:$0xff] %v17630_v36  ;;  %v5850_v36 = vrot.slane %v5719_v11, 5 }
 0x1a1   : > { %v15198_v18 = vpop.f32.mrf.mxu1  ;;  %v15155_v40 = vpop.f32.mrf.mxu0 }
 0x1a2   : > { %v17656_v60 = vadd.f32 %v15198_v18, %v2516_v55  ;;  %v5851_v16 = vsel %vm16775_vm14, %v5849_v22, %v5850_v36  ;;  %v2520_v18 = vadd.f32 %v15154_v1, %v17403_v44  ;;  %v17680_v55 = vld [vmem:[#allocation2 + $0xac] sm:$0xf]  ;;  %v17686_v22 = vsel %vm16775_vm14, %v13995_v57, %v5854_v54  ;;  %v17688_v44 = vld [vmem:[#allocation2 + $0xa4] sm:$0x1] }
 0x1a3   : > { %v2853_v5 = vpop.f32.mrf.mxu1  ;;  %v17650_v29 = vpop.f32.mrf.mxu0  ;;  %15429 = vmatmul.mubr.bf16.gmra.mxu0 %v14023_v45  ;;  %v14026_v36 = vcombine.low %v5848_v52, %v5851_v16  ;;  %v5863_v52 = vrot.slane %v5861_v49, 4  ;;  %v5868_v57 = vrot.slane %v17675_v19, 5 }
 0x1a4   : > { %20378 = vst [vmem:[#allocation37_spill] sm:$0xff] %v17650_v29  ;;  %v17668_v35 = vadd.f32 %v2853_v5, %v2514_v53  ;;  %15432 = vmatprep.mubr.bf16.mxu0 %v14024_v14  ;;  %v20380_v5 = vld [vmem:[#allocation27_spill] sm:$0xff]  ;;  %v13996_v53 = vrot.slane %v5723_v62, 9  ;;  %v5875_v62 = vrot.slane %v17680_v55, 5 }
 0x1a5   : > { %v15199_v56 = vpop.f32.mrf.mxu1  ;;  %v15158_v8 = vpop.f32.mrf.mxu0  ;;  %v2518_v45 = vadd.f32 %v2419_v31, %v20380_v5  ;;  %v5858_v31 = vsel %vm16775_vm14, %v5856_v41, %v5857_v10  ;;  %v17714_v10 = vld [vmem:[#allocation2 + $0xbc] sm:$0x1]  ;;  %v13997_v5 = vrot.slane %v17677_v17, 9 }
 0x1a6   : > { %v17670_v9 = vadd.f32 %v15199_v56, %v2517_v37  ;;  %v2521_v56 = vadd.f32 %v15155_v40, %v17436_v4  ;;  %v5864_v37 = vrot.slane %v5725_v26, 5  ;;  %v17706_v4 = vld [vmem:[#allocation2 + $0xb4] sm:$0xe]  ;;  %v17708_v40 = vld [vmem:[#allocation2 + $0xc4] sm:$0xf]  ;;  %v2524_v26 = vadd.f32 %v15158_v8, %v17442_v28 }
 0x1a7   : > { %v17664_v61 = vpop.f32.mrf.mxu1  ;;  %v2435_v11 = vpop.f32.mrf.mxu0  ;;  %v14027_v19 = vcombine.low %v17686_v22, %v5858_v31  ;;  %v5862_v28 = vsel %vm16775_vm14, %v13996_v53, %v5861_v49  ;;  %v5871_v8 = vrot.slane %v17688_v44, 5  ;;  %v17728_v22 = vld [vmem:[#allocation2 + $0xcc] sm:$0xe]  ;;  %v5877_v49 = vrot.slane %v5875_v62, 4 }
 0x1a8   : > { %20379 = vst [vmem:[#allocation38_spill] sm:$0xff] %v17664_v61  ;;  %v2522_v55 = vadd.f32 %v2435_v11, %v17458_v0  ;;  %v5865_v31 = vsel %vm16775_vm14, %v5863_v52, %v5864_v37  ;;  %v17735_v61 = vld [vmem:[#allocation2 + $0xd0] sm:$0xf]  ;;  %v13999_v0 = vrot.slane %v17706_v4, 9  ;;  %v20384_v53 = vrot.slane %v17693_v32, 5 }
 0x1a9   : > { %v15202_v39 = vpop.f32.mrf.mxu1  ;;  %v15159_v24 = vpop.f32.mrf.mxu0  ;;  %v5885_v52 = vrot.slane %v17714_v10, 5  ;;  %v14028_v15 = vcombine.low %v5862_v28, %v5865_v31  ;;  %v20385_v10 = vld [vmem:[#allocation34_spill] sm:$0xff]  ;;  %v5869_v28 = vsel %vm16775_vm14, %v13997_v5, %v5868_v57 }
 0x1aa   : > { %v17690_v1 = vadd.f32 %v15202_v39, %v2520_v18  ;;  %v17704_v18 = vld [vmem:[#allocation2 + $0xb0] sm:$0x1]  ;;  %v5884_v37 = vrot.slane %v20384_v53, 4 }
 0x1ab   : > { %v2869_v42 = vpop.f32.mrf.mxu1  ;;  %v17682_v14 = vpop.f32.mrf.mxu0  ;;  %15433 = vmatmul.mubr.bf16.gmra.mxu0 %v14025_v2  ;;  %v2525_v2 = vadd.f32 %v15159_v24, %v17466_v59  ;;  %v5878_v44 = vrot.slane %v17704_v18, 5  ;;  %v5889_v59 = vrot.slane %v17708_v40, 5 }
 0x1ac   : > { %20381 = vst [vmem:[#allocation27_spill] sm:$0xff] %v17682_v14  ;;  %v17697_v20 = vadd.f32 %v2869_v42, %v2518_v45  ;;  %v17719_v42 = vld [vmem:[#allocation2 + $0xc0] sm:$0xe]  ;;  %15436 = vmatprep.mubr.bf16.mxu0 %v14026_v36  ;;  %v5870_v45 = vrot.slane %v5868_v57, 4 }
 0x1ad   : > { %v15203_v12 = vpop.f32.mrf.mxu1  ;;  %v15162_v54 = vpop.f32.mrf.mxu0  ;;  %v14000_v4 = vrot.slane %v17719_v42, 9 }
 0x1ae   : > { %v17702_v16 = vadd.f32 %v15203_v12, %v2521_v56  ;;  %v17721_v56 = vld [vmem:[#allocation2 + $0xc8] sm:$0x1] }
 0x1af   : > { %v17712_v41 = vpop.f32.mrf.mxu1  ;;  %v2451_v39 = vpop.f32.mrf.mxu0  ;;  %v5892_v47 = vrot.slane %v17721_v56, 5 }
 0x1b0   : > { %20382 = vst [vmem:[#allocation39_spill] sm:$0xff] %v17712_v41  ;;  %v13998_v41 = vrot.slane %v17699_v21, 9  ;;  %v2526_v53 = vadd.f32 %v2451_v39, %v17495_v46  ;;  %v5872_v46 = vsel %vm16775_vm14, %v5870_v45, %v5871_v8 }
 0x1b1   : > { %v15206_v12 = vpop.f32.mrf.mxu1  ;;  %v15163_v17 = vpop.f32.mrf.mxu0  ;;  %v14029_v45 = vcombine.low %v5869_v28, %v5872_v46 }
 0x1b2   : > { %v17733_v36 = vadd.f32 %v15206_v12, %v2524_v26  ;;  %v2528_v26 = vadd.f32 %v15162_v54, %v17479_v34  ;;  %v17748_v12 = vld [vmem:[#allocation2 + $0xd4] sm:$0x1]  ;;  %v5896_v34 = vrot.slane %v17735_v61, 5  ;;  %v16047_v61 = vld [vmem:[%s20316_s1 + $0x278] sm:$0xff]  }
 0x1b3   : > { %v2885_v11 = vpop.f32.mrf.mxu1  ;;  %v17740_v24 = vpop.f32.mrf.mxu0  ;;  %15437 = vmatmul.mubr.bf16.gmra.mxu0 %v14027_v19  ;;  %v5899_v39 = vrot.slane %v17748_v12, 5  ;;  %15452 = vmatprep.subr.bf16.mxu1 %v16047_v61 }
 0x1b4   : > { %20383 = vst [vmem:[#allocation40_spill] sm:$0xff] %v17740_v24  ;;  %v17745_v21 = vadd.f32 %v2885_v11, %v2522_v55  ;;  %v14001_v24 = vrot.slane %v17728_v22, 9  ;;  %v2529_v55 = vadd.f32 %v15163_v17, %v20385_v10  ;;  %v5891_v11 = vrot.slane %v5889_v59, 4  ;;  %15440 = vmatprep.mubr.bf16.mxu0 %v14028_v15  ;;  %15453 = vmatpush3.bf16.msra.mxu1 %v16047_v61 }
 0x1b5   : > { %v15207_v18 = vpop.f32.mrf.mxu1  ;;  %v15230_v40 = vpop.f32.mrf.mxu0 }
 0x1b6   : > { %v17752_v14 = vadd.f32 %v15207_v18, %v2525_v2  ;;  %v17761_v42 = vadd.f32 %v15230_v40, %v17549_v43  ;;  %v5876_v43 = vsel %vm16775_vm14, %v13998_v41, %v5875_v62  ;;  %v5886_v40 = vsel %vm16775_vm14, %v5884_v37, %v5885_v52 }
 0x1b7   : > { %v17757_v29 = vpop.f32.mrf.mxu1  ;;  %v3607_v54 = vpop.f32.mrf.mxu0 }
 0x1b8   : > { %v17764_v56 = vadd.f32 %v3607_v54, %v17558_v48  ;;  %v5879_v48 = vsel %vm16775_vm14, %v5877_v49, %v5878_v44 }
 0x1b9   : > { %v15210_v2 = vpop.f32.mrf.mxu1  ;;  %v15231_v22 = vpop.f32.mrf.mxu0  ;;  %v14030_v17 = vcombine.low %v5876_v43, %v5879_v48 }
 0x1ba   : > { %v17778_v15 = vadd.f32 %v15210_v2, %v2528_v26  ;;  %v17781_v57 = vadd.f32 %v15231_v22, %v17563_v6  ;;  %v20386_v26 = vrot.slane %v17693_v32, 5  ;;  %v5893_v32 = vsel %vm16775_vm14, %v5891_v11, %v5892_v47  ;;  %v16049_v11 = vld [vmem:[%s20316_s1 + $0x268] sm:$0xff]  }
 0x1bb   : > { %v2901_v19 = vpop.f32.mrf.mxu1  ;;  %v17783_v5 = vpop.f32.mrf.mxu0  ;;  %15441 = vmatmul.mubr.bf16.gmra.mxu0 %v14029_v45  ;;  %v5897_v47 = vsel %vm16775_vm14, %v14001_v24, %v5896_v34 }
 0x1bc   : > { %v17785_v8 = vadd.f32 %v2901_v19, %v2526_v53  ;;  %15444 = vmatprep.mubr.bf16.mxu0 %v14030_v17  ;;  %v5883_v18 = vsel %vm16775_vm14, %v13999_v0, %v20386_v26  ;;  %v5898_v53 = vrot.slane %v5896_v34, 4 }
 0x1bd   : > { %v15211_v31 = vpop.f32.mrf.mxu1  ;;  %v15234_v12 = vpop.f32.mrf.mxu0  ;;  %v14031_v37 = vcombine.low %v5883_v18, %v5886_v40 }
 0x1be   : > { %v17787_v62 = vadd.f32 %v15211_v31, %v2529_v55  ;;  %v17790_v41 = vadd.f32 %v15234_v12, %v17588_v63  ;;  %v16048_v55 = vld [vmem:[%s20316_s1 + $0x270] sm:$0xff]   ;;  %v16050_v12 = vld [vmem:[%s20316_s1 + $0x260] sm:$0xff]  }
 0x1bf   : > { %v17792_v49 = vpop.f32.mrf.mxu1  ;;  %v3623_v6 = vpop.f32.mrf.mxu0  ;;  %15454 = vmatprep.subr.bf16.mxu1 %v16048_v55 }
 0x1c0   : > { %v17795_v44 = vadd.f32 %v3623_v6, %v17592_v51  ;;  %v5890_v51 = vsel %vm16775_vm14, %v14000_v4, %v5889_v59  ;;  %15455 = vmatpush3.bf16.msra.mxu1 %v16048_v55 }
 0x1c1   : > { %v17803_v10 = vpop.f32.mrf.mxu1  ;;  %v15235_v63 = vpop.f32.mrf.mxu0  ;;  %v14032_v28 = vcombine.low %v5890_v51, %v5893_v32  ;;  %15456 = vmatprep.subr.bf16.mxu1 %v16049_v11 }
 0x1c2   : > { %v3773_v54 = vadd.f32 %v15235_v63, %v17599_v25  ;;  %v5900_v25 = vsel %vm16775_vm14, %v5898_v53, %v5899_v39 }
 0x1c3   : > { %v17813_v0 = vpop.f32.mrf.mxu1  ;;  %v17815_v52 = vpop.f32.mrf.mxu0  ;;  %15445 = vmatmul.mubr.bf16.gmra.mxu0 %v14031_v37  ;;  %v14033_v19 = vcombine.low %v5897_v47, %v5900_v25 }
 0x1c4   : > { %15448 = vmatprep.mubr.bf16.mxu0 %v14032_v28  ;;  %15457 = vmatpush3.bf16.msra.mxu1 %v16049_v11 }
 0x1c5   : > { %v17817_v46 = vpop.f32.mrf.mxu1  ;;  %v15238_v22 = vpop.f32.mrf.mxu0  ;;  %15458 = vmatprep.subr.bf16.mxu1 %v16050_v12 }
 0x1c6   : > { %v3776_v4 = vadd.f32 %v15238_v22, %v17615_v27 }
 0x1c7   : > { %v17819_v2 = vpop.f32.mrf.mxu1  ;;  %v3639_v61 = vpop.f32.mrf.mxu0 }
 0x1c8   : > { %v3774_v48 = vadd.f32 %v3639_v61, %v17623_v50  ;;  %15459 = vmatpush3.bf16.msra.mxu1 %v16050_v12 }
 0x1c9   : > { %v17825_v59 = vpop.f32.mrf.mxu1  ;;  %v15239_v45 = vpop.f32.mrf.mxu0 }
 0x1ca   : > { %v3777_v34 = vadd.f32 %v15239_v45, %v17625_v7 }
 0x1cb   : > { %v17831_v43 = vpop.f32.mrf.mxu1  ;;  %v17839_v27 = vpop.f32.mrf.mxu0  ;;  %15449 = vmatmul.mubr.bf16.gmra.mxu0 %v14033_v19 }
 0x1cd   : > { %v15283_v24 = vpop.f32.mrf.mxu1 }
 0x1ce   : > { %v17835_v39 = vadd.f32 %v15283_v24, %v3773_v54 }
 0x1cf   : > { %v17837_v17 = vpop.f32.mrf.mxu1 }
 0x1d1   : > { %v15286_v31 = vpop.f32.mrf.mxu1  ;;  %v15242_v26 = vpop.f32.mrf.mxu0 }
 0x1d2   : > { %v17844_v50 = vadd.f32 %v15286_v31, %v3776_v4  ;;  %v3780_v7 = vadd.f32 %v15242_v26, %v17638_v58 }
 0x1d3   : > { %v4233_v6 = vpop.f32.mrf.mxu1  ;;  %v3655_v53 = vpop.f32.mrf.mxu0 }
 0x1d4   : > { %v17846_v18 = vadd.f32 %v4233_v6, %v3774_v48  ;;  %v3778_v55 = vadd.f32 %v3655_v53, %v17646_v23  ;;  %v16053_v6 = vld [vmem:[%s20316_s1 + $0x2b8] sm:$0xff]  }
 0x1d5   : > { %v15287_v40 = vpop.f32.mrf.mxu1  ;;  %v15243_v32 = vpop.f32.mrf.mxu0  ;;  %15500 = vmatprep.subr.bf16.mxu0 %v16053_v6 }
 0x1d6   : > { %v17849_v63 = vadd.f32 %v15287_v40, %v3777_v34  ;;  %v3781_v54 = vadd.f32 %v15243_v32, %v17648_v33  ;;  %15501 = vmatpush3.bf16.msra.mxu0 %v16053_v6  ;;  %v16051_v40 = vld [vmem:[%s20316_s1 + $0x258] sm:$0xff]  }
 0x1d7   : > { %v17852_v51 = vpop.f32.mrf.mxu1  ;;  %v17857_v47 = vpop.f32.mrf.mxu0  ;;  %15460 = vmatprep.subr.bf16.mxu1 %v16051_v40 }
 0x1d8   : > { %15461 = vmatpush3.bf16.msra.mxu1 %v16051_v40 }
 0x1d9   : > { %v15290_v37 = vpop.f32.mrf.mxu1 }
 0x1da   : > { %v17855_v28 = vadd.f32 %v15290_v37, %v3780_v7 }
 0x1db   : > { %v4249_v22 = vpop.f32.mrf.mxu1 }
 0x1dc   : > { %v17859_v25 = vadd.f32 %v4249_v22, %v3778_v55  ;;  %v15246_v11 = vpop.f32.mrf.mxu0 }
 0x1dd   : > { %v15291_v58 = vpop.f32.mrf.mxu1  ;;  %v3784_v23 = vadd.f32 %v15246_v11, %v17656_v60 }
 0x1de   : > { %v17861_v4 = vadd.f32 %v15291_v58, %v3781_v54  ;;  %v3671_v48 = vpop.f32.mrf.mxu0  ;;  %v16056_v54 = vld [vmem:[%s20316_s1 + $0x2a8] sm:$0xff]  }
 0x1df   : > { %v17863_v61 = vpop.f32.mrf.mxu1  ;;  %v3782_v33 = vadd.f32 %v3671_v48, %v17668_v35 }
 0x1e0   : > { %v15247_v24 = vpop.f32.mrf.mxu0 }
 0x1e1   : > { %v15294_v19 = vpop.f32.mrf.mxu1  ;;  %v3785_v31 = vadd.f32 %v15247_v24, %v17670_v9  ;;  %v16054_v9 = vld [vmem:[%s20316_s1 + $0x2b0] sm:$0xff]  }
 0x1e2   : > { %v17867_v45 = vadd.f32 %v15294_v19, %v3784_v23  ;;  %v17877_v60 = vpop.f32.mrf.mxu0  ;;  %15502 = vmatprep.subr.bf16.mxu0 %v16054_v9  ;;  %v16052_v23 = vld [vmem:[%s20316_s1 + $0x250] sm:$0xff]  }
 0x1e3   : > { %v4265_v34 = vpop.f32.mrf.mxu1  ;;  %15503 = vmatpush3.bf16.msra.mxu0 %v16054_v9  ;;  %15462 = vmatprep.subr.bf16.mxu1 %v16052_v23  ;;  %v16059_v9 = vld [vmem:[%s20316_s1 + $0x298] sm:$0xff]  }
 0x1e4   : > { %v17870_v12 = vadd.f32 %v4265_v34, %v3782_v33  ;;  %15504 = vmatprep.subr.bf16.mxu0 %v16056_v54  ;;  %15463 = vmatpush3.bf16.msra.mxu1 %v16052_v23  ;;  %v16055_v34 = vld [vmem:[%s20316_s1 + $0x248] sm:$0xff]  }
 0x1e5   : > { %v15295_v26 = vpop.f32.mrf.mxu1  ;;  %15464 = vmatprep.subr.bf16.mxu1 %v16055_v34 }
 0x1e6   : > { %v17875_v7 = vadd.f32 %v15295_v26, %v3785_v31  ;;  %v15250_v53 = vpop.f32.mrf.mxu0 }
 0x1e7   : > { %v17879_v35 = vpop.f32.mrf.mxu1  ;;  %v3788_v55 = vadd.f32 %v15250_v53, %v17690_v1  ;;  %15505 = vmatpush3.bf16.msra.mxu0 %v16056_v54 }
 0x1e8   : > { %v3687_v37 = vpop.f32.mrf.mxu0  ;;  %15465 = vmatpush3.bf16.msra.mxu1 %v16055_v34 }
 0x1e9   : > { %v15298_v32 = vpop.f32.mrf.mxu1  ;;  %v3786_v22 = vadd.f32 %v3687_v37, %v17697_v20  ;;  %v16057_v20 = vld [vmem:[%s20316_s1 + $0x2a0] sm:$0xff]  }
 0x1ea   : > { %v17892_v58 = vadd.f32 %v15298_v32, %v3788_v55  ;;  %v15251_v48 = vpop.f32.mrf.mxu0  ;;  %15506 = vmatprep.subr.bf16.mxu0 %v16057_v20  ;;  %v16058_v37 = vld [vmem:[%s20316_s1 + $0x240] sm:$0xff]  }
 0x1eb   : > { %v4281_v11 = vpop.f32.mrf.mxu1  ;;  %v3789_v1 = vadd.f32 %v15251_v48, %v17702_v16  ;;  %15507 = vmatpush3.bf16.msra.mxu0 %v16057_v20  ;;  %15466 = vmatprep.subr.bf16.mxu1 %v16058_v37  ;;  %v7305_v20 = vld [vmem:[#allocation2 + $0x4] sm:$0xf] }
 0x1ec   : > { %v17898_v19 = vadd.f32 %v4281_v11, %v3786_v22  ;;  %v17908_v31 = vpop.f32.mrf.mxu0  ;;  %15508 = vmatprep.subr.bf16.mxu0 %v16059_v9  ;;  %15467 = vmatpush3.bf16.msra.mxu1 %v16058_v37 }
 0x1ed   : > { %v15299_v33 = vpop.f32.mrf.mxu1 }
 0x1ee   : > { %v17903_v24 = vadd.f32 %v15299_v33, %v3789_v1  ;;  %v16061_v1 = vld [vmem:[#allocation2] sm:$0xff]   ;;  %v16065_v33 = vld [vmem:[%s20316_s1 + $0x288] sm:$0xff]  }
 0x1ef   : > { %v17910_v6 = vpop.f32.mrf.mxu1  ;;  %15509 = vmatpush3.bf16.msra.mxu0 %v16059_v9  ;;  %15468 = vmatprep.mubr.bf16.mxu1 %v16061_v1  ;;  %v16066_v9 = vld [vmem:[%s20316_s1 + $0x280] sm:$0xff]  }
 0x1f0   : > { %20387 = vst [vmem:[#allocation34_spill] sm:$0xff] %v17910_v6 }
 0x1f2   : > { %v15254_v16 = vpop.f32.mrf.mxu0 }
 0x1f3   : > { %v3792_v26 = vadd.f32 %v15254_v16, %v17733_v36  ;;  %v15302_v40 = vpop.f32.mrf.mxu1 }
 0x1f4   : > { %v3703_v53 = vpop.f32.mrf.mxu0 }
 0x1f5   : > { %v3790_v55 = vadd.f32 %v3703_v53, %v17745_v21  ;;  %v17917_v32 = vadd.f32 %v15302_v40, %v3792_v26  ;;  %v4297_v54 = vpop.f32.mrf.mxu1  ;;  %v16060_v21 = vld [vmem:[%s20316_s1 + $0x290] sm:$0xff]   ;;  %v7362_v26 = vshll.u32 %v7305_v20, 16  ;;  %v7366_v40 = vshrl.u32 %v7305_v20, 16 }
 0x1f6   : > { %v15255_v22 = vpop.f32.mrf.mxu0  ;;  %15510 = vmatprep.subr.bf16.mxu0 %v16060_v21 }
 0x1f7   : > { %v3793_v36 = vadd.f32 %v15255_v22, %v17752_v14  ;;  %v17923_v11 = vadd.f32 %v4297_v54, %v3790_v55  ;;  %v15303_v23 = vpop.f32.mrf.mxu1  ;;  %15511 = vmatpush3.bf16.msra.mxu0 %v16060_v21  ;;  %v7304_v14 = vld [vmem:[#allocation2] sm:$0xf]  ;;  %v7364_v54 = vrot.slane %v7362_v26, 5  ;;  %v7368_v37 = vrot.slane %v7366_v40, 4  ;;  %v7306_v22 = vld [vmem:[#allocation2 + $0x8] sm:$0x1] }
 0x1f8   : > { %15512 = vmatprep.subr.bf16.mxu0 %v16065_v33  ;;  %v7353_v34 = vshrl.u32 %v7304_v14, 16  ;;  %v7356_v16 = vshll.u32 %v7304_v14, 16  ;;  %v7372_v21 = vshll.u32 %v7306_v22, 16  ;;  %v17938_v20 = vpop.f32.mrf.mxu0 }
 0x1f9   : > { %v17928_v48 = vadd.f32 %v15303_v23, %v3793_v36  ;;  %v7369_v23 = vor.u32 %v7368_v37, %v7364_v54  ;;  %v17936_v1 = vpop.f32.mrf.mxu1 }
 0x1fa   : > { %v7355_v53 = vrot.slane %v7353_v34, 4  ;;  %v7358_v55 = vrot.slane %v7356_v16, 5  ;;  %20388 = vst [vmem:[#allocation41_spill] sm:$0xff] %v17936_v1  ;;  %v7374_v13 = vrot.slane %v7372_v21, 5 }
 0x1fb   : > { %15513 = vmatpush3.bf16.msra.mxu0 %v16065_v33  ;;  %v7370_v14 = vrot.slane %v7369_v23, 4 }
 0x1fc   : > { %15514 = vmatprep.subr.bf16.mxu0 %v16066_v9  ;;  %v7359_v36 = vor.u32 %v7358_v55, %v7355_v53  ;;  %v17948_v55 = vld [vmem:[%s20316_s1 + $0x2f8] sm:$0xff]  }
 0x1fd   : > { %v7375_v34 = vsel %vm16415_vm11, %v7370_v14, %v7374_v13  ;;  %20389 = vst [vmem:[#allocation42_spill] sm:$0xff] %v17948_v55  ;;  %15548 = vmatprep.subr.bf16.mxu1 %v17948_v55 }
 0x1fe   : > { %v7360_v33 = vrot.slane %v7359_v36, 4 }
 0x1ff   : > { %15515 = vmatpush3.bf16.msra.mxu0 %v16066_v9 }
 0x200   : > { %v7365_v6 = vsel %vm16415_vm11, %v7360_v33, %v7364_v54 }
 0x201   : > { %v14131_v16 = vcombine.low %v7365_v6, %v7375_v34 }
 0x203   : > { %15516 = vmatprep.mubr.bf16.mxu0 %v14131_v16 }
 0x20a   : > { %v15306_v26 = vpop.f32.mrf.mxu1 }
 0x20b   : > { %v15258_v40 = vpop.f32.mrf.mxu0 }
 0x20c   : > { %v4313_v9 = vpop.f32.mrf.mxu1  ;;  %v3796_v53 = vadd.f32 %v15258_v40, %v17778_v15 }
 0x20d   : > { %v3719_v37 = vpop.f32.mrf.mxu0 }
 0x20e   : > { %v15307_v22 = vpop.f32.mrf.mxu1  ;;  %v3794_v36 = vadd.f32 %v3719_v37, %v17785_v8  ;;  %v17951_v54 = vadd.f32 %v15306_v26, %v3796_v53 }
 0x20f   : > { %v15259_v13 = vpop.f32.mrf.mxu0 }
 0x210   : > { %v17954_v6 = vpop.f32.mrf.mxu1  ;;  %v3797_v23 = vadd.f32 %v15259_v13, %v17787_v62  ;;  %v17957_v21 = vadd.f32 %v4313_v9, %v3794_v36 }
 0x211   : > { %20390 = vst [vmem:[#allocation43_spill] sm:$0xff] %v17954_v6  ;;  %v17959_v15 = vpop.f32.mrf.mxu0 }
 0x212   : > { %v17961_v33 = vpop.f32.mrf.mxu1  ;;  %v17963_v14 = vadd.f32 %v15307_v22, %v3797_v23 }
 0x213   : > { %20391 = vst [vmem:[#allocation44_spill] sm:$0xff] %v17961_v33  ;;  %v17965_v34 = vpop.f32.mrf.mxu0 }
 0x214   : > { %20392 = vst [vmem:[#allocation45_spill] sm:$0xff] %v17963_v14  ;;  %v17967_v8 = vpop.f32.mrf.mxu1 }
 0x215   : > { %20393 = vst [vmem:[#allocation46_spill] sm:$0xff] %v17967_v8  ;;  %v17969_v16 = vpop.f32.mrf.mxu0 }
 0x216   : > { %v17971_v26 = vpop.f32.mrf.mxu1 }
 0x217   : > { %20394 = vst [vmem:[#allocation47_spill] sm:$0xff] %v17971_v26  ;;  %v17973_v40 = vpop.f32.mrf.mxu0 }
 0x218   : > { %v17975_v53 = vpop.f32.mrf.mxu1 }
 0x219   : > { %20395 = vst [vmem:[#allocation48_spill] sm:$0xff] %v17975_v53  ;;  %v17977_v62 = vpop.f32.mrf.mxu0 }
 0x21a   : > { %v17979_v9 = vpop.f32.mrf.mxu1 }
 0x21b   : > { %20396 = vst [vmem:[#allocation49_spill] sm:$0xff] %v17979_v9  ;;  %v17981_v37 = vpop.f32.mrf.mxu0 }
 0x21c   : > { %v17983_v22 = vpop.f32.mrf.mxu1 }
 0x21d   : > { %20397 = vst [vmem:[#allocation50_spill] sm:$0xff] %v17983_v22  ;;  %v17985_v36 = vpop.f32.mrf.mxu0 }
 0x21e   : > { %v17987_v13 = vpop.f32.mrf.mxu1 }
 0x21f   : > { %20398 = vst [vmem:[#allocation51_spill] sm:$0xff] %v17987_v13  ;;  %v15331_v23 = vpop.f32.mrf.mxu0 }
 0x220   : > { %v17989_v3 = vpop.f32.mrf.mxu1  ;;  %v17992_v55 = vadd.f32 %v15331_v23, %v17835_v39 }
 0x221   : > { %20399 = vst [vmem:[#allocation52_spill] sm:$0xff] %v17989_v3  ;;  %v17994_v26 = vpop.f32.mrf.mxu0 }
 0x222   : > { %20400 = vst [vmem:[#allocation53_spill] sm:$0xff] %v17992_v55  ;;  %v17996_v53 = vpop.f32.mrf.mxu1 }
 0x223   : > { %20401 = vst [vmem:[#allocation54_spill] sm:$0xff] %v17996_v53  ;;  %v15334_v8 = vpop.f32.mrf.mxu0 }
 0x224   : > { %v17998_v9 = vpop.f32.mrf.mxu1  ;;  %v18001_v33 = vadd.f32 %v15334_v8, %v17844_v50 }
 0x225   : > { %20402 = vst [vmem:[#allocation55_spill] sm:$0xff] %v17998_v9  ;;  %v4684_v22 = vpop.f32.mrf.mxu0 }
 0x226   : > { %20403 = vst [vmem:[#allocation56_spill] sm:$0xff] %v18001_v33  ;;  %v18003_v14 = vpop.f32.mrf.mxu1  ;;  %v18006_v13 = vadd.f32 %v4684_v22, %v17846_v18  ;;  %v20450_v33 = vld [vmem:[#allocation31_spill] sm:$0xff] }
 0x227   : > { %20404 = vst [vmem:[#allocation57_spill] sm:$0xff] %v18003_v14  ;;  %v15335_v3 = vpop.f32.mrf.mxu0 }
 0x228   : > { %20405 = vst [vmem:[#allocation58_spill] sm:$0xff] %v18006_v13  ;;  %v18008_v6 = vpop.f32.mrf.mxu1  ;;  %v18011_v39 = vadd.f32 %v15335_v3, %v17849_v63  ;;  %v20444_v13 = vld [vmem:[#allocation24_spill] sm:$0xff] }
 0x229   : > { %20406 = vst [vmem:[#allocation59_spill] sm:$0xff] %v18008_v6  ;;  %v18013_v23 = vpop.f32.mrf.mxu0 }
 0x22a   : > { %20407 = vst [vmem:[#allocation60_spill] sm:$0xff] %v18011_v39  ;;  %20408 = vst [vmem:[#allocation61_spill] sm:$0xff] %v18013_v23  ;;  %v18015_v53 = vpop.f32.mrf.mxu1 }
 0x22b   : > { %20409 = vst [vmem:[#allocation62_spill] sm:$0xff] %v18015_v53  ;;  %v15338_v9 = vpop.f32.mrf.mxu0 }
 0x22c   : > { %v18017_v55 = vpop.f32.mrf.mxu1  ;;  %v18020_v50 = vadd.f32 %v15338_v9, %v17855_v28 }
 0x22d   : > { %20410 = vst [vmem:[#allocation63_spill] sm:$0xff] %v18017_v55  ;;  %v4700_v8 = vpop.f32.mrf.mxu0 }
 0x22e   : > { %20411 = vst [vmem:[#allocation64_spill] sm:$0xff] %v18020_v50  ;;  %v18022_v14 = vpop.f32.mrf.mxu1  ;;  %v18025_v18 = vadd.f32 %v4700_v8, %v17859_v25 }
 0x22f   : > { %20412 = vst [vmem:[#allocation65_spill] sm:$0xff] %v18022_v14  ;;  %v15339_v22 = vpop.f32.mrf.mxu0 }
 0x230   : > { %20413 = vst [vmem:[#allocation66_spill] sm:$0xff] %v18025_v18  ;;  %v18027_v6 = vpop.f32.mrf.mxu1  ;;  %v18030_v3 = vadd.f32 %v15339_v22, %v17861_v4 }
 0x231   : > { %20414 = vst [vmem:[#allocation67_spill] sm:$0xff] %v18027_v6  ;;  %v18032_v63 = vpop.f32.mrf.mxu0 }
 0x232   : > { %20415 = vst [vmem:[#allocation68_spill] sm:$0xff] %v18030_v3  ;;  %20416 = vst [vmem:[#allocation69_spill] sm:$0xff] %v18032_v63  ;;  %v18034_v53 = vpop.f32.mrf.mxu1 }
 0x233   : > { %20417 = vst [vmem:[#allocation70_spill] sm:$0xff] %v18034_v53  ;;  %v15342_v55 = vpop.f32.mrf.mxu0 }
 0x234   : > { %v18037_v28 = vadd.f32 %v15342_v55, %v17867_v45  ;;  %v18039_v9 = vpop.f32.mrf.mxu1 }
 0x235   : > { %20419 = vst [vmem:[#allocation72_spill] sm:$0xff] %v18039_v9  ;;  %v4716_v14 = vpop.f32.mrf.mxu0 }
 0x236   : > { %20418 = vst [vmem:[#allocation71_spill] sm:$0xff] %v18037_v28  ;;  %v18042_v25 = vadd.f32 %v4716_v14, %v17870_v12  ;;  %v18044_v8 = vpop.f32.mrf.mxu1  ;;  %v20428_v14 = vld [vmem:[#allocation12_spill] sm:$0xff] }
 0x237   : > { %20421 = vst [vmem:[#allocation74_spill] sm:$0xff] %v18044_v8  ;;  %v15343_v6 = vpop.f32.mrf.mxu0 }
 0x238   : > { %20420 = vst [vmem:[#allocation73_spill] sm:$0xff] %v18042_v25  ;;  %v18047_v4 = vadd.f32 %v15343_v6, %v17875_v7  ;;  %v18049_v22 = vpop.f32.mrf.mxu1  ;;  %v20429_v25 = vld [vmem:[#allocation13_spill] sm:$0xff] }
 0x239   : > { %20423 = vst [vmem:[#allocation76_spill] sm:$0xff] %v18049_v22  ;;  %v18051_v3 = vpop.f32.mrf.mxu0  ;;  %v1902_v8 = vadd.f32 %v20429_v25, %v20428_v14  ;;  %v20432_v22 = vld [vmem:[#allocation14_spill] sm:$0xff]  ;;  %v20439_v25 = vld [vmem:[#allocation19_spill] sm:$0xff]  ;;  %v20440_v14 = vld [vmem:[#allocation20_spill] sm:$0xff] }
 0x23a   : > { %20422 = vst [vmem:[#allocation75_spill] sm:$0xff] %v18047_v4  ;;  %20424 = vst [vmem:[#allocation77_spill] sm:$0xff] %v18051_v3  ;;  %v20433_v4 = vld [vmem:[#allocation16_spill] sm:$0xff] }
 0x23b   : > { %v18053_v53 = vpop.f32.mrf.mxu1  ;;  %v15346_v45 = vpop.f32.mrf.mxu0  ;;  %v1906_v18 = vadd.f32 %v20433_v4, %v20432_v22  ;;  %v20445_v4 = vld [vmem:[#allocation25_spill] sm:$0xff] }
 0x23c   : > { %20425 = vst [vmem:[#allocation78_spill] sm:$0xff] %v18053_v53  ;;  %v18056_v55 = vadd.f32 %v15346_v45, %v17892_v58  ;;  %v20434_v53 = vld [vmem:[#allocation30_spill] sm:$0xff]  ;;  %v1922_v22 = vadd.f32 %v20445_v4, %v20444_v13  ;;  %v20454_v4 = vld [vmem:[#allocation27_spill] sm:$0xff] }
 0x23d   : > { %v18058_v9 = vpop.f32.mrf.mxu1  ;;  %v4732_v12 = vpop.f32.mrf.mxu0  ;;  %v2499_v50 = vadd.f32 %v20434_v53, %v1902_v8  ;;  %v20446_v53 = vld [vmem:[#allocation32_spill] sm:$0xff] }
 0x23e   : > { %20426 = vst [vmem:[#allocation79_spill] sm:$0xff] %v18056_v55  ;;  %20427 = vst [vmem:[#allocation80_spill] sm:$0xff] %v18058_v9  ;;  %v18063_v28 = vadd.f32 %v4732_v12, %v17898_v19  ;;  %v20437_v9 = vld [vmem:[#allocation17_spill] sm:$0xff]  ;;  %v20438_v55 = vld [vmem:[#allocation18_spill] sm:$0xff]  ;;  %v1914_v19 = vadd.f32 %v20440_v14, %v20439_v25  ;;  %v2503_v8 = vadd.f32 %v20446_v53, %v1906_v18 }
 0x23f   : > { %v18065_v7 = vpop.f32.mrf.mxu1  ;;  %v15347_v6 = vpop.f32.mrf.mxu0  ;;  %v1910_v39 = vadd.f32 %v20438_v55, %v20437_v9  ;;  %v20451_v9 = vld [vmem:[#allocation35_spill] sm:$0xff] }
 0x240   : > { %20430 = vst [vmem:[#allocation12_spill] sm:$0xff] %v18063_v28  ;;  %20431 = vst [vmem:[#allocation13_spill] sm:$0xff] %v18065_v7  ;;  %v18071_v58 = vadd.f32 %v15347_v6, %v17903_v24  ;;  %v20442_v7 = vld [vmem:[#allocation21_spill] sm:$0xff]  ;;  %v20443_v28 = vld [vmem:[#allocation23_spill] sm:$0xff]  ;;  %v2511_v25 = vadd.f32 %v17576_v38, %v1914_v19 }
 0x241   : > { %v18073_v45 = vpop.f32.mrf.mxu1  ;;  %v18079_v12 = vpop.f32.mrf.mxu0  ;;  %v1918_v3 = vadd.f32 %v20443_v28, %v20442_v7  ;;  %v20447_v24 = vld [vmem:[#allocation26_spill] sm:$0xff]  ;;  %v20448_v6 = vld [vmem:[#allocation29_spill] sm:$0xff]  ;;  %v2507_v55 = vadd.f32 %v20451_v9, %v1910_v39  ;;  %v20456_v39 = vld [vmem:[#allocation36_spill] sm:$0xff] }
 0x242   : > { %20435 = vst [vmem:[#allocation14_spill] sm:$0xff] %v18071_v58  ;;  %20436 = vst [vmem:[#allocation16_spill] sm:$0xff] %v18073_v45  ;;  %v1926_v58 = vadd.f32 %v20448_v6, %v20447_v24  ;;  %v20449_v45 = vld [vmem:[#allocation28_spill] sm:$0xff]  ;;  %v20453_v7 = vld [vmem:[#allocation37_spill] sm:$0xff]  ;;  %v2953_v6 = vadd.f32 %v20456_v39, %v2503_v8 }
 0x243   : > { %20441 = vst [vmem:[#allocation30_spill] sm:$0xff] %v18079_v12  ;;  %v1930_v63 = vadd.f32 %v20450_v33, %v20449_v45  ;;  %v15350_v14 = vpop.f32.mrf.mxu0  ;;  %v20452_v12 = vld [vmem:[#allocation33_spill] sm:$0xff]  ;;  %v2515_v28 = vadd.f32 %v17619_v30, %v1918_v3  ;;  %v2519_v1 = vadd.f32 %v20453_v7, %v1922_v22  ;;  %v20455_v24 = vld [vmem:[#allocation40_spill] sm:$0xff]  ;;  %v20457_v3 = vld [vmem:[#allocation15_spill] sm:$0xff] }
 0x244   : > { %v2949_v23 = vadd.f32 %v20452_v12, %v2499_v50  ;;  %v18096_v13 = vadd.f32 %v15350_v14, %v17917_v32  ;;  %v2523_v53 = vadd.f32 %v20454_v4, %v1926_v58  ;;  %v2957_v19 = vadd.f32 %v20457_v3, %v2507_v55  ;;  %v20458_v32 = vld [vmem:[#allocation22_spill] sm:$0xff]  ;;  %v20460_v58 = vld [vmem:[#allocation39_spill] sm:$0xff] }
 0x245   : > { %v18098_v18 = vpop.f32.mrf.mxu1  ;;  %v2527_v33 = vadd.f32 %v20455_v24, %v1930_v63  ;;  %v4748_v45 = vpop.f32.mrf.mxu0  ;;  %v2961_v12 = vadd.f32 %v20458_v32, %v2511_v25  ;;  %v20459_v9 = vld [vmem:[#allocation38_spill] sm:$0xff]  ;;  %v2969_v7 = vadd.f32 %v20460_v58, %v2519_v1  ;;  %v3771_v63 = vadd.f32 %v17815_v52, %v2953_v6  ;;  %v20463_v24 = vld [vmem:[#allocation43_spill] sm:$0xff]  ;;  %v20466_v6 = vld [vmem:[#allocation44_spill] sm:$0xff] }
 0x246   : > { %v3767_v38 = vadd.f32 %v17783_v5, %v2949_v23  ;;  %v18105_v50 = vadd.f32 %v4748_v45, %v17923_v11  ;;  %v2965_v14 = vadd.f32 %v20459_v9, %v2515_v28  ;;  %v2973_v5 = vadd.f32 %v17757_v29, %v2523_v53  ;;  %v20462_v53 = vld [vmem:[#allocation41_spill] sm:$0xff]  ;;  %v20472_v58 = vld [vmem:[#allocation50_spill] sm:$0xff] }
 0x247   : > { %v18107_v30 = vpop.f32.mrf.mxu1  ;;  %v15351_v22 = vpop.f32.mrf.mxu0  ;;  %v2977_v11 = vadd.f32 %v17792_v49, %v2527_v33  ;;  %v4362_v23 = vadd.f32 %v17803_v10, %v17761_v42  ;;  %v3775_v55 = vadd.f32 %v17839_v27, %v2957_v19  ;;  %v4360_v28 = vadd.f32 %v17813_v0, %v17764_v56  ;;  %v20464_v33 = vld [vmem:[#allocation61_spill] sm:$0xff] }
 0x248   : > { %v18115_v8 = vadd.f32 %v15351_v22, %v17928_v48  ;;  %v4363_v52 = vadd.f32 %v17817_v46, %v17781_v57  ;;  %v4361_v48 = vadd.f32 %v17819_v2, %v3767_v38  ;;  %v4366_v29 = vadd.f32 %v17825_v59, %v17790_v41  ;;  %v20465_v45 = vld [vmem:[#allocation45_spill] sm:$0xff]  ;;  %v20467_v38 = vld [vmem:[#allocation46_spill] sm:$0xff]  ;;  %v20470_v22 = vld [vmem:[#allocation48_spill] sm:$0xff] }
 0x249   : > { %v18122_v25 = vpop.f32.mrf.mxu0  ;;  %v18131_v1 = vpop.f32.mrf.mxu1  ;;  %v4364_v42 = vadd.f32 %v17831_v43, %v17795_v44  ;;  %v3779_v49 = vadd.f32 %v17857_v47, %v2961_v12  ;;  %v3783_v10 = vadd.f32 %v17877_v60, %v2965_v14  ;;  %v3787_v27 = vadd.f32 %v17908_v31, %v2969_v7  ;;  %v20471_v9 = vld [vmem:[#allocation49_spill] sm:$0xff] }
 0x24a   : > { %v4365_v0 = vadd.f32 %v17837_v17, %v3771_v63  ;;  %v3791_v57 = vadd.f32 %v17938_v20, %v2973_v5  ;;  %v3795_v46 = vadd.f32 %v17959_v15, %v2977_v11  ;;  %v4369_v2 = vadd.f32 %v17852_v51, %v3775_v55  ;;  %v20473_v63 = vld [vmem:[#allocation53_spill] sm:$0xff]  ;;  %v20474_v5 = vld [vmem:[#allocation51_spill] sm:$0xff]  ;;  %v20475_v55 = vld [vmem:[#allocation52_spill] sm:$0xff] }
 0x24b   : > { %v15354_v56 = vpop.f32.mrf.mxu0  ;;  %v4813_v44 = vadd.f32 %v17965_v34, %v4362_v23  ;;  %v4811_v59 = vadd.f32 %v17969_v16, %v4360_v28  ;;  %v4814_v43 = vadd.f32 %v17973_v40, %v4363_v52  ;;  %v4812_v60 = vadd.f32 %v17977_v62, %v4361_v48  ;;  %v18151_v20 = vpop.f32.mrf.mxu1  ;;  %v20461_v34 = vld [vmem:[#allocation34_spill] sm:$0xff]  ;;  %v20476_v52 = vld [vmem:[#allocation56_spill] sm:$0xff] }
 0x24c   : > { %v18142_v41 = vadd.f32 %v15354_v56, %v17951_v54  ;;  %v4817_v17 = vadd.f32 %v17981_v37, %v4366_v29  ;;  %v4815_v31 = vadd.f32 %v17985_v36, %v4364_v42  ;;  %v4373_v51 = vadd.f32 %v17863_v61, %v3779_v49  ;;  %v20468_v61 = vld [vmem:[#allocation47_spill] sm:$0xff]  ;;  %v20477_v48 = vld [vmem:[#allocation54_spill] sm:$0xff] }
 0x24d   : > { %v4764_v47 = vpop.f32.mrf.mxu0  ;;  %v4377_v15 = vadd.f32 %v17879_v35, %v3783_v10  ;;  %v4381_v16 = vadd.f32 %v20461_v34, %v3787_v27  ;;  %v4816_v40 = vadd.f32 %v17994_v26, %v4365_v0  ;;  %v4385_v62 = vadd.f32 %v20462_v53, %v3791_v57  ;;  %v20469_v35 = vld [vmem:[#allocation69_spill] sm:$0xff]  ;;  %v20478_v42 = vld [vmem:[#allocation58_spill] sm:$0xff]  ;;  %v20479_v49 = vld [vmem:[#allocation55_spill] sm:$0xff] }
 0x24e   : > { %v18154_v54 = vadd.f32 %v4764_v47, %v17957_v21  ;;  %v4389_v37 = vadd.f32 %v20463_v24, %v3795_v46  ;;  %v4820_v36 = vadd.f32 %v20464_v33, %v4369_v2  ;;  %v5631_v21 = vadd.f32 %v20466_v6, %v4813_v44  ;;  %v20480_v27 = vld [vmem:[#allocation77_spill] sm:$0xff]  ;;  %v18192_v57 = vld [vmem:[%s20317_s2] ss:$0 sm:$0xff]  ;;  %v20487_v34 = vld [vmem:[#allocation63_spill] sm:$0xff] }
 0x24f   : > { %v15355_v4 = vpop.f32.mrf.mxu0  ;;  %v5629_v3 = vadd.f32 %v20467_v38, %v4811_v59  ;;  %v5632_v19 = vadd.f32 %v20468_v61, %v4814_v43  ;;  %v4824_v32 = vadd.f32 %v20469_v35, %v4373_v51  ;;  %v5630_v26 = vadd.f32 %v20470_v22, %v4812_v60  ;;  %v15402_v23 = vpop.f32.mrf.mxu1  ;;  %v20481_v46 = vld [vmem:[#allocation60_spill] sm:$0xff]  ;;  %v20482_v2 = vld [vmem:[#allocation57_spill] sm:$0xff]  ;;  %v20483_v59 = vld [vmem:[#allocation59_spill] sm:$0xff] }
 0x250   : > { %v4842_v39 = vadd.f32 %v15355_v4, %v20465_v45  ;;  %v5635_v14 = vadd.f32 %v20471_v9, %v4817_v17  ;;  %v18171_v7 = vadd.f32 %v20472_v58, %v4815_v31  ;;  %v18175_v11 = vadd.f32 %v20474_v5, %v20473_v63  ;;  %v20484_v47 = vld [vmem:[#allocation64_spill] sm:$0xff]  ;;  %v20485_v60 = vld [vmem:[#allocation62_spill] sm:$0xff]  ;;  %v20489_v53 = vld [vmem:[#allocation65_spill] sm:$0xff] }
 0x251   : > { %v4767_v12 = vpop.f32.mrf.mxu0  ;;  %v18178_v28 = vadd.f32 %v20475_v55, %v4816_v40  ;;  %v18182_v29 = vadd.f32 %v20477_v48, %v20476_v52  ;;  %v18186_v10 = vadd.f32 %v20479_v49, %v20478_v42  ;;  %v4828_v56 = vadd.f32 %v20480_v27, %v4377_v15  ;;  %v5582_v31 = vpop.f32.mrf.mxu1  ;;  %v20486_v15 = vld [vmem:[#allocation66_spill] sm:$0xff]  ;;  %v20488_v4 = vld [vmem:[#allocation68_spill] sm:$0xff]  ;;  %v20490_v33 = vld [vmem:[#allocation67_spill] sm:$0xff] }
 0x252   : > { %v18196_v44 = vadd.f32 %v20482_v2, %v20481_v46  ;;  %v18199_v43 = vadd.f32 %v20483_v59, %v4820_v36  ;;  %v18203_v17 = vadd.f32 %v20485_v60, %v20484_v47  ;;  %v18207_v40 = vadd.f32 %v20487_v34, %v20486_v15  ;;  %v20491_v6 = vld [vmem:[#allocation30_spill] sm:$0xff]  ;;  %v20492_v61 = vld [vmem:[#allocation71_spill] sm:$0xff]  ;;  %v20494_v9 = vld [vmem:[#allocation73_spill] sm:$0xff] }
 0x253   : > { %v15422_v0 = vpop.f32.mrf.mxu0  ;;  %v18211_v24 = vadd.f32 %v20489_v53, %v20488_v4  ;;  %v18214_v45 = vadd.f32 %v20490_v33, %v4824_v32  ;;  %v4832_v36 = vadd.f32 %v20491_v6, %v4381_v16  ;;  %v20493_v35 = vld [vmem:[#allocation70_spill] sm:$0xff]  ;;  %v15403_v63 = vpop.f32.mrf.mxu1  ;;  %v20496_v52 = vld [vmem:[#allocation75_spill] sm:$0xff]  ;;  %v20498_v32 = vld [vmem:[#allocation76_spill] sm:$0xff]  ;;  %v4836_v46 = vadd.f32 %v18122_v25, %v4385_v62 }
 0x254   : > { %v6225_v51 = vadd.f32 %v15422_v0, %v5631_v21  ;;  %v18219_v22 = vadd.f32 %v20493_v35, %v20492_v61  ;;  %v20495_v21 = vld [vmem:[#allocation72_spill] sm:$0xff]  ;;  %v20497_v48 = vld [vmem:[#allocation74_spill] sm:$0xff]  ;;  %v18231_v49 = vadd.f32 %v20498_v32, %v4828_v56  ;;  %v20499_v16 = vld [vmem:[#allocation79_spill] sm:$0xff]  ;;  %v18252_v6 = vadd.f32 %v18098_v18, %v18096_v13 }
 0x255   : > { %v6064_v38 = vpop.f32.mrf.mxu0  ;;  %v18223_v58 = vadd.f32 %v20495_v21, %v20494_v9  ;;  %v18228_v42 = vadd.f32 %v20497_v48, %v20496_v52  ;;  %v20500_v27 = vld [vmem:[#allocation78_spill] sm:$0xff]  ;;  %v20501_v59 = vld [vmem:[#allocation12_spill] sm:$0xff]  ;;  %v20504_v4 = vld [vmem:[#allocation13_spill] sm:$0xff]  ;;  %v4840_v25 = vadd.f32 %v4767_v12, %v4389_v37  ;;  %v18267_v13 = vadd.f32 %v15402_v23, %v18142_v41 }
 0x256   : > { %v6328_v5 = vadd.f32 %v18192_v57, %v6225_v51  ;;  %v6223_v55 = vadd.f32 %v6064_v38, %v5629_v3  ;;  %v18235_v0 = vadd.f32 %v20500_v27, %v20499_v16  ;;  %v20502_v47 = vld [vmem:[#allocation80_spill] sm:$0xff]  ;;  %v20503_v34 = vld [vmem:[#allocation14_spill] sm:$0xff]  ;;  %v5585_v38 = vpop.f32.mrf.mxu1  ;;  %v18272_v37 = vld [vmem:[%s20316_s1 + $0x338] sm:$0xff]   ;;  %v18275_v12 = vadd.f32 %v5582_v31, %v18154_v54 }
 0x257   : > { %v15423_v2 = vpop.f32.mrf.mxu0  ;;  %v18240_v60 = vadd.f32 %v20502_v47, %v20501_v59  ;;  %v18245_v53 = vadd.f32 %v20504_v4, %v20503_v34  ;;  %v20505_v56 = vld [vmem:[#allocation16_spill] sm:$0xff]  ;;  %15596 = vmatprep.subr.bf16.mxu0 %v18272_v37  ;;  %v6813_v16 = vld [vmem:[#allocation2 + $0x18] sm:$0xf] }
 0x258   : > { %v6360_v51 = vmax.f32 %v6328_v5, 0.0  ;;  %v6326_v3 = vadd.f32 %v18192_v57, %v6223_v55  ;;  %v6226_v15 = vadd.f32 %v15423_v2, %v5632_v19  ;;  %v18248_v33 = vadd.f32 %v20505_v56, %v4832_v36 }
 0x259   : > { %v6067_v62 = vpop.f32.mrf.mxu0  ;;  %v18257_v19 = vadd.f32 %v18107_v30, %v18105_v50  ;;  %v18261_v36 = vadd.f32 %v18131_v1, %v18115_v8  ;;  %v18264_v5 = vadd.f32 %v18151_v20, %v4836_v46  ;;  %v18277_v8 = vadd.f32 %v15403_v63, %v4842_v39 }
 0x25a   : > { %v14557_v61 = vpack.c.bf16 %v6360_v51, %v6360_v51  ;;  %v6358_v35 = vmax.f32 %v6326_v3, 0.0  ;;  %v6329_v9 = vadd.f32 %v18192_v57, %v6226_v15  ;;  %v6224_v21 = vadd.f32 %v6067_v62, %v5630_v26 }
 0x25b   : > { %v15426_v18 = vpop.f32.mrf.mxu0  ;;  %v18279_v1 = vadd.f32 %v5585_v38, %v4840_v25 }
 0x25c   : > { %v6504_v50 = vshrl.u32 %v14557_v61, 16  ;;  %v14555_v30 = vpack.c.bf16 %v6358_v35, %v6358_v35  ;;  %v6361_v26 = vmax.f32 %v6329_v9, 0.0  ;;  %v6327_v20 = vadd.f32 %v18192_v57, %v6224_v21 }
 0x25d   : > { %v6229_v41 = vadd.f32 %v15426_v18, %v5635_v14  ;;  %v6080_v23 = vpop.f32.mrf.mxu0  ;;  %v6507_v52 = vshll.u32 %v14557_v61, 16  ;;  %v6806_v14 = vld [vmem:[#allocation2 + $0xc] sm:$0xf] }
 0x25e   : > { %v6506_v55 = vrot.slane %v6504_v50, 7  ;;  %v6487_v48 = vshrl.u32 %v14555_v30, 16  ;;  %v14558_v32 = vpack.c.bf16 %v6361_v26, %v6361_v26  ;;  %v6490_v54 = vshll.u32 %v14555_v30, 16 }
 0x25f   : > { %v6359_v31 = vmax.f32 %v6327_v20, 0.0  ;;  %v6332_v27 = vadd.f32 %v18192_v57, %v6229_v41  ;;  %v6227_v39 = vadd.f32 %v6080_v23, %v18171_v7  ;;  %v15427_v63 = vpop.f32.mrf.mxu0  ;;  %v6817_v7 = vld [vmem:[#allocation2 + $0x20] sm:$0x1] }
 0x260   : > { %v6509_v46 = vor.u32 %v6507_v52, %v6506_v55  ;;  %v6510_v2 = vrot.slane %v6506_v55, 4  ;;  %v6489_v59 = vrot.slane %v6487_v48, 7  ;;  %v6512_v47 = vshrl.u32 %v14558_v32, 16 }
 0x261   : > { %v6515_v51 = vshll.u32 %v14558_v32, 16  ;;  %v14556_v3 = vpack.c.bf16 %v6359_v31, %v6359_v31  ;;  %v6364_v15 = vmax.f32 %v6332_v27, 0.0  ;;  %v6330_v34 = vadd.f32 %v18192_v57, %v6227_v39  ;;  %v6083_v4 = vpop.f32.mrf.mxu0  ;;  %v6810_v39 = vld [vmem:[#allocation2 + $0x14] sm:$0x1] }
 0x262   : > { %v6814_v25 = vsel %vm16399_vm10, %v6509_v46, %v6813_v16  ;;  %v6492_v62 = vor.u32 %v6490_v54, %v6489_v59  ;;  %v6493_v38 = vrot.slane %v6489_v59, 4  ;;  %v6514_v61 = vrot.slane %v6512_v47, 7 }
 0x263   : > { %6815 = vst [vmem:[#allocation2 + $0x18] sm:$0xf] %v6814_v25  ;;  %v6495_v35 = vshrl.u32 %v14556_v3, 16  ;;  %v6498_v9 = vshll.u32 %v14556_v3, 16  ;;  %v14561_v21 = vpack.c.bf16 %v6364_v15, %v6364_v15  ;;  %v6362_v18 = vmax.f32 %v6330_v34, 0.0  ;;  %v15430_v50 = vpop.f32.mrf.mxu0 }
 0x264   : > { %v6807_v30 = vsel %vm16399_vm10, %v6492_v62, %v6806_v14  ;;  %v6517_v26 = vor.u32 %v6515_v51, %v6514_v61  ;;  %v6519_v20 = vrot.slane %v6514_v61, 4  ;;  %v6230_v41 = vadd.f32 %v15427_v63, %v18175_v11  ;;  %v6827_v3 = vld [vmem:[#allocation2 + $0x30] sm:$0xf] }
 0x265   : > { %6808 = vst [vmem:[#allocation2 + $0xc] sm:$0xf] %v6807_v30  ;;  %v6497_v23 = vrot.slane %v6495_v35, 7  ;;  %v6538_v55 = vshrl.u32 %v14561_v21, 16  ;;  %v6541_v52 = vshll.u32 %v14561_v21, 16  ;;  %v14559_v48 = vpack.c.bf16 %v6362_v18, %v6362_v18  ;;  %v6096_v32 = vpop.f32.mrf.mxu0 }
 0x266   : > { %v6518_v54 = vsel %vm16389_vm9, %v6510_v2, %v6517_v26  ;;  %v6818_v27 = vsel %vm16350_vm2, %v6519_v20, %v6817_v7  ;;  %v6333_v46 = vadd.f32 %v18192_v57, %v6230_v41  ;;  %v6228_v59 = vadd.f32 %v6083_v4, %v18178_v28 }
 0x267   : > { %6816 = vst [vmem:[#allocation2 + $0x1c] sm:$0xf] %v6518_v54  ;;  %6819 = vst [vmem:[#allocation2 + $0x20] sm:$0x1] %v6818_v27  ;;  %v6500_v11 = vor.u32 %v6498_v9, %v6497_v23  ;;  %v6502_v63 = vrot.slane %v6497_v23, 4  ;;  %v6540_v47 = vrot.slane %v6538_v55, 7  ;;  %v15431_v51 = vpop.f32.mrf.mxu0  ;;  %v6233_v25 = vadd.f32 %v15430_v50, %v18182_v29 }
 0x268   : > { %v6521_v14 = vshrl.u32 %v14559_v48, 16  ;;  %v6524_v15 = vshll.u32 %v14559_v48, 16  ;;  %v6365_v34 = vmax.f32 %v6333_v46, 0.0  ;;  %v6331_v2 = vadd.f32 %v18192_v57, %v6228_v59  ;;  %v6820_v50 = vld [vmem:[#allocation2 + $0x24] sm:$0xf] }
 0x269   : > { %v6501_v62 = vsel %vm16389_vm9, %v6493_v38, %v6500_v11  ;;  %v6811_v28 = vsel %vm16350_vm2, %v6502_v63, %v6810_v39  ;;  %v6543_v4 = vor.u32 %v6541_v52, %v6540_v47  ;;  %v6544_v61 = vrot.slane %v6540_v47, 4  ;;  %v6099_v7 = vpop.f32.mrf.mxu0  ;;  %v6831_v59 = vld [vmem:[#allocation2 + $0x38] sm:$0x1] }
 0x26a   : > { %6809 = vst [vmem:[#allocation2 + $0x10] sm:$0xf] %v6501_v62  ;;  %6812 = vst [vmem:[#allocation2 + $0x14] sm:$0x1] %v6811_v28  ;;  %v18303_v35 = vrot.slane %v6521_v14, 7  ;;  %v14562_v9 = vpack.c.bf16 %v6365_v34, %v6365_v34  ;;  %v6363_v21 = vmax.f32 %v6331_v2, 0.0  ;;  %v6336_v18 = vadd.f32 %v18192_v57, %v6233_v25 }
 0x26b   : > { %v6828_v29 = vsel %vm16399_vm10, %v6543_v4, %v6827_v3  ;;  %v6231_v38 = vadd.f32 %v6096_v32, %v18186_v10  ;;  %v6234_v30 = vadd.f32 %v15431_v51, %v18196_v44  ;;  %v6232_v26 = vadd.f32 %v6099_v7, %v18199_v43  ;;  %v15434_v20 = vpop.f32.mrf.mxu0  ;;  %v16068_v25 = vld [vmem:[%s20316_s1 + $0x2f0] sm:$0xff]  }
 0x26c   : > { %6829 = vst [vmem:[#allocation2 + $0x30] sm:$0xf] %v6828_v29  ;;  %v6526_v41 = vor.u32 %v6524_v15, %v18303_v35  ;;  %v6527_v23 = vrot.slane %v18303_v35, 4  ;;  %v6546_v55 = vshrl.u32 %v14562_v9, 16  ;;  %v6549_v52 = vshll.u32 %v14562_v9, 16 }
 0x26d   : > { %v14560_v48 = vpack.c.bf16 %v6363_v21, %v6363_v21  ;;  %v6368_v54 = vmax.f32 %v6336_v18, 0.0  ;;  %v6334_v27 = vadd.f32 %v18192_v57, %v6231_v38  ;;  %v6337_v39 = vadd.f32 %v18192_v57, %v6234_v30  ;;  %v6112_v46 = vpop.f32.mrf.mxu0  ;;  %v6824_v18 = vld [vmem:[#allocation2 + $0x2c] sm:$0x1] }
 0x26e   : > { %v6821_v10 = vsel %vm16399_vm10, %v6526_v41, %v6820_v50  ;;  %v6548_v44 = vrot.slane %v6546_v55, 7  ;;  %v6335_v43 = vadd.f32 %v18192_v57, %v6232_v26  ;;  %v6237_v32 = vadd.f32 %v15434_v20, %v18203_v17  ;;  %v16064_v38 = vld [vmem:[#allocation2 + $0x18] sm:$0xff]  }
 0x26f   : > { %6822 = vst [vmem:[#allocation2 + $0x24] sm:$0xf] %v6821_v10  ;;  %v6529_v11 = vshrl.u32 %v14560_v48, 16  ;;  %v6532_v63 = vshll.u32 %v14560_v48, 16  ;;  %v14565_v47 = vpack.c.bf16 %v6368_v54, %v6368_v54  ;;  %v6366_v14 = vmax.f32 %v6334_v27, 0.0  ;;  %v15435_v51 = vpop.f32.mrf.mxu0 }
 0x270   : > { %v6551_v3 = vor.u32 %v6549_v52, %v6548_v44  ;;  %v6553_v15 = vrot.slane %v6548_v44, 4  ;;  %v6369_v34 = vmax.f32 %v6337_v39, 0.0  ;;  %v6367_v2 = vmax.f32 %v6335_v43, 0.0  ;;  %v6841_v52 = vld [vmem:[#allocation2 + $0x48] sm:$0xf]  ;;  %v20509_v39 = vld [vmem:[#allocation42_spill] sm:$0xff] }
 0x271   : > { %v6531_v62 = vrot.slane %v6529_v11, 7  ;;  %v6572_v28 = vshrl.u32 %v14565_v47, 16  ;;  %v6575_v4 = vshll.u32 %v14565_v47, 16  ;;  %v14563_v7 = vpack.c.bf16 %v6366_v14, %v6366_v14  ;;  %v18322_v17 = vpop.f32.mrf.mxu0  ;;  %v16062_v35 = vld [vmem:[#allocation2 + $0xc] sm:$0xff]  }
 0x272   : > { %v6552_v9 = vsel %vm16389_vm9, %v6544_v61, %v6551_v3  ;;  %v6832_v21 = vsel %vm16350_vm2, %v6553_v15, %v6831_v59  ;;  %v14566_v29 = vpack.c.bf16 %v6369_v34, %v6369_v34  ;;  %v14564_v50 = vpack.c.bf16 %v6367_v2, %v6367_v2  ;;  %15469 = vmatmul.mubr.bf16.vlgmr.msra.gmra.mxu1 %v16062_v35  ;;  %v16071_v11 = vld [vmem:[%s20316_s1 + $0x2e8] sm:$0xff]   ;;  %v6834_v34 = vld [vmem:[#allocation2 + $0x3c] sm:$0xf]  ;;  %v6845_v2 = vld [vmem:[#allocation2 + $0x50] sm:$0x1] }
 0x273   : > { %6830 = vst [vmem:[#allocation2 + $0x34] sm:$0xf] %v6552_v9  ;;  %6833 = vst [vmem:[#allocation2 + $0x38] sm:$0x1] %v6832_v21  ;;  %v6534_v30 = vor.u32 %v6532_v63, %v6531_v62  ;;  %v6536_v26 = vrot.slane %v6531_v62, 4  ;;  %v6574_v20 = vrot.slane %v6572_v28, 7  ;;  %v15438_v55 = vpop.f32.mrf.mxu0  ;;  %15472 = vmatprep.mubr.bf16.mxu1 %v16064_v38  ;;  %15549 = vmatpush3.bf16.msra.mxu1 %v20509_v39 }
 0x274   : > { %v6555_v41 = vshrl.u32 %v14563_v7, 16  ;;  %v6558_v48 = vshll.u32 %v14563_v7, 16  ;;  %v6580_v54 = vshrl.u32 %v14566_v29, 16  ;;  %v6583_v27 = vshll.u32 %v14566_v29, 16  ;;  %15550 = vmatprep.subr.bf16.mxu1 %v16068_v25 }
 0x275   : > { %v6563_v61 = vshrl.u32 %v14564_v50, 16  ;;  %v6535_v10 = vsel %vm16389_vm9, %v6527_v23, %v6534_v30  ;;  %v6825_v44 = vsel %vm16350_vm2, %v6536_v26, %v6824_v18  ;;  %v6577_v43 = vor.u32 %v6575_v4, %v6574_v20  ;;  %v6128_v15 = vpop.f32.mrf.mxu0  ;;  %v6838_v18 = vld [vmem:[#allocation2 + $0x44] sm:$0x1] }
 0x276   : > { %v6578_v59 = vrot.slane %v6574_v20, 4  ;;  %6826 = vst [vmem:[#allocation2 + $0x2c] sm:$0x1] %v6825_v44  ;;  %6823 = vst [vmem:[#allocation2 + $0x28] sm:$0xf] %v6535_v10  ;;  %v6557_v63 = vrot.slane %v6555_v41, 7  ;;  %v6340_v62 = vadd.f32 %v18192_v57, %v6237_v32  ;;  %v6235_v28 = vadd.f32 %v6112_v46, %v18207_v40 }
 0x277   : > { %v6582_v47 = vrot.slane %v6580_v54, 7  ;;  %v6565_v14 = vrot.slane %v6563_v61, 7  ;;  %v6566_v3 = vshll.u32 %v14564_v50, 16  ;;  %v6842_v23 = vsel %vm16399_vm10, %v6577_v43, %v6841_v52  ;;  %15551 = vmatpush3.bf16.msra.mxu1 %v16068_v25  ;;  %v16074_v32 = vld [vmem:[%s20316_s1 + $0x2e0] sm:$0xff]   ;;  %v15439_v25 = vpop.f32.mrf.mxu0 }
 0x278   : > { %v6238_v4 = vadd.f32 %v15435_v51, %v18211_v24  ;;  %6843 = vst [vmem:[#allocation2 + $0x48] sm:$0xf] %v6842_v23  ;;  %v6560_v7 = vor.u32 %v6558_v48, %v6557_v63  ;;  %v6561_v35 = vrot.slane %v6557_v63, 4  ;;  %v6372_v38 = vmax.f32 %v6340_v62, 0.0  ;;  %15552 = vmatprep.subr.bf16.mxu1 %v16071_v11  ;;  %v16077_v63 = vld [vmem:[%s20316_s1 + $0x2d8] sm:$0xff]  }
 0x279   : > { %v6585_v9 = vor.u32 %v6583_v27, %v6582_v47  ;;  %v6587_v21 = vrot.slane %v6582_v47, 4  ;;  %v6568_v29 = vor.u32 %v6566_v3, %v6565_v14  ;;  %v6570_v50 = vrot.slane %v6565_v14, 4 }
 0x27a   : > { %v6338_v30 = vadd.f32 %v18192_v57, %v6235_v28  ;;  %v6835_v40 = vsel %vm16399_vm10, %v6560_v7, %v6834_v34  ;;  %v6341_v51 = vadd.f32 %v18192_v57, %v6238_v4  ;;  %v14569_v41 = vpack.c.bf16 %v6372_v38, %v6372_v38  ;;  %v6848_v7 = vld [vmem:[#allocation2 + $0x54] sm:$0xf] }
 0x27b   : > { %v6586_v24 = vsel %vm16389_vm9, %v6578_v59, %v6585_v9  ;;  %v6846_v46 = vsel %vm16350_vm2, %v6587_v21, %v6845_v2  ;;  %6836 = vst [vmem:[#allocation2 + $0x3c] sm:$0xf] %v6835_v40  ;;  %v6569_v26 = vsel %vm16389_vm9, %v6561_v35, %v6568_v29  ;;  %v6839_v20 = vsel %vm16350_vm2, %v6570_v50, %v6838_v18  ;;  %v6131_v9 = vpop.f32.mrf.mxu0  ;;  %v16080_v21 = vld [vmem:[%s20316_s1 + $0x2d0] sm:$0xff]  }
 0x27c   : > { %6844 = vst [vmem:[#allocation2 + $0x4c] sm:$0xf] %v6586_v24  ;;  %6847 = vst [vmem:[#allocation2 + $0x50] sm:$0x1] %v6846_v46  ;;  %v6370_v52 = vmax.f32 %v6338_v30, 0.0  ;;  %v6373_v48 = vmax.f32 %v6341_v51, 0.0  ;;  %v6236_v54 = vadd.f32 %v18322_v17, %v18214_v45  ;;  %v6241_v27 = vadd.f32 %v15438_v55, %v18219_v22  ;;  %15553 = vmatpush3.bf16.msra.mxu1 %v16071_v11 }
 0x27d   : > { %6840 = vst [vmem:[#allocation2 + $0x44] sm:$0x1] %v6839_v20  ;;  %6837 = vst [vmem:[#allocation2 + $0x40] sm:$0xf] %v6569_v26  ;;  %v6239_v61 = vadd.f32 %v6128_v15, %v18223_v58  ;;  %v6606_v39 = vshrl.u32 %v14569_v41, 16  ;;  %v6609_v10 = vshll.u32 %v14569_v41, 16  ;;  %v6242_v43 = vadd.f32 %v15439_v25, %v18228_v42  ;;  %15554 = vmatprep.subr.bf16.mxu1 %v16074_v32 }
 0x27e   : > { %v14567_v44 = vpack.c.bf16 %v6370_v52, %v6370_v52  ;;  %v16067_v59 = vld [vmem:[#allocation2 + $0x24] sm:$0xff]   ;;  %v14570_v47 = vpack.c.bf16 %v6373_v48, %v6373_v48  ;;  %v6339_v14 = vadd.f32 %v18192_v57, %v6236_v54  ;;  %v6344_v45 = vadd.f32 %v18192_v57, %v6241_v27  ;;  %v16069_v58 = vld [vmem:[#allocation2 + $0x30] sm:$0xff]   ;;  %v6855_v42 = vld [vmem:[#allocation2 + $0x60] sm:$0xf] }
 0x27f   : > { %v6342_v22 = vadd.f32 %v18192_v57, %v6239_v61  ;;  %v6608_v17 = vrot.slane %v6606_v39, 7  ;;  %v6345_v3 = vadd.f32 %v18192_v57, %v6242_v43  ;;  %15473 = vmatmul.mubr.bf16.gmra.mxu1 %v16067_v59  ;;  %v6859_v24 = vld [vmem:[#allocation2 + $0x68] sm:$0x1]  ;;  %v6852_v48 = vld [vmem:[#allocation2 + $0x5c] sm:$0x1]  ;;  %v15442_v39 = vpop.f32.mrf.mxu0 }
 0x280   : > { %v6589_v55 = vshrl.u32 %v14567_v44, 16  ;;  %v6592_v11 = vshll.u32 %v14567_v44, 16  ;;  %v6614_v15 = vshrl.u32 %v14570_v47, 16  ;;  %v6617_v23 = vshll.u32 %v14570_v47, 16  ;;  %15476 = vmatprep.mubr.bf16.mxu1 %v16069_v58  ;;  %15555 = vmatpush3.bf16.msra.mxu1 %v16074_v32  ;;  %v16085_v44 = vld [vmem:[%s20316_s1 + $0x2c8] sm:$0xff]  }
 0x281   : > { %v6371_v34 = vmax.f32 %v6339_v14, 0.0  ;;  %v6376_v2 = vmax.f32 %v6344_v45, 0.0  ;;  %v6611_v62 = vor.u32 %v6609_v10, %v6608_v17  ;;  %v6612_v28 = vrot.slane %v6608_v17, 4  ;;  %15556 = vmatprep.subr.bf16.mxu1 %v16077_v63  ;;  %v7307_v10 = vld [vmem:[#allocation2 + $0xc] sm:$0xf] }
 0x282   : > { %v6591_v4 = vrot.slane %v6589_v55, 7  ;;  %v6374_v35 = vmax.f32 %v6342_v22, 0.0  ;;  %v6616_v18 = vrot.slane %v6614_v15, 7  ;;  %v6377_v38 = vmax.f32 %v6345_v3, 0.0  ;;  %v6869_v47 = vld [vmem:[#allocation2 + $0x78] sm:$0xf] }
 0x283   : > { %v14568_v29 = vpack.c.bf16 %v6371_v34, %v6371_v34  ;;  %v14573_v50 = vpack.c.bf16 %v6376_v2, %v6376_v2  ;;  %v6856_v30 = vsel %vm16399_vm10, %v6611_v62, %v6855_v42  ;;  %v16072_v45 = vld [vmem:[#allocation2 + $0x48] sm:$0xff]   ;;  %v16090_v3 = vld [vmem:[%s20316_s1 + $0x2c0] sm:$0xff]   ;;  %v7308_v34 = vld [vmem:[#allocation2 + $0x10] sm:$0xf]  ;;  %v7377_v2 = vshrl.u32 %v7307_v10, 16 }
 0x284   : > { %v6594_v40 = vor.u32 %v6592_v11, %v6591_v4  ;;  %v6595_v32 = vrot.slane %v6591_v4, 4  ;;  %v14571_v46 = vpack.c.bf16 %v6374_v35, %v6374_v35  ;;  %v16070_v51 = vld [vmem:[#allocation2 + $0x3c] sm:$0xff]   ;;  %6857 = vst [vmem:[#allocation2 + $0x60] sm:$0xf] %v6856_v30  ;;  %v6619_v25 = vor.u32 %v6617_v23, %v6616_v18  ;;  %15557 = vmatpush3.bf16.msra.mxu1 %v16077_v63  ;;  %v6862_v17 = vld [vmem:[#allocation2 + $0x6c] sm:$0xf] }
 0x285   : > { %v6621_v26 = vrot.slane %v6616_v18, 4  ;;  %v6597_v20 = vshrl.u32 %v14568_v29, 16  ;;  %v6600_v41 = vshll.u32 %v14568_v29, 16  ;;  %v6640_v54 = vshrl.u32 %v14573_v50, 16  ;;  %15558 = vmatprep.subr.bf16.mxu1 %v16080_v21  ;;  %v6144_v29 = vpop.f32.mrf.mxu0 }
 0x286   : > { %v6849_v52 = vsel %vm16399_vm10, %v6594_v40, %v6848_v7  ;;  %v6643_v27 = vshll.u32 %v14573_v50, 16  ;;  %v6623_v61 = vshrl.u32 %v14571_v46, 16  ;;  %v6620_v43 = vsel %vm16389_vm9, %v6612_v28, %v6619_v25  ;;  %v16093_v25 = vld [vmem:[%s20316_s1 + $0x378] sm:$0xff]  }
 0x287   : > { %6850 = vst [vmem:[#allocation2 + $0x54] sm:$0xf] %v6849_v52  ;;  %v6860_v59 = vsel %vm16350_vm2, %v6621_v26, %v6859_v24  ;;  %v6599_v63 = vrot.slane %v6597_v20, 7  ;;  %v6626_v14 = vshll.u32 %v14571_v46, 16  ;;  %6858 = vst [vmem:[#allocation2 + $0x64] sm:$0xf] %v6620_v43  ;;  %v14574_v55 = vpack.c.bf16 %v6377_v38, %v6377_v38  ;;  %15477 = vmatmul.mubr.bf16.gmra.mxu1 %v16070_v51 }
 0x288   : > { %6861 = vst [vmem:[#allocation2 + $0x68] sm:$0x1] %v6860_v59  ;;  %v6642_v22 = vrot.slane %v6640_v54, 7  ;;  %v18382_v58 = vrot.slane %v6623_v61, 7  ;;  %v6240_v11 = vadd.f32 %v6131_v9, %v18231_v49  ;;  %v6245_v23 = vadd.f32 %v15442_v39, %v18235_v0  ;;  %15480 = vmatprep.mubr.bf16.mxu1 %v16072_v45  ;;  %15559 = vmatpush3.bf16.msra.mxu1 %v16080_v21  ;;  %v7309_v0 = vld [vmem:[#allocation2 + $0x14] sm:$0x1]  ;;  %v18404_v39 = vpop.f32.mrf.mxu0 }
 0x289   : > { %v6602_v42 = vor.u32 %v6600_v41, %v6599_v63  ;;  %v6604_v15 = vrot.slane %v6599_v63, 4  ;;  %15560 = vmatprep.subr.bf16.mxu1 %v16085_v44  ;;  %v6648_v9 = vshrl.u32 %v14574_v55, 16  ;;  %v6651_v18 = vshll.u32 %v14574_v55, 16  ;;  %v6873_v38 = vld [vmem:[#allocation2 + $0x80] sm:$0x1] }
 0x28a   : > { %v6645_v62 = vor.u32 %v6643_v27, %v6642_v22  ;;  %v6646_v28 = vrot.slane %v6642_v22, 4  ;;  %v6628_v4 = vor.u32 %v6626_v14, %v18382_v58  ;;  %v6629_v7 = vrot.slane %v18382_v58, 4 }
 0x28b   : > { %v6603_v49 = vsel %vm16389_vm9, %v6595_v32, %v6602_v42  ;;  %v6853_v35 = vsel %vm16350_vm2, %v6604_v15, %v6852_v48  ;;  %v6343_v30 = vadd.f32 %v18192_v57, %v6240_v11  ;;  %v6348_v40 = vadd.f32 %v18192_v57, %v6245_v23  ;;  %v6866_v23 = vld [vmem:[#allocation2 + $0x74] sm:$0x1] }
 0x28c   : > { %6854 = vst [vmem:[#allocation2 + $0x5c] sm:$0x1] %v6853_v35  ;;  %6851 = vst [vmem:[#allocation2 + $0x58] sm:$0xf] %v6603_v49  ;;  %v6870_v21 = vsel %vm16399_vm10, %v6645_v62, %v6869_v47  ;;  %v6863_v50 = vsel %vm16399_vm10, %v6628_v4, %v6862_v17  ;;  %v6650_v32 = vrot.slane %v6648_v9, 7  ;;  %v7379_v24 = vrot.slane %v7377_v2, 4  ;;  %15561 = vmatpush3.bf16.msra.mxu1 %v16085_v44  ;;  %v6147_v49 = vpop.f32.mrf.mxu0 }
 0x28d   : > { %6871 = vst [vmem:[#allocation2 + $0x78] sm:$0xf] %v6870_v21  ;;  %6864 = vst [vmem:[#allocation2 + $0x6c] sm:$0xf] %v6863_v50  ;;  %v7380_v46 = vshll.u32 %v7307_v10, 16  ;;  %v7386_v51 = vshll.u32 %v7308_v34, 16  ;;  %15562 = vmatprep.subr.bf16.mxu1 %v16090_v3  ;;  %v6243_v22 = vadd.f32 %v6144_v29, %v18240_v60  ;;  %v6246_v58 = vadd.f32 %v18404_v39, %v18245_v53 }
 0x28e   : > { %v6375_v26 = vmax.f32 %v6343_v30, 0.0  ;;  %v6380_v20 = vmax.f32 %v6348_v40, 0.0  ;;  %v7390_v41 = vshrl.u32 %v7308_v34, 16  ;;  %v7396_v52 = vshll.u32 %v7309_v0, 16  ;;  %v7310_v44 = vld [vmem:[#allocation2 + $0x18] sm:$0xf] }
 0x28f   : > { %v6653_v48 = vor.u32 %v6651_v18, %v6650_v32  ;;  %v6655_v54 = vrot.slane %v6650_v32, 4  ;;  %v7382_v27 = vrot.slane %v7380_v46, 5  ;;  %v7388_v61 = vrot.slane %v7386_v51, 5  ;;  %v7311_v17 = vld [vmem:[#allocation2 + $0x1c] sm:$0xf]  ;;  %v16075_v9 = vld [vmem:[#allocation2 + $0x60] sm:$0xff]  }
 0x290   : > { %v14572_v43 = vpack.c.bf16 %v6375_v26, %v6375_v26  ;;  %v14577_v59 = vpack.c.bf16 %v6380_v20, %v6380_v20  ;;  %v7392_v10 = vrot.slane %v7390_v41, 4  ;;  %v7398_v63 = vrot.slane %v7396_v52, 5  ;;  %15563 = vmatpush3.bf16.msra.mxu1 %v16090_v3  ;;  %v6883_v34 = vld [vmem:[#allocation2 + $0x90] sm:$0xf]  ;;  %v7312_v20 = vld [vmem:[#allocation2 + $0x20] sm:$0x1] }
 0x291   : > { %v6654_v47 = vsel %vm16389_vm9, %v6646_v28, %v6653_v48  ;;  %v6874_v14 = vsel %vm16350_vm2, %v6655_v54, %v6873_v38  ;;  %v7383_v45 = vor.u32 %v7382_v27, %v7379_v24  ;;  %15644 = vmatprep.subr.bf16.mxu1 %v16093_v25  ;;  %v6346_v28 = vadd.f32 %v18192_v57, %v6243_v22  ;;  %v16083_v51 = vld [vmem:[%s20316_s1 + $0x330] sm:$0xff]   ;;  %v15446_v48 = vpop.f32.mrf.mxu0  ;;  %v7313_v54 = vld [vmem:[#allocation2 + $0x24] sm:$0xf]  ;;  %v7314_v53 = vld [vmem:[#allocation2 + $0x28] sm:$0xf] }
 0x292   : > { %6872 = vst [vmem:[#allocation2 + $0x7c] sm:$0xf] %v6654_v47  ;;  %6875 = vst [vmem:[#allocation2 + $0x80] sm:$0x1] %v6874_v14  ;;  %v6631_v55 = vshrl.u32 %v14572_v43, 16  ;;  %v6634_v11 = vshll.u32 %v14572_v43, 16  ;;  %v7393_v62 = vor.u32 %v7392_v10, %v7388_v61 }
 0x293   : > { %v6674_v42 = vshrl.u32 %v14577_v59, 16  ;;  %v6677_v15 = vshll.u32 %v14577_v59, 16  ;;  %v7384_v2 = vrot.slane %v7383_v45, 4  ;;  %v7401_v4 = vshrl.u32 %v7310_v44, 16  ;;  %v16073_v35 = vld [vmem:[#allocation2 + $0x54] sm:$0xff]  }
 0x294   : > { %v6633_v60 = vrot.slane %v6631_v55, 7  ;;  %v7404_v3 = vshll.u32 %v7310_v44, 16  ;;  %v7410_v0 = vshll.u32 %v7311_v17, 16  ;;  %v7394_v50 = vrot.slane %v7393_v62, 4  ;;  %15481 = vmatmul.mubr.bf16.gmra.mxu1 %v16073_v35  ;;  %v7315_v35 = vld [vmem:[#allocation2 + $0x2c] sm:$0x1] }
 0x295   : > { %v18412_v18 = vrot.slane %v6674_v42, 7  ;;  %v7389_v21 = vsel %vm16415_vm11, %v7384_v2, %v7388_v61  ;;  %v6378_v38 = vmax.f32 %v6346_v28, 0.0  ;;  %v7403_v30 = vrot.slane %v7401_v4, 4  ;;  %15484 = vmatprep.mubr.bf16.mxu1 %v16075_v9 }
 0x296   : > { %v6636_v40 = vor.u32 %v6634_v11, %v6633_v60  ;;  %v6638_v32 = vrot.slane %v6633_v60, 4  ;;  %v7399_v25 = vsel %vm16415_vm11, %v7394_v50, %v7398_v63  ;;  %v7406_v41 = vrot.slane %v7404_v3, 5  ;;  %v16088_v50 = vld [vmem:[%s20316_s1 + $0x320] sm:$0xff]  }
 0x297   : > { %v6679_v24 = vor.u32 %v6677_v15, %v18412_v18  ;;  %v6680_v46 = vrot.slane %v18412_v18, 4  ;;  %v14575_v26 = vpack.c.bf16 %v6378_v38, %v6378_v38  ;;  %v7412_v52 = vrot.slane %v7410_v0, 5  ;;  %v6876_v15 = vld [vmem:[#allocation2 + $0x84] sm:$0xf] }
 0x298   : > { %v6637_v27 = vsel %vm16389_vm9, %v6629_v7, %v6636_v40  ;;  %v6867_v61 = vsel %vm16350_vm2, %v6638_v32, %v6866_v23  ;;  %v14132_v59 = vcombine.low %v7389_v21, %v7399_v25  ;;  %v7407_v44 = vor.u32 %v7406_v41, %v7403_v30  ;;  %v6160_v21 = vpop.f32.mrf.mxu0 }
 0x299   : > { %v6884_v43 = vsel %vm16399_vm10, %v6679_v24, %v6883_v34  ;;  %6868 = vst [vmem:[#allocation2 + $0x74] sm:$0x1] %v6867_v61  ;;  %6865 = vst [vmem:[#allocation2 + $0x70] sm:$0xf] %v6637_v27  ;;  %v6657_v10 = vshrl.u32 %v14575_v26, 16  ;;  %v6660_v63 = vshll.u32 %v14575_v26, 16  ;;  %v6244_v7 = vadd.f32 %v6147_v49, %v18248_v33 }
 0x29a   : > { %6885 = vst [vmem:[#allocation2 + $0x90] sm:$0xf] %v6884_v43  ;;  %v7414_v47 = vshrl.u32 %v7311_v17, 16  ;;  %15517 = vmatmul.mubr.bf16.vlgmr.msra.gmra.mxu0 %v14132_v59  ;;  %v7420_v14 = vshll.u32 %v7312_v20, 16  ;;  %v6249_v45 = vadd.f32 %v15446_v48, %v18252_v6  ;;  %v7408_v55 = vrot.slane %v7407_v44, 4  ;;  %v16087_v33 = vld [vmem:[%s20316_s1 + $0x328] sm:$0xff]  }
 0x29b   : > { %v18435_v22 = vrot.slane %v6657_v10, 7  ;;  %v7425_v42 = vshrl.u32 %v7313_v54, 16  ;;  %15597 = vmatpush3.bf16.msra.mxu0 %v18272_v37  ;;  %v6349_v17 = vadd.f32 %v18192_v57, %v6246_v58  ;;  %v6347_v34 = vadd.f32 %v18192_v57, %v6244_v7  ;;  %v18457_v61 = vld [vmem:[#allocation2 + $0x30] sm:$0xf]  ;;  %v6887_v43 = vld [vmem:[#allocation2 + $0x98] sm:$0x1] }
 0x29c   : > { %v7416_v11 = vrot.slane %v7414_v47, 4  ;;  %v7422_v23 = vrot.slane %v7420_v14, 5  ;;  %v6352_v2 = vadd.f32 %v18192_v57, %v6249_v45  ;;  %15598 = vmatprep.subr.bf16.mxu0 %v16083_v51  ;;  %v7413_v37 = vsel %vm16415_vm11, %v7408_v55, %v7412_v52  ;;  %v6880_v10 = vld [vmem:[#allocation2 + $0x8c] sm:$0x1]  ;;  %v15447_v14 = vpop.f32.mrf.mxu0  ;;  %v16091_v58 = vld [vmem:[%s20316_s1 + $0x318] sm:$0xff]  }
 0x29d   : > { %v6662_v6 = vor.u32 %v6660_v63, %v18435_v22  ;;  %v6663_v39 = vrot.slane %v18435_v22, 4  ;;  %v6381_v28 = vmax.f32 %v6349_v17, 0.0  ;;  %v6379_v4 = vmax.f32 %v6347_v34, 0.0  ;;  %v6897_v55 = vld [vmem:[#allocation2 + $0xa8] sm:$0xf] }
 0x29e   : > { %v7417_v62 = vor.u32 %v7416_v11, %v7412_v52  ;;  %v6384_v49 = vmax.f32 %v6352_v2, 0.0  ;;  %v7427_v9 = vrot.slane %v7425_v42, 4  ;;  %v7428_v3 = vshll.u32 %v7313_v54, 16  ;;  %v16078_v52 = vld [vmem:[#allocation2 + $0x78] sm:$0xff]   ;;  %v18492_v22 = vld [vmem:[%s20317_s2] ss:$0 sm:$0xff] }
 0x29f   : > { %v6877_v57 = vsel %vm16399_vm10, %v6662_v6, %v6876_v15  ;;  %v7434_v0 = vshll.u32 %v7314_v53, 16  ;;  %15599 = vmatpush3.bf16.msra.mxu0 %v16083_v51  ;;  %v14578_v38 = vpack.c.bf16 %v6381_v28, %v6381_v28  ;;  %v14576_v30 = vpack.c.bf16 %v6379_v4, %v6379_v4 }
 0x2a0   : > { %v7418_v60 = vrot.slane %v7417_v62, 4  ;;  %6878 = vst [vmem:[#allocation2 + $0x84] sm:$0xf] %v6877_v57  ;;  %v14581_v40 = vpack.c.bf16 %v6384_v49, %v6384_v49  ;;  %v7438_v32 = vshrl.u32 %v7314_v53, 16  ;;  %v16076_v24 = vld [vmem:[#allocation2 + $0x6c] sm:$0xff]   ;;  %15600 = vmatprep.subr.bf16.mxu0 %v16087_v33  ;;  %v7430_v26 = vrot.slane %v7428_v3, 5 }
 0x2a1   : > { %v18455_v20 = vrot.slane %v7434_v0, 5  ;;  %v7444_v41 = vshll.u32 %v7315_v35, 16  ;;  %v6682_v48 = vshrl.u32 %v14578_v38, 16  ;;  %v6685_v54 = vshll.u32 %v14578_v38, 16  ;;  %15485 = vmatmul.mubr.bf16.gmra.mxu1 %v16076_v24  ;;  %v7318_v35 = vld [vmem:[#allocation2 + $0x38] sm:$0x1] }
 0x2a2   : > { %v7423_v25 = vsel %vm16415_vm11, %v7418_v60, %v7422_v23  ;;  %v6665_v27 = vshrl.u32 %v14576_v30, 16  ;;  %v6668_v59 = vshll.u32 %v14576_v30, 16  ;;  %v6708_v63 = vshrl.u32 %v14581_v40, 16  ;;  %15488 = vmatprep.mubr.bf16.mxu1 %v16078_v52  ;;  %v16092_v0 = vld [vmem:[%s20316_s1 + $0x310] sm:$0xff]  }
 0x2a3   : > { %v14133_v51 = vcombine.low %v7413_v37, %v7423_v25  ;;  %v6711_v44 = vshll.u32 %v14581_v40, 16  ;;  %v7431_v47 = vor.u32 %v7430_v26, %v7427_v9  ;;  %15601 = vmatpush3.bf16.msra.mxu0 %v16087_v33  ;;  %v6684_v7 = vrot.slane %v6682_v48, 7  ;;  %v7317_v37 = vld [vmem:[#allocation2 + $0x34] sm:$0xf]  ;;  %v6163_v9 = vpop.f32.mrf.mxu0 }
 0x2a4   : > { %v6667_v45 = vrot.slane %v6665_v27, 7  ;;  %v7440_v11 = vrot.slane %v7438_v32, 4  ;;  %v7446_v42 = vrot.slane %v7444_v41, 5  ;;  %15602 = vmatprep.subr.bf16.mxu0 %v16088_v50  ;;  %v18462_v15 = vrot.slane %v6708_v63, 7  ;;  %v16094_v27 = vld [vmem:[%s20316_s1 + $0x308] sm:$0xff]  }
 0x2a5   : > { %15520 = vmatprep.mubr.bf16.mxu0 %v14133_v51  ;;  %v7432_v23 = vrot.slane %v7431_v47, 4  ;;  %v6247_v17 = vadd.f32 %v6160_v21, %v18257_v19  ;;  %v7449_v34 = vshrl.u32 %v18457_v61, 16  ;;  %v6687_v2 = vor.u32 %v6685_v54, %v6684_v7  ;;  %v15450_v41 = vpop.f32.mrf.mxu0 }
 0x2a6   : > { %v6689_v53 = vrot.slane %v6684_v7, 4  ;;  %v6670_v33 = vor.u32 %v6668_v59, %v6667_v45  ;;  %v6672_v6 = vrot.slane %v6667_v45, 4  ;;  %v6713_v62 = vor.u32 %v6711_v44, %v18462_v15 }
 0x2a7   : > { %v6714_v28 = vrot.slane %v18462_v15, 4  ;;  %v7437_v4 = vsel %vm16415_vm11, %v7432_v23, %v18455_v20  ;;  %v7441_v49 = vor.u32 %v7440_v11, %v18455_v20  ;;  %15603 = vmatpush3.bf16.msra.mxu0 %v16088_v50  ;;  %v6688_v19 = vsel %vm16389_vm9, %v6680_v46, %v6687_v2  ;;  %v18495_v50 = vld [vmem:[#allocation2 + $0x3c] sm:$0xf] }
 0x2a8   : > { %v6888_v57 = vsel %vm16350_vm2, %v6689_v53, %v6887_v43  ;;  %v6671_v60 = vsel %vm16389_vm9, %v6663_v39, %v6670_v33  ;;  %v6881_v3 = vsel %vm16350_vm2, %v6672_v6, %v6880_v10  ;;  %15604 = vmatprep.subr.bf16.mxu0 %v16091_v58  ;;  %6886 = vst [vmem:[#allocation2 + $0x94] sm:$0xf] %v6688_v19  ;;  %v7451_v21 = vrot.slane %v7449_v34, 4 }
 0x2a9   : > { %6889 = vst [vmem:[#allocation2 + $0x98] sm:$0x1] %v6888_v57  ;;  %6882 = vst [vmem:[#allocation2 + $0x8c] sm:$0x1] %v6881_v3  ;;  %v6898_v18 = vsel %vm16399_vm10, %v6713_v62, %v6897_v55  ;;  %v7442_v46 = vrot.slane %v7441_v49, 4  ;;  %v6350_v39 = vadd.f32 %v18492_v22, %v6247_v17  ;;  %v7452_v38 = vshll.u32 %v18457_v61, 16 }
 0x2aa   : > { %6879 = vst [vmem:[#allocation2 + $0x88] sm:$0xf] %v6671_v60  ;;  %6899 = vst [vmem:[#allocation2 + $0xa8] sm:$0xf] %v6898_v18  ;;  %v7458_v30 = vshll.u32 %v7317_v37, 16  ;;  %v7462_v40 = vshrl.u32 %v7317_v37, 16  ;;  %v6250_v26 = vadd.f32 %v15447_v14, %v18261_v36  ;;  %v6248_v20 = vadd.f32 %v6163_v9, %v18264_v5 }
 0x2ab   : > { %v7468_v32 = vshll.u32 %v7318_v35, 16  ;;  %v7447_v24 = vsel %vm16415_vm11, %v7442_v46, %v7446_v42  ;;  %v6382_v25 = vmax.f32 %v6350_v39, 0.0  ;;  %15605 = vmatpush3.bf16.msra.mxu0 %v16091_v58  ;;  %v7454_v51 = vrot.slane %v7452_v38, 5  ;;  %v18507_v36 = vld [vmem:[#allocation2 + $0x40] sm:$0xf] }
 0x2ac   : > { %v14134_v52 = vcombine.low %v7437_v4, %v7447_v24  ;;  %v7460_v48 = vrot.slane %v7458_v30, 5  ;;  %v7464_v54 = vrot.slane %v7462_v40, 4  ;;  %15606 = vmatprep.subr.bf16.mxu0 %v16092_v0  ;;  %v6353_v59 = vadd.f32 %v18492_v22, %v6250_v26  ;;  %v16096_v14 = vld [vmem:[%s20316_s1 + $0x300] sm:$0xff]   ;;  %v6890_v37 = vld [vmem:[#allocation2 + $0x9c] sm:$0xf] }
 0x2ad   : > { %v14579_v61 = vpack.c.bf16 %v6382_v25, %v6382_v25  ;;  %v7470_v43 = vrot.slane %v7468_v32, 5  ;;  %v6351_v10 = vadd.f32 %v18492_v22, %v6248_v20  ;;  %v7455_v5 = vor.u32 %v7454_v51, %v7451_v21  ;;  %v7321_v39 = vld [vmem:[#allocation2 + $0x44] sm:$0x1]  ;;  %v6176_v21 = vpop.f32.mrf.mxu0  ;;  %v6901_v40 = vld [vmem:[#allocation2 + $0xb0] sm:$0x1] }
 0x2ae   : > { %15521 = vmatmul.mubr.bf16.gmra.mxu0 %v14134_v52  ;;  %v7465_v63 = vor.u32 %v7464_v54, %v7460_v48  ;;  %v6253_v44 = vadd.f32 %v15450_v41, %v18267_v13  ;;  %v7473_v47 = vshrl.u32 %v18495_v50, 16  ;;  %v6385_v45 = vmax.f32 %v6353_v59, 0.0  ;;  %v6894_v26 = vld [vmem:[#allocation2 + $0xa4] sm:$0x1]  ;;  %v6911_v54 = vld [vmem:[#allocation2 + $0xc0] sm:$0xf] }
 0x2af   : > { %v6691_v58 = vshrl.u32 %v14579_v61, 16  ;;  %v6694_v7 = vshll.u32 %v14579_v61, 16  ;;  %v6383_v55 = vmax.f32 %v6351_v10, 0.0  ;;  %15607 = vmatpush3.bf16.msra.mxu0 %v16092_v0  ;;  %v7456_v11 = vrot.slane %v7455_v5, 4  ;;  %v16081_v6 = vld [vmem:[#allocation2 + $0x90] sm:$0xff]  }
 0x2b0   : > { %v7466_v42 = vrot.slane %v7465_v63, 4  ;;  %v6356_v23 = vadd.f32 %v18492_v22, %v6253_v44  ;;  %v7475_v17 = vrot.slane %v7473_v47, 4  ;;  %15608 = vmatprep.subr.bf16.mxu0 %v16094_v27  ;;  %v14582_v13 = vpack.c.bf16 %v6385_v45, %v6385_v45  ;;  %v7323_v44 = vld [vmem:[#allocation2 + $0x4c] sm:$0xf]  ;;  %v15451_v47 = vpop.f32.mrf.mxu0 }
 0x2b1   : > { %v16079_v34 = vld [vmem:[#allocation2 + $0x84] sm:$0xff]   ;;  %v6693_v2 = vrot.slane %v6691_v58, 7  ;;  %v14580_v53 = vpack.c.bf16 %v6383_v55, %v6383_v55  ;;  %v7476_v33 = vshll.u32 %v18495_v50, 16  ;;  %v7461_v62 = vsel %vm16415_vm11, %v7456_v11, %v7460_v48  ;;  %v18524_v50 = vld [vmem:[%s20316_s1 + $0x3b8] sm:$0xff]  }
 0x2b2   : > { %v7471_v4 = vsel %vm16415_vm11, %v7466_v42, %v7470_v43  ;;  %v6388_v49 = vmax.f32 %v6356_v23, 0.0  ;;  %v7482_v35 = vshll.u32 %v18507_v36, 16  ;;  %15489 = vmatmul.mubr.bf16.gmra.mxu1 %v16079_v34  ;;  %v6716_v60 = vshrl.u32 %v14582_v13, 16  ;;  %v7322_v43 = vld [vmem:[#allocation2 + $0x48] sm:$0xf] }
 0x2b3   : > { %v6696_v9 = vor.u32 %v6694_v7, %v6693_v2  ;;  %v6697_v19 = vrot.slane %v6693_v2, 4  ;;  %v14135_v57 = vcombine.low %v7461_v62, %v7471_v4  ;;  %15492 = vmatprep.mubr.bf16.mxu1 %v16081_v6  ;;  %15609 = vmatpush3.bf16.msra.mxu0 %v16094_v27  ;;  %v6719_v3 = vshll.u32 %v14582_v13, 16  ;;  %v6179_v6 = vpop.f32.mrf.mxu0 }
 0x2b4   : > { %v6699_v0 = vshrl.u32 %v14580_v53, 16  ;;  %v6702_v18 = vshll.u32 %v14580_v53, 16  ;;  %v14585_v46 = vpack.c.bf16 %v6388_v49, %v6388_v49  ;;  %15610 = vmatprep.subr.bf16.mxu0 %v16096_v14  ;;  %v6718_v30 = vrot.slane %v6716_v60, 7 }
 0x2b5   : > { %v6891_v38 = vsel %vm16399_vm10, %v6696_v9, %v6890_v37  ;;  %15524 = vmatprep.mubr.bf16.mxu0 %v14135_v57  ;;  %v7478_v32 = vrot.slane %v7476_v33, 5  ;;  %v7484_v24 = vrot.slane %v7482_v35, 5  ;;  %v7486_v52 = vshrl.u32 %v18507_v36, 16 }
 0x2b6   : > { %6892 = vst [vmem:[#allocation2 + $0x9c] sm:$0xf] %v6891_v38  ;;  %v6701_v25 = vrot.slane %v6699_v0, 7  ;;  %v6742_v20 = vshrl.u32 %v14585_v46, 16  ;;  %v6745_v41 = vshll.u32 %v14585_v46, 16  ;;  %v6721_v51 = vor.u32 %v6719_v3, %v6718_v30 }
 0x2b7   : > { %v6723_v48 = vrot.slane %v6718_v30, 4  ;;  %v7479_v27 = vor.u32 %v7478_v32, %v7475_v17  ;;  %v7492_v61 = vshll.u32 %v7321_v39, 16  ;;  %15611 = vmatpush3.bf16.msra.mxu0 %v16096_v14  ;;  %v7488_v63 = vrot.slane %v7486_v52, 4  ;;  %v7324_v14 = vld [vmem:[#allocation2 + $0x50] sm:$0x1] }
 0x2b8   : > { %v6704_v59 = vor.u32 %v6702_v18, %v6701_v25  ;;  %v6706_v10 = vrot.slane %v6701_v25, 4  ;;  %v18529_v5 = vrot.slane %v6742_v20, 7  ;;  %15692 = vmatprep.subr.bf16.mxu0 %v18524_v50  ;;  %v6722_v36 = vsel %vm16389_vm9, %v6714_v28, %v6721_v51  ;;  %v7326_v46 = vld [vmem:[#allocation2 + $0x58] sm:$0xf] }
 0x2b9   : > { %v6902_v58 = vsel %vm16350_vm2, %v6723_v48, %v6901_v40  ;;  %v7480_v7 = vrot.slane %v7479_v27, 4  ;;  %v7494_v45 = vrot.slane %v7492_v61, 5  ;;  %6900 = vst [vmem:[#allocation2 + $0xac] sm:$0xf] %v6722_v36  ;;  %v7489_v23 = vor.u32 %v7488_v63, %v7484_v24  ;;  %v6904_v63 = vld [vmem:[#allocation2 + $0xb4] sm:$0xf] }
 0x2ba   : > { %6903 = vst [vmem:[#allocation2 + $0xb0] sm:$0x1] %v6902_v58  ;;  %v6705_v55 = vsel %vm16389_vm9, %v6697_v19, %v6704_v59  ;;  %v6895_v11 = vsel %vm16350_vm2, %v6706_v10, %v6894_v26  ;;  %v6747_v42 = vor.u32 %v6745_v41, %v18529_v5  ;;  %v6748_v15 = vrot.slane %v18529_v5, 4  ;;  %v7327_v36 = vld [vmem:[#allocation2 + $0x5c] sm:$0x1] }
 0x2bb   : > { %6896 = vst [vmem:[#allocation2 + $0xa4] sm:$0x1] %v6895_v11  ;;  %6893 = vst [vmem:[#allocation2 + $0xa0] sm:$0xf] %v6705_v55  ;;  %v7485_v28 = vsel %vm16415_vm11, %v7480_v7, %v7484_v24  ;;  %v6251_v17 = vadd.f32 %v6176_v21, %v18275_v12  ;;  %v7497_v34 = vshrl.u32 %v7322_v43, 16  ;;  %v7500_v13 = vshll.u32 %v7322_v43, 16 }
 0x2bc   : > { %v6912_v2 = vsel %vm16399_vm10, %v6747_v42, %v6911_v54  ;;  %v7506_v53 = vshll.u32 %v7323_v44, 16  ;;  %v7510_v33 = vshrl.u32 %v7323_v44, 16  ;;  %v7490_v37 = vrot.slane %v7489_v23, 4  ;;  %v7325_v12 = vld [vmem:[#allocation2 + $0x54] sm:$0xf] }
 0x2bd   : > { %6913 = vst [vmem:[#allocation2 + $0xc0] sm:$0xf] %v6912_v2  ;;  %v6354_v62 = vadd.f32 %v18492_v22, %v6251_v17  ;;  %v7499_v4 = vrot.slane %v7497_v34, 4  ;;  %v7516_v49 = vshll.u32 %v7324_v14, 16  ;;  %v7502_v35 = vrot.slane %v7500_v13, 5 }
 0x2be   : > { %v7508_v9 = vrot.slane %v7506_v53, 5  ;;  %v7512_v19 = vrot.slane %v7510_v33, 4  ;;  %v6254_v57 = vadd.f32 %v15451_v47, %v18277_v8  ;;  %v7495_v60 = vsel %vm16415_vm11, %v7490_v37, %v7494_v45  ;;  %v7328_v11 = vld [vmem:[#allocation2 + $0x60] sm:$0xf]  ;;  %v6915_v23 = vld [vmem:[#allocation2 + $0xc8] sm:$0x1] }
 0x2bf   : > { %v6386_v3 = vmax.f32 %v6354_v62, 0.0  ;;  %v7518_v0 = vrot.slane %v7516_v49, 5  ;;  %v6252_v18 = vadd.f32 %v6179_v6, %v18279_v1  ;;  %v14136_v39 = vcombine.low %v7485_v28, %v7495_v60  ;;  %v6908_v13 = vld [vmem:[#allocation2 + $0xbc] sm:$0x1]  ;;  %v7329_v37 = vld [vmem:[#allocation2 + $0x64] sm:$0xf] }
 0x2c0   : > { %v7503_v21 = vor.u32 %v7502_v35, %v7499_v4  ;;  %v7513_v38 = vor.u32 %v7512_v19, %v7508_v9  ;;  %v6357_v30 = vadd.f32 %v18492_v22, %v6254_v57  ;;  %v7521_v24 = vshrl.u32 %v7325_v12, 16  ;;  %v16086_v59 = vld [vmem:[#allocation2 + $0xa8] sm:$0xff]  }
 0x2c1   : > { %v14583_v40 = vpack.c.bf16 %v6386_v3, %v6386_v3  ;;  %v6355_v32 = vadd.f32 %v18492_v22, %v6252_v18  ;;  %v7524_v25 = vshll.u32 %v7325_v12, 16  ;;  %15525 = vmatmul.mubr.bf16.gmra.mxu0 %v14136_v39  ;;  %v7530_v41 = vshll.u32 %v7326_v46, 16  ;;  %v7330_v49 = vld [vmem:[#allocation2 + $0x68] sm:$0x1]  ;;  %v7331_v39 = vld [vmem:[#allocation2 + $0x6c] sm:$0xf] }
 0x2c2   : > { %v7504_v8 = vrot.slane %v7503_v21, 4  ;;  %v7514_v26 = vrot.slane %v7513_v38, 4  ;;  %v6389_v20 = vmax.f32 %v6357_v30, 0.0  ;;  %v7523_v1 = vrot.slane %v7521_v24, 4  ;;  %v16084_v54 = vld [vmem:[#allocation2 + $0x9c] sm:$0xff]  }
 0x2c3   : > { %v6725_v52 = vshrl.u32 %v14583_v40, 16  ;;  %v6728_v51 = vshll.u32 %v14583_v40, 16  ;;  %v6387_v48 = vmax.f32 %v6355_v32, 0.0  ;;  %v7526_v22 = vrot.slane %v7524_v25, 5  ;;  %15493 = vmatmul.mubr.bf16.gmra.mxu1 %v16084_v54  ;;  %v7335_v54 = vld [vmem:[#allocation2 + $0x7c] sm:$0xf] }
 0x2c4   : > { %v7509_v27 = vsel %vm16415_vm11, %v7504_v8, %v7508_v9  ;;  %v7519_v61 = vsel %vm16415_vm11, %v7514_v26, %v7518_v0  ;;  %v14586_v43 = vpack.c.bf16 %v6389_v20, %v6389_v20  ;;  %v7532_v58 = vrot.slane %v7530_v41, 5  ;;  %15496 = vmatprep.mubr.bf16.mxu1 %v16086_v59  ;;  %v7332_v8 = vld [vmem:[#allocation2 + $0x70] sm:$0xf]  ;;  %v7333_v20 = vld [vmem:[#allocation2 + $0x74] sm:$0x1] }
 0x2c5   : > { %v6727_v10 = vrot.slane %v6725_v52, 7  ;;  %v14137_v44 = vcombine.low %v7509_v27, %v7519_v61  ;;  %v14584_v47 = vpack.c.bf16 %v6387_v48, %v6387_v48  ;;  %v7527_v14 = vor.u32 %v7526_v22, %v7523_v1  ;;  %v7334_v52 = vld [vmem:[#allocation2 + $0x78] sm:$0xf]  ;;  %v7336_v22 = vld [vmem:[#allocation2 + $0x80] sm:$0x1] }
 0x2c6   : > { %v6750_v7 = vshrl.u32 %v14586_v43, 16  ;;  %v6753_v45 = vshll.u32 %v14586_v43, 16  ;;  %v7534_v55 = vshrl.u32 %v7326_v46, 16  ;;  %v7540_v6 = vshll.u32 %v7327_v36, 16 }
 0x2c7   : > { %v6730_v42 = vor.u32 %v6728_v51, %v6727_v10  ;;  %v6731_v28 = vrot.slane %v6727_v10, 4  ;;  %15528 = vmatprep.mubr.bf16.mxu0 %v14137_v44  ;;  %v6733_v17 = vshrl.u32 %v14584_v47, 16  ;;  %v6736_v34 = vshll.u32 %v14584_v47, 16 }
 0x2c8   : > { %v6752_v2 = vrot.slane %v6750_v7, 7  ;;  %v7528_v53 = vrot.slane %v7527_v14, 4  ;;  %v7536_v33 = vrot.slane %v7534_v55, 4  ;;  %v7545_v35 = vshrl.u32 %v7328_v11, 16 }
 0x2c9   : > { %v6905_v62 = vsel %vm16399_vm10, %v6730_v42, %v6904_v63  ;;  %v6735_v4 = vrot.slane %v6733_v17, 7  ;;  %v7548_v9 = vshll.u32 %v7328_v11, 16  ;;  %v7542_v18 = vrot.slane %v7540_v6, 5 }
 0x2ca   : > { %6906 = vst [vmem:[#allocation2 + $0xb4] sm:$0xf] %v6905_v62  ;;  %v6755_v19 = vor.u32 %v6753_v45, %v6752_v2  ;;  %v6757_v57 = vrot.slane %v6752_v2, 4  ;;  %v7533_v12 = vsel %vm16415_vm11, %v7528_v53, %v7532_v58  ;;  %v7537_v60 = vor.u32 %v7536_v33, %v7532_v58  ;;  %v7337_v45 = vld [vmem:[#allocation2 + $0x84] sm:$0xf] }
 0x2cb   : > { %v6738_v3 = vor.u32 %v6736_v34, %v6735_v4  ;;  %v6740_v0 = vrot.slane %v6735_v4, 4  ;;  %v7547_v46 = vrot.slane %v7545_v35, 4  ;;  %v7550_v30 = vrot.slane %v7548_v9, 5  ;;  %v7339_v9 = vld [vmem:[#allocation2 + $0x8c] sm:$0x1] }
 0x2cc   : > { %v6756_v56 = vsel %vm16389_vm9, %v6748_v15, %v6755_v19  ;;  %v6916_v21 = vsel %vm16350_vm2, %v6757_v57, %v6915_v23  ;;  %v7538_v38 = vrot.slane %v7537_v60, 4  ;;  %v7554_v24 = vshll.u32 %v7329_v37, 16 }
 0x2cd   : > { %6914 = vst [vmem:[#allocation2 + $0xc4] sm:$0xf] %v6756_v56  ;;  %6917 = vst [vmem:[#allocation2 + $0xc8] sm:$0x1] %v6916_v21  ;;  %v6739_v40 = vsel %vm16389_vm9, %v6731_v28, %v6738_v3  ;;  %v6909_v32 = vsel %vm16350_vm2, %v6740_v0, %v6908_v13  ;;  %v7558_v25 = vshrl.u32 %v7329_v37, 16  ;;  %v7551_v15 = vor.u32 %v7550_v30, %v7547_v46 }
 0x2ce   : > { %6910 = vst [vmem:[#allocation2 + $0xbc] sm:$0x1] %v6909_v32  ;;  %6907 = vst [vmem:[#allocation2 + $0xb8] sm:$0xf] %v6739_v40  ;;  %v7543_v5 = vsel %vm16415_vm11, %v7538_v38, %v7542_v18  ;;  %v7564_v26 = vshll.u32 %v7330_v49, 16  ;;  %v7569_v41 = vshrl.u32 %v7331_v39, 16 }
 0x2cf   : > { %v14138_v51 = vcombine.low %v7533_v12, %v7543_v5  ;;  %v7556_v48 = vrot.slane %v7554_v24, 5  ;;  %v7560_v16 = vrot.slane %v7558_v25, 4  ;;  %v7572_v1 = vshll.u32 %v7331_v39, 16  ;;  %v7338_v28 = vld [vmem:[#allocation2 + $0x88] sm:$0xf] }
 0x2d0   : > { %v7552_v31 = vrot.slane %v7551_v15, 4  ;;  %v7566_v27 = vrot.slane %v7564_v26, 5  ;;  %v7571_v61 = vrot.slane %v7569_v41, 4  ;;  %v7578_v43 = vshll.u32 %v7332_v8, 16  ;;  %v7340_v3 = vld [vmem:[#allocation2 + $0x90] sm:$0xf] }
 0x2d1   : > { %15529 = vmatmul.mubr.bf16.gmra.mxu0 %v14138_v51  ;;  %v7561_v59 = vor.u32 %v7560_v16, %v7556_v48  ;;  %v7574_v10 = vrot.slane %v7572_v1, 5  ;;  %v7582_v63 = vshrl.u32 %v7332_v8, 16  ;;  %v7588_v44 = vshll.u32 %v7333_v20, 16  ;;  %v7341_v56 = vld [vmem:[#allocation2 + $0x94] sm:$0xf] }
 0x2d2   : > { %v7557_v47 = vsel %vm16415_vm11, %v7552_v31, %v7556_v48  ;;  %v7580_v36 = vrot.slane %v7578_v43, 5  ;;  %v7593_v58 = vshrl.u32 %v7334_v52, 16  ;;  %v7596_v7 = vshll.u32 %v7334_v52, 16  ;;  %v7342_v20 = vld [vmem:[#allocation2 + $0x98] sm:$0x1] }
 0x2d3   : > { %v7562_v14 = vrot.slane %v7561_v59, 4  ;;  %v7575_v55 = vor.u32 %v7574_v10, %v7571_v61  ;;  %v7584_v11 = vrot.slane %v7582_v63, 4  ;;  %v7590_v42 = vrot.slane %v7588_v44, 5  ;;  %v7343_v1 = vld [vmem:[#allocation2 + $0x9c] sm:$0xf] }
 0x2d4   : > { %v7595_v23 = vrot.slane %v7593_v58, 4  ;;  %v7598_v17 = vrot.slane %v7596_v7, 5  ;;  %v7602_v34 = vshll.u32 %v7335_v54, 16  ;;  %v7606_v2 = vshrl.u32 %v7335_v54, 16  ;;  %v7344_v43 = vld [vmem:[#allocation2 + $0xa0] sm:$0xf] }
 0x2d5   : > { %v7567_v13 = vsel %vm16415_vm11, %v7562_v14, %v7566_v27  ;;  %v7576_v53 = vrot.slane %v7575_v55, 4  ;;  %v7585_v33 = vor.u32 %v7584_v11, %v7580_v36  ;;  %v7612_v6 = vshll.u32 %v7336_v22, 16  ;;  %v16089_v37 = vld [vmem:[#allocation2 + $0xb4] sm:$0xff]   ;;  %v7345_v55 = vld [vmem:[#allocation2 + $0xa4] sm:$0x1] }
 0x2d6   : > { %v14139_v62 = vcombine.low %v7557_v47, %v7567_v13  ;;  %v7599_v4 = vor.u32 %v7598_v17, %v7595_v23  ;;  %v7604_v49 = vrot.slane %v7602_v34, 5  ;;  %v7608_v35 = vrot.slane %v7606_v2, 4  ;;  %15497 = vmatmul.mubr.bf16.gmra.mxu1 %v16089_v37  ;;  %v7347_v2 = vld [vmem:[#allocation2 + $0xac] sm:$0xf]  ;;  %v8122_v37 = vld [vmem:[#allocation2] sm:$0xe] }
 0x2d7   : > { %v7581_v19 = vsel %vm16415_vm11, %v7576_v53, %v7580_v36  ;;  %v7586_v57 = vrot.slane %v7585_v33, 4  ;;  %v7614_v12 = vrot.slane %v7612_v6, 5  ;;  %v7617_v60 = vshrl.u32 %v7337_v45, 16 }
 0x2d8   : > { %15532 = vmatprep.mubr.bf16.mxu0 %v14139_v62  ;;  %v7600_v0 = vrot.slane %v7599_v4, 4  ;;  %v7609_v18 = vor.u32 %v7608_v35, %v7604_v49  ;;  %v7620_v46 = vshll.u32 %v7337_v45, 16  ;;  %v7626_v39 = vshll.u32 %v7338_v28, 16 }
 0x2d9   : > { %v7591_v21 = vsel %vm16415_vm11, %v7586_v57, %v7590_v42  ;;  %v7619_v38 = vrot.slane %v7617_v60, 4  ;;  %v7630_v30 = vshrl.u32 %v7338_v28, 16  ;;  %v7636_v40 = vshll.u32 %v7339_v9, 16  ;;  %v7346_v42 = vld [vmem:[#allocation2 + $0xa8] sm:$0xf] }
 0x2da   : > { %v14140_v32 = vcombine.low %v7581_v19, %v7591_v21  ;;  %v7605_v24 = vsel %vm16415_vm11, %v7600_v0, %v7604_v49  ;;  %v7610_v25 = vrot.slane %v7609_v18, 4  ;;  %v7622_v8 = vrot.slane %v7620_v46, 5  ;;  %v8123_v9 = vld [vmem:[#allocation2 + $0x4] sm:$0xf] }
 0x2db   : > { %v7628_v5 = vrot.slane %v7626_v39, 5  ;;  %v7632_v15 = vrot.slane %v7630_v30, 4  ;;  %v7638_v26 = vrot.slane %v7636_v40, 5  ;;  %v7641_v41 = vshrl.u32 %v7340_v3, 16 }
 0x2dc   : > { %15533 = vmatmul.mubr.bf16.gmra.mxu0 %v14140_v32  ;;  %v7615_v52 = vsel %vm16415_vm11, %v7610_v25, %v7614_v12  ;;  %v7623_v51 = vor.u32 %v7622_v8, %v7619_v38  ;;  %v7644_v48 = vshll.u32 %v7340_v3, 16  ;;  %v7650_v16 = vshll.u32 %v7341_v56, 16  ;;  %v7348_v12 = vld [vmem:[#allocation2 + $0xb0] sm:$0x1]  ;;  %v8125_v32 = vld [vmem:[#allocation2 + $0xc] sm:$0xe] }
 0x2dd   : > { %v14141_v54 = vcombine.low %v7605_v24, %v7615_v52  ;;  %v7633_v31 = vor.u32 %v7632_v15, %v7628_v5  ;;  %v7643_v27 = vrot.slane %v7641_v41, 4  ;;  %v7654_v61 = vshrl.u32 %v7341_v56, 16  ;;  %v8124_v56 = vld [vmem:[#allocation2 + $0x8] sm:$0x1]  ;;  %v8126_v24 = vld [vmem:[#allocation2 + $0x10] sm:$0xf] }
 0x2de   : > { %v7624_v22 = vrot.slane %v7623_v51, 4  ;;  %v7646_v59 = vrot.slane %v7644_v48, 5  ;;  %v7652_v10 = vrot.slane %v7650_v16, 5  ;;  %v7660_v63 = vshll.u32 %v7342_v20, 16  ;;  %v8127_v51 = vld [vmem:[#allocation2 + $0x14] sm:$0x1] }
 0x2df   : > { %15536 = vmatprep.mubr.bf16.mxu0 %v14141_v54  ;;  %v7634_v44 = vrot.slane %v7633_v31, 4  ;;  %v7656_v47 = vrot.slane %v7654_v61, 4  ;;  %v7665_v36 = vshrl.u32 %v7343_v1, 16  ;;  %v7668_v58 = vshll.u32 %v7343_v1, 16  ;;  %v7349_v31 = vld [vmem:[#allocation2 + $0xb4] sm:$0xf] }
 0x2e0   : > { %v7629_v7 = vsel %vm16415_vm11, %v7624_v22, %v7628_v5  ;;  %v7647_v45 = vor.u32 %v7646_v59, %v7643_v27  ;;  %v7662_v14 = vrot.slane %v7660_v63, 5  ;;  %v7674_v11 = vshll.u32 %v7344_v43, 16 }
 0x2e1   : > { %v7639_v28 = vsel %vm16415_vm11, %v7634_v44, %v7638_v26  ;;  %v7657_v23 = vor.u32 %v7656_v47, %v7652_v10  ;;  %v7667_v17 = vrot.slane %v7665_v36, 4  ;;  %v7670_v34 = vrot.slane %v7668_v58, 5  ;;  %v7351_v58 = vld [vmem:[#allocation2 + $0xbc] sm:$0x1] }
 0x2e2   : > { %v14142_v13 = vcombine.low %v7629_v7, %v7639_v28  ;;  %v7648_v53 = vrot.slane %v7647_v45, 4  ;;  %v7676_v33 = vrot.slane %v7674_v11, 5  ;;  %v7678_v6 = vshrl.u32 %v7344_v43, 16  ;;  %v8128_v11 = vld [vmem:[#allocation2 + $0x18] sm:$0xe] }
 0x2e3   : > { %v7658_v62 = vrot.slane %v7657_v23, 4  ;;  %v7671_v4 = vor.u32 %v7670_v34, %v7667_v17  ;;  %v7684_v49 = vshll.u32 %v7345_v55, 16  ;;  %v7689_v35 = vshrl.u32 %v7346_v42, 16 }
 0x2e4   : > { %15537 = vmatmul.mubr.bf16.gmra.mxu0 %v14142_v13  ;;  %v7653_v19 = vsel %vm16415_vm11, %v7648_v53, %v7652_v10  ;;  %v7680_v57 = vrot.slane %v7678_v6, 4  ;;  %v7692_v60 = vshll.u32 %v7346_v42, 16  ;;  %v7698_v3 = vshll.u32 %v7347_v2, 16  ;;  %v7350_v10 = vld [vmem:[#allocation2 + $0xb8] sm:$0xf] }
 0x2e5   : > { %v7663_v0 = vsel %vm16415_vm11, %v7658_v62, %v7662_v14  ;;  %v7672_v18 = vrot.slane %v7671_v4, 4  ;;  %v7686_v46 = vrot.slane %v7684_v49, 5  ;;  %v7691_v39 = vrot.slane %v7689_v35, 4  ;;  %v8129_v42 = vld [vmem:[#allocation2 + $0x1c] sm:$0xf]  ;;  %v16097_v62 = vld [vmem:[%s20316_s1 + $0x370] sm:$0xff]  }
 0x2e6   : > { %v14143_v21 = vcombine.low %v7653_v19, %v7663_v0  ;;  %v7681_v38 = vor.u32 %v7680_v57, %v7676_v33  ;;  %v7694_v30 = vrot.slane %v7692_v60, 5  ;;  %v7700_v40 = vrot.slane %v7698_v3, 5  ;;  %v8132_v19 = vld [vmem:[#allocation2 + $0x28] sm:$0xf]  ;;  %v8133_v57 = vld [vmem:[#allocation2 + $0x2c] sm:$0x1] }
 0x2e7   : > { %v7677_v25 = vsel %vm16415_vm11, %v7672_v18, %v7676_v33  ;;  %v7702_v8 = vshrl.u32 %v7347_v2, 16  ;;  %v7708_v5 = vshll.u32 %v7348_v12, 16  ;;  %v14155_v15 = vrot.slane %v8122_v37, 9  ;;  %v8130_v2 = vld [vmem:[#allocation2 + $0x20] sm:$0x1] }
 0x2e8   : > { %15540 = vmatprep.mubr.bf16.mxu0 %v14143_v21  ;;  %v7682_v26 = vrot.slane %v7681_v38, 4  ;;  %v7695_v20 = vor.u32 %v7694_v30, %v7691_v39  ;;  %v8220_v41 = vrot.slane %v8123_v9, 5  ;;  %v8223_v52 = vrot.slane %v8124_v56, 5  ;;  %v8131_v37 = vld [vmem:[#allocation2 + $0x24] sm:$0xe]  ;;  %v16169_v30 = vld [vmem:[%s20316_s1 + $0x378] sm:$0xff]  }
 0x2e9   : > { %v7704_v48 = vrot.slane %v7702_v8, 4  ;;  %v7710_v16 = vrot.slane %v7708_v5, 5  ;;  %v14156_v1 = vrot.slane %v8125_v32, 9  ;;  %v8227_v54 = vrot.slane %v8126_v24, 5  ;;  %v8134_v0 = vld [vmem:[#allocation2 + $0x30] sm:$0xe] }
 0x2ea   : > { %v7687_v27 = vsel %vm16415_vm11, %v7682_v26, %v7686_v46  ;;  %v7696_v61 = vrot.slane %v7695_v20, 4  ;;  %v8221_v22 = vsel %vm16775_vm14, %v14155_v15, %v8220_v41  ;;  %v8222_v59 = vrot.slane %v8220_v41, 4  ;;  %v8135_v18 = vld [vmem:[#allocation2 + $0x34] sm:$0xf]  ;;  %v16100_v20 = vld [vmem:[%s20316_s1 + $0x368] sm:$0xff]  }
 0x2eb   : > { %v14144_v63 = vcombine.low %v7677_v25, %v7687_v27  ;;  %v7705_v44 = vor.u32 %v7704_v48, %v7700_v40  ;;  %v8228_v47 = vsel %vm16775_vm14, %v14156_v1, %v8227_v54  ;;  %v8229_v36 = vrot.slane %v8227_v54, 4  ;;  %v8136_v25 = vld [vmem:[#allocation2 + $0x38] sm:$0x1]  ;;  %v8138_v1 = vld [vmem:[#allocation2 + $0x40] sm:$0xf] }
 0x2ec   : > { %v7701_v7 = vsel %vm16415_vm11, %v7696_v61, %v7700_v40  ;;  %v8224_v45 = vsel %vm16775_vm14, %v8222_v59, %v8223_v52  ;;  %v8230_v14 = vrot.slane %v8127_v51, 5  ;;  %v7713_v55 = vshrl.u32 %v7349_v31, 16  ;;  %v8141_v59 = vld [vmem:[#allocation2 + $0x4c] sm:$0xf] }
 0x2ed   : > { %15541 = vmatmul.mubr.bf16.gmra.mxu0 %v14144_v63  ;;  %v7706_v28 = vrot.slane %v7705_v44, 4  ;;  %v14187_v23 = vcombine.low %v8221_v22, %v8224_v45  ;;  %v7716_v17 = vshll.u32 %v7349_v31, 16  ;;  %v7722_v34 = vshll.u32 %v7350_v10, 16  ;;  %v8139_v22 = vld [vmem:[#allocation2 + $0x44] sm:$0x1]  ;;  %v16095_v44 = vld [vmem:[#allocation2 + $0xc] sm:$0xff]  }
 0x2ee   : > { %v8231_v13 = vsel %vm16775_vm14, %v8229_v36, %v8230_v14  ;;  %v7715_v53 = vrot.slane %v7713_v55, 4  ;;  %v7726_v33 = vshrl.u32 %v7350_v10, 16  ;;  %v7732_v6 = vshll.u32 %v7351_v58, 16  ;;  %v8140_v58 = vld [vmem:[#allocation2 + $0x48] sm:$0xe] }
 0x2ef   : > { %v7711_v4 = vsel %vm16415_vm11, %v7706_v28, %v7710_v16  ;;  %15564 = vmatprep.mubr.bf16.mxu1 %v14187_v23  ;;  %v14188_v49 = vcombine.low %v8228_v47, %v8231_v13  ;;  %v7718_v35 = vrot.slane %v7716_v17, 5  ;;  %v7724_v9 = vrot.slane %v7722_v34, 5  ;;  %v8137_v16 = vld [vmem:[#allocation2 + $0x3c] sm:$0xe]  ;;  %v8143_v45 = vld [vmem:[#allocation2 + $0x54] sm:$0xe] }
 0x2f0   : > { %v14145_v12 = vcombine.low %v7701_v7, %v7711_v4  ;;  %v7728_v60 = vrot.slane %v7726_v33, 4  ;;  %v7734_v3 = vrot.slane %v7732_v6, 5  ;;  %v14157_v39 = vrot.slane %v8128_v11, 9  ;;  %v8142_v7 = vld [vmem:[#allocation2 + $0x50] sm:$0x1]  ;;  %v16103_v17 = vld [vmem:[%s20316_s1 + $0x360] sm:$0xff]  }
 0x2f1   : > { %15565 = vmatmul.mubr.bf16.vlgmr.msra.gmra.mxu1 %v14188_v49  ;;  %v7719_v46 = vor.u32 %v7718_v35, %v7715_v53  ;;  %v8234_v56 = vrot.slane %v8129_v42, 5  ;;  %v8237_v21 = vrot.slane %v8130_v2, 5  ;;  %v14158_v40 = vrot.slane %v8131_v37, 9  ;;  %v8144_v28 = vld [vmem:[#allocation2 + $0x58] sm:$0xf] }
 0x2f2   : > { %15544 = vmatprep.mubr.bf16.mxu0 %v14145_v12  ;;  %v7729_v38 = vor.u32 %v7728_v60, %v7724_v9  ;;  %15645 = vmatpush3.bf16.msra.mxu1 %v16169_v30  ;;  %v8241_v32 = vrot.slane %v8132_v19, 5  ;;  %v8244_v24 = vrot.slane %v8133_v57, 5  ;;  %v14159_v15 = vrot.slane %v8134_v0, 9  ;;  %v8145_v23 = vld [vmem:[#allocation2 + $0x5c] sm:$0x1] }
 0x2f3   : > { %v7720_v8 = vrot.slane %v7719_v46, 4  ;;  %v8236_v5 = vrot.slane %v8234_v56, 4  ;;  %15646 = vmatprep.subr.bf16.mxu1 %v16097_v62  ;;  %v8248_v26 = vrot.slane %v8135_v18, 5  ;;  %v8235_v52 = vsel %vm16775_vm14, %v14157_v39, %v8234_v56  ;;  %v8146_v53 = vld [vmem:[#allocation2 + $0x60] sm:$0xe] }
 0x2f4   : > { %v7730_v41 = vrot.slane %v7729_v38, 4  ;;  %v8242_v51 = vsel %vm16775_vm14, %v14158_v40, %v8241_v32  ;;  %v8243_v48 = vrot.slane %v8241_v32, 4  ;;  %v8251_v61 = vrot.slane %v8136_v25, 5  ;;  %v8147_v33 = vld [vmem:[#allocation2 + $0x64] sm:$0xf]  ;;  %v16106_v40 = vld [vmem:[%s20316_s1 + $0x358] sm:$0xff]  }
 0x2f5   : > { %v7725_v54 = vsel %vm16415_vm11, %v7720_v8, %v7724_v9  ;;  %v8238_v31 = vsel %vm16775_vm14, %v8236_v5, %v8237_v21  ;;  %v8250_v27 = vrot.slane %v8248_v26, 4  ;;  %v8249_v36 = vsel %vm16775_vm14, %v14159_v15, %v8248_v26  ;;  %v8148_v4 = vld [vmem:[#allocation2 + $0x68] sm:$0x1]  ;;  %v8149_v57 = vld [vmem:[#allocation2 + $0x6c] sm:$0xe] }
 0x2f6   : > { %v7735_v10 = vsel %vm16415_vm11, %v7730_v41, %v7734_v3  ;;  %v14189_v63 = vcombine.low %v8235_v52, %v8238_v31  ;;  %v8245_v47 = vsel %vm16775_vm14, %v8243_v48, %v8244_v24  ;;  %15647 = vmatpush3.bf16.msra.mxu1 %v16097_v62  ;;  %v8255_v42 = vrot.slane %v8138_v1, 5  ;;  %v8150_v12 = vld [vmem:[#allocation2 + $0x70] sm:$0xf]  ;;  %v8151_v46 = vld [vmem:[#allocation2 + $0x74] sm:$0x1]  ;;  %v16098_v24 = vld [vmem:[#allocation2 + $0x18] sm:$0xff]  }
 0x2f7   : > { %v14146_v14 = vcombine.low %v7725_v54, %v7735_v10  ;;  %v14190_v55 = vcombine.low %v8242_v51, %v8245_v47  ;;  %v8252_v11 = vsel %vm16775_vm14, %v8250_v27, %v8251_v61  ;;  %15648 = vmatprep.subr.bf16.mxu1 %v16100_v20  ;;  %v14160_v2 = vrot.slane %v8137_v16, 9  ;;  %v8152_v39 = vld [vmem:[#allocation2 + $0x78] sm:$0xe]  ;;  %v8153_v32 = vld [vmem:[#allocation2 + $0x7c] sm:$0xf]  ;;  %v16099_v41 = vld [vmem:[#allocation2 + $0x24] sm:$0xff]  }
 0x2f8   : > { %15568 = vmatprep.mubr.bf16.mxu1 %v14189_v63  ;;  %v14191_v34 = vcombine.low %v8249_v36, %v8252_v11  ;;  %v8262_v13 = vrot.slane %v8141_v59, 5  ;;  %v8257_v6 = vrot.slane %v8255_v42, 4  ;;  %v8258_v37 = vrot.slane %v8139_v22, 5  ;;  %v8154_v26 = vld [vmem:[#allocation2 + $0x80] sm:$0x1]  ;;  %v16109_v59 = vld [vmem:[%s20316_s1 + $0x350] sm:$0xff]  }
 0x2f9   : > { %15545 = vmatmul.mubr.bf16.gmra.mxu0 %v14146_v14  ;;  %15569 = vmatmul.mubr.bf16.gmra.mxu1 %v14190_v55  ;;  %v14161_v62 = vrot.slane %v8140_v58, 9  ;;  %v8256_v49 = vsel %vm16775_vm14, %v14160_v2, %v8255_v42  ;;  %v8265_v9 = vrot.slane %v8142_v7, 5  ;;  %v8269_v19 = vrot.slane %v8144_v28, 5  ;;  %v8156_v1 = vld [vmem:[#allocation2 + $0x88] sm:$0xf]  ;;  %v16113_v7 = vld [vmem:[%s20316_s1 + $0x3b0] sm:$0xff]  }
 0x2fa   : > { %15612 = vmatprep.mubr.bf16.mxu0 %v16095_v44  ;;  %15572 = vmatprep.mubr.bf16.mxu1 %v14191_v34  ;;  %v8264_v35 = vrot.slane %v8262_v13, 4  ;;  %v8259_v60 = vsel %vm16775_vm14, %v8257_v6, %v8258_v37  ;;  %v14162_v0 = vrot.slane %v8143_v45, 9  ;;  %v8276_v18 = vrot.slane %v8147_v33, 5  ;;  %v8158_v54 = vld [vmem:[#allocation2 + $0x90] sm:$0xe]  ;;  %v18692_v33 = vld [vmem:[%s20316_s1 + $0x348] sm:$0xff]  }
 0x2fb   : > { %v8263_v3 = vsel %vm16775_vm14, %v14161_v62, %v8262_v13  ;;  %15649 = vmatpush3.bf16.msra.mxu1 %v16100_v20  ;;  %v8271_v21 = vrot.slane %v8269_v19, 4  ;;  %v8272_v38 = vrot.slane %v8145_v23, 5  ;;  %v14163_v30 = vrot.slane %v8146_v53, 9  ;;  %v8155_v20 = vld [vmem:[#allocation2 + $0x84] sm:$0xe] }
 0x2fc   : > { %v8266_v56 = vsel %vm16775_vm14, %v8264_v35, %v8265_v9  ;;  %15650 = vmatprep.subr.bf16.mxu1 %v16103_v17  ;;  %v14192_v25 = vcombine.low %v8256_v49, %v8259_v60  ;;  %v18653_v8 = vsel %vm16775_vm14, %v14162_v0, %v8269_v19  ;;  %v8278_v5 = vrot.slane %v8276_v18, 4  ;;  %v8159_v10 = vld [vmem:[#allocation2 + $0x94] sm:$0xf]  ;;  %v8157_v58 = vld [vmem:[#allocation2 + $0x8c] sm:$0x1] }
 0x2fd   : > { %v8279_v15 = vrot.slane %v8148_v4, 5  ;;  %v14193_v52 = vcombine.low %v8263_v3, %v8266_v56  ;;  %v18657_v51 = vsel %vm16775_vm14, %v8271_v21, %v8272_v38  ;;  %v18661_v48 = vsel %vm16775_vm14, %v14163_v30, %v8276_v18  ;;  %v8160_v42 = vld [vmem:[#allocation2 + $0x98] sm:$0x1]  ;;  %v8161_v28 = vld [vmem:[#allocation2 + $0x9c] sm:$0xe]  ;;  %v16116_v9 = vld [vmem:[%s20316_s1 + $0x3a8] sm:$0xff]  }
 0x2fe   : > { %v8283_v16 = vrot.slane %v8150_v12, 5  ;;  %v14164_v27 = vrot.slane %v8149_v57, 9  ;;  %v8286_v61 = vrot.slane %v8151_v46, 5  ;;  %v8290_v22 = vrot.slane %v8153_v32, 5  ;;  %v8162_v13 = vld [vmem:[#allocation2 + $0xa0] sm:$0xf] }
 0x2ff   : > { %v18665_v31 = vsel %vm16775_vm14, %v8278_v5, %v8279_v15  ;;  %15651 = vmatpush3.bf16.msra.mxu1 %v16103_v17  ;;  %v14194_v63 = vcombine.low %v18653_v8, %v18657_v51  ;;  %v14165_v47 = vrot.slane %v8152_v39, 9  ;;  %v8293_v36 = vrot.slane %v8154_v26, 5  ;;  %v8163_v53 = vld [vmem:[#allocation2 + $0xa4] sm:$0x1]  ;;  %v8164_v6 = vld [vmem:[#allocation2 + $0xa8] sm:$0xe] }
 0x300   : > { %v8285_v44 = vrot.slane %v8283_v16, 4  ;;  %15652 = vmatprep.subr.bf16.mxu1 %v16106_v40  ;;  %v14195_v45 = vcombine.low %v18661_v48, %v18665_v31  ;;  %v18679_v14 = vsel %vm16775_vm14, %v14164_v27, %v8283_v16  ;;  %v8292_v55 = vrot.slane %v8290_v22, 4  ;;  %v8165_v35 = vld [vmem:[#allocation2 + $0xac] sm:$0xf]  ;;  %v8166_v3 = vld [vmem:[#allocation2 + $0xb0] sm:$0x1] }
 0x301   : > { %15613 = vmatmul.mubr.bf16.vlgmr.msra.gmra.mxu0 %v16098_v24  ;;  %15573 = vmatmul.mubr.bf16.gmra.mxu1 %v14192_v25  ;;  %v8297_v11 = vrot.slane %v8156_v1, 5  ;;  %v18687_v17 = vsel %vm16775_vm14, %v14165_v47, %v8290_v22  ;;  %v14166_v34 = vrot.slane %v8155_v20, 9  ;;  %v8304_v2 = vrot.slane %v8159_v10, 5  ;;  %v9166_v0 = vld [vmem:[#allocation2 + $0xc] sm:$0xf]  ;;  %v16101_v38 = vld [vmem:[#allocation2 + $0x30] sm:$0xff]  }
 0x302   : > { %15616 = vmatprep.mubr.bf16.mxu0 %v16099_v41  ;;  %15576 = vmatprep.mubr.bf16.mxu1 %v14193_v52  ;;  %v18683_v23 = vsel %vm16775_vm14, %v8285_v44, %v8286_v61  ;;  %v18696_v37 = vsel %vm16775_vm14, %v8292_v55, %v8293_v36  ;;  %v8300_v4 = vrot.slane %v8157_v58, 5  ;;  %v14167_v49 = vrot.slane %v8158_v54, 9  ;;  %v8168_v56 = vld [vmem:[#allocation2 + $0xb8] sm:$0xf]  ;;  %v9167_v21 = vld [vmem:[#allocation2 + $0x10] sm:$0xf] }
 0x303   : > { %15653 = vmatpush3.bf16.msra.mxu1 %v16106_v40  ;;  %v8299_v62 = vrot.slane %v8297_v11, 4  ;;  %15693 = vmatpush3.bf16.msra.mxu0 %v18524_v50  ;;  %v14196_v19 = vcombine.low %v18679_v14, %v18683_v23  ;;  %v18706_v57 = vsel %vm16775_vm14, %v14166_v34, %v8297_v11  ;;  %v8306_v12 = vrot.slane %v8304_v2, 4  ;;  %v8167_v25 = vld [vmem:[#allocation2 + $0xb4] sm:$0xe]  ;;  %v16102_v5 = vld [vmem:[#allocation2 + $0x3c] sm:$0xff]  }
 0x304   : > { %15654 = vmatprep.subr.bf16.mxu1 %v16109_v59  ;;  %v8307_v60 = vrot.slane %v8160_v42, 5  ;;  %15694 = vmatprep.subr.bf16.mxu0 %v16113_v7  ;;  %v14197_v50 = vcombine.low %v18687_v17, %v18696_v37  ;;  %v18716_v46 = vsel %vm16775_vm14, %v14167_v49, %v8304_v2  ;;  %v8311_v39 = vrot.slane %v8162_v13, 5  ;;  %v8169_v52 = vld [vmem:[#allocation2 + $0xbc] sm:$0x1]  ;;  %v16118_v27 = vld [vmem:[%s20316_s1 + $0x3a0] sm:$0xff]  }
 0x305   : > { %v18712_v18 = vsel %vm16775_vm14, %v8299_v62, %v8300_v4  ;;  %v14168_v40 = vrot.slane %v8161_v28, 9  ;;  %v8314_v32 = vrot.slane %v8163_v53, 5  ;;  %v8318_v24 = vrot.slane %v8165_v35, 5  ;;  %v16119_v22 = vld [vmem:[%s20316_s1 + $0x340] sm:$0xff]   ;;  %v9169_v58 = vld [vmem:[#allocation2 + $0x18] sm:$0xf] }
 0x306   : > { %v18720_v30 = vsel %vm16775_vm14, %v8306_v12, %v8307_v60  ;;  %v14198_v15 = vcombine.low %v18706_v57, %v18712_v18  ;;  %v8313_v26 = vrot.slane %v8311_v39, 4  ;;  %v14169_v20 = vrot.slane %v8164_v6, 9  ;;  %v9170_v55 = vld [vmem:[#allocation2 + $0x1c] sm:$0xf]  ;;  %v9171_v62 = vld [vmem:[#allocation2 + $0x20] sm:$0x1] }
 0x307   : > { %15655 = vmatpush3.bf16.msra.mxu1 %v16109_v59  ;;  %15695 = vmatpush3.bf16.msra.mxu0 %v16113_v7  ;;  %v8321_v41 = vrot.slane %v8166_v3, 5  ;;  %v14199_v16 = vcombine.low %v18716_v46, %v18720_v30  ;;  %v18728_v1 = vsel %vm16775_vm14, %v14168_v40, %v8311_v39  ;;  %v8320_v54 = vrot.slane %v8318_v24, 4  ;;  %v9168_v59 = vld [vmem:[#allocation2 + $0x14] sm:$0x1]  ;;  %v16121_v2 = vld [vmem:[%s20316_s1 + $0x398] sm:$0xff]  }
 0x308   : > { %15656 = vmatprep.subr.bf16.mxu1 %v18692_v33  ;;  %15696 = vmatprep.subr.bf16.mxu0 %v16116_v9  ;;  %v8325_v61 = vrot.slane %v8168_v56, 5  ;;  %v18742_v10 = vsel %vm16775_vm14, %v8313_v26, %v8314_v32  ;;  %v9215_v44 = vshrl.u32 %v9166_v0, 16  ;;  %v9218_v47 = vshll.u32 %v9166_v0, 16  ;;  %v18766_v53 = vld [vmem:[%s20316_s1 + $0x3f8] sm:$0xff]   ;;  %v9172_v35 = vld [vmem:[#allocation2 + $0x24] sm:$0xf] }
 0x309   : > { %15617 = vmatmul.mubr.bf16.gmra.mxu0 %v16101_v38  ;;  %15577 = vmatmul.mubr.bf16.gmra.mxu1 %v14194_v63  ;;  %v9224_v36 = vshll.u32 %v9167_v21, 16  ;;  %v14200_v7 = vcombine.low %v18728_v1, %v18742_v10  ;;  %v18751_v8 = vsel %vm16775_vm14, %v14169_v20, %v8318_v24  ;;  %v14170_v51 = vrot.slane %v8167_v25, 9  ;;  %v9173_v39 = vld [vmem:[#allocation2 + $0x28] sm:$0xf]  ;;  %v16105_v56 = vld [vmem:[#allocation2 + $0x54] sm:$0xff]  }
 0x30a   : > { %15620 = vmatprep.mubr.bf16.mxu0 %v16102_v5  ;;  %15580 = vmatprep.mubr.bf16.mxu1 %v14195_v45  ;;  %v8328_v63 = vrot.slane %v8169_v52, 5  ;;  %v18755_v11 = vsel %vm16775_vm14, %v8320_v54, %v8321_v41  ;;  %v8327_v42 = vrot.slane %v8325_v61, 4  ;;  %v9217_v48 = vrot.slane %v9215_v44, 4  ;;  %v9174_v24 = vld [vmem:[#allocation2 + $0x2c] sm:$0x1]  ;;  %v16123_v5 = vld [vmem:[%s20316_s1 + $0x390] sm:$0xff]  }
 0x30b   : > { %15657 = vmatpush3.bf16.msra.mxu1 %v18692_v33  ;;  %15697 = vmatpush3.bf16.msra.mxu0 %v16116_v9  ;;  %v9220_v31 = vrot.slane %v9218_v47, 5  ;;  %v18758_v45 = vrot.slane %v9224_v36, 5  ;;  %v9228_v28 = vshrl.u32 %v9167_v21, 16  ;;  %v9234_v34 = vshll.u32 %v9168_v59, 16  ;;  %v16104_v9 = vld [vmem:[#allocation2 + $0x48] sm:$0xff]  }
 0x30c   : > { %15698 = vmatprep.subr.bf16.mxu0 %v16118_v27  ;;  %15658 = vmatprep.subr.bf16.mxu1 %v16119_v22  ;;  %v9239_v13 = vshrl.u32 %v9169_v58, 16  ;;  %v18770_v33 = vsel %vm16775_vm14, %v14170_v51, %v8325_v61  ;;  %v9242_v4 = vshll.u32 %v9169_v58, 16  ;;  %v9248_v49 = vshll.u32 %v9170_v55, 16  ;;  %v18785_v52 = vld [vmem:[#allocation2 + $0xc] sm:$0xe] }
 0x30d   : > { %v9221_v6 = vor.u32 %v9220_v31, %v9217_v48  ;;  %v14201_v12 = vcombine.low %v18751_v8, %v18755_v11  ;;  %v9230_v60 = vrot.slane %v9228_v28, 4  ;;  %v9252_v0 = vshrl.u32 %v9170_v55, 16  ;;  %v9985_v58 = vld [vmem:[#allocation2 + $0x10] sm:$0xf]  ;;  %v9986_v17 = vld [vmem:[#allocation2 + $0x14] sm:$0x1] }
 0x30e   : > { %v9241_v3 = vrot.slane %v9239_v13, 4  ;;  %v18776_v21 = vsel %vm16775_vm14, %v8327_v42, %v8328_v63  ;;  %v9236_v38 = vrot.slane %v9234_v34, 5  ;;  %v9244_v40 = vrot.slane %v9242_v4, 5  ;;  %v16126_v63 = vld [vmem:[%s20316_s1 + $0x388] sm:$0xff]   ;;  %v9175_v37 = vld [vmem:[#allocation2 + $0x30] sm:$0xf] }
 0x30f   : > { %15699 = vmatpush3.bf16.msra.mxu0 %v16118_v27  ;;  %15659 = vmatpush3.bf16.msra.mxu1 %v16119_v22  ;;  %v18778_v32 = vrot.slane %v9248_v49, 5  ;;  %v9231_v25 = vor.u32 %v9230_v60, %v18758_v45  ;;  %v9254_v26 = vrot.slane %v9252_v0, 4  ;;  %v9263_v20 = vshrl.u32 %v9172_v35, 16  ;;  %v16107_v31 = vld [vmem:[#allocation2 + $0x60] sm:$0xff]   ;;  %v9988_v57 = vld [vmem:[#allocation2 + $0x1c] sm:$0xf] }
 0x310   : > { %15700 = vmatprep.subr.bf16.mxu0 %v16121_v2  ;;  %15740 = vmatprep.subr.bf16.mxu1 %v18766_v53  ;;  %v9266_v41 = vshll.u32 %v9172_v35, 16  ;;  %v9222_v54 = vrot.slane %v9221_v6, 4  ;;  %v9245_v27 = vor.u32 %v9244_v40, %v9241_v3  ;;  %v9258_v61 = vshll.u32 %v9171_v62, 16  ;;  %v9176_v6 = vld [vmem:[#allocation2 + $0x34] sm:$0xf]  ;;  %v16108_v62 = vld [vmem:[#allocation2 + $0x6c] sm:$0xff]  }
 0x311   : > { %15621 = vmatmul.mubr.bf16.gmra.mxu0 %v16104_v9  ;;  %15581 = vmatmul.mubr.bf16.gmra.mxu1 %v14196_v19  ;;  %v9272_v22 = vshll.u32 %v9173_v39, 16  ;;  %v9232_v59 = vrot.slane %v9231_v25, 4  ;;  %v9255_v44 = vor.u32 %v9254_v26, %v18778_v32  ;;  %v9265_v47 = vrot.slane %v9263_v20, 4  ;;  %v16127_v60 = vld [vmem:[%s20316_s1 + $0x380] sm:$0xff]   ;;  %v9177_v3 = vld [vmem:[#allocation2 + $0x38] sm:$0x1] }
 0x312   : > { %15624 = vmatprep.mubr.bf16.mxu0 %v16105_v56  ;;  %15584 = vmatprep.mubr.bf16.mxu1 %v14197_v50  ;;  %v9268_v36 = vrot.slane %v9266_v41, 5  ;;  %v14202_v51 = vcombine.low %v18770_v33, %v18776_v21  ;;  %v9246_v14 = vrot.slane %v9245_v27, 4  ;;  %v9276_v19 = vshrl.u32 %v9173_v39, 16  ;;  %v9179_v26 = vld [vmem:[#allocation2 + $0x40] sm:$0xf] }
 0x313   : > { %15701 = vmatpush3.bf16.msra.mxu0 %v16121_v2  ;;  %v18796_v23 = vrot.slane %v9272_v22, 5  ;;  %v9237_v50 = vsel %vm16415_vm11, %v9232_v59, %v9236_v38  ;;  %v9256_v55 = vrot.slane %v9255_v44, 4  ;;  %v9282_v48 = vshll.u32 %v9174_v24, 16 }
 0x314   : > { %15702 = vmatprep.subr.bf16.mxu0 %v16123_v5  ;;  %v9269_v42 = vor.u32 %v9268_v36, %v9265_v47  ;;  %v9227_v28 = vsel %vm16415_vm11, %v9222_v54, %v18758_v45  ;;  %v9260_v34 = vrot.slane %v9258_v61, 5  ;;  %v9278_v2 = vrot.slane %v9276_v19, 4  ;;  %v9178_v45 = vld [vmem:[#allocation2 + $0x3c] sm:$0xf]  ;;  %v9180_v54 = vld [vmem:[#allocation2 + $0x44] sm:$0x1] }
 0x315   : > { %v14291_v13 = vrot.slane %v18785_v52, 9  ;;  %v18807_v4 = vcombine.low %v9227_v28, %v9237_v50  ;;  %v9251_v49 = vsel %vm16415_vm11, %v9246_v14, %v18778_v32  ;;  %v10082_v9 = vrot.slane %v9985_v58, 5  ;;  %v18842_v58 = vld [vmem:[%s20316_s1 + $0x438] sm:$0xff]   ;;  %v16112_v50 = vld [vmem:[#allocation2 + $0x84] sm:$0xff]  }
 0x316   : > { %v9270_v35 = vrot.slane %v9269_v42, 4  ;;  %v9261_v0 = vsel %vm16415_vm11, %v9256_v55, %v9260_v34  ;;  %v9279_v39 = vor.u32 %v9278_v2, %v18796_v23  ;;  %v9287_v56 = vshrl.u32 %v9175_v37, 16  ;;  %v16110_v14 = vld [vmem:[#allocation2 + $0x78] sm:$0xff]  }
 0x317   : > { %15703 = vmatpush3.bf16.msra.mxu0 %v16123_v5  ;;  %v9290_v38 = vshll.u32 %v9175_v37, 16  ;;  %v9284_v40 = vrot.slane %v9282_v48, 5  ;;  %v10084_v24 = vrot.slane %v10082_v9, 4  ;;  %v10085_v32 = vrot.slane %v9986_v17, 5  ;;  %v9987_v37 = vld [vmem:[#allocation2 + $0x18] sm:$0xe] }
 0x318   : > { %15704 = vmatprep.subr.bf16.mxu0 %v16126_v63  ;;  %v9296_v25 = vshll.u32 %v9176_v6, 16  ;;  %v9280_v20 = vrot.slane %v9279_v39, 4  ;;  %v9289_v5 = vrot.slane %v9287_v56, 4  ;;  %v9300_v52 = vshrl.u32 %v9176_v6, 16  ;;  %v9181_v39 = vld [vmem:[#allocation2 + $0x48] sm:$0xf] }
 0x319   : > { %15625 = vmatmul.mubr.bf16.gmra.mxu0 %v16107_v31  ;;  %15585 = vmatmul.mubr.bf16.gmra.mxu1 %v14198_v15  ;;  %v9292_v41 = vrot.slane %v9290_v38, 5  ;;  %v18824_v27 = vcombine.low %v9251_v49, %v9261_v0  ;;  %v9275_v61 = vsel %vm16415_vm11, %v9270_v35, %v18796_v23  ;;  %v9311_v59 = vshrl.u32 %v9178_v45, 16  ;;  %v9989_v31 = vld [vmem:[#allocation2 + $0x20] sm:$0x1]  ;;  %v9991_v49 = vld [vmem:[#allocation2 + $0x28] sm:$0xf] }
 0x31a   : > { %15628 = vmatprep.mubr.bf16.mxu0 %v16108_v62  ;;  %15588 = vmatprep.mubr.bf16.mxu1 %v14199_v16  ;;  %v9298_v22 = vrot.slane %v9296_v25, 5  ;;  %v18831_v18 = vsel %vm16775_vm14, %v10084_v24, %v10085_v32  ;;  %v9302_v44 = vrot.slane %v9300_v52, 4  ;;  %v9306_v47 = vshll.u32 %v9177_v3, 16  ;;  %v9990_v62 = vld [vmem:[#allocation2 + $0x24] sm:$0xe] }
 0x31b   : > { %15705 = vmatpush3.bf16.msra.mxu0 %v16126_v63  ;;  %v9293_v15 = vor.u32 %v9292_v41, %v9289_v5  ;;  %v9285_v46 = vsel %vm16415_vm11, %v9280_v20, %v9284_v40  ;;  %v18837_v30 = vsel %vm16775_vm14, %v14291_v13, %v10082_v9  ;;  %v9313_v16 = vrot.slane %v9311_v59, 4  ;;  %v9992_v0 = vld [vmem:[#allocation2 + $0x2c] sm:$0x1] }
 0x31c   : > { %15706 = vmatprep.subr.bf16.mxu0 %v16127_v60  ;;  %v9314_v36 = vshll.u32 %v9178_v45, 16  ;;  %v9303_v19 = vor.u32 %v9302_v44, %v9298_v22  ;;  %v9320_v63 = vshll.u32 %v9179_v26, 16  ;;  %v9324_v17 = vshrl.u32 %v9179_v26, 16  ;;  %v9182_v24 = vld [vmem:[#allocation2 + $0x4c] sm:$0xf] }
 0x31d   : > { %v9294_v23 = vrot.slane %v9293_v15, 4  ;;  %v14323_v55 = vcombine.low %v18837_v30, %v18831_v18  ;;  %v9330_v48 = vshll.u32 %v9180_v54, 16  ;;  %v10089_v28 = vrot.slane %v9988_v57, 5  ;;  %v9184_v26 = vld [vmem:[#allocation2 + $0x54] sm:$0xf] }
 0x31e   : > { %v9316_v42 = vrot.slane %v9314_v36, 5  ;;  %v9304_v34 = vrot.slane %v9303_v19, 4  ;;  %v9308_v2 = vrot.slane %v9306_v47, 5  ;;  %v9322_v13 = vrot.slane %v9320_v63, 5  ;;  %v9185_v15 = vld [vmem:[#allocation2 + $0x58] sm:$0xf] }
 0x31f   : > { %15707 = vmatpush3.bf16.msra.mxu0 %v16127_v60  ;;  %v9326_v6 = vrot.slane %v9324_v17, 4  ;;  %v18846_v35 = vcombine.low %v9275_v61, %v9285_v46  ;;  %v14292_v3 = vrot.slane %v9987_v37, 9  ;;  %v10091_v45 = vrot.slane %v10089_v28, 4  ;;  %v9186_v36 = vld [vmem:[#allocation2 + $0x5c] sm:$0x1] }
 0x320   : > { %v9317_v9 = vor.u32 %v9316_v42, %v9313_v16  ;;  %15788 = vmatprep.subr.bf16.mxu0 %v18842_v58  ;;  %v9299_v60 = vsel %vm16415_vm11, %v9294_v23, %v9298_v22  ;;  %v9309_v56 = vsel %vm16415_vm11, %v9304_v34, %v9308_v2  ;;  %v10092_v40 = vrot.slane %v9989_v31, 5  ;;  %v9993_v37 = vld [vmem:[#allocation2 + $0x30] sm:$0xe]  ;;  %v16117_v42 = vld [vmem:[#allocation2 + $0x9c] sm:$0xff]   ;;  %v9995_v2 = vld [vmem:[#allocation2 + $0x38] sm:$0x1] }
 0x321   : > { %15629 = vmatmul.mubr.bf16.gmra.mxu0 %v16110_v14  ;;  %15589 = vmatmul.mubr.bf16.gmra.mxu1 %v14200_v7  ;;  %v9327_v38 = vor.u32 %v9326_v6, %v9322_v13  ;;  %v9332_v25 = vrot.slane %v9330_v48, 5  ;;  %v18861_v1 = vsel %vm16775_vm14, %v14292_v3, %v10089_v28  ;;  %v10096_v10 = vrot.slane %v9991_v49, 5  ;;  %v9183_v7 = vld [vmem:[#allocation2 + $0x50] sm:$0x1]  ;;  %v9996_v3 = vld [vmem:[#allocation2 + $0x3c] sm:$0xe] }
 0x322   : > { %15632 = vmatprep.mubr.bf16.mxu0 %v16112_v50  ;;  %15592 = vmatprep.mubr.bf16.mxu1 %v14201_v12  ;;  %v9318_v32 = vrot.slane %v9317_v9, 4  ;;  %v18865_v5 = vsel %vm16775_vm14, %v10091_v45, %v10092_v40  ;;  %v9335_v41 = vshrl.u32 %v9181_v39, 16  ;;  %v9338_v52 = vshll.u32 %v9181_v39, 16  ;;  %v16115_v14 = vld [vmem:[#allocation2 + $0x90] sm:$0xff]  }
 0x323   : > { %v9328_v20 = vrot.slane %v9327_v38, 4  ;;  %v18867_v54 = vcombine.low %v9299_v60, %v9309_v56  ;;  %v14293_v8 = vrot.slane %v9990_v62, 9  ;;  %v10098_v11 = vrot.slane %v10096_v10, 4  ;;  %v9994_v50 = vld [vmem:[#allocation2 + $0x34] sm:$0xf] }
 0x324   : > { %v10099_v12 = vrot.slane %v9992_v0, 5  ;;  %v9323_v61 = vsel %vm16415_vm11, %v9318_v32, %v9322_v13  ;;  %v9337_v22 = vrot.slane %v9335_v41, 4  ;;  %v9340_v59 = vrot.slane %v9338_v52, 5  ;;  %v9997_v13 = vld [vmem:[#allocation2 + $0x40] sm:$0xf] }
 0x325   : > { %v9344_v57 = vshll.u32 %v9182_v24, 16  ;;  %v9333_v44 = vsel %vm16415_vm11, %v9328_v20, %v9332_v25  ;;  %v14324_v47 = vcombine.low %v18861_v1, %v18865_v5  ;;  %v9348_v16 = vshrl.u32 %v9182_v24, 16  ;;  %v9187_v56 = vld [vmem:[#allocation2 + $0x60] sm:$0xf]  ;;  %v9188_v52 = vld [vmem:[#allocation2 + $0x64] sm:$0xf] }
 0x326   : > { %v18877_v46 = vsel %vm16775_vm14, %v10098_v11, %v10099_v12  ;;  %v9341_v23 = vor.u32 %v9340_v59, %v9337_v22  ;;  %v9354_v63 = vshll.u32 %v9183_v7, 16  ;;  %v9359_v17 = vshrl.u32 %v9184_v26, 16  ;;  %v16128_v11 = vld [vmem:[%s20316_s1 + $0x3f0] sm:$0xff]   ;;  %v9189_v59 = vld [vmem:[#allocation2 + $0x68] sm:$0x1] }
 0x327   : > { %v9346_v19 = vrot.slane %v9344_v57, 5  ;;  %v18881_v48 = vsel %vm16775_vm14, %v14293_v8, %v10096_v10  ;;  %v9350_v31 = vrot.slane %v9348_v16, 4  ;;  %v9362_v28 = vshll.u32 %v9184_v26, 16  ;;  %v9998_v10 = vld [vmem:[#allocation2 + $0x44] sm:$0x1]  ;;  %v16122_v8 = vld [vmem:[#allocation2 + $0xb4] sm:$0xff]  }
 0x328   : > { %v9368_v34 = vshll.u32 %v9185_v15, 16  ;;  %v18886_v6 = vcombine.low %v9323_v61, %v9333_v44  ;;  %v9342_v62 = vrot.slane %v9341_v23, 4  ;;  %v9361_v49 = vrot.slane %v9359_v17, 4  ;;  %v9191_v23 = vld [vmem:[#allocation2 + $0x70] sm:$0xf] }
 0x329   : > { %15633 = vmatmul.mubr.bf16.gmra.mxu0 %v16115_v14  ;;  %15593 = vmatmul.mubr.bf16.gmra.mxu1 %v14202_v51  ;;  %v9372_v9 = vshrl.u32 %v9185_v15, 16  ;;  %v14325_v45 = vcombine.low %v18881_v48, %v18877_v46  ;;  %v9351_v0 = vor.u32 %v9350_v31, %v9346_v19  ;;  %v9364_v39 = vrot.slane %v9362_v28, 5  ;;  %v9190_v14 = vld [vmem:[#allocation2 + $0x6c] sm:$0xf] }
 0x32a   : > { %15636 = vmatprep.mubr.bf16.mxu0 %v16117_v42  ;;  %15660 = vmatprep.mubr.bf16.mxu1 %v18807_v4  ;;  %v18891_v60 = vrot.slane %v9368_v34, 5  ;;  %v9356_v38 = vrot.slane %v9354_v63, 5  ;;  %v9378_v21 = vshll.u32 %v9186_v36, 16  ;;  %v10103_v51 = vrot.slane %v9994_v50, 5  ;;  %v16120_v4 = vld [vmem:[#allocation2 + $0xa8] sm:$0xff]  }
 0x32b   : > { %v9374_v33 = vrot.slane %v9372_v9, 4  ;;  %v9347_v40 = vsel %vm16415_vm11, %v9342_v62, %v9346_v19  ;;  %v9352_v24 = vrot.slane %v9351_v0, 4  ;;  %v9365_v32 = vor.u32 %v9364_v39, %v9361_v49  ;;  %v9192_v62 = vld [vmem:[#allocation2 + $0x74] sm:$0x1]  ;;  %v16129_v39 = vld [vmem:[%s20316_s1 + $0x3e8] sm:$0xff]  }
 0x32c   : > { %v14294_v25 = vrot.slane %v9993_v37, 9  ;;  %v10105_v26 = vrot.slane %v10103_v51, 4  ;;  %v10106_v20 = vrot.slane %v9995_v2, 5  ;;  %v10110_v41 = vrot.slane %v9997_v13, 5  ;;  %v10008_v5 = vld [vmem:[#allocation2 + $0x6c] sm:$0xe] }
 0x32d   : > { %v9375_v7 = vor.u32 %v9374_v33, %v18891_v60  ;;  %v9357_v12 = vsel %vm16415_vm11, %v9352_v24, %v9356_v38  ;;  %v18901_v61 = vrot.slane %v9365_v32, 4  ;;  %v14295_v22 = vrot.slane %v9996_v3, 9 }
 0x32e   : > { %v9383_v57 = vshrl.u32 %v9187_v56, 16  ;;  %v9380_v44 = vrot.slane %v9378_v21, 5  ;;  %v18905_v16 = vsel %vm16775_vm14, %v14294_v25, %v10103_v51  ;;  %v18909_v36 = vsel %vm16775_vm14, %v10105_v26, %v10106_v20  ;;  %v16125_v51 = vld [vmem:[#allocation2 + $0xc0] sm:$0xff]  }
 0x32f   : > { %v9376_v15 = vrot.slane %v9375_v7, 4  ;;  %v18911_v19 = vcombine.low %v9347_v40, %v9357_v12  ;;  %v18915_v63 = vsel %vm16775_vm14, %v14295_v22, %v10110_v41  ;;  %v10112_v17 = vrot.slane %v10110_v41, 4  ;;  %v16130_v26 = vld [vmem:[%s20316_s1 + $0x3e0] sm:$0xff]   ;;  %v9193_v12 = vld [vmem:[#allocation2 + $0x78] sm:$0xf] }
 0x330   : > { %v10113_v37 = vrot.slane %v9998_v10, 5  ;;  %v9385_v50 = vrot.slane %v9383_v57, 4  ;;  %v9386_v42 = vshll.u32 %v9187_v56, 16  ;;  %v9392_v31 = vshll.u32 %v9188_v52, 16  ;;  %v10001_v10 = vld [vmem:[#allocation2 + $0x50] sm:$0x1] }
 0x331   : > { %15637 = vmatmul.mubr.bf16.gmra.mxu0 %v16120_v4  ;;  %15661 = vmatmul.mubr.bf16.vlgmr.msra.gmra.mxu1 %v18824_v27  ;;  %v9396_v28 = vshrl.u32 %v9188_v52, 16  ;;  %v9371_v34 = vsel %vm16415_vm11, %v18901_v61, %v18891_v60  ;;  %v14326_v2 = vcombine.low %v18905_v16, %v18909_v36  ;;  %v9402_v13 = vshll.u32 %v9189_v59, 16  ;;  %v10003_v4 = vld [vmem:[#allocation2 + $0x58] sm:$0xf] }
 0x332   : > { %15640 = vmatprep.mubr.bf16.mxu0 %v16122_v8  ;;  %15664 = vmatprep.mubr.bf16.mxu1 %v18846_v35  ;;  %v9407_v49 = vshrl.u32 %v9190_v14, 16  ;;  %v9381_v27 = vsel %vm16415_vm11, %v9376_v15, %v9380_v44  ;;  %v9388_v9 = vrot.slane %v9386_v42, 5  ;;  %v9394_v3 = vrot.slane %v9392_v31, 5  ;;  %v10000_v35 = vld [vmem:[#allocation2 + $0x4c] sm:$0xf]  ;;  %v18935_v21 = vpop.f32.mrf.mxu1 }
 0x333   : > { %15741 = vmatpush3.bf16.msra.mxu1 %v18766_v53  ;;  %v9398_v0 = vrot.slane %v9396_v28, 4  ;;  %v18933_v60 = vsel %vm16775_vm14, %v10112_v17, %v10113_v37  ;;  %v9410_v38 = vshll.u32 %v9190_v14, 16  ;;  %v9416_v33 = vshll.u32 %v9191_v23, 16  ;;  %v9999_v53 = vld [vmem:[#allocation2 + $0x48] sm:$0xe] }
 0x334   : > { %15742 = vmatprep.subr.bf16.mxu1 %v16128_v11  ;;  %v9409_v56 = vrot.slane %v9407_v49, 4  ;;  %v9389_v40 = vor.u32 %v9388_v9, %v9385_v50  ;;  %v9420_v32 = vshrl.u32 %v9191_v23, 16  ;;  %v9426_v25 = vshll.u32 %v9192_v62, 16  ;;  %v10002_v8 = vld [vmem:[#allocation2 + $0x54] sm:$0xe]  ;;  %v18942_v61 = vpop.f32.mrf.mxu1 }
 0x335   : > { %v9399_v24 = vor.u32 %v9398_v0, %v9394_v3  ;;  %v9404_v7 = vrot.slane %v9402_v13, 5  ;;  %v9412_v20 = vrot.slane %v9410_v38, 5  ;;  %v18940_v41 = vrot.slane %v9416_v33, 5  ;;  %v10004_v31 = vld [vmem:[#allocation2 + $0x5c] sm:$0x1] }
 0x336   : > { %v10117_v52 = vrot.slane %v10000_v35, 5  ;;  %v9390_v22 = vrot.slane %v9389_v40, 4  ;;  %v9422_v57 = vrot.slane %v9420_v32, 4  ;;  %v14296_v15 = vrot.slane %v9999_v53, 9  ;;  %v18952_v28 = vpop.f32.mrf.mxu1  ;;  %v9194_v49 = vld [vmem:[#allocation2 + $0x7c] sm:$0xf] }
 0x337   : > { %15743 = vmatpush3.bf16.msra.mxu1 %v16128_v11  ;;  %v9400_v59 = vrot.slane %v9399_v24, 4  ;;  %v18944_v44 = vcombine.low %v9371_v34, %v9381_v27  ;;  %v9413_v14 = vor.u32 %v9412_v20, %v9409_v56  ;;  %v10120_v17 = vrot.slane %v10001_v10, 5  ;;  %v9195_v27 = vld [vmem:[#allocation2 + $0x80] sm:$0x1]  ;;  %v9196_v0 = vld [vmem:[#allocation2 + $0x84] sm:$0xf] }
 0x338   : > { %15744 = vmatprep.subr.bf16.mxu1 %v16129_v39  ;;  %v10119_v23 = vrot.slane %v10117_v52, 4  ;;  %v14327_v37 = vcombine.low %v18915_v63, %v18933_v60  ;;  %v9423_v11 = vor.u32 %v9422_v57, %v18940_v41  ;;  %v9428_v42 = vrot.slane %v9426_v25, 5  ;;  %v9198_v53 = vld [vmem:[#allocation2 + $0x8c] sm:$0x1]  ;;  %v18975_v32 = vpop.f32.mrf.mxu1  ;;  %v16132_v20 = vld [vmem:[%s20316_s1 + $0x3d0] sm:$0xff]   ;;  %v16140_v60 = vld [vmem:[%s20316_s1 + $0x418] sm:$0xff]  }
 0x339   : > { %15641 = vmatmul.mubr.bf16.gmra.mxu0 %v16125_v51  ;;  %15665 = vmatmul.mubr.bf16.gmra.mxu1 %v18867_v54  ;;  %v9405_v50 = vsel %vm16415_vm11, %v9400_v59, %v9404_v7  ;;  %v9414_v34 = vrot.slane %v9413_v14, 4  ;;  %v18960_v54 = vsel %vm16775_vm14, %v14296_v15, %v10117_v52  ;;  %v10124_v62 = vrot.slane %v10003_v4, 5  ;;  %v16134_v52 = vld [vmem:[%s20316_s1 + $0x430] sm:$0xff]  }
 0x33a   : > { %15708 = vmatprep.mubr.bf16.mxu0 %v14323_v55  ;;  %15668 = vmatprep.mubr.bf16.mxu1 %v18886_v6  ;;  %v18964_v13 = vsel %vm16775_vm14, %v10119_v23, %v10120_v17  ;;  %v9395_v9 = vsel %vm16415_vm11, %v9390_v22, %v9394_v3  ;;  %v9424_v18 = vrot.slane %v9423_v11, 4  ;;  %v14297_v30 = vrot.slane %v10002_v8, 9  ;;  %v16131_v6 = vld [vmem:[%s20316_s1 + $0x3d8] sm:$0xff]   ;;  %v10005_v23 = vld [vmem:[#allocation2 + $0x60] sm:$0xe] }
 0x33b   : > { %15745 = vmatpush3.bf16.msra.mxu1 %v16129_v39  ;;  %v9431_v55 = vshrl.u32 %v9193_v12, 16  ;;  %v18971_v35 = vcombine.low %v9395_v9, %v9405_v50  ;;  %v14328_v56 = vcombine.low %v18960_v54, %v18964_v13  ;;  %v10126_v38 = vrot.slane %v10124_v62, 4  ;;  %v9197_v39 = vld [vmem:[#allocation2 + $0x88] sm:$0xf]  ;;  %v10006_v17 = vld [vmem:[#allocation2 + $0x64] sm:$0xf] }
 0x33c   : > { %15746 = vmatprep.subr.bf16.mxu1 %v16130_v26  ;;  %v9434_v33 = vshll.u32 %v9193_v12, 16  ;;  %v10127_v51 = vrot.slane %v10004_v31, 5  ;;  %v9440_v40 = vshll.u32 %v9194_v49, 16  ;;  %v9444_v24 = vshrl.u32 %v9194_v49, 16  ;;  %v10007_v31 = vld [vmem:[#allocation2 + $0x68] sm:$0x1] }
 0x33d   : > { %v9433_v3 = vrot.slane %v9431_v55, 4  ;;  %v9419_v25 = vsel %vm16415_vm11, %v9414_v34, %v18940_v41  ;;  %v9429_v10 = vsel %vm16415_vm11, %v9424_v18, %v9428_v42  ;;  %v18984_v4 = vsel %vm16775_vm14, %v14297_v30, %v10124_v62  ;;  %v10009_v30 = vld [vmem:[#allocation2 + $0x70] sm:$0xf]  ;;  %v9206_v54 = vld [vmem:[#allocation2 + $0xac] sm:$0xf] }
 0x33e   : > { %v9436_v7 = vrot.slane %v9434_v33, 5  ;;  %v9442_v8 = vrot.slane %v9440_v40, 5  ;;  %v9446_v12 = vrot.slane %v9444_v24, 4  ;;  %v9450_v41 = vshll.u32 %v9195_v27, 16  ;;  %v9199_v55 = vld [vmem:[#allocation2 + $0x90] sm:$0xf] }
 0x33f   : > { %15747 = vmatpush3.bf16.msra.mxu1 %v16130_v26  ;;  %v9455_v22 = vshrl.u32 %v9196_v0, 16  ;;  %v18994_v59 = vsel %vm16775_vm14, %v10126_v38, %v10127_v51  ;;  %v9458_v15 = vshll.u32 %v9196_v0, 16  ;;  %v9464_v14 = vshll.u32 %v9197_v39, 16  ;;  %v19000_v34 = vpop.f32.mrf.mxu1  ;;  %v16135_v0 = vld [vmem:[%s20316_s1 + $0x3c8] sm:$0xff]  }
 0x340   : > { %v9437_v57 = vor.u32 %v9436_v7, %v9433_v3  ;;  %15748 = vmatprep.subr.bf16.mxu1 %v16131_v6  ;;  %v9447_v26 = vor.u32 %v9446_v12, %v9442_v8  ;;  %v9468_v11 = vshrl.u32 %v9197_v39, 16  ;;  %v9474_v42 = vshll.u32 %v9198_v53, 16  ;;  %v10010_v53 = vld [vmem:[#allocation2 + $0x74] sm:$0x1] }
 0x341   : > { %15709 = vmatmul.mubr.bf16.vlgmr.msra.gmra.mxu0 %v14324_v47  ;;  %15669 = vmatmul.mubr.bf16.gmra.mxu1 %v18911_v19  ;;  %v9457_v50 = vrot.slane %v9455_v22, 4  ;;  %v14275_v62 = vcombine.low %v9419_v25, %v9429_v10  ;;  %v9460_v27 = vrot.slane %v9458_v15, 5  ;;  %v19006_v1 = vrot.slane %v9464_v14, 5  ;;  %v19022_v51 = vpop.f32.mrf.mxu1  ;;  %v9200_v10 = vld [vmem:[#allocation2 + $0x94] sm:$0xf] }
 0x342   : > { %15712 = vmatprep.mubr.bf16.mxu0 %v14325_v45  ;;  %15672 = vmatprep.mubr.bf16.mxu1 %v18944_v44  ;;  %v9438_v49 = vrot.slane %v9437_v57, 4  ;;  %v9448_v47 = vrot.slane %v9447_v26, 4  ;;  %v9452_v19 = vrot.slane %v9450_v41, 5  ;;  %v9470_v9 = vrot.slane %v9468_v11, 4  ;;  %v16137_v57 = vld [vmem:[%s20316_s1 + $0x420] sm:$0xff]  }
 0x343   : > { %v10131_v18 = vrot.slane %v10006_v17, 5  ;;  %15749 = vmatpush3.bf16.msra.mxu1 %v16131_v6  ;;  %15789 = vmatpush3.bf16.msra.mxu0 %v18842_v58  ;;  %v14329_v46 = vcombine.low %v18984_v4, %v18994_v59  ;;  %v9461_v48 = vor.u32 %v9460_v27, %v9457_v50  ;;  %v19011_v45 = vrot.slane %v9474_v42, 5  ;;  %v16136_v6 = vld [vmem:[%s20316_s1 + $0x428] sm:$0xff]   ;;  %v9201_v26 = vld [vmem:[#allocation2 + $0x98] sm:$0x1] }
 0x344   : > { %v14298_v44 = vrot.slane %v10005_v23, 9  ;;  %15750 = vmatprep.subr.bf16.mxu1 %v16132_v20  ;;  %15790 = vmatprep.subr.bf16.mxu0 %v16134_v52  ;;  %v9453_v58 = vsel %vm16415_vm11, %v9448_v47, %v9452_v19  ;;  %v9471_v38 = vor.u32 %v9470_v9, %v19006_v1  ;;  %v10134_v39 = vrot.slane %v10007_v31, 5  ;;  %v9202_v50 = vld [vmem:[#allocation2 + $0x9c] sm:$0xf]  ;;  %v9203_v31 = vld [vmem:[#allocation2 + $0xa0] sm:$0xf] }
 0x345   : > { %v10133_v33 = vrot.slane %v10131_v18, 4  ;;  %v9443_v3 = vsel %vm16415_vm11, %v9438_v49, %v9442_v8  ;;  %v9462_v40 = vrot.slane %v9461_v48, 4  ;;  %v14299_v24 = vrot.slane %v10008_v5, 9  ;;  %v16138_v8 = vld [vmem:[%s20316_s1 + $0x3c0] sm:$0xff]   ;;  %v19049_v49 = vpop.f32.mrf.mxu1 }
 0x346   : > { %v10138_v25 = vrot.slane %v10009_v30, 5  ;;  %v9472_v7 = vrot.slane %v9471_v38, 4  ;;  %v9479_v41 = vshrl.u32 %v9199_v55, 16  ;;  %v9482_v22 = vshll.u32 %v9199_v55, 16  ;;  %v9204_v27 = vld [vmem:[#allocation2 + $0xa4] sm:$0x1] }
 0x347   : > { %v19028_v12 = vsel %vm16775_vm14, %v10133_v33, %v10134_v39  ;;  %15751 = vmatpush3.bf16.msra.mxu1 %v16132_v20  ;;  %15791 = vmatpush3.bf16.msra.mxu0 %v16134_v52  ;;  %v19036_v15 = vcombine.low %v9443_v3, %v9453_v58  ;;  %v19040_v14 = vsel %vm16775_vm14, %v14298_v44, %v10131_v18  ;;  %v10141_v17 = vrot.slane %v10010_v53, 5  ;;  %v10012_v18 = vld [vmem:[#allocation2 + $0x7c] sm:$0xf]  ;;  %v10013_v53 = vld [vmem:[#allocation2 + $0x80] sm:$0x1] }
 0x348   : > { %v10140_v23 = vrot.slane %v10138_v25, 4  ;;  %15752 = vmatprep.subr.bf16.mxu1 %v16135_v0  ;;  %15792 = vmatprep.subr.bf16.mxu0 %v16136_v6  ;;  %v9467_v20 = vsel %vm16415_vm11, %v9462_v40, %v19006_v1  ;;  %v9481_v52 = vrot.slane %v9479_v41, 4  ;;  %v9484_v11 = vrot.slane %v9482_v22, 5  ;;  %v19075_v30 = vld [vmem:[%s20316_s1 + $0x478] sm:$0xff]   ;;  %v10015_v3 = vld [vmem:[#allocation2 + $0x88] sm:$0xf] }
 0x349   : > { %15713 = vmatmul.mubr.bf16.gmra.mxu0 %v14326_v2  ;;  %15673 = vmatmul.mubr.bf16.gmra.mxu1 %v18971_v35  ;;  %v9488_v42 = vshll.u32 %v9200_v10, 16  ;;  %v9477_v16 = vsel %vm16415_vm11, %v9472_v7, %v19011_v45  ;;  %v14330_v36 = vcombine.low %v19040_v14, %v19028_v12  ;;  %v19061_v2 = vsel %vm16775_vm14, %v14299_v24, %v10138_v25  ;;  %v9205_v7 = vld [vmem:[#allocation2 + $0xa8] sm:$0xf]  ;;  %v16141_v41 = vld [vmem:[%s20316_s1 + $0x410] sm:$0xff]  }
 0x34a   : > { %15716 = vmatprep.mubr.bf16.mxu0 %v14327_v37  ;;  %15676 = vmatprep.mubr.bf16.mxu1 %v14275_v62  ;;  %v9492_v35 = vshrl.u32 %v9200_v10, 16  ;;  %v9485_v1 = vor.u32 %v9484_v11, %v9481_v52  ;;  %v9498_v47 = vshll.u32 %v9201_v26, 16  ;;  %v9503_v63 = vshrl.u32 %v9202_v50, 16 }
 0x34b   : > { %v19063_v5 = vrot.slane %v9488_v42, 5  ;;  %15753 = vmatpush3.bf16.msra.mxu1 %v16135_v0  ;;  %15793 = vmatpush3.bf16.msra.mxu0 %v16136_v6  ;;  %v19070_v37 = vsel %vm16775_vm14, %v10140_v23, %v10141_v17  ;;  %v9506_v19 = vshll.u32 %v9202_v50, 16  ;;  %v9512_v9 = vshll.u32 %v9203_v31, 16  ;;  %v10011_v0 = vld [vmem:[#allocation2 + $0x78] sm:$0xe]  ;;  %v19077_v6 = vpop.f32.mrf.mxu1 }
 0x34c   : > { %v9494_v62 = vrot.slane %v9492_v35, 4  ;;  %15794 = vmatprep.subr.bf16.mxu0 %v16137_v57  ;;  %15754 = vmatprep.subr.bf16.mxu1 %v16138_v8  ;;  %v9486_v48 = vrot.slane %v9485_v1, 4  ;;  %v9505_v45 = vrot.slane %v9503_v63, 4  ;;  %v9516_v44 = vshrl.u32 %v9203_v31, 16  ;;  %v10014_v50 = vld [vmem:[#allocation2 + $0x84] sm:$0xe] }
 0x34d   : > { %v9522_v55 = vshll.u32 %v9204_v27, 16  ;;  %v14277_v58 = vcombine.low %v9467_v20, %v9477_v16  ;;  %v9508_v33 = vrot.slane %v9506_v19, 5  ;;  %v9514_v39 = vrot.slane %v9512_v9, 5  ;;  %v10016_v20 = vld [vmem:[#allocation2 + $0x8c] sm:$0x1]  ;;  %v19093_v42 = vpop.f32.mrf.mxu1 }
 0x34e   : > { %v9495_v38 = vor.u32 %v9494_v62, %v19063_v5  ;;  %v14331_v40 = vcombine.low %v19061_v2, %v19070_v37  ;;  %v9500_v24 = vrot.slane %v9498_v47, 5  ;;  %v9518_v25 = vrot.slane %v9516_v44, 4  ;;  %v16145_v62 = vld [vmem:[%s20316_s1 + $0x408] sm:$0xff]  }
 0x34f   : > { %v10145_v10 = vrot.slane %v10012_v18, 5  ;;  %15795 = vmatpush3.bf16.msra.mxu0 %v16137_v57  ;;  %15755 = vmatpush3.bf16.msra.mxu1 %v16138_v8  ;;  %v9491_v22 = vsel %vm16415_vm11, %v9486_v48, %v19063_v5  ;;  %v9509_v17 = vor.u32 %v9508_v33, %v9505_v45  ;;  %v14300_v26 = vrot.slane %v10011_v0, 9  ;;  %v9208_v5 = vld [vmem:[#allocation2 + $0xb4] sm:$0xf]  ;;  %v9209_v45 = vld [vmem:[#allocation2 + $0xb8] sm:$0xf] }
 0x350   : > { %v9496_v23 = vrot.slane %v9495_v38, 4  ;;  %15796 = vmatprep.subr.bf16.mxu0 %v16140_v60  ;;  %15836 = vmatprep.subr.bf16.mxu1 %v19075_v30  ;;  %v9519_v57 = vor.u32 %v9518_v25, %v9514_v39  ;;  %v9524_v8 = vrot.slane %v9522_v55, 5  ;;  %v10148_v52 = vrot.slane %v10013_v53, 5 }
 0x351   : > { %15717 = vmatmul.mubr.bf16.gmra.mxu0 %v14328_v56  ;;  %15677 = vmatmul.mubr.bf16.gmra.mxu1 %v19036_v15  ;;  %v10152_v11 = vrot.slane %v10015_v3, 5  ;;  %v9510_v16 = vrot.slane %v9509_v17, 4  ;;  %v10147_v35 = vrot.slane %v10145_v10, 4  ;;  %v9527_v13 = vshrl.u32 %v9205_v7, 16 }
 0x352   : > { %15720 = vmatprep.mubr.bf16.mxu0 %v14329_v46  ;;  %15680 = vmatprep.mubr.bf16.mxu1 %v14277_v58  ;;  %v9501_v31 = vsel %vm16415_vm11, %v9496_v23, %v9500_v24  ;;  %v9520_v56 = vrot.slane %v9519_v57, 4  ;;  %v19102_v15 = vsel %vm16775_vm14, %v14300_v26, %v10145_v10  ;;  %v14301_v27 = vrot.slane %v10014_v50, 9  ;;  %v9207_v46 = vld [vmem:[#allocation2 + $0xb0] sm:$0x1]  ;;  %v9210_v58 = vld [vmem:[#allocation2 + $0xbc] sm:$0x1] }
 0x353   : > { %v10155_v1 = vrot.slane %v10016_v20, 5  ;;  %15797 = vmatpush3.bf16.msra.mxu0 %v16140_v60  ;;  %v14278_v47 = vcombine.low %v9491_v22, %v9501_v31  ;;  %v9515_v4 = vsel %vm16415_vm11, %v9510_v16, %v9514_v39  ;;  %v10154_v59 = vrot.slane %v10152_v11, 4  ;;  %v19111_v60 = vpop.f32.mrf.mxu1  ;;  %v19121_v24 = vld [vmem:[#allocation2 + $0x94] sm:$0xf]  ;;  %v16146_v23 = vld [vmem:[%s20316_s1 + $0x400] sm:$0xff]  }
 0x354   : > { %v9529_v63 = vrot.slane %v9527_v13, 4  ;;  %15798 = vmatprep.subr.bf16.mxu0 %v16141_v41  ;;  %v9525_v19 = vsel %vm16415_vm11, %v9520_v56, %v9524_v8  ;;  %v9530_v9 = vshll.u32 %v9205_v7, 16  ;;  %v9536_v18 = vshll.u32 %v9206_v54, 16  ;;  %v10017_v20 = vld [vmem:[#allocation2 + $0x90] sm:$0xe] }
 0x355   : > { %v9540_v48 = vshrl.u32 %v9206_v54, 16  ;;  %v14279_v44 = vcombine.low %v9515_v4, %v9525_v19  ;;  %v19115_v55 = vsel %vm16775_vm14, %v10147_v35, %v10148_v52  ;;  %v19119_v0 = vsel %vm16775_vm14, %v14301_v27, %v10152_v11  ;;  %v10019_v57 = vld [vmem:[#allocation2 + $0x98] sm:$0x1]  ;;  %v19133_v8 = vpop.f32.mrf.mxu1  ;;  %v10021_v13 = vld [vmem:[#allocation2 + $0xa0] sm:$0xf] }
 0x356   : > { %v9551_v38 = vshrl.u32 %v9208_v5, 16  ;;  %v9532_v33 = vrot.slane %v9530_v9, 5  ;;  %v9538_v39 = vrot.slane %v9536_v18, 5  ;;  %v9546_v3 = vshll.u32 %v9207_v46, 16  ;;  %v9211_v27 = vld [vmem:[#allocation2 + $0xc0] sm:$0xf] }
 0x357   : > { %v9542_v53 = vrot.slane %v9540_v48, 4  ;;  %15799 = vmatpush3.bf16.msra.mxu0 %v16141_v41  ;;  %v19125_v25 = vsel %vm16775_vm14, %v10154_v59, %v10155_v1  ;;  %v9554_v7 = vshll.u32 %v9208_v5, 16  ;;  %v9560_v22 = vshll.u32 %v9209_v45, 16  ;;  %v10022_v4 = vld [vmem:[#allocation2 + $0xa4] sm:$0x1]  ;;  %v19145_v59 = vpop.f32.mrf.mxu1 }
 0x358   : > { %v9553_v10 = vrot.slane %v9551_v38, 4  ;;  %15800 = vmatprep.subr.bf16.mxu0 %v16145_v62  ;;  %v9533_v17 = vor.u32 %v9532_v33, %v9529_v63  ;;  %v9564_v41 = vshrl.u32 %v9209_v45, 16  ;;  %v9570_v50 = vshll.u32 %v9210_v58, 16  ;;  %v9212_v9 = vld [vmem:[#allocation2 + $0xc4] sm:$0xf] }
 0x359   : > { %15721 = vmatmul.mubr.bf16.gmra.mxu0 %v14330_v36  ;;  %15681 = vmatmul.mubr.bf16.gmra.mxu1 %v14278_v47  ;;  %v9543_v26 = vor.u32 %v9542_v53, %v9538_v39  ;;  %v14332_v52 = vcombine.low %v19102_v15, %v19115_v55  ;;  %v9556_v11 = vrot.slane %v9554_v7, 5  ;;  %v9562_v12 = vrot.slane %v9560_v22, 5  ;;  %v10020_v36 = vld [vmem:[#allocation2 + $0x9c] sm:$0xe]  ;;  %v10023_v53 = vld [vmem:[#allocation2 + $0xa8] sm:$0xe]  ;;  %v19155_v7 = vpop.f32.mrf.mxu1 }
 0x35a   : > { %15724 = vmatprep.mubr.bf16.mxu0 %v14331_v40  ;;  %15684 = vmatprep.mubr.bf16.mxu1 %v14279_v44  ;;  %v10159_v14 = vrot.slane %v19121_v24, 5  ;;  %v9534_v31 = vrot.slane %v9533_v17, 4  ;;  %v9548_v35 = vrot.slane %v9546_v3, 5  ;;  %v9566_v54 = vrot.slane %v9564_v41, 4  ;;  %v9213_v44 = vld [vmem:[#allocation2 + $0xc8] sm:$0x1] }
 0x35b   : > { %v9544_v16 = vrot.slane %v9543_v26, 4  ;;  %15801 = vmatpush3.bf16.msra.mxu0 %v16145_v62  ;;  %v14333_v56 = vcombine.low %v19119_v0, %v19125_v25  ;;  %v9557_v2 = vor.u32 %v9556_v11, %v9553_v10  ;;  %v14302_v37 = vrot.slane %v10017_v20, 9  ;;  %v10024_v10 = vld [vmem:[#allocation2 + $0xac] sm:$0xf]  ;;  %v10025_v41 = vld [vmem:[#allocation2 + $0xb0] sm:$0x1]  ;;  %v15518_v20 = vpop.f32.mrf.mxu0 }
 0x35c   : > { %v10161_v40 = vrot.slane %v10159_v14, 4  ;;  %15802 = vmatprep.subr.bf16.mxu0 %v16146_v23  ;;  %v9567_v1 = vor.u32 %v9566_v54, %v9562_v12  ;;  %v9572_v5 = vrot.slane %v9570_v50, 5  ;;  %v10162_v47 = vrot.slane %v10019_v57, 5  ;;  %v10027_v50 = vld [vmem:[#allocation2 + $0xb8] sm:$0xf] }
 0x35d   : > { %v9549_v15 = vsel %vm16415_vm11, %v9544_v16, %v9548_v35  ;;  %v9539_v46 = vsel %vm16415_vm11, %v9534_v31, %v9538_v39  ;;  %v9558_v63 = vrot.slane %v9557_v2, 4  ;;  %v14303_v62 = vrot.slane %v10020_v36, 9  ;;  %v10026_v36 = vld [vmem:[#allocation2 + $0xb4] sm:$0xe]  ;;  %v10028_v31 = vld [vmem:[#allocation2 + $0xbc] sm:$0x1] }
 0x35e   : > { %v10166_v19 = vrot.slane %v10021_v13, 5  ;;  %v14280_v18 = vcombine.low %v9539_v46, %v9549_v15  ;;  %v9568_v48 = vrot.slane %v9567_v1, 4  ;;  %v10163_v45 = vsel %vm16775_vm14, %v10161_v40, %v10162_v47  ;;  %v10030_v2 = vld [vmem:[#allocation2 + $0xc4] sm:$0xf] }
 0x35f   : > { %v9575_v55 = vshrl.u32 %v9211_v27, 16  ;;  %15803 = vmatpush3.bf16.msra.mxu0 %v16146_v23  ;;  %v9563_v0 = vsel %vm16415_vm11, %v9558_v63, %v9562_v12  ;;  %v10169_v38 = vrot.slane %v10022_v4, 5  ;;  %v9578_v33 = vshll.u32 %v9211_v27, 16  ;;  %v19165_v63 = vpop.f32.mrf.mxu0 }
 0x360   : > { %v10168_v58 = vrot.slane %v10166_v19, 4  ;;  %v9573_v39 = vsel %vm16415_vm11, %v9568_v48, %v9572_v5  ;;  %v9584_v24 = vshll.u32 %v9212_v9, 16  ;;  %v9588_v25 = vshrl.u32 %v9212_v9, 16  ;;  %v11028_v5 = vld [vmem:[#allocation2 + $0x18] sm:$0xf] }
 0x361   : > { %15725 = vmatmul.mubr.bf16.gmra.mxu0 %v14332_v52  ;;  %15685 = vmatmul.mubr.bf16.gmra.mxu1 %v14280_v18  ;;  %v9577_v3 = vrot.slane %v9575_v55, 4  ;;  %v14281_v22 = vcombine.low %v9563_v0, %v9573_v39  ;;  %v9580_v17 = vrot.slane %v9578_v33, 5  ;;  %v9594_v26 = vshll.u32 %v9213_v44, 16  ;;  %v19167_v18 = vld [vmem:[#allocation2 + $0xc8] sm:$0x1] }
 0x362   : > { %15728 = vmatprep.mubr.bf16.mxu0 %v14333_v56  ;;  %v10170_v23 = vsel %vm16775_vm14, %v10168_v58, %v10169_v38  ;;  %v10160_v57 = vsel %vm16775_vm14, %v14302_v37, %v10159_v14  ;;  %v10167_v52 = vsel %vm16775_vm14, %v14303_v62, %v10166_v19  ;;  %v9586_v11 = vrot.slane %v9584_v24, 5  ;;  %v10029_v56 = vld [vmem:[#allocation2 + $0xc0] sm:$0xe]  ;;  %v19163_v14 = vpop.f32.mrf.mxu1  ;;  %v11029_v0 = vld [vmem:[#allocation2 + $0x1c] sm:$0xf] }
 0x363   : > { %v9590_v12 = vrot.slane %v9588_v25, 4  ;;  %15688 = vmatprep.mubr.bf16.mxu1 %v14281_v22  ;;  %v14334_v16 = vcombine.low %v10160_v57, %v10163_v45  ;;  %v14335_v35 = vcombine.low %v10167_v52, %v10170_v23  ;;  %v9581_v54 = vor.u32 %v9580_v17, %v9577_v3  ;;  %v11031_v3 = vld [vmem:[#allocation2 + $0x24] sm:$0xf]  ;;  %v16139_v22 = vld [vmem:[#allocation2 + $0x18] sm:$0xff]  }
 0x364   : > { %v10173_v13 = vrot.slane %v10024_v10, 5  ;;  %v9596_v27 = vrot.slane %v9594_v26, 5  ;;  %v14304_v15 = vrot.slane %v10023_v53, 9  ;;  %v10180_v1 = vrot.slane %v10027_v50, 5  ;;  %v19181_v24 = vpop.f32.mrf.mxu1  ;;  %v11030_v26 = vld [vmem:[#allocation2 + $0x20] sm:$0x1] }
 0x365   : > { %v9591_v40 = vor.u32 %v9590_v12, %v9586_v11  ;;  %v9582_v37 = vrot.slane %v9581_v54, 4  ;;  %v10176_v4 = vrot.slane %v10025_v41, 5  ;;  %v14305_v46 = vrot.slane %v10026_v36, 9  ;;  %v19188_v41 = vpop.f32.mrf.mxu0  ;;  %v11032_v12 = vld [vmem:[#allocation2 + $0x28] sm:$0xf] }
 0x366   : > { %v10175_v47 = vrot.slane %v10173_v13, 4  ;;  %v10182_v19 = vrot.slane %v10180_v1, 4  ;;  %v10183_v9 = vrot.slane %v10028_v31, 5  ;;  %v10187_v48 = vrot.slane %v10030_v2, 5 }
 0x367   : > { %v9592_v62 = vrot.slane %v9591_v40, 4  ;;  %v10174_v45 = vsel %vm16775_vm14, %v14304_v15, %v10173_v13  ;;  %v14306_v55 = vrot.slane %v10029_v56, 9  ;;  %v11077_v58 = vshrl.u32 %v11028_v5, 16  ;;  %v19193_v15 = vpop.f32.mrf.mxu1 }
 0x368   : > { %v10177_v44 = vsel %vm16775_vm14, %v10175_v47, %v10176_v4  ;;  %v9587_v38 = vsel %vm16415_vm11, %v9582_v37, %v9586_v11  ;;  %v10181_v53 = vsel %vm16775_vm14, %v14305_v46, %v10180_v1  ;;  %v10184_v39 = vsel %vm16775_vm14, %v10182_v19, %v10183_v9  ;;  %v19195_v4 = vpop.f32.mrf.mxu0  ;;  %v11035_v19 = vld [vmem:[#allocation2 + $0x34] sm:$0xf] }
 0x369   : > { %15729 = vmatmul.mubr.bf16.gmra.mxu0 %v14334_v16  ;;  %v9597_v33 = vsel %vm16415_vm11, %v9592_v62, %v9596_v27  ;;  %v14336_v10 = vcombine.low %v10174_v45, %v10177_v44  ;;  %v19185_v23 = vsel %vm16775_vm14, %v14306_v55, %v10187_v48  ;;  %v10190_v17 = vrot.slane %v19167_v18, 5  ;;  %v11033_v16 = vld [vmem:[#allocation2 + $0x2c] sm:$0x1]  ;;  %v11034_v27 = vld [vmem:[#allocation2 + $0x30] sm:$0xf]  ;;  %v16142_v55 = vld [vmem:[#allocation2 + $0x24] sm:$0xff]  }
 0x36a   : > { %15732 = vmatprep.mubr.bf16.mxu0 %v14335_v35  ;;  %v14282_v25 = vcombine.low %v9587_v38, %v9597_v33  ;;  %v11079_v50 = vrot.slane %v11077_v58, 4  ;;  %v11080_v57 = vshll.u32 %v11028_v5, 16  ;;  %v11086_v52 = vshll.u32 %v11029_v0, 16  ;;  %v19197_v33 = vpop.f32.mrf.mxu1 }
 0x36b   : > { %v11090_v11 = vshrl.u32 %v11029_v0, 16  ;;  %v14337_v36 = vcombine.low %v10181_v53, %v10184_v39  ;;  %v19191_v31 = vadd.f32 %v15518_v20, %v18935_v21  ;;  %v11101_v35 = vshrl.u32 %v11031_v3, 16  ;;  %v16148_v39 = vld [vmem:[%s20316_s1 + $0x470] sm:$0xff]  }
 0x36c   : > { %15689 = vmatmul.mubr.bf16.gmra.mxu1 %v14282_v25  ;;  %v11104_v54 = vshll.u32 %v11031_v3, 16  ;;  %v11082_v13 = vrot.slane %v11080_v57, 5  ;;  %v11088_v56 = vrot.slane %v11086_v52, 5  ;;  %v11096_v40 = vshll.u32 %v11030_v26, 16  ;;  %v11036_v3 = vld [vmem:[#allocation2 + $0x38] sm:$0x1] }
 0x36d   : > { %15756 = vmatprep.mubr.bf16.mxu1 %v16139_v22  ;;  %v11092_v2 = vrot.slane %v11090_v11, 4  ;;  %v10189_v1 = vrot.slane %v10187_v48, 4  ;;  %v11103_v5 = vrot.slane %v11101_v35, 4  ;;  %v11110_v47 = vshll.u32 %v11032_v12, 16 }
 0x36e   : > { %v11106_v37 = vrot.slane %v11104_v54, 5  ;;  %v11083_v46 = vor.u32 %v11082_v13, %v11079_v50  ;;  %v11114_v20 = vshrl.u32 %v11032_v12, 16  ;;  %v11120_v62 = vshll.u32 %v11033_v16, 16  ;;  %v16144_v50 = vld [vmem:[#allocation2 + $0x30] sm:$0xff]   ;;  %v11037_v54 = vld [vmem:[#allocation2 + $0x3c] sm:$0xf] }
 0x36f   : > { %v11093_v21 = vor.u32 %v11092_v2, %v11088_v56  ;;  %v11112_v18 = vrot.slane %v11110_v47, 5  ;;  %v11125_v45 = vshrl.u32 %v11034_v27, 16  ;;  %v11128_v44 = vshll.u32 %v11034_v27, 16 }
 0x370   : > { %v11107_v9 = vor.u32 %v11106_v37, %v11103_v5  ;;  %v11084_v0 = vrot.slane %v11083_v46, 4  ;;  %v11098_v38 = vrot.slane %v11096_v40, 5  ;;  %v11116_v48 = vrot.slane %v11114_v20, 4  ;;  %v19215_v5 = vpop.f32.mrf.mxu1  ;;  %v11039_v20 = vld [vmem:[#allocation2 + $0x44] sm:$0x1] }
 0x371   : > { %15733 = vmatmul.mubr.bf16.gmra.mxu0 %v14336_v10  ;;  %v11094_v58 = vrot.slane %v11093_v21, 4  ;;  %v10191_v53 = vsel %vm16775_vm14, %v10189_v1, %v10190_v17  ;;  %v11127_v25 = vrot.slane %v11125_v45, 4  ;;  %v11130_v22 = vrot.slane %v11128_v44, 5  ;;  %v15522_v10 = vpop.f32.mrf.mxu0  ;;  %v11038_v1 = vld [vmem:[#allocation2 + $0x40] sm:$0xf] }
 0x372   : > { %15736 = vmatprep.mubr.bf16.mxu0 %v14337_v36  ;;  %v11134_v26 = vshll.u32 %v11035_v19, 16  ;;  %v11117_v52 = vor.u32 %v11116_v48, %v11112_v18  ;;  %v11122_v11 = vrot.slane %v11120_v62, 5  ;;  %v11138_v12 = vshrl.u32 %v11035_v19, 16  ;;  %v11040_v19 = vld [vmem:[#allocation2 + $0x48] sm:$0xf]  ;;  %v16154_v48 = vld [vmem:[%s20316_s1 + $0x460] sm:$0xff]  }
 0x373   : > { %v11099_v57 = vsel %vm16415_vm11, %v11094_v58, %v11098_v38  ;;  %v11089_v17 = vsel %vm16415_vm11, %v11084_v0, %v11088_v56  ;;  %v11108_v36 = vrot.slane %v11107_v9, 4  ;;  %v11131_v16 = vor.u32 %v11130_v22, %v11127_v25  ;;  %v11041_v44 = vld [vmem:[#allocation2 + $0x4c] sm:$0xf]  ;;  %v11042_v25 = vld [vmem:[#allocation2 + $0x50] sm:$0x1] }
 0x374   : > { %15757 = vmatmul.mubr.bf16.vlgmr.msra.gmra.mxu1 %v16142_v55  ;;  %v19208_v35 = vrot.slane %v11134_v26, 5  ;;  %v11118_v13 = vrot.slane %v11117_v52, 4  ;;  %v11140_v2 = vrot.slane %v11138_v12, 4  ;;  %v11144_v40 = vshll.u32 %v11036_v3, 16 }
 0x375   : > { %15760 = vmatprep.mubr.bf16.mxu1 %v16144_v50  ;;  %15837 = vmatpush3.bf16.msra.mxu1 %v19075_v30  ;;  %v19213_v27 = vadd.f32 %v19165_v63, %v18942_v61  ;;  %v14338_v56 = vcombine.low %v19185_v23, %v10191_v53  ;;  %v14403_v37 = vcombine.low %v11089_v17, %v11099_v57  ;;  %v16151_v30 = vld [vmem:[%s20316_s1 + $0x468] sm:$0xff]   ;;  %v7915_v61 = vpop.f32.mrf.mxu0  ;;  %v11132_v21 = vrot.slane %v11131_v16, 4  ;;  %v19236_v53 = vpop.f32.mrf.mxu1 }
 0x376   : > { %15838 = vmatprep.subr.bf16.mxu1 %v16148_v39  ;;  %v19220_v47 = vadd.f32 %v19188_v41, %v18952_v28  ;;  %v19226_v46 = vadd.f32 %v15522_v10, %v19000_v34  ;;  %v11123_v63 = vsel %vm16415_vm11, %v11118_v13, %v11122_v11  ;;  %v11141_v23 = vor.u32 %v11140_v2, %v19208_v35  ;;  %v16147_v34 = vld [vmem:[#allocation2 + $0x3c] sm:$0xff]   ;;  %v16149_v50 = vld [vmem:[#allocation2 + $0x48] sm:$0xff]  }
 0x377   : > { %v11149_v62 = vshrl.u32 %v11037_v54, 16  ;;  %v11113_v28 = vsel %vm16415_vm11, %v11108_v36, %v11112_v18  ;;  %v11146_v41 = vrot.slane %v11144_v40, 5  ;;  %v11152_v9 = vshll.u32 %v11037_v54, 16  ;;  %v15523_v10 = vpop.f32.mrf.mxu0 }
 0x378   : > { %v11158_v45 = vshll.u32 %v11038_v1, 16  ;;  %v14404_v55 = vcombine.low %v11113_v28, %v11123_v63  ;;  %v11142_v0 = vrot.slane %v11141_v23, 4  ;;  %v11162_v38 = vshrl.u32 %v11038_v1, 16  ;;  %v11043_v1 = vld [vmem:[#allocation2 + $0x54] sm:$0xf] }
 0x379   : > { %15737 = vmatmul.mubr.bf16.gmra.mxu0 %v14338_v56  ;;  %15839 = vmatpush3.bf16.msra.mxu1 %v16148_v39  ;;  %v11151_v58 = vrot.slane %v11149_v62, 4  ;;  %v11154_v18 = vrot.slane %v11152_v9, 5  ;;  %v11173_v22 = vshrl.u32 %v11040_v19, 16  ;;  %v11176_v26 = vshll.u32 %v11040_v19, 16  ;;  %v19245_v56 = vpop.f32.mrf.mxu1  ;;  %v19253_v23 = vpop.f32.mrf.mxu0  ;;  %v16150_v9 = vld [vmem:[#allocation2 + $0x54] sm:$0xff]  }
 0x37a   : > { %15804 = vmatprep.mubr.bf16.mxu0 %v14403_v37  ;;  %15840 = vmatprep.subr.bf16.mxu1 %v16151_v30  ;;  %v11160_v3 = vrot.slane %v11158_v45, 5  ;;  %v11137_v39 = vsel %vm16415_vm11, %v11132_v21, %v19208_v35  ;;  %v11164_v57 = vrot.slane %v11162_v38, 4  ;;  %v11168_v52 = vshll.u32 %v11039_v20, 16  ;;  %v11044_v20 = vld [vmem:[#allocation2 + $0x58] sm:$0xf] }
 0x37b   : > { %v11182_v11 = vshll.u32 %v11041_v44, 16  ;;  %v11147_v12 = vsel %vm16415_vm11, %v11142_v0, %v11146_v41  ;;  %v11155_v17 = vor.u32 %v11154_v18, %v11151_v58  ;;  %v11175_v36 = vrot.slane %v11173_v22, 4  ;;  %v11045_v0 = vld [vmem:[#allocation2 + $0x5c] sm:$0x1]  ;;  %v11046_v18 = vld [vmem:[#allocation2 + $0x60] sm:$0xf] }
 0x37c   : > { %15761 = vmatmul.mubr.bf16.gmra.mxu1 %v16147_v34  ;;  %v11178_v16 = vrot.slane %v11176_v26, 5  ;;  %v11165_v54 = vor.u32 %v11164_v57, %v11160_v3  ;;  %v11186_v2 = vshrl.u32 %v11041_v44, 16  ;;  %v11192_v40 = vshll.u32 %v11042_v25, 16  ;;  %v19263_v25 = vpop.f32.mrf.mxu1  ;;  %v16152_v57 = vld [vmem:[#allocation2 + $0x60] sm:$0xff]  }
 0x37d   : > { %15764 = vmatprep.mubr.bf16.mxu1 %v16149_v50  ;;  %15841 = vmatpush3.bf16.msra.mxu1 %v16151_v30  ;;  %v19243_v13 = vrot.slane %v11182_v11, 5  ;;  %v11156_v35 = vrot.slane %v11155_v17, 4  ;;  %v19248_v63 = vadd.f32 %v7915_v61, %v19022_v51  ;;  %v19251_v21 = vadd.f32 %v15523_v10, %v19049_v49  ;;  %v16157_v30 = vld [vmem:[%s20316_s1 + $0x458] sm:$0xff]  }
 0x37e   : > { %v11179_v37 = vor.u32 %v11178_v16, %v11175_v36  ;;  %15842 = vmatprep.subr.bf16.mxu1 %v16154_v48  ;;  %v14405_v62 = vcombine.low %v11137_v39, %v11147_v12  ;;  %v11166_v19 = vrot.slane %v11165_v54, 4  ;;  %v11170_v28 = vrot.slane %v11168_v52, 5  ;;  %v11047_v39 = vld [vmem:[#allocation2 + $0x64] sm:$0xf] }
 0x37f   : > { %v11188_v41 = vrot.slane %v11186_v2, 4  ;;  %v11161_v51 = vsel %vm16415_vm11, %v11156_v35, %v11160_v3  ;;  %v11194_v61 = vrot.slane %v11192_v40, 5  ;;  %v11197_v45 = vshrl.u32 %v11043_v1, 16  ;;  %v11048_v35 = vld [vmem:[#allocation2 + $0x68] sm:$0x1] }
 0x380   : > { %v11200_v49 = vshll.u32 %v11043_v1, 16  ;;  %v11171_v44 = vsel %vm16415_vm11, %v11166_v19, %v11170_v28  ;;  %v11206_v58 = vshll.u32 %v11044_v20, 16  ;;  %v11210_v38 = vshrl.u32 %v11044_v20, 16 }
 0x381   : > { %15805 = vmatmul.mubr.bf16.vlgmr.msra.gmra.mxu0 %v14404_v55  ;;  %v11189_v34 = vor.u32 %v11188_v41, %v19243_v13  ;;  %15843 = vmatpush3.bf16.msra.mxu1 %v16154_v48  ;;  %v14406_v22 = vcombine.low %v11161_v51, %v11171_v44  ;;  %v11180_v26 = vrot.slane %v11179_v37, 4  ;;  %v15526_v3 = vpop.f32.mrf.mxu0  ;;  %v11199_v10 = vrot.slane %v11197_v45, 4  ;;  %v16160_v55 = vld [vmem:[%s20316_s1 + $0x450] sm:$0xff]   ;;  %v16163_v51 = vld [vmem:[%s20316_s1 + $0x448] sm:$0xff]  }
 0x382   : > { %15808 = vmatprep.mubr.bf16.mxu0 %v14405_v62  ;;  %v11202_v50 = vrot.slane %v11200_v49, 5  ;;  %15844 = vmatprep.subr.bf16.mxu1 %v16157_v30  ;;  %v19269_v11 = vadd.f32 %v15526_v3, %v19093_v42  ;;  %v11208_v48 = vrot.slane %v11206_v58, 5  ;;  %v11212_v12 = vrot.slane %v11210_v38, 4  ;;  %v19273_v62 = vpop.f32.mrf.mxu1  ;;  %v11050_v38 = vld [vmem:[#allocation2 + $0x70] sm:$0xf] }
 0x383   : > { %v11190_v52 = vrot.slane %v11189_v34, 4  ;;  %v11216_v36 = vshll.u32 %v11045_v0, 16  ;;  %v11221_v16 = vshrl.u32 %v11046_v18, 16  ;;  %v11224_v54 = vshll.u32 %v11046_v18, 16  ;;  %v7931_v2 = vpop.f32.mrf.mxu0 }
 0x384   : > { %15765 = vmatmul.mubr.bf16.gmra.mxu1 %v16150_v9  ;;  %v11203_v17 = vor.u32 %v11202_v50, %v11199_v10  ;;  %v11213_v1 = vor.u32 %v11212_v12, %v11208_v48  ;;  %v11230_v37 = vshll.u32 %v11047_v39, 16  ;;  %v11234_v20 = vshrl.u32 %v11047_v39, 16  ;;  %v11052_v10 = vld [vmem:[#allocation2 + $0x78] sm:$0xf]  ;;  %v19289_v50 = vpop.f32.mrf.mxu1  ;;  %v16153_v39 = vld [vmem:[#allocation2 + $0x6c] sm:$0xff]  }
 0x385   : > { %15768 = vmatprep.mubr.bf16.mxu1 %v16152_v57  ;;  %v11195_v40 = vsel %vm16415_vm11, %v11190_v52, %v11194_v61  ;;  %15845 = vmatpush3.bf16.msra.mxu1 %v16157_v30  ;;  %v11185_v42 = vsel %vm16415_vm11, %v11180_v26, %v19243_v13  ;;  %v11218_v28 = vrot.slane %v11216_v36, 5  ;;  %v11223_v41 = vrot.slane %v11221_v16, 4  ;;  %v15527_v9 = vpop.f32.mrf.mxu0  ;;  %v11049_v30 = vld [vmem:[#allocation2 + $0x6c] sm:$0xf]  ;;  %v16155_v57 = vld [vmem:[#allocation2 + $0x78] sm:$0xff]  }
 0x386   : > { %v11204_v19 = vrot.slane %v11203_v17, 4  ;;  %15846 = vmatprep.subr.bf16.mxu1 %v16160_v55  ;;  %v11214_v61 = vrot.slane %v11213_v1, 4  ;;  %v11226_v45 = vrot.slane %v11224_v54, 5  ;;  %v11232_v49 = vrot.slane %v11230_v37, 5  ;;  %v11051_v16 = vld [vmem:[#allocation2 + $0x74] sm:$0x1] }
 0x387   : > { %v11236_v44 = vrot.slane %v11234_v20, 4  ;;  %v14407_v34 = vcombine.low %v11185_v42, %v11195_v40  ;;  %v11240_v0 = vshll.u32 %v11048_v35, 16  ;;  %v19282_v58 = vadd.f32 %v7931_v2, %v19111_v60  ;;  %v11053_v37 = vld [vmem:[#allocation2 + $0x7c] sm:$0xf]  ;;  %v19300_v42 = vpop.f32.mrf.mxu0 }
 0x388   : > { %v19285_v13 = vadd.f32 %v15527_v9, %v19133_v8  ;;  %v11219_v18 = vsel %vm16415_vm11, %v11214_v61, %v11218_v28  ;;  %v11227_v26 = vor.u32 %v11226_v45, %v11223_v41  ;;  %v11209_v60 = vsel %vm16415_vm11, %v11204_v19, %v11208_v48  ;;  %v11054_v41 = vld [vmem:[#allocation2 + $0x80] sm:$0x1]  ;;  %v11055_v9 = vld [vmem:[#allocation2 + $0x84] sm:$0xf]  ;;  %v19302_v61 = vpop.f32.mrf.mxu1 }
 0x389   : > { %15809 = vmatmul.mubr.bf16.gmra.mxu0 %v14406_v22  ;;  %v11237_v3 = vor.u32 %v11236_v44, %v11232_v49  ;;  %v11242_v52 = vrot.slane %v11240_v0, 5  ;;  %v11245_v12 = vshrl.u32 %v11049_v30, 16  ;;  %v11248_v8 = vshll.u32 %v11049_v30, 16  ;;  %15847 = vmatpush3.bf16.msra.mxu1 %v16160_v55  ;;  %v16166_v22 = vld [vmem:[%s20316_s1 + $0x440] sm:$0xff]  }
 0x38a   : > { %15812 = vmatprep.mubr.bf16.mxu0 %v14407_v34  ;;  %v11228_v17 = vrot.slane %v11227_v26, 4  ;;  %v11254_v54 = vshll.u32 %v11050_v38, 16  ;;  %v11258_v2 = vshrl.u32 %v11050_v38, 16  ;;  %15848 = vmatprep.subr.bf16.mxu1 %v16163_v51  ;;  %v14408_v40 = vcombine.low %v11209_v60, %v11219_v18 }
 0x38b   : > { %v11238_v36 = vrot.slane %v11237_v3, 4  ;;  %v11247_v1 = vrot.slane %v11245_v12, 4  ;;  %v11250_v35 = vrot.slane %v11248_v8, 5  ;;  %v11269_v48 = vshrl.u32 %v11052_v10, 16 }
 0x38c   : > { %15769 = vmatmul.mubr.bf16.gmra.mxu1 %v16153_v39  ;;  %v11233_v55 = vsel %vm16415_vm11, %v11228_v17, %v11232_v49  ;;  %v11256_v19 = vrot.slane %v11254_v54, 5  ;;  %v11260_v28 = vrot.slane %v11258_v2, 4  ;;  %v11264_v30 = vshll.u32 %v11051_v16, 16  ;;  %v19304_v54 = vpop.f32.mrf.mxu1 }
 0x38d   : > { %15772 = vmatprep.mubr.bf16.mxu1 %v16155_v57  ;;  %v11243_v20 = vsel %vm16415_vm11, %v11238_v36, %v11242_v52  ;;  %v11251_v44 = vor.u32 %v11250_v35, %v11247_v1  ;;  %v11271_v34 = vrot.slane %v11269_v48, 4  ;;  %15849 = vmatpush3.bf16.msra.mxu1 %v16163_v51  ;;  %v11272_v38 = vshll.u32 %v11052_v10, 16  ;;  %v11056_v36 = vld [vmem:[#allocation2 + $0x88] sm:$0xf]  ;;  %v11057_v1 = vld [vmem:[#allocation2 + $0x8c] sm:$0x1] }
 0x38e   : > { %v14409_v45 = vcombine.low %v11233_v55, %v11243_v20  ;;  %v11261_v0 = vor.u32 %v11260_v28, %v11256_v19  ;;  %v11278_v18 = vshll.u32 %v11053_v37, 16  ;;  %v11282_v49 = vshrl.u32 %v11053_v37, 16  ;;  %15850 = vmatprep.subr.bf16.mxu1 %v16166_v22  ;;  %v16156_v51 = vld [vmem:[#allocation2 + $0x84] sm:$0xff]  }
 0x38f   : > { %v11252_v26 = vrot.slane %v11251_v44, 4  ;;  %v11288_v3 = vshll.u32 %v11054_v41, 16  ;;  %v11293_v39 = vshrl.u32 %v11055_v9, 16  ;;  %v11296_v57 = vshll.u32 %v11055_v9, 16  ;;  %v11058_v41 = vld [vmem:[#allocation2 + $0x90] sm:$0xf] }
 0x390   : > { %v11262_v52 = vrot.slane %v11261_v0, 4  ;;  %v11274_v12 = vrot.slane %v11272_v38, 5  ;;  %v11280_v8 = vrot.slane %v11278_v18, 5  ;;  %v11284_v17 = vrot.slane %v11282_v49, 4  ;;  %v19316_v38 = vpop.f32.mrf.mxu1 }
 0x391   : > { %15813 = vmatmul.mubr.bf16.gmra.mxu0 %v14408_v40  ;;  %v15530_v60 = vpop.f32.mrf.mxu0  ;;  %v11257_v16 = vsel %vm16415_vm11, %v11252_v26, %v11256_v19  ;;  %v11266_v2 = vrot.slane %v11264_v30, 5  ;;  %v11295_v35 = vrot.slane %v11293_v39, 4  ;;  %15851 = vmatpush3.bf16.msra.mxu1 %v16166_v22  ;;  %v16158_v40 = vld [vmem:[#allocation2 + $0x90] sm:$0xff]   ;;  %v11290_v55 = vrot.slane %v11288_v3, 5 }
 0x392   : > { %15816 = vmatprep.mubr.bf16.mxu0 %v14409_v45  ;;  %v19307_v10 = vadd.f32 %v15530_v60, %v19155_v7  ;;  %v11275_v37 = vor.u32 %v11274_v12, %v11271_v34  ;;  %v11285_v48 = vor.u32 %v11284_v17, %v11280_v8  ;;  %v11298_v28 = vrot.slane %v11296_v57, 5  ;;  %v11059_v3 = vld [vmem:[#allocation2 + $0x94] sm:$0xf]  ;;  %v11060_v12 = vld [vmem:[#allocation2 + $0x98] sm:$0x1] }
 0x393   : > { %v7947_v20 = vpop.f32.mrf.mxu0  ;;  %v11267_v9 = vsel %vm16415_vm11, %v11262_v52, %v11266_v2  ;;  %v11302_v45 = vshll.u32 %v11056_v36, 16  ;;  %v11306_v19 = vshrl.u32 %v11056_v36, 16  ;;  %v11312_v34 = vshll.u32 %v11057_v1, 16  ;;  %v11061_v17 = vld [vmem:[#allocation2 + $0x9c] sm:$0xf] }
 0x394   : > { %15773 = vmatmul.mubr.bf16.gmra.mxu1 %v16156_v51  ;;  %v19314_v7 = vadd.f32 %v7947_v20, %v19163_v14  ;;  %v11276_v44 = vrot.slane %v11275_v37, 4  ;;  %v11286_v30 = vrot.slane %v11285_v48, 4  ;;  %v11299_v0 = vor.u32 %v11298_v28, %v11295_v35  ;;  %v11062_v35 = vld [vmem:[#allocation2 + $0xa0] sm:$0xf]  ;;  %v19329_v48 = vpop.f32.mrf.mxu1  ;;  %v16161_v20 = vld [vmem:[#allocation2 + $0xa8] sm:$0xff]  }
 0x395   : > { %15776 = vmatprep.mubr.bf16.mxu1 %v16158_v40  ;;  %v15531_v22 = vpop.f32.mrf.mxu0  ;;  %v11304_v49 = vrot.slane %v11302_v45, 5  ;;  %v11308_v26 = vrot.slane %v11306_v19, 4  ;;  %v11317_v39 = vshrl.u32 %v11058_v41, 16  ;;  %v14410_v57 = vcombine.low %v11257_v16, %v11267_v9 }
 0x396   : > { %v19319_v18 = vadd.f32 %v15531_v22, %v19181_v24  ;;  %v11281_v14 = vsel %vm16415_vm11, %v11276_v44, %v11280_v8  ;;  %v11291_v60 = vsel %vm16415_vm11, %v11286_v30, %v11290_v55  ;;  %v11300_v52 = vrot.slane %v11299_v0, 4  ;;  %v16159_v55 = vld [vmem:[#allocation2 + $0x9c] sm:$0xff]   ;;  %v11063_v0 = vld [vmem:[#allocation2 + $0xa4] sm:$0x1] }
 0x397   : > { %v14411_v36 = vcombine.low %v11281_v14, %v11291_v60  ;;  %v19325_v51 = vpop.f32.mrf.mxu0  ;;  %v11309_v2 = vor.u32 %v11308_v26, %v11304_v49  ;;  %v11314_v24 = vrot.slane %v11312_v34, 5  ;;  %v11319_v1 = vrot.slane %v11317_v39, 4 }
 0x398   : > { %v11305_v16 = vsel %vm16415_vm11, %v11300_v52, %v11304_v49  ;;  %v11320_v40 = vshll.u32 %v11058_v41, 16  ;;  %v11326_v37 = vshll.u32 %v11059_v3, 16  ;;  %v11330_v8 = vshrl.u32 %v11059_v3, 16 }
 0x399   : > { %15817 = vmatmul.mubr.bf16.gmra.mxu0 %v14410_v57  ;;  %v11310_v28 = vrot.slane %v11309_v2, 4  ;;  %v11336_v9 = vshll.u32 %v11060_v12, 16  ;;  %v11341_v45 = vshrl.u32 %v11061_v17, 16  ;;  %v11344_v19 = vshll.u32 %v11061_v17, 16  ;;  %v11064_v57 = vld [vmem:[#allocation2 + $0xa8] sm:$0xf]  ;;  %v19336_v17 = vpop.f32.mrf.mxu1 }
 0x39a   : > { %15820 = vmatprep.mubr.bf16.mxu0 %v14411_v36  ;;  %v11322_v44 = vrot.slane %v11320_v40, 5  ;;  %v11328_v30 = vrot.slane %v11326_v37, 5  ;;  %v11332_v22 = vrot.slane %v11330_v8, 4  ;;  %v11350_v34 = vshll.u32 %v11062_v35, 16 }
 0x39b   : > { %v11315_v41 = vsel %vm16415_vm11, %v11310_v28, %v11314_v24  ;;  %v11338_v49 = vrot.slane %v11336_v9, 5  ;;  %v11343_v3 = vrot.slane %v11341_v45, 4  ;;  %v11346_v39 = vrot.slane %v11344_v19, 5  ;;  %v11065_v9 = vld [vmem:[#allocation2 + $0xac] sm:$0xf] }
 0x39c   : > { %15777 = vmatmul.mubr.bf16.gmra.mxu1 %v16159_v55  ;;  %v15534_v26 = vpop.f32.mrf.mxu0  ;;  %v14412_v60 = vcombine.low %v11305_v16, %v11315_v41  ;;  %v11323_v52 = vor.u32 %v11322_v44, %v11319_v1  ;;  %v11333_v12 = vor.u32 %v11332_v22, %v11328_v30  ;;  %v11352_v40 = vrot.slane %v11350_v34, 5  ;;  %v11066_v19 = vld [vmem:[#allocation2 + $0xb0] sm:$0x1]  ;;  %v19352_v34 = vpop.f32.mrf.mxu1  ;;  %v16162_v41 = vld [vmem:[#allocation2 + $0xb4] sm:$0xff]  }
 0x39d   : > { %v19334_v14 = vadd.f32 %v15534_v26, %v19197_v33  ;;  %15780 = vmatprep.mubr.bf16.mxu1 %v16161_v20  ;;  %v11347_v2 = vor.u32 %v11346_v39, %v11343_v3  ;;  %v11354_v37 = vshrl.u32 %v11062_v35, 16  ;;  %v11360_v8 = vshll.u32 %v11063_v0, 16 }
 0x39e   : > { %v7963_v36 = vpop.f32.mrf.mxu0  ;;  %v11324_v55 = vrot.slane %v11323_v52, 4  ;;  %v11334_v24 = vrot.slane %v11333_v12, 4  ;;  %v11365_v45 = vshrl.u32 %v11064_v57, 16  ;;  %v19343_v33 = vadd.f32 %v19195_v4, %v18975_v32  ;;  %v11067_v32 = vld [vmem:[#allocation2 + $0xb4] sm:$0xf] }
 0x39f   : > { %v19339_v28 = vadd.f32 %v7963_v36, %v19215_v5  ;;  %v11348_v16 = vrot.slane %v11347_v2, 4  ;;  %v11356_v20 = vrot.slane %v11354_v37, 4  ;;  %v11368_v44 = vshll.u32 %v11064_v57, 16  ;;  %v11068_v37 = vld [vmem:[#allocation2 + $0xb8] sm:$0xf] }
 0x3a0   : > { %v15535_v1 = vpop.f32.mrf.mxu0  ;;  %v11329_v35 = vsel %vm16415_vm11, %v11324_v55, %v11328_v30  ;;  %v11339_v22 = vsel %vm16415_vm11, %v11334_v24, %v11338_v49  ;;  %v11367_v0 = vrot.slane %v11365_v45, 4  ;;  %v11362_v39 = vrot.slane %v11360_v8, 5 }
 0x3a1   : > { %15821 = vmatmul.mubr.bf16.gmra.mxu0 %v14412_v60  ;;  %v19350_v5 = vadd.f32 %v15535_v1, %v19236_v53  ;;  %v14413_v4 = vcombine.low %v11329_v35, %v11339_v22  ;;  %v11357_v3 = vor.u32 %v11356_v20, %v11352_v40  ;;  %v11370_v57 = vrot.slane %v11368_v44, 5  ;;  %v16164_v60 = vld [vmem:[#allocation2 + $0xc0] sm:$0xff]   ;;  %v11069_v44 = vld [vmem:[#allocation2 + $0xbc] sm:$0x1] }
 0x3a2   : > { %v19354_v26 = vpop.f32.mrf.mxu0  ;;  %v11353_v30 = vsel %vm16415_vm11, %v11348_v16, %v11352_v40  ;;  %v11374_v52 = vshll.u32 %v11065_v9, 16  ;;  %v11378_v49 = vshrl.u32 %v11065_v9, 16  ;;  %v11384_v12 = vshll.u32 %v11066_v19, 16  ;;  %v19361_v40 = vpop.f32.mrf.mxu1 }
 0x3a3   : > { %15824 = vmatprep.mubr.bf16.mxu0 %v14413_v4  ;;  %v11358_v36 = vrot.slane %v11357_v3, 4  ;;  %v11371_v2 = vor.u32 %v11370_v57, %v11367_v0  ;;  %v11389_v55 = vshrl.u32 %v11067_v32, 16  ;;  %v11392_v24 = vshll.u32 %v11067_v32, 16  ;;  %v11846_v0 = vld [vmem:[#allocation2 + $0x18] sm:$0xe] }
 0x3a4   : > { %15781 = vmatmul.mubr.bf16.gmra.mxu1 %v16162_v41  ;;  %v15538_v53 = vpop.f32.mrf.mxu0  ;;  %v11376_v8 = vrot.slane %v11374_v52, 5  ;;  %v11380_v1 = vrot.slane %v11378_v49, 4  ;;  %v11386_v20 = vrot.slane %v11384_v12, 5  ;;  %v16165_v41 = vld [vmem:[#allocation2 + $0xcc] sm:$0xff]   ;;  %v11398_v3 = vshll.u32 %v11068_v37, 16 }
 0x3a5   : > { %v19359_v45 = vadd.f32 %v15538_v53, %v19263_v25  ;;  %15784 = vmatprep.mubr.bf16.mxu1 %v16164_v60  ;;  %v11363_v9 = vsel %vm16415_vm11, %v11358_v36, %v11362_v39  ;;  %v11372_v16 = vrot.slane %v11371_v2, 4  ;;  %v11391_v35 = vrot.slane %v11389_v55, 4  ;;  %v11847_v57 = vld [vmem:[#allocation2 + $0x1c] sm:$0xf]  ;;  %v11848_v53 = vld [vmem:[#allocation2 + $0x20] sm:$0x1] }
 0x3a6   : > { %v7979_v19 = vpop.f32.mrf.mxu0  ;;  %v11394_v22 = vrot.slane %v11392_v24, 5  ;;  %v14414_v4 = vcombine.low %v11353_v30, %v11363_v9  ;;  %v11381_v32 = vor.u32 %v11380_v1, %v11376_v8  ;;  %v11402_v12 = vshrl.u32 %v11068_v37, 16  ;;  %v11070_v36 = vld [vmem:[#allocation2 + $0xc0] sm:$0xf]  ;;  %v19373_v24 = vpop.f32.mrf.mxu1 }
 0x3a7   : > { %v19366_v25 = vadd.f32 %v7979_v19, %v19273_v62  ;;  %v11377_v60 = vsel %vm16415_vm11, %v11372_v16, %v11376_v8  ;;  %v11408_v39 = vshll.u32 %v11069_v44, 16  ;;  %v11400_v55 = vrot.slane %v11398_v3, 5  ;;  %v11071_v16 = vld [vmem:[#allocation2 + $0xc4] sm:$0xf] }
 0x3a8   : > { %v15539_v52 = vpop.f32.mrf.mxu0  ;;  %v11395_v49 = vor.u32 %v11394_v22, %v11391_v35  ;;  %v11382_v2 = vrot.slane %v11381_v32, 4  ;;  %v14427_v62 = vrot.slane %v11846_v0, 9  ;;  %v11404_v19 = vrot.slane %v11402_v12, 4  ;;  %v11072_v22 = vld [vmem:[#allocation2 + $0xc8] sm:$0x1] }
 0x3a9   : > { %20512 = vst [vmem:[#allocation17_spill] sm:$0xff] %v19366_v25  ;;  %15825 = vmatmul.mubr.bf16.gmra.mxu0 %v14414_v4  ;;  %v19371_v30 = vadd.f32 %v15539_v52, %v19289_v50  ;;  %v11410_v25 = vrot.slane %v11408_v39, 5  ;;  %v11944_v8 = vrot.slane %v11847_v57, 5  ;;  %v11947_v35 = vrot.slane %v11848_v53, 5  ;;  %v11849_v57 = vld [vmem:[#allocation2 + $0x24] sm:$0xe] }
 0x3aa   : > { %v7982_v1 = vpop.f32.mrf.mxu0  ;;  %v11396_v9 = vrot.slane %v11395_v49, 4  ;;  %v11387_v37 = vsel %vm16415_vm11, %v11382_v2, %v11386_v20  ;;  %v11413_v50 = vshrl.u32 %v11070_v36, 16  ;;  %v11405_v32 = vor.u32 %v11404_v19, %v11400_v55 }
 0x3ab   : > { %v19378_v44 = vadd.f32 %v7982_v1, %v19302_v61  ;;  %v14415_v4 = vcombine.low %v11377_v60, %v11387_v37  ;;  %v11945_v3 = vsel %vm16775_vm14, %v14427_v62, %v11944_v8  ;;  %v11946_v49 = vrot.slane %v11944_v8, 4  ;;  %v19384_v61 = vpop.f32.mrf.mxu1  ;;  %v11850_v1 = vld [vmem:[#allocation2 + $0x28] sm:$0xf]  ;;  %v11851_v8 = vld [vmem:[#allocation2 + $0x2c] sm:$0x1] }
 0x3ac   : > { %15785 = vmatmul.mubr.bf16.gmra.mxu1 %v16165_v41  ;;  %v11401_v0 = vsel %vm16415_vm11, %v11396_v9, %v11400_v55  ;;  %v11415_v12 = vrot.slane %v11413_v50, 4  ;;  %v11416_v20 = vshll.u32 %v11070_v36, 16  ;;  %v11422_v39 = vshll.u32 %v11071_v16, 16 }
 0x3ad   : > { %20513 = vst [vmem:[#allocation18_spill] sm:$0xff] %v19378_v44  ;;  %v15542_v52 = vpop.f32.mrf.mxu0  ;;  %15828 = vmatprep.mubr.bf16.mxu0 %v14415_v4  ;;  %v11406_v41 = vrot.slane %v11405_v32, 4  ;;  %v11426_v60 = vshrl.u32 %v11071_v16, 16  ;;  %v11432_v2 = vshll.u32 %v11072_v22, 16  ;;  %v11948_v55 = vsel %vm16775_vm14, %v11946_v49, %v11947_v35  ;;  %v11074_v49 = vld [vmem:[#allocation2 + $0xd0] sm:$0xf] }
 0x3ae   : > { %v19387_v53 = vadd.f32 %v15542_v52, %v19304_v54  ;;  %v11418_v62 = vrot.slane %v11416_v20, 5  ;;  %v11424_v9 = vrot.slane %v11422_v39, 5  ;;  %v14428_v37 = vrot.slane %v11849_v57, 9  ;;  %v11073_v54 = vld [vmem:[#allocation2 + $0xcc] sm:$0xf] }
 0x3af   : > { %v7995_v19 = vpop.f32.mrf.mxu0  ;;  %v11411_v36 = vsel %vm16415_vm11, %v11406_v41, %v11410_v25  ;;  %v14459_v50 = vcombine.low %v11945_v3, %v11948_v55  ;;  %v11428_v4 = vrot.slane %v11426_v60, 4  ;;  %v11434_v44 = vrot.slane %v11432_v2, 5  ;;  %v11075_v55 = vld [vmem:[#allocation2 + $0xd4] sm:$0x1] }
 0x3b0   : > { %20514 = vst [vmem:[#allocation19_spill] sm:$0xff] %v19387_v53  ;;  %v14416_v52 = vcombine.low %v11401_v0, %v11411_v36  ;;  %v11419_v32 = vor.u32 %v11418_v62, %v11415_v12  ;;  %v19394_v16 = vadd.f32 %v7995_v19, %v19316_v38  ;;  %v11951_v35 = vrot.slane %v11850_v1, 5  ;;  %v11852_v36 = vld [vmem:[#allocation2 + $0x30] sm:$0xe] }
 0x3b1   : > { %v15543_v22 = vpop.f32.mrf.mxu0  ;;  %v15566_v53 = vpop.f32.mrf.mxu1  ;;  %15852 = vmatprep.mubr.bf16.mxu1 %v14459_v50  ;;  %v11429_v20 = vor.u32 %v11428_v4, %v11424_v9  ;;  %v11954_v3 = vrot.slane %v11851_v8, 5  ;;  %v11437_v41 = vshrl.u32 %v11073_v54, 16  ;;  %v11446_v62 = vshll.u32 %v11074_v49, 16 }
 0x3b2   : > { %v19397_v57 = vadd.f32 %v15543_v22, %v19329_v48  ;;  %v19400_v25 = vadd.f32 %v15566_v53, %v19191_v31  ;;  %15829 = vmatmul.mubr.bf16.gmra.mxu0 %v14416_v52  ;;  %v11420_v39 = vrot.slane %v11419_v32, 4  ;;  %v11952_v38 = vsel %vm16775_vm14, %v14428_v37, %v11951_v35  ;;  %v11853_v37 = vld [vmem:[#allocation2 + $0x34] sm:$0xf] }
 0x3b3   : > { %v7998_v0 = vpop.f32.mrf.mxu0  ;;  %v11953_v12 = vrot.slane %v11951_v35, 4  ;;  %v8493_v60 = vpop.f32.mrf.mxu1  ;;  %v11430_v2 = vrot.slane %v11429_v20, 4  ;;  %v11440_v48 = vshll.u32 %v11073_v54, 16  ;;  %v11439_v19 = vrot.slane %v11437_v41, 4  ;;  %v11854_v20 = vld [vmem:[#allocation2 + $0x38] sm:$0x1] }
 0x3b4   : > { %v19405_v1 = vadd.f32 %v7998_v0, %v19336_v17  ;;  %v11425_v31 = vsel %vm16415_vm11, %v11420_v39, %v11424_v9  ;;  %v11450_v8 = vshrl.u32 %v11074_v49, 16  ;;  %v11448_v32 = vrot.slane %v11446_v62, 5 }
 0x3b5   : > { %v11955_v53 = vsel %vm16775_vm14, %v11953_v12, %v11954_v3  ;;  %v15567_v50 = vpop.f32.mrf.mxu1  ;;  %v11435_v4 = vsel %vm16415_vm11, %v11430_v2, %v11434_v44  ;;  %v11442_v17 = vrot.slane %v11440_v48, 5  ;;  %v19415_v54 = vadd.f32 %v19253_v23, %v19077_v6  ;;  %v11856_v44 = vld [vmem:[#allocation2 + $0x40] sm:$0xf]  ;;  %v11855_v48 = vld [vmem:[#allocation2 + $0x3c] sm:$0xe] }
 0x3b6   : > { %v14460_v52 = vcombine.low %v11952_v38, %v11955_v53  ;;  %v14417_v22 = vcombine.low %v11425_v31, %v11435_v4  ;;  %v11452_v9 = vrot.slane %v11450_v8, 4  ;;  %v11456_v35 = vshll.u32 %v11075_v55, 16 }
 0x3b7   : > { %v8496_v3 = vpop.f32.mrf.mxu1  ;;  %v11443_v49 = vor.u32 %v11442_v17, %v11439_v19  ;;  %v14429_v39 = vrot.slane %v11852_v36, 9  ;;  %v11958_v0 = vrot.slane %v11853_v37, 5  ;;  %v19418_v12 = vadd.f32 %v8493_v60, %v19213_v27  ;;  %v11857_v60 = vld [vmem:[#allocation2 + $0x44] sm:$0x1] }
 0x3b8   : > { %15853 = vmatmul.mubr.bf16.vlgmr.msra.gmra.mxu1 %v14460_v52  ;;  %15832 = vmatprep.mubr.bf16.mxu0 %v14417_v22  ;;  %v11453_v41 = vor.u32 %v11452_v9, %v11448_v32  ;;  %v11458_v2 = vrot.slane %v11456_v35, 5  ;;  %v19421_v6 = vadd.f32 %v15567_v50, %v19220_v47  ;;  %v19424_v23 = vadd.f32 %v8496_v3, %v19343_v33  ;;  %v11859_v33 = vld [vmem:[#allocation2 + $0x4c] sm:$0xf]  ;;  %v11858_v22 = vld [vmem:[#allocation2 + $0x48] sm:$0xe] }
 0x3b9   : > { %v15546_v38 = vpop.f32.mrf.mxu0  ;;  %v15570_v55 = vpop.f32.mrf.mxu1  ;;  %v11444_v31 = vrot.slane %v11443_v49, 4  ;;  %v11960_v53 = vrot.slane %v11958_v0, 4  ;;  %v11961_v27 = vrot.slane %v11854_v20, 5  ;;  %v11959_v8 = vsel %vm16775_vm14, %v14429_v39, %v11958_v0  ;;  %v11860_v49 = vld [vmem:[#allocation2 + $0x50] sm:$0x1] }
 0x3ba   : > { %v19427_v62 = vadd.f32 %v15546_v38, %v19352_v34  ;;  %v11454_v19 = vrot.slane %v11453_v41, 4  ;;  %v19432_v47 = vadd.f32 %v15570_v55, %v19226_v46  ;;  %v11965_v37 = vrot.slane %v11856_v44, 5  ;;  %v11862_v38 = vld [vmem:[#allocation2 + $0x58] sm:$0xf] }
 0x3bb   : > { %v8011_v36 = vpop.f32.mrf.mxu0  ;;  %v8509_v50 = vpop.f32.mrf.mxu1  ;;  %v11449_v4 = vsel %vm16415_vm11, %v11444_v31, %v11448_v32  ;;  %v11962_v34 = vsel %vm16775_vm14, %v11960_v53, %v11961_v27  ;;  %v14430_v17 = vrot.slane %v11855_v48, 9  ;;  %v11968_v3 = vrot.slane %v11857_v60, 5 }
 0x3bc   : > { %v19439_v52 = vadd.f32 %v8011_v36, %v19361_v40  ;;  %v11459_v9 = vsel %vm16415_vm11, %v11454_v19, %v11458_v2  ;;  %v14461_v35 = vcombine.low %v11959_v8, %v11962_v34  ;;  %v11967_v20 = vrot.slane %v11965_v37, 4  ;;  %v11863_v19 = vld [vmem:[#allocation2 + $0x5c] sm:$0x1]  ;;  %v11865_v8 = vld [vmem:[#allocation2 + $0x64] sm:$0xf] }
 0x3bd   : > { %v15547_v46 = vpop.f32.mrf.mxu0  ;;  %v15571_v39 = vpop.f32.mrf.mxu1  ;;  %v14418_v0 = vcombine.low %v11449_v4, %v11459_v9  ;;  %v11966_v44 = vsel %vm16775_vm14, %v14430_v17, %v11965_v37  ;;  %v11972_v40 = vrot.slane %v11859_v33, 5  ;;  %v14431_v2 = vrot.slane %v11858_v22, 9  ;;  %v11864_v4 = vld [vmem:[#allocation2 + $0x60] sm:$0xe]  ;;  %v11866_v22 = vld [vmem:[#allocation2 + $0x68] sm:$0x1] }
 0x3be   : > { %v19444_v32 = vadd.f32 %v15547_v46, %v19373_v24  ;;  %15856 = vmatprep.mubr.bf16.mxu1 %v14461_v35  ;;  %v11969_v29 = vsel %vm16775_vm14, %v11967_v20, %v11968_v3  ;;  %v19451_v55 = vadd.f32 %v8509_v50, %v19248_v63  ;;  %v19454_v48 = vadd.f32 %v15571_v39, %v19251_v21  ;;  %v11861_v63 = vld [vmem:[#allocation2 + $0x54] sm:$0xe] }
 0x3bf   : > { %v8014_v41 = vpop.f32.mrf.mxu0  ;;  %v8512_v31 = vpop.f32.mrf.mxu1  ;;  %15833 = vmatmul.mubr.bf16.gmra.mxu0 %v14418_v0  ;;  %v14462_v53 = vcombine.low %v11966_v44, %v11969_v29  ;;  %v11974_v27 = vrot.slane %v11972_v40, 4  ;;  %v11975_v60 = vrot.slane %v11860_v49, 5  ;;  %v11979_v50 = vrot.slane %v11862_v38, 5 }
 0x3c0   : > { %v19457_v24 = vadd.f32 %v8014_v41, %v19384_v61  ;;  %v19460_v37 = vadd.f32 %v8512_v31, %v19415_v54  ;;  %v11973_v61 = vsel %vm16775_vm14, %v14431_v2, %v11972_v40  ;;  %v19472_v54 = vld [vmem:[#allocation2 + $0x70] sm:$0xf]  ;;  %v11982_v20 = vrot.slane %v11863_v19, 5  ;;  %v11871_v31 = vld [vmem:[#allocation2 + $0x7c] sm:$0xf] }
 0x3c1   : > { %v15614_v36 = vpop.f32.mrf.mxu0  ;;  %v15574_v33 = vpop.f32.mrf.mxu1  ;;  %15857 = vmatmul.mubr.bf16.gmra.mxu1 %v14462_v53  ;;  %v11976_v34 = vsel %vm16775_vm14, %v11974_v27, %v11975_v60  ;;  %v11981_v46 = vrot.slane %v11979_v50, 4  ;;  %v11986_v3 = vrot.slane %v11865_v8, 5  ;;  %v14432_v39 = vrot.slane %v11861_v63, 9 }
 0x3c2   : > { %v19463_v21 = vadd.f32 %v15614_v36, %v19400_v25  ;;  %v19470_v17 = vadd.f32 %v15574_v33, %v19269_v11  ;;  %v14463_v9 = vcombine.low %v11973_v61, %v11976_v34  ;;  %v14433_v0 = vrot.slane %v11864_v4, 9 }
 0x3c3   : > { %v8943_v35 = vpop.f32.mrf.mxu0  ;;  %v8525_v49 = vpop.f32.mrf.mxu1  ;;  %v11983_v40 = vsel %vm16775_vm14, %v11981_v46, %v11982_v20  ;;  %v11988_v38 = vrot.slane %v11986_v3, 4  ;;  %v11989_v41 = vrot.slane %v11866_v22, 5  ;;  %v11993_v2 = vrot.slane %v19472_v54, 5 }
 0x3c4   : > { %v19475_v25 = vadd.f32 %v8943_v35, %v19418_v12  ;;  %v19478_v44 = vadd.f32 %v8525_v49, %v19282_v58  ;;  %15860 = vmatprep.mubr.bf16.mxu1 %v14463_v9  ;;  %v8067_v12 = vadd.f32 %v19300_v42, %v19145_v59  ;;  %v11980_v60 = vsel %vm16775_vm14, %v14432_v39, %v11979_v50  ;;  %v11872_v50 = vld [vmem:[#allocation2 + $0x80] sm:$0x1]  ;;  %v11867_v9 = vld [vmem:[#allocation2 + $0x6c] sm:$0xe]  ;;  %v19508_v35 = vld [vmem:[#allocation2 + $0x88] sm:$0xf] }
 0x3c5   : > { %v15615_v11 = vpop.f32.mrf.mxu0  ;;  %v15575_v29 = vpop.f32.mrf.mxu1  ;;  %v11987_v19 = vsel %vm16775_vm14, %v14433_v0, %v11986_v3  ;;  %v11990_v8 = vsel %vm16775_vm14, %v11988_v38, %v11989_v41  ;;  %v14464_v59 = vcombine.low %v11980_v60, %v11983_v40  ;;  %v11995_v34 = vrot.slane %v11993_v2, 4  ;;  %v11877_v39 = vld [vmem:[#allocation2 + $0x94] sm:$0xf] }
 0x3c6   : > { %v19486_v53 = vadd.f32 %v15615_v11, %v19421_v6  ;;  %v19489_v58 = vadd.f32 %v15575_v29, %v19285_v13  ;;  %v11869_v6 = vld [vmem:[#allocation2 + $0x74] sm:$0x1]  ;;  %v12000_v13 = vrot.slane %v11871_v31, 5  ;;  %v14465_v4 = vcombine.low %v11987_v19, %v11990_v8 }
 0x3c7   : > { %v8946_v27 = vpop.f32.mrf.mxu0  ;;  %v8528_v36 = vpop.f32.mrf.mxu1  ;;  %v11996_v20 = vrot.slane %v11869_v6, 5  ;;  %v8071_v0 = vadd.f32 %v19325_v51, %v19193_v15  ;;  %v14434_v38 = vrot.slane %v11867_v9, 9  ;;  %v11875_v6 = vld [vmem:[#allocation2 + $0x8c] sm:$0x1]  ;;  %v11876_v9 = vld [vmem:[#allocation2 + $0x90] sm:$0xe] }
 0x3c8   : > { %v19498_v33 = vadd.f32 %v8946_v27, %v19424_v23  ;;  %v19500_v42 = vadd.f32 %v8528_v36, %v8067_v12  ;;  %v11870_v23 = vld [vmem:[#allocation2 + $0x78] sm:$0xe]  ;;  %v12002_v3 = vrot.slane %v12000_v13, 4  ;;  %v12007_v12 = vrot.slane %v19508_v35, 5  ;;  %v11880_v35 = vld [vmem:[#allocation2 + $0xa0] sm:$0xf] }
 0x3c9   : > { %v15618_v63 = vpop.f32.mrf.mxu0  ;;  %v15578_v61 = vpop.f32.mrf.mxu1  ;;  %15861 = vmatmul.mubr.bf16.gmra.mxu1 %v14464_v59  ;;  %v11997_v41 = vsel %vm16775_vm14, %v11995_v34, %v11996_v20  ;;  %v14435_v29 = vrot.slane %v11870_v23, 9  ;;  %v11994_v60 = vsel %vm16775_vm14, %v14434_v38, %v11993_v2  ;;  %v14437_v38 = vrot.slane %v11876_v9, 9  ;;  %v11886_v9 = vld [vmem:[#allocation2 + $0xb8] sm:$0xf] }
 0x3ca   : > { %v19503_v22 = vadd.f32 %v15618_v63, %v19432_v47  ;;  %v19506_v54 = vadd.f32 %v15578_v61, %v19307_v10  ;;  %15864 = vmatprep.mubr.bf16.mxu1 %v14465_v4  ;;  %v12003_v47 = vrot.slane %v11872_v50, 5  ;;  %v14466_v36 = vcombine.low %v11994_v60, %v11997_v41  ;;  %v11873_v61 = vld [vmem:[#allocation2 + $0x84] sm:$0xe]  ;;  %v11878_v50 = vld [vmem:[#allocation2 + $0x98] sm:$0x1] }
 0x3cb   : > { %v8959_v46 = vpop.f32.mrf.mxu0  ;;  %v8541_v49 = vpop.f32.mrf.mxu1  ;;  %v12009_v34 = vrot.slane %v12007_v12, 4  ;;  %vm13494_vm2 = vcmask 1044484  }
 0x3cc   : > { %v19513_v11 = vadd.f32 %v8959_v46, %v19451_v55  ;;  %v19516_v10 = vadd.f32 %v8541_v49, %v19314_v7  ;;  %v12004_v15 = vsel %vm16775_vm14, %v12002_v3, %v12003_v47  ;;  %v12014_v7 = vrot.slane %v11877_v39, 5  ;;  %v11883_v3 = vld [vmem:[#allocation2 + $0xac] sm:$0xf] }
 0x3cd   : > { %v15619_v40 = vpop.f32.mrf.mxu0  ;;  %v15579_v31 = vpop.f32.mrf.mxu1  ;;  %v12010_v46 = vrot.slane %v11875_v6, 5  ;;  %v8075_v49 = vadd.f32 %v19354_v26, %v19245_v56  ;;  %v14436_v47 = vrot.slane %v11873_v61, 9  ;;  %v11884_v61 = vld [vmem:[#allocation2 + $0xb0] sm:$0x1] }
 0x3ce   : > { %v19522_v27 = vadd.f32 %v15619_v40, %v19454_v48  ;;  %v19527_v51 = vadd.f32 %v15579_v31, %v19319_v18  ;;  %v12001_v48 = vsel %vm16775_vm14, %v14435_v29, %v12000_v13  ;;  %v12016_v23 = vrot.slane %v12014_v7, 4 }
 0x3cf   : > { %v8962_v55 = vpop.f32.mrf.mxu0  ;;  %v8544_v19 = vpop.f32.mrf.mxu1  ;;  %v14467_v4 = vcombine.low %v12001_v48, %v12004_v15  ;;  %v12011_v40 = vsel %vm16775_vm14, %v12009_v34, %v12010_v46  ;;  %v12021_v29 = vrot.slane %v11880_v35, 5  ;;  %v12008_v15 = vsel %vm16775_vm14, %v14436_v47, %v12007_v12  ;;  %v11881_v48 = vld [vmem:[#allocation2 + $0xa4] sm:$0x1]  ;;  %v11882_v34 = vld [vmem:[#allocation2 + $0xa8] sm:$0xe] }
 0x3d0   : > { %v19532_v8 = vadd.f32 %v8962_v55, %v19460_v37  ;;  %v19536_v59 = vadd.f32 %v8544_v19, %v8071_v0  ;;  %v12017_v0 = vrot.slane %v11878_v50, 5  ;;  %v14468_v19 = vcombine.low %v12008_v15, %v12011_v40 }
 0x3d1   : > { %v15622_v63 = vpop.f32.mrf.mxu0  ;;  %v15582_v18 = vpop.f32.mrf.mxu1  ;;  %15865 = vmatmul.mubr.bf16.gmra.mxu1 %v14466_v36  ;;  %v12035_v40 = vrot.slane %v11886_v9, 5  ;;  %v11885_v9 = vld [vmem:[#allocation2 + $0xb4] sm:$0xe] }
 0x3d2   : > { %v19539_v2 = vadd.f32 %v15622_v63, %v19470_v17  ;;  %v19542_v37 = vadd.f32 %v15582_v18, %v19334_v14  ;;  %15868 = vmatprep.mubr.bf16.mxu1 %v14467_v4  ;;  %v12018_v56 = vsel %vm16775_vm14, %v12016_v23, %v12017_v0  ;;  %v11879_v4 = vld [vmem:[#allocation2 + $0x9c] sm:$0xe]  ;;  %v12023_v18 = vrot.slane %v12021_v29, 4 }
 0x3d3   : > { %v8975_v13 = vpop.f32.mrf.mxu0  ;;  %v8557_v20 = vpop.f32.mrf.mxu1  ;;  %v12024_v23 = vrot.slane %v11881_v48, 5  ;;  %v14438_v0 = vrot.slane %v11879_v4, 9  ;;  %v20516_v48 = vld [vmem:[#allocation18_spill] sm:$0xff] }
 0x3d4   : > { %v19547_v39 = vadd.f32 %v8975_v13, %v19478_v44  ;;  %v19550_v17 = vadd.f32 %v8557_v20, %v19339_v28  ;;  %v12028_v44 = vrot.slane %v11883_v3, 5  ;;  %v11889_v13 = vld [vmem:[#allocation2 + $0xc4] sm:$0xf]  ;;  %v12031_v20 = vrot.slane %v11884_v61, 5  ;;  %v20515_v3 = vld [vmem:[#allocation17_spill] sm:$0xff] }
 0x3d5   : > { %v15623_v14 = vpop.f32.mrf.mxu0  ;;  %v15583_v41 = vpop.f32.mrf.mxu1  ;;  %v12022_v15 = vsel %vm16775_vm14, %v14438_v0, %v12021_v29  ;;  %v12037_v61 = vrot.slane %v12035_v40, 4 }
 0x3d6   : > { %v19555_v31 = vadd.f32 %v15623_v14, %v19489_v58  ;;  %v19560_v26 = vadd.f32 %v15583_v41, %v19350_v5  ;;  %v12015_v58 = vsel %vm16775_vm14, %v14437_v38, %v12014_v7  ;;  %v12030_v50 = vrot.slane %v12028_v44, 4 }
 0x3d7   : > { %v8978_v28 = vpop.f32.mrf.mxu0  ;;  %v8560_v55 = vpop.f32.mrf.mxu1  ;;  %v14469_v63 = vcombine.low %v12015_v58, %v12018_v56  ;;  %v14439_v14 = vrot.slane %v11882_v34, 9  ;;  %v12042_v56 = vrot.slane %v11889_v13, 5  ;;  %v11890_v34 = vld [vmem:[#allocation2 + $0xc8] sm:$0x1] }
 0x3d8   : > { %v19565_v60 = vadd.f32 %v8978_v28, %v19500_v42  ;;  %v19569_v36 = vadd.f32 %v8560_v55, %v8075_v49  ;;  %v12032_v41 = vsel %vm16775_vm14, %v12030_v50, %v12031_v20  ;;  %v20517_v50 = vld [vmem:[#allocation19_spill] sm:$0xff] }
 0x3d9   : > { %v15626_v6 = vpop.f32.mrf.mxu0  ;;  %v15586_v5 = vpop.f32.mrf.mxu1  ;;  %15869 = vmatmul.mubr.bf16.gmra.mxu1 %v14468_v19 }
 0x3da   : > { %v19572_v12 = vadd.f32 %v15626_v6, %v19506_v54  ;;  %v19575_v42 = vadd.f32 %v15586_v5, %v19359_v45  ;;  %15872 = vmatprep.mubr.bf16.mxu1 %v14469_v63  ;;  %v12025_v45 = vsel %vm16775_vm14, %v12023_v18, %v12024_v23  ;;  %v11887_v63 = vld [vmem:[#allocation2 + $0xbc] sm:$0x1]  ;;  %v11892_v5 = vld [vmem:[#allocation2 + $0xd0] sm:$0xf] }
 0x3db   : > { %v8991_v7 = vpop.f32.mrf.mxu0  ;;  %v8573_v35 = vpop.f32.mrf.mxu1  ;;  %v14470_v58 = vcombine.low %v12022_v15, %v12025_v45  ;;  %v12049_v20 = vrot.slane %v11892_v5, 5  ;;  %v11891_v45 = vld [vmem:[#allocation2 + $0xcc] sm:$0xe] }
 0x3dc   : > { %v19578_v46 = vadd.f32 %v8991_v7, %v19516_v10  ;;  %v19581_v49 = vadd.f32 %v8573_v35, %v20515_v3  ;;  %v12044_v7 = vrot.slane %v12042_v56, 4  ;;  %v11888_v35 = vld [vmem:[#allocation2 + $0xc0] sm:$0xe] }
 0x3dd   : > { %v15627_v54 = vpop.f32.mrf.mxu0  ;;  %v15587_v47 = vpop.f32.mrf.mxu1  ;;  %v12051_v5 = vrot.slane %v12049_v20, 4 }
 0x3de   : > { %v19586_v38 = vadd.f32 %v15627_v54, %v19527_v51  ;;  %v19591_v10 = vadd.f32 %v15587_v47, %v19371_v30  ;;  %v12029_v51 = vsel %vm16775_vm14, %v14439_v14, %v12028_v44  ;;  %v12038_v44 = vrot.slane %v11887_v63, 5  ;;  %v11893_v14 = vld [vmem:[#allocation2 + $0xd4] sm:$0x1] }
 0x3df   : > { %v8994_v28 = vpop.f32.mrf.mxu0  ;;  %v8576_v55 = vpop.f32.mrf.mxu1  ;;  %v14471_v30 = vcombine.low %v12029_v51, %v12032_v41  ;;  %v12045_v54 = vrot.slane %v11890_v34, 5  ;;  %v14440_v47 = vrot.slane %v11885_v9, 9  ;;  %v14442_v63 = vrot.slane %v11891_v45, 9 }
 0x3e0   : > { %v19596_v19 = vadd.f32 %v8994_v28, %v19536_v59  ;;  %v8673_v6 = vadd.f32 %v8576_v55, %v20516_v48  ;;  %v12039_v41 = vsel %vm16775_vm14, %v12037_v61, %v12038_v44  ;;  %v14441_v55 = vrot.slane %v11888_v35, 9 }
 0x3e1   : > { %v15630_v4 = vpop.f32.mrf.mxu0  ;;  %v15590_v18 = vpop.f32.mrf.mxu1  ;;  %15873 = vmatmul.mubr.bf16.gmra.mxu1 %v14470_v58  ;;  %v12046_v58 = vsel %vm16775_vm14, %v12044_v7, %v12045_v54 }
 0x3e2   : > { %v19602_v29 = vadd.f32 %v15630_v4, %v19542_v37  ;;  %v8678_v59 = vadd.f32 %v15590_v18, %v20517_v50  ;;  %15876 = vmatprep.mubr.bf16.mxu1 %v14471_v30  ;;  %v12052_v4 = vrot.slane %v11893_v14, 5 }
 0x3e3   : > { %v9007_v23 = vpop.f32.mrf.mxu0  ;;  %v8589_v13 = vpop.f32.mrf.mxu1 }
 0x3e4   : > { %v19606_v3 = vadd.f32 %v9007_v23, %v19550_v17  ;;  %v8676_v0 = vadd.f32 %v8589_v13, %v19394_v16  ;;  %v12036_v16 = vsel %vm16775_vm14, %v14440_v47, %v12035_v40  ;;  %v12053_v23 = vsel %vm16775_vm14, %v12051_v5, %v12052_v4 }
 0x3e5   : > { %v15631_v37 = vpop.f32.mrf.mxu0  ;;  %v15591_v28 = vpop.f32.mrf.mxu1  ;;  %v14472_v18 = vcombine.low %v12036_v16, %v12039_v41 }
 0x3e6   : > { %v19612_v15 = vadd.f32 %v15631_v37, %v19560_v26  ;;  %v8679_v17 = vadd.f32 %v15591_v28, %v19397_v57  ;;  %v12043_v26 = vsel %vm16775_vm14, %v14441_v55, %v12042_v56 }
 0x3e7   : > { %v9010_v51 = vpop.f32.mrf.mxu0  ;;  %v8592_v48 = vpop.f32.mrf.mxu1  ;;  %v14473_v50 = vcombine.low %v12043_v26, %v12046_v58 }
 0x3e8   : > { %v19620_v30 = vadd.f32 %v9010_v51, %v19569_v36  ;;  %v8677_v61 = vadd.f32 %v8592_v48, %v19405_v1  ;;  %v12050_v36 = vsel %vm16775_vm14, %v14442_v63, %v12049_v20 }
 0x3e9   : > { %v15634_v34 = vpop.f32.mrf.mxu0  ;;  %v15594_v57 = vpop.f32.mrf.mxu1  ;;  %15877 = vmatmul.mubr.bf16.gmra.mxu1 %v14472_v18 }
 0x3ea   : > { %v19626_v9 = vadd.f32 %v15634_v34, %v19575_v42  ;;  %v8682_v40 = vadd.f32 %v15594_v57, %v19427_v62  ;;  %15880 = vmatprep.mubr.bf16.mxu1 %v14473_v50  ;;  %v14474_v62 = vcombine.low %v12050_v36, %v12053_v23 }
 0x3eb   : > { %v9023_v7 = vpop.f32.mrf.mxu0  ;;  %v8605_v56 = vpop.f32.mrf.mxu1 }
 0x3ec   : > { %v19634_v1 = vadd.f32 %v9023_v7, %v19581_v49  ;;  %v8680_v44 = vadd.f32 %v8605_v56, %v19439_v52 }
 0x3ed   : > { %v15635_v35 = vpop.f32.mrf.mxu0  ;;  %v15595_v13 = vpop.f32.mrf.mxu1 }
 0x3ee   : > { %v19638_v42 = vadd.f32 %v15635_v35, %v19591_v10  ;;  %v8683_v54 = vadd.f32 %v15595_v13, %v19444_v32 }
 0x3ef   : > { %v9026_v45 = vpop.f32.mrf.mxu0  ;;  %v8608_v14 = vpop.f32.mrf.mxu1 }
 0x3f0   : > { %v19641_v20 = vadd.f32 %v9026_v45, %v8673_v6  ;;  %v8681_v43 = vadd.f32 %v8608_v14, %v19457_v24 }
 0x3f1   : > { %v15638_v37 = vpop.f32.mrf.mxu0  ;;  %v15662_v47 = vpop.f32.mrf.mxu1  ;;  %15881 = vmatmul.mubr.bf16.gmra.mxu1 %v14474_v62 }
 0x3f2   : > { %v19644_v49 = vadd.f32 %v15638_v37, %v8678_v59  ;;  %v19647_v52 = vadd.f32 %v15662_v47, %v19463_v21 }
 0x3f3   : > { %v9039_v41 = vpop.f32.mrf.mxu0  ;;  %v9761_v10 = vpop.f32.mrf.mxu1 }
 0x3f4   : > { %v19649_v28 = vadd.f32 %v9039_v41, %v8676_v0  ;;  %v19652_v32 = vadd.f32 %v9761_v10, %v19475_v25 }
 0x3f5   : > { %v15639_v55 = vpop.f32.mrf.mxu0  ;;  %v15663_v6 = vpop.f32.mrf.mxu1 }
 0x3f6   : > { %v19654_v58 = vadd.f32 %v15639_v55, %v8679_v17  ;;  %v19657_v24 = vadd.f32 %v15663_v6, %v19486_v53 }
 0x3f7   : > { %v9042_v51 = vpop.f32.mrf.mxu0  ;;  %v9764_v59 = vpop.f32.mrf.mxu1 }
 0x3f8   : > { %v19659_v16 = vadd.f32 %v9042_v51, %v8677_v61  ;;  %v19662_v21 = vadd.f32 %v9764_v59, %v19498_v33 }
 0x3f9   : > { %v15642_v48 = vpop.f32.mrf.mxu0  ;;  %v15666_v0 = vpop.f32.mrf.mxu1 }
 0x3fa   : > { %v19664_v63 = vadd.f32 %v15642_v48, %v8682_v40  ;;  %v9926_v25 = vadd.f32 %v15666_v0, %v19503_v22 }
 0x3fb   : > { %v9055_v5 = vpop.f32.mrf.mxu0  ;;  %v9777_v4 = vpop.f32.mrf.mxu1 }
 0x3fc   : > { %v19667_v17 = vadd.f32 %v9055_v5, %v8680_v44  ;;  %v9924_v53 = vadd.f32 %v9777_v4, %v19513_v11 }
 0x3fd   : > { %v15643_v18 = vpop.f32.mrf.mxu0  ;;  %v15667_v26 = vpop.f32.mrf.mxu1 }
 0x3fe   : > { %v19670_v34 = vadd.f32 %v15643_v18, %v8683_v54  ;;  %v9927_v61 = vadd.f32 %v15667_v26, %v19522_v27 }
 0x3ff   : > { %v9058_v33 = vpop.f32.mrf.mxu0  ;;  %v9780_v50 = vpop.f32.mrf.mxu1 }
 0x400   : > { %v19673_v57 = vadd.f32 %v9058_v33, %v8681_v43  ;;  %v9925_v40 = vadd.f32 %v9780_v50, %v19532_v8 }
 0x401   : > { %v19676_v7 = vpop.f32.mrf.mxu0  ;;  %v15670_v22 = vpop.f32.mrf.mxu1 }
 0x402   : > { %v9930_v36 = vadd.f32 %v15670_v22, %v19539_v2 }
 0x403   : > { %v19679_v23 = vpop.f32.mrf.mxu0  ;;  %v9793_v11 = vpop.f32.mrf.mxu1 }
 0x404   : > { %v9928_v56 = vadd.f32 %v9793_v11, %v19547_v39 }
 0x405   : > { %v19682_v44 = vpop.f32.mrf.mxu0  ;;  %v15671_v35 = vpop.f32.mrf.mxu1 }
 0x406   : > { %v9931_v27 = vadd.f32 %v15671_v35, %v19555_v31 }
 0x407   : > { %v19685_v13 = vpop.f32.mrf.mxu0  ;;  %v9796_v62 = vpop.f32.mrf.mxu1 }
 0x408   : > { %v9929_v8 = vadd.f32 %v9796_v62, %v19565_v60 }
 0x409   : > { %v15714_v54 = vpop.f32.mrf.mxu0  ;;  %v15674_v45 = vpop.f32.mrf.mxu1 }
 0x40a   : > { %v19688_v14 = vadd.f32 %v15714_v54, %v9926_v25  ;;  %v9934_v2 = vadd.f32 %v15674_v45, %v19572_v12 }
 0x40b   : > { %v10371_v43 = vpop.f32.mrf.mxu0  ;;  %v9809_v37 = vpop.f32.mrf.mxu1 }
 0x40c   : > { %v19691_v47 = vadd.f32 %v10371_v43, %v9924_v53  ;;  %v9932_v39 = vadd.f32 %v9809_v37, %v19578_v46 }
 0x40d   : > { %v15715_v41 = vpop.f32.mrf.mxu0  ;;  %v15675_v10 = vpop.f32.mrf.mxu1 }
 0x40e   : > { %v19694_v31 = vadd.f32 %v15715_v41, %v9927_v61  ;;  %v9935_v55 = vadd.f32 %v15675_v10, %v19586_v38 }
 0x40f   : > { %v10374_v6 = vpop.f32.mrf.mxu0  ;;  %v9812_v60 = vpop.f32.mrf.mxu1 }
 0x410   : > { %v19697_v51 = vadd.f32 %v10374_v6, %v9925_v40  ;;  %v9933_v59 = vadd.f32 %v9812_v60, %v19596_v19 }
 0x411   : > { %v15718_v48 = vpop.f32.mrf.mxu0  ;;  %v15678_v12 = vpop.f32.mrf.mxu1 }
 0x412   : > { %v19700_v0 = vadd.f32 %v15718_v48, %v9930_v36  ;;  %v9938_v25 = vadd.f32 %v15678_v12, %v19602_v29 }
 0x413   : > { %v10387_v5 = vpop.f32.mrf.mxu0  ;;  %v9825_v46 = vpop.f32.mrf.mxu1 }
 0x414   : > { %v19703_v4 = vadd.f32 %v10387_v5, %v9928_v56  ;;  %v9936_v53 = vadd.f32 %v9825_v46, %v19606_v3 }
 0x415   : > { %v15719_v18 = vpop.f32.mrf.mxu0  ;;  %v15679_v38 = vpop.f32.mrf.mxu1 }
 0x416   : > { %v19706_v26 = vadd.f32 %v15719_v18, %v9931_v27  ;;  %v9939_v61 = vadd.f32 %v15679_v38, %v19612_v15 }
 0x417   : > { %v10390_v33 = vpop.f32.mrf.mxu0  ;;  %v9828_v19 = vpop.f32.mrf.mxu1 }
 0x418   : > { %v19709_v50 = vadd.f32 %v10390_v33, %v9929_v8  ;;  %v9937_v40 = vadd.f32 %v9828_v19, %v19620_v30 }
 0x419   : > { %v15722_v22 = vpop.f32.mrf.mxu0  ;;  %v15682_v29 = vpop.f32.mrf.mxu1 }
 0x41a   : > { %v19712_v36 = vadd.f32 %v15722_v22, %v9934_v2  ;;  %v9942_v11 = vadd.f32 %v15682_v29, %v19626_v9 }
 0x41b   : > { %v10403_v56 = vpop.f32.mrf.mxu0  ;;  %v9841_v3 = vpop.f32.mrf.mxu1 }
 0x41c   : > { %v19715_v35 = vadd.f32 %v10403_v56, %v9932_v39  ;;  %v9940_v27 = vadd.f32 %v9841_v3, %v19634_v1 }
 0x41d   : > { %v15723_v62 = vpop.f32.mrf.mxu0  ;;  %v15683_v15 = vpop.f32.mrf.mxu1 }
 0x41e   : > { %v19718_v54 = vadd.f32 %v15723_v62, %v9935_v55  ;;  %v9943_v8 = vadd.f32 %v15683_v15, %v19638_v42 }
 0x41f   : > { %v10406_v45 = vpop.f32.mrf.mxu0  ;;  %v9844_v30 = vpop.f32.mrf.mxu1 }
 0x420   : > { %v19721_v43 = vadd.f32 %v10406_v45, %v9933_v59  ;;  %v9941_v2 = vadd.f32 %v9844_v30, %v19641_v20 }
 0x421   : > { %v15726_v37 = vpop.f32.mrf.mxu0  ;;  %v15686_v9 = vpop.f32.mrf.mxu1 }
 0x422   : > { %v19724_v41 = vadd.f32 %v15726_v37, %v9938_v25  ;;  %v9946_v39 = vadd.f32 %v15686_v9, %v19644_v49 }
 0x423   : > { %v10419_v10 = vpop.f32.mrf.mxu0  ;;  %v9857_v1 = vpop.f32.mrf.mxu1 }
 0x424   : > { %v19727_v6 = vadd.f32 %v10419_v10, %v9936_v53  ;;  %v9944_v55 = vadd.f32 %v9857_v1, %v19649_v28 }
 0x425   : > { %v15727_v60 = vpop.f32.mrf.mxu0  ;;  %v15687_v42 = vpop.f32.mrf.mxu1 }
 0x426   : > { %v19730_v48 = vadd.f32 %v15727_v60, %v9939_v61  ;;  %v9947_v59 = vadd.f32 %v15687_v42, %v19654_v58 }
 0x427   : > { %v10422_v12 = vpop.f32.mrf.mxu0  ;;  %v9860_v20 = vpop.f32.mrf.mxu1 }
 0x428   : > { %v19733_v5 = vadd.f32 %v10422_v12, %v9937_v40  ;;  %v9945_v25 = vadd.f32 %v9860_v20, %v19659_v16 }
 0x429   : > { %v15730_v46 = vpop.f32.mrf.mxu0 }
 0x42a   : > { %v19736_v49 = vadd.f32 %v15730_v46, %v9942_v11 }
 0x42b   : > { %v10435_v18 = vpop.f32.mrf.mxu0 }
 0x42c   : > { %v19738_v53 = vadd.f32 %v10435_v18, %v9940_v27  ;;  %v15690_v38 = vpop.f32.mrf.mxu1 }
 0x42d   : > { %v15731_v28 = vpop.f32.mrf.mxu0  ;;  %v9950_v33 = vadd.f32 %v15690_v38, %v19664_v63 }
 0x42e   : > { %v19741_v61 = vadd.f32 %v15731_v28, %v9943_v8  ;;  %v9873_v19 = vpop.f32.mrf.mxu1 }
 0x42f   : > { %v10438_v58 = vpop.f32.mrf.mxu0  ;;  %v9948_v22 = vadd.f32 %v9873_v19, %v19667_v17 }
 0x430   : > { %v19744_v40 = vadd.f32 %v10438_v58, %v9941_v2  ;;  %v15691_v29 = vpop.f32.mrf.mxu1 }
 0x431   : > { %v15734_v16 = vpop.f32.mrf.mxu0  ;;  %v9951_v11 = vadd.f32 %v15691_v29, %v19670_v34 }
 0x432   : > { %v19747_v56 = vadd.f32 %v15734_v16, %v9946_v39  ;;  %v9876_v3 = vpop.f32.mrf.mxu1 }
 0x433   : > { %v10451_v27 = vpop.f32.mrf.mxu0  ;;  %v9949_v62 = vadd.f32 %v9876_v3, %v19673_v57 }
 0x434   : > { %v19750_v15 = vadd.f32 %v10451_v27, %v9944_v55  ;;  %v19752_v63 = vpop.f32.mrf.mxu1 }
 0x435   : > { %v15735_v8 = vpop.f32.mrf.mxu0 }
 0x436   : > { %v19754_v45 = vadd.f32 %v15735_v8, %v9947_v59  ;;  %v19756_v17 = vpop.f32.mrf.mxu1 }
 0x437   : > { %v10454_v30 = vpop.f32.mrf.mxu0 }
 0x438   : > { %v19758_v2 = vadd.f32 %v10454_v30, %v9945_v25  ;;  %v19760_v37 = vpop.f32.mrf.mxu1 }
 0x439   : > { %v15738_v34 = vpop.f32.mrf.mxu0 }
 0x43a   : > { %v19762_v9 = vadd.f32 %v15738_v34, %v9950_v33  ;;  %v19764_v39 = vpop.f32.mrf.mxu1 }
 0x43b   : > { %v10467_v57 = vpop.f32.mrf.mxu0 }
 0x43c   : > { %v19766_v10 = vadd.f32 %v10467_v57, %v9948_v22  ;;  %v15762_v1 = vpop.f32.mrf.mxu1 }
 0x43d   : > { %v15739_v55 = vpop.f32.mrf.mxu0  ;;  %v19769_v60 = vadd.f32 %v15762_v1, %v19688_v14 }
 0x43e   : > { %v19771_v42 = vadd.f32 %v15739_v55, %v9951_v11  ;;  %v10821_v59 = vpop.f32.mrf.mxu1 }
 0x43f   : > { %v10470_v12 = vpop.f32.mrf.mxu0  ;;  %v19774_v20 = vadd.f32 %v10821_v59, %v19691_v47 }
 0x440   : > { %v19776_v25 = vadd.f32 %v10470_v12, %v9949_v62  ;;  %v15763_v46 = vpop.f32.mrf.mxu1 }
 0x441   : > { %v19778_v18 = vpop.f32.mrf.mxu0  ;;  %v19781_v38 = vadd.f32 %v15763_v46, %v19694_v31 }
 0x442   : > { %v10824_v28 = vpop.f32.mrf.mxu1 }
 0x443   : > { %v19783_v33 = vpop.f32.mrf.mxu0  ;;  %v19786_v14 = vadd.f32 %v10824_v28, %v19697_v51 }
 0x444   : > { %v15766_v19 = vpop.f32.mrf.mxu1 }
 0x445   : > { %v19788_v58 = vpop.f32.mrf.mxu0  ;;  %v19791_v47 = vadd.f32 %v15766_v19, %v19700_v0 }
 0x446   : > { %v10837_v22 = vpop.f32.mrf.mxu1 }
 0x447   : > { %v19793_v29 = vpop.f32.mrf.mxu0  ;;  %v19796_v16 = vadd.f32 %v10837_v22, %v19703_v4 }
 0x448   : > { %v15767_v31 = vpop.f32.mrf.mxu1 }
 0x449   : > { %v19798_v11 = vpop.f32.mrf.mxu0  ;;  %v19801_v3 = vadd.f32 %v15767_v31, %v19706_v26 }
 0x44a   : > { %v10840_v51 = vpop.f32.mrf.mxu1 }
 0x44b   : > { %v19803_v27 = vpop.f32.mrf.mxu0  ;;  %v19806_v62 = vadd.f32 %v10840_v51, %v19709_v50 }
 0x44c   : > { %v15770_v0 = vpop.f32.mrf.mxu1 }
 0x44d   : > { %v19808_v8 = vpop.f32.mrf.mxu0  ;;  %v19811_v30 = vadd.f32 %v15770_v0, %v19712_v36 }
 0x44e   : > { %v10853_v4 = vpop.f32.mrf.mxu1 }
 0x44f   : > { %v19813_v34 = vpop.f32.mrf.mxu0  ;;  %v19816_v57 = vadd.f32 %v10853_v4, %v19715_v35 }
 0x450   : > { %v15771_v26 = vpop.f32.mrf.mxu1 }
 0x451   : > { %v19818_v1 = vpop.f32.mrf.mxu0  ;;  %v19821_v55 = vadd.f32 %v15771_v26, %v19718_v54 }
 0x452   : > { %v10856_v50 = vpop.f32.mrf.mxu1 }
 0x453   : > { %v19823_v59 = vpop.f32.mrf.mxu0  ;;  %v19826_v12 = vadd.f32 %v10856_v50, %v19721_v43 }
 0x454   : > { %v15774_v36 = vpop.f32.mrf.mxu1 }
 0x455   : > { %v19828_v46 = vpop.f32.mrf.mxu0  ;;  %v19831_v28 = vadd.f32 %v15774_v36, %v19724_v41 }
 0x456   : > { %v10869_v35 = vpop.f32.mrf.mxu1 }
 0x457   : > { %v19833_v19 = vpop.f32.mrf.mxu0  ;;  %v19836_v22 = vadd.f32 %v10869_v35, %v19727_v6 }
 0x458   : > { %v15775_v54 = vpop.f32.mrf.mxu1 }
 0x459   : > { %v19838_v31 = vpop.f32.mrf.mxu0  ;;  %v19841_v51 = vadd.f32 %v15775_v54, %v19730_v48 }
 0x45a   : > { %v10872_v43 = vpop.f32.mrf.mxu1 }
 0x45b   : > { %20518 = vst [vmem:[#allocation20_spill] sm:$0xff] %v19841_v51  ;;  %v19843_v0 = vpop.f32.mrf.mxu0  ;;  %v19846_v4 = vadd.f32 %v10872_v43, %v19733_v5 }
 0x45c   : > { %v15778_v41 = vpop.f32.mrf.mxu1 }
 0x45d   : > { %20519 = vst [vmem:[#allocation21_spill] sm:$0xff] %v19846_v4  ;;  %v19848_v26 = vpop.f32.mrf.mxu0  ;;  %v19851_v50 = vadd.f32 %v15778_v41, %v19736_v49 }
 0x45e   : > { %v10885_v6 = vpop.f32.mrf.mxu1 }
 0x45f   : > { %20520 = vst [vmem:[#allocation23_spill] sm:$0xff] %v19851_v50  ;;  %v19853_v36 = vpop.f32.mrf.mxu0  ;;  %v19856_v35 = vadd.f32 %v10885_v6, %v19738_v53 }
 0x460   : > { %v15779_v48 = vpop.f32.mrf.mxu1 }
 0x461   : > { %20521 = vst [vmem:[#allocation24_spill] sm:$0xff] %v19856_v35  ;;  %v19858_v54 = vpop.f32.mrf.mxu0  ;;  %v19861_v51 = vadd.f32 %v15779_v48, %v19741_v61 }
 0x462   : > { %v10888_v5 = vpop.f32.mrf.mxu1 }
 0x463   : > { %20522 = vst [vmem:[#allocation25_spill] sm:$0xff] %v19861_v51  ;;  %v19863_v43 = vpop.f32.mrf.mxu0  ;;  %v19866_v4 = vadd.f32 %v10888_v5, %v19744_v40 }
 0x464   : > { %v15782_v49 = vpop.f32.mrf.mxu1 }
 0x465   : > { %20523 = vst [vmem:[#allocation32_spill] sm:$0xff] %v19866_v4  ;;  %v19868_v41 = vpop.f32.mrf.mxu0  ;;  %v19871_v50 = vadd.f32 %v15782_v49, %v19747_v56 }
 0x466   : > { %v10901_v53 = vpop.f32.mrf.mxu1 }
 0x467   : > { %20524 = vst [vmem:[#allocation26_spill] sm:$0xff] %v19871_v50  ;;  %v19873_v6 = vpop.f32.mrf.mxu0  ;;  %v19876_v35 = vadd.f32 %v10901_v53, %v19750_v15 }
 0x468   : > { %v15783_v61 = vpop.f32.mrf.mxu1 }
 0x469   : > { %20525 = vst [vmem:[#allocation29_spill] sm:$0xff] %v19876_v35  ;;  %v19878_v48 = vpop.f32.mrf.mxu0  ;;  %v19881_v51 = vadd.f32 %v15783_v61, %v19754_v45 }
 0x46a   : > { %v10904_v40 = vpop.f32.mrf.mxu1 }
 0x46b   : > { %20526 = vst [vmem:[#allocation28_spill] sm:$0xff] %v19881_v51  ;;  %v19883_v5 = vpop.f32.mrf.mxu0  ;;  %v19886_v4 = vadd.f32 %v10904_v40, %v19758_v2  ;;  %v12580_v40 = vlaneseq }
 0x46c   : > { %20527 = vst [vmem:[#allocation31_spill] sm:$0xff] %v19883_v5  ;;  %v15786_v56 = vpop.f32.mrf.mxu1  ;;  %v16233_v5 = vmov 1983009808  }
 0x46d   : > { %20528 = vst [vmem:[#allocation35_spill] sm:$0xff] %v19886_v4  ;;  %v19888_v49 = vpop.f32.mrf.mxu0  ;;  %v19891_v50 = vadd.f32 %v15786_v56, %v19762_v9  ;;  %v12578_v2 = vunpack.c.l.s4 %v16233_v5  ;;  %v10516_v4 = vadd.f32 %v19676_v7, %v19647_v52  ;;  %v10514_v56 = vadd.f32 %v19679_v23, %v19652_v32  ;;  %v19918_v32 = vld [vmem:[%s20317_s2 + $0x1] ss:$0 sm:$0xff] }
 0x46e   : > { %20529 = vst [vmem:[#allocation33_spill] sm:$0xff] %v19888_v49  ;;  %v10917_v15 = vpop.f32.mrf.mxu1  ;;  %v10515_v5 = vadd.f32 %v19685_v13, %v19662_v21 }
 0x46f   : > { %v19893_v53 = vpop.f32.mrf.mxu0  ;;  %v19896_v35 = vadd.f32 %v10917_v15, %v19766_v10  ;;  %v10966_v10 = vadd.f32 %v19752_v63, %v10516_v4  ;;  %v10964_v52 = vadd.f32 %v19756_v17, %v10514_v56  ;;  %v19948_v56 = vadd.f32 %v19823_v59, %v19796_v16 }
 0x470   : > { %v15787_v45 = vpop.f32.mrf.mxu1  ;;  %v10965_v63 = vadd.f32 %v19764_v39, %v10515_v5  ;;  %v11786_v39 = vadd.f32 %v19803_v27, %v19774_v20  ;;  %v19965_v16 = vadd.f32 %v19843_v0, %v19816_v57  ;;  %v19981_v57 = vadd.f32 %v19863_v43, %v19836_v22  ;;  %v20534_v22 = vld [vmem:[#allocation24_spill] sm:$0xff] }
 0x471   : > { %20530 = vst [vmem:[#allocation37_spill] sm:$0xff] %v19896_v35  ;;  %v19899_v61 = vadd.f32 %v15787_v45, %v19771_v42  ;;  %v12579_v35 = vunpack.c.0.s8 %v12578_v2  ;;  %v12581_v42 = vshrl.u32 %v12580_v40, 7  ;;  %v10517_v45 = vadd.f32 %v19682_v44, %v19657_v24 }
 0x472   : > { %v10920_v51 = vpop.f32.mrf.mxu1  ;;  %v15830_v49 = vpop.f32.mrf.mxu0  ;;  %v11784_v7 = vadd.f32 %v19778_v18, %v10966_v10  ;;  %v11783_v18 = vadd.f32 %v19793_v29, %v10965_v63  ;;  %v19944_v29 = vadd.f32 %v19818_v1, %v19791_v47  ;;  %v19961_v47 = vadd.f32 %v19838_v31, %v19811_v30  ;;  %v20536_v10 = vld [vmem:[#allocation25_spill] sm:$0xff] }
 0x473   : > { %v19904_v9 = vadd.f32 %v10920_v51, %v19776_v25  ;;  %v10967_v23 = vadd.f32 %v19760_v37, %v10517_v45  ;;  %v11782_v51 = vadd.f32 %v19783_v33, %v10964_v52  ;;  %v19923_v21 = vsub.s32 %v12579_v35, %v12581_v42  ;;  %v20538_v45 = vld [vmem:[#allocation32_spill] sm:$0xff]  ;;  %v20539_v52 = vld [vmem:[#allocation26_spill] sm:$0xff]  ;;  %v20540_v63 = vld [vmem:[#allocation29_spill] sm:$0xff] }
 0x474   : > { %v11719_v15 = vpop.f32.mrf.mxu0  ;;  %v19925_v13 = vsub.s32 0, %v12581_v42  ;;  %v11788_v37 = vadd.f32 %v19798_v11, %v19769_v60  ;;  %v19936_v33 = vadd.f32 %v19808_v8, %v19781_v38  ;;  %v19940_v35 = vadd.f32 %v19813_v34, %v19786_v14 }
 0x475   : > { %v11785_v17 = vadd.f32 %v19788_v58, %v10967_v23  ;;  %v19953_v38 = vadd.f32 %v19828_v46, %v19801_v3  ;;  %v19957_v14 = vadd.f32 %v19833_v19, %v19806_v62  ;;  %v19969_v8 = vadd.f32 %v19848_v26, %v19821_v55  ;;  %v20531_v46 = vld [vmem:[#allocation20_spill] sm:$0xff]  ;;  %v20532_v19 = vld [vmem:[#allocation21_spill] sm:$0xff] }
 0x476   : > { %v15831_v24 = vpop.f32.mrf.mxu0  ;;  %v19973_v62 = vadd.f32 %v19853_v36, %v19826_v12  ;;  %v19977_v30 = vadd.f32 %v19858_v54, %v19831_v28  ;;  %v19986_v55 = vadd.f32 %v19868_v41, %v20531_v46  ;;  %v19990_v31 = vadd.f32 %v19873_v6, %v20532_v19  ;;  %v20533_v28 = vld [vmem:[#allocation23_spill] sm:$0xff]  ;;  %v20537_v42 = vld [vmem:[#allocation33_spill] sm:$0xff] }
 0x477   : > { %v19995_v36 = vadd.f32 %v19878_v48, %v20533_v28  ;;  %v20535_v54 = vld [vmem:[#allocation31_spill] sm:$0xff]  ;;  %v20003_v41 = vadd.f32 %v20537_v42, %v20536_v10  ;;  %v20007_v6 = vadd.f32 %v19893_v53, %v20538_v45 }
 0x478   : > { %v15854_v25 = vpop.f32.mrf.mxu1  ;;  %v11722_v60 = vpop.f32.mrf.mxu0  ;;  %v19999_v43 = vadd.f32 %v20535_v54, %v20534_v22 }
 0x479   : > { %v12378_v44 = vadd.f32 %v15854_v25, %v11784_v7  ;;  %v20010_v7 = vadd.f32 %v15830_v49, %v20539_v52 }
 0x47a   : > { %v12217_v4 = vpop.f32.mrf.mxu1 }
 0x47b   : > { %v12482_v2 = vadd.f32 %v19918_v32, %v12378_v44  ;;  %v12376_v40 = vadd.f32 %v12217_v4, %v11782_v51  ;;  %v20014_v51 = vadd.f32 %v11719_v15, %v20540_v63  ;;  %v20541_v44 = vld [vmem:[#allocation28_spill] sm:$0xff] }
 0x47c   : > { %v15855_v58 = vpop.f32.mrf.mxu1  ;;  %v20017_v4 = vadd.f32 %v15831_v24, %v20541_v44 }
 0x47d   : > { %v12480_v20 = vadd.f32 %v19918_v32, %v12376_v40  ;;  %v12379_v11 = vadd.f32 %v15855_v58, %v11785_v17  ;;  %v12514_v34 = vmax.f32 %v12482_v2, 0.0  ;;  %v20542_v2 = vld [vmem:[#allocation35_spill] sm:$0xff] }
 0x47e   : > { %v12220_v27 = vpop.f32.mrf.mxu1  ;;  %v20020_v40 = vadd.f32 %v11722_v60, %v20542_v2  ;;  %v20543_v60 = vld [vmem:[#allocation37_spill] sm:$0xff] }
 0x47f   : > { %v12512_v3 = vmax.f32 %v12480_v20, 0.0  ;;  %v12377_v1 = vadd.f32 %v12220_v27, %v11783_v18  ;;  %v12483_v59 = vadd.f32 %v19918_v32, %v12379_v11  ;;  %v15834_v12 = vpop.f32.mrf.mxu0 }
 0x480   : > { %v20024_v27 = vadd.f32 %v15834_v12, %v19891_v50 }
 0x481   : > { %v12544_v0 = vmax.f32 %v12512_v3, %v12514_v34  ;;  %v12481_v26 = vadd.f32 %v19918_v32, %v12377_v1  ;;  %v15858_v5 = vpop.f32.mrf.mxu1  ;;  %v12515_v17 = vmax.f32 %v12483_v59, 0.0  ;;  %v11735_v11 = vpop.f32.mrf.mxu0 }
 0x482   : > { %v12382_v53 = vadd.f32 %v15858_v5, %v11788_v37  ;;  %v20028_v19 = vadd.f32 %v11735_v11, %v20543_v60 }
 0x483   : > { %v12576_v25 = vcombine.high %v12544_v0, %v12544_v0  ;;  %v12583_v48 = vrot.slane %v12544_v0, %v19923_v21  ;;  %v12513_v23 = vmax.f32 %v12481_v26, 0.0  ;;  %v12233_v18 = vpop.f32.mrf.mxu1 }
 0x484   : > { %v12486_v24 = vadd.f32 %v19918_v32, %v12382_v53  ;;  %v12380_v34 = vadd.f32 %v12233_v18, %v11786_v39 }
 0x485   : > { %v12590_v49 = vrot.slane %v12576_v25, %v19923_v21  ;;  %v12591_v58 = vcombine.high %v12583_v48, %v12583_v48  ;;  %v14485_v20 = vrot.slane %v12583_v48, 9  ;;  %v12545_v15 = vmax.f32 %v12513_v23, %v12515_v17  ;;  %v15859_v3 = vpop.f32.mrf.mxu1 }
 0x486   : > { %v12518_v50 = vmax.f32 %v12486_v24, 0.0  ;;  %v12484_v5 = vadd.f32 %v19918_v32, %v12380_v34  ;;  %v12383_v63 = vadd.f32 %v15859_v3, %v19936_v33 }
 0x487   : > { %v12592_v1 = vcombine.high %v12590_v49, %v12590_v49  ;;  %v14486_v37 = vrot.slane %v12591_v58, 9  ;;  %v14487_v59 = vrot.slane %v12590_v49, 9  ;;  %v13104_v46 = vmax.f32 %v12583_v48, %v14485_v20  ;;  %v12236_v12 = vpop.f32.mrf.mxu1 }
 0x488   : > { %v12593_v0 = vcombine.high %v12545_v15, %v12545_v15  ;;  %v12600_v26 = vrot.slane %v12545_v15, %v19923_v21  ;;  %v12516_v20 = vmax.f32 %v12484_v5, 0.0  ;;  %v12487_v11 = vadd.f32 %v19918_v32, %v12383_v63 }
 0x489   : > { %v14488_v28 = vrot.slane %v12592_v1, 9  ;;  %v13105_v22 = vmax.f32 %v12591_v58, %v14486_v37  ;;  %v13106_v54 = vmax.f32 %v12590_v49, %v14487_v59  ;;  %v13235_v39 = vrot.slane %v13104_v46, %v19925_v13  ;;  %v15862_v52 = vpop.f32.mrf.mxu1 }
 0x48a   : > { %v12607_v10 = vrot.slane %v12593_v0, %v19923_v21  ;;  %v12608_v42 = vcombine.high %v12600_v26, %v12600_v26  ;;  %v14489_v45 = vrot.slane %v12600_v26, 9  ;;  %v12546_v59 = vmax.f32 %v12516_v20, %v12518_v50 }
 0x48b   : > { %v13107_v25 = vmax.f32 %v12592_v1, %v14488_v28  ;;  %v13239_v48 = vrot.slane %v13105_v22, %v19925_v13  ;;  %v13243_v23 = vrot.slane %v13106_v54, %v19925_v13  ;;  %v12249_v2 = vpop.f32.mrf.mxu1  ;;  %v12519_v46 = vmax.f32 %v12487_v11, 0.0 }
 0x48c   : > { %v12609_v44 = vcombine.high %v12607_v10, %v12607_v10  ;;  %v14490_v17 = vrot.slane %v12608_v42, 9  ;;  %v14491_v53 = vrot.slane %v12607_v10, 9  ;;  %v13108_v18 = vmax.f32 %v12600_v26, %v14489_v45 }
 0x48d   : > { %v13247_v49 = vrot.slane %v13107_v25, %v19925_v13  ;;  %v13489_v58 = vsel %vm13488_vm15, %v13239_v48, %v13235_v39  ;;  %v15863_v33 = vpop.f32.mrf.mxu1  ;;  %v12381_v28 = vadd.f32 %v12236_v12, %v19940_v35  ;;  %v12610_v39 = vcombine.high %v12546_v59, %v12546_v59 }
 0x48e   : > { %v13491_v15 = vsel %vm13490_vm0, %v13243_v23, %v13489_v58  ;;  %v14492_v24 = vrot.slane %v12609_v44, 9  ;;  %v13109_v34 = vmax.f32 %v12608_v42, %v14490_v17  ;;  %v13110_v1 = vmax.f32 %v12607_v10, %v14491_v53 }
 0x48f   : > { %v13251_v3 = vrot.slane %v13108_v18, %v19925_v13  ;;  %v13493_v37 = vsel %vm13492_vm1, %v13247_v49, %v13491_v15  ;;  %v12252_v22 = vpop.f32.mrf.mxu1  ;;  %v12617_v10 = vrot.slane %v12546_v59, %v19923_v21  ;;  %v12386_v42 = vadd.f32 %v15862_v52, %v19944_v29 }
 0x490   : > { %v13111_v60 = vmax.f32 %v12609_v44, %v14492_v24  ;;  %v13255_v0 = vrot.slane %v13109_v34, %v19925_v13  ;;  %v13259_v26 = vrot.slane %v13110_v1, %v19925_v13  ;;  %v12485_v5 = vadd.f32 %v19918_v32, %v12381_v28 }
 0x491   : > { %v13495_v54 = vsel %vm13494_vm2, %v13251_v3, %v13493_v37  ;;  %v12384_v25 = vadd.f32 %v12249_v2, %v19948_v56  ;;  %v20056_v48 = vpop.f32.mrf.mxu1  ;;  %v12624_v12 = vrot.slane %v12610_v39, %v19923_v21  ;;  %v12625_v23 = vcombine.high %v12617_v10, %v12617_v10 }
 0x492   : > { %v13263_v45 = vrot.slane %v13111_v60, %v19925_v13  ;;  %v13497_v50 = vsel %vm13496_vm3, %v13255_v0, %v13495_v54  ;;  %v14493_v63 = vrot.slane %v12617_v10, 9  ;;  %v12517_v17 = vmax.f32 %v12485_v5, 0.0 }
 0x493   : > { %v13499_v35 = vsel %vm13498_vm4, %v13259_v26, %v13497_v50  ;;  %v12490_v29 = vadd.f32 %v19918_v32, %v12386_v42  ;;  %v12488_v52 = vadd.f32 %v19918_v32, %v12384_v25  ;;  %v20063_v53 = vpop.f32.mrf.mxu1  ;;  %v12626_v56 = vcombine.high %v12624_v12, %v12624_v12 }
 0x494   : > { %v13501_v44 = vsel %vm13500_vm5, %v13263_v45, %v13499_v35  ;;  %v14494_v18 = vrot.slane %v12625_v23, 9  ;;  %v14495_v2 = vrot.slane %v12624_v12, 9  ;;  %v13112_v49 = vmax.f32 %v12617_v10, %v14493_v63 }
 0x495   : > { %13559 = vst [vmem:[%s20065_s7] sm:$0xff] %v13501_v44  ;;  %v12547_v58 = vmax.f32 %v12517_v17, %v12519_v46  ;;  %v12522_v20 = vmax.f32 %v12490_v29, 0.0  ;;  %v12520_v11 = vmax.f32 %v12488_v52, 0.0  ;;  %v12387_v15 = vadd.f32 %v15863_v33, %v19953_v38  ;;  %v20069_v24 = vpop.f32.mrf.mxu1 }
 0x496   : > { %v14496_v34 = vrot.slane %v12626_v56, 9  ;;  %v13113_v1 = vmax.f32 %v12625_v23, %v14494_v18  ;;  %v13114_v3 = vmax.f32 %v12624_v12, %v14495_v2  ;;  %v13267_v37 = vrot.slane %v13112_v49, %v19925_v13 }
 0x497   : > { %v12627_v59 = vcombine.high %v12547_v58, %v12547_v58  ;;  %v12634_v60 = vrot.slane %v12547_v58, %v19923_v21  ;;  %v12548_v0 = vmax.f32 %v12520_v11, %v12522_v20  ;;  %v12491_v26 = vadd.f32 %v19918_v32, %v12387_v15  ;;  %v12268_v45 = vpop.f32.mrf.mxu1 }
 0x498   : > { %v13115_v28 = vmax.f32 %v12626_v56, %v14496_v34  ;;  %v13271_v46 = vrot.slane %v13113_v1, %v19925_v13  ;;  %v13275_v54 = vrot.slane %v13114_v3, %v19925_v13  ;;  %v12385_v38 = vadd.f32 %v12252_v22, %v19957_v14 }
 0x499   : > { %v12641_v33 = vrot.slane %v12627_v59, %v19923_v21  ;;  %v12642_v39 = vcombine.high %v12634_v60, %v12634_v60  ;;  %v14497_v10 = vrot.slane %v12634_v60, 9  ;;  %v12644_v42 = vcombine.high %v12548_v0, %v12548_v0  ;;  %v15870_v49 = vpop.f32.mrf.mxu1 }
 0x49a   : > { %v13279_v50 = vrot.slane %v13115_v28, %v19925_v13  ;;  %v13502_v5 = vsel %vm13488_vm15, %v13271_v46, %v13267_v37  ;;  %v12651_v25 = vrot.slane %v12548_v0, %v19923_v21  ;;  %v12523_v35 = vmax.f32 %v12491_v26, 0.0 }
 0x49b   : > { %v13503_v12 = vsel %vm13490_vm0, %v13275_v54, %v13502_v5  ;;  %v12643_v23 = vcombine.high %v12641_v33, %v12641_v33  ;;  %v14498_v63 = vrot.slane %v12642_v39, 9  ;;  %v14499_v44 = vrot.slane %v12641_v33, 9 }
 0x49c   : > { %v13116_v17 = vmax.f32 %v12634_v60, %v14497_v10  ;;  %v13504_v14 = vsel %vm13492_vm1, %v13279_v50, %v13503_v12  ;;  %v12658_v22 = vrot.slane %v12644_v42, %v19923_v21  ;;  %v12659_v29 = vcombine.high %v12651_v25, %v12651_v25 }
 0x49d   : > { %v14500_v52 = vrot.slane %v12643_v23, 9  ;;  %v13117_v56 = vmax.f32 %v12642_v39, %v14498_v63  ;;  %v13118_v18 = vmax.f32 %v12641_v33, %v14499_v44  ;;  %v14501_v2 = vrot.slane %v12651_v25, 9  ;;  %v12281_v39 = vpop.f32.mrf.mxu1 }
 0x49e   : > { %v13283_v58 = vrot.slane %v13116_v17, %v19925_v13  ;;  %v12660_v20 = vcombine.high %v12658_v22, %v12658_v22  ;;  %v14502_v11 = vrot.slane %v12659_v29, 9  ;;  %v14503_v15 = vrot.slane %v12658_v22, 9 }
 0x49f   : > { %v13119_v34 = vmax.f32 %v12643_v23, %v14500_v52  ;;  %v13287_v1 = vrot.slane %v13117_v56, %v19925_v13  ;;  %v13291_v3 = vrot.slane %v13118_v18, %v19925_v13  ;;  %v13120_v37 = vmax.f32 %v12651_v25, %v14501_v2 }
 0x4a0   : > { %v13505_v59 = vsel %vm13494_vm2, %v13283_v58, %v13504_v14  ;;  %v14504_v60 = vrot.slane %v12660_v20, 9  ;;  %v13121_v0 = vmax.f32 %v12659_v29, %v14502_v11  ;;  %v13122_v26 = vmax.f32 %v12658_v22, %v14503_v15 }
 0x4a1   : > { %v13295_v28 = vrot.slane %v13119_v34, %v19925_v13  ;;  %v13506_v46 = vsel %vm13496_vm3, %v13287_v1, %v13505_v59  ;;  %v13299_v54 = vrot.slane %v13120_v37, %v19925_v13  ;;  %v12489_v33 = vadd.f32 %v19918_v32, %v12385_v38 }
 0x4a2   : > { %v13507_v10 = vsel %vm13498_vm4, %v13291_v3, %v13506_v46  ;;  %v13123_v42 = vmax.f32 %v12660_v20, %v14504_v60  ;;  %v13303_v50 = vrot.slane %v13121_v0, %v19925_v13  ;;  %v13307_v5 = vrot.slane %v13122_v26, %v19925_v13 }
 0x4a3   : > { %v13508_v25 = vsel %vm13500_vm5, %v13295_v28, %v13507_v10  ;;  %v12521_v12 = vmax.f32 %v12489_v33, 0.0  ;;  %v12390_v23 = vadd.f32 %v20056_v48, %v19961_v47  ;;  %v12388_v63 = vadd.f32 %v20063_v53, %v19965_v16  ;;  %v15871_v48 = vpop.f32.mrf.mxu1 }
 0x4a4   : > { %13560 = vst [vmem:[%s20065_s7 + $0x8] sm:$0xff] %v13508_v25  ;;  %v13311_v38 = vrot.slane %v13123_v42, %v19925_v13  ;;  %v13509_v44 = vsel %vm13488_vm15, %v13303_v50, %v13299_v54  ;;  %v12391_v17 = vadd.f32 %v20069_v24, %v19969_v8  ;;  %v12389_v14 = vadd.f32 %v12268_v45, %v19973_v62 }
 0x4a5   : > { %v13510_v22 = vsel %vm13490_vm0, %v13307_v5, %v13509_v44  ;;  %v12549_v29 = vmax.f32 %v12521_v12, %v12523_v35  ;;  %v12494_v52 = vadd.f32 %v19918_v32, %v12390_v23  ;;  %v12492_v47 = vadd.f32 %v19918_v32, %v12388_v63  ;;  %v20119_v3 = vpop.f32.mrf.mxu1 }
 0x4a6   : > { %v13511_v16 = vsel %vm13492_vm1, %v13311_v38, %v13510_v22  ;;  %v12495_v53 = vadd.f32 %v19918_v32, %v12391_v17  ;;  %v12493_v56 = vadd.f32 %v19918_v32, %v12389_v14  ;;  %v12394_v18 = vadd.f32 %v15870_v49, %v19977_v30 }
 0x4a7   : > { %v12661_v2 = vcombine.high %v12549_v29, %v12549_v29  ;;  %v12668_v8 = vrot.slane %v12549_v29, %v19923_v21  ;;  %v12526_v62 = vmax.f32 %v12494_v52, 0.0  ;;  %v12524_v24 = vmax.f32 %v12492_v47, 0.0  ;;  %v15874_v5 = vpop.f32.mrf.mxu1 }
 0x4a8   : > { %v12527_v45 = vmax.f32 %v12495_v53, 0.0  ;;  %v12525_v35 = vmax.f32 %v12493_v56, 0.0  ;;  %v20115_v58 = vadd.f32 %v19918_v32, %v12394_v18  ;;  %v12392_v20 = vadd.f32 %v12281_v39, %v19981_v57 }
 0x4a9   : > { %v12675_v11 = vrot.slane %v12661_v2, %v19923_v21  ;;  %v12676_v15 = vcombine.high %v12668_v8, %v12668_v8  ;;  %v14505_v34 = vrot.slane %v12668_v8, 9  ;;  %v12550_v1 = vmax.f32 %v12524_v24, %v12526_v62  ;;  %v12297_v18 = vpop.f32.mrf.mxu1 }
 0x4aa   : > { %v12551_v30 = vmax.f32 %v12525_v35, %v12527_v45  ;;  %v12530_v49 = vmax.f32 %v20115_v58, 0.0  ;;  %v12496_v37 = vadd.f32 %v19918_v32, %v12392_v20  ;;  %v12395_v59 = vadd.f32 %v15871_v48, %v19986_v55 }
 0x4ab   : > { %v12677_v60 = vcombine.high %v12675_v11, %v12675_v11  ;;  %v14506_v0 = vrot.slane %v12676_v15, 9  ;;  %v14507_v26 = vrot.slane %v12675_v11, 9  ;;  %v13124_v28 = vmax.f32 %v12668_v8, %v14505_v34 }
 0x4ac   : > { %v12678_v46 = vcombine.high %v12550_v1, %v12550_v1  ;;  %v12685_v57 = vrot.slane %v12550_v1, %v19923_v21  ;;  %v12695_v54 = vcombine.high %v12551_v30, %v12551_v30  ;;  %v12702_v33 = vrot.slane %v12551_v30, %v19923_v21 }
 0x4ad   : > { %v14508_v39 = vrot.slane %v12677_v60, 9  ;;  %v13125_v10 = vmax.f32 %v12676_v15, %v14506_v0  ;;  %v13126_v42 = vmax.f32 %v12675_v11, %v14507_v26  ;;  %v13315_v50 = vrot.slane %v13124_v28, %v19925_v13  ;;  %v15875_v26 = vpop.f32.mrf.mxu1 }
 0x4ae   : > { %v12692_v25 = vrot.slane %v12678_v46, %v19923_v21  ;;  %v12693_v12 = vcombine.high %v12685_v57, %v12685_v57  ;;  %v14509_v55 = vrot.slane %v12685_v57, 9  ;;  %v12709_v23 = vrot.slane %v12695_v54, %v19923_v21 }
 0x4af   : > { %v13127_v63 = vmax.f32 %v12677_v60, %v14508_v39  ;;  %v13319_v38 = vrot.slane %v13125_v10, %v19925_v13  ;;  %v13323_v44 = vrot.slane %v13126_v42, %v19925_v13  ;;  %v13512_v17 = vsel %vm13494_vm2, %v13315_v50, %v13511_v16 }
 0x4b0   : > { %v12694_v14 = vcombine.high %v12692_v25, %v12692_v25  ;;  %v14510_v22 = vrot.slane %v12693_v12, 9  ;;  %v14511_v29 = vrot.slane %v12692_v25, 9  ;;  %v13128_v52 = vmax.f32 %v12685_v57, %v14509_v55 }
 0x4b1   : > { %v13327_v47 = vrot.slane %v13127_v63, %v19925_v13  ;;  %v13513_v48 = vsel %vm13496_vm3, %v13319_v38, %v13512_v17  ;;  %v12710_v53 = vcombine.high %v12702_v33, %v12702_v33  ;;  %v12711_v56 = vcombine.high %v12709_v23, %v12709_v23  ;;  %v12300_v38 = vpop.f32.mrf.mxu1 }
 0x4b2   : > { %v13514_v2 = vsel %vm13498_vm4, %v13323_v44, %v13513_v48  ;;  %v14512_v8 = vrot.slane %v12694_v14, 9  ;;  %v13129_v62 = vmax.f32 %v12693_v12, %v14510_v22  ;;  %v13130_v24 = vmax.f32 %v12692_v25, %v14511_v29 }
 0x4b3   : > { %v13515_v45 = vsel %vm13500_vm5, %v13327_v47, %v13514_v2  ;;  %v13331_v16 = vrot.slane %v13128_v52, %v19925_v13  ;;  %v14513_v35 = vrot.slane %v12702_v33, 9  ;;  %v14514_v58 = vrot.slane %v12710_v53, 9 }
 0x4b4   : > { %13561 = vst [vmem:[%s20065_s7 + $0x10] sm:$0xff] %v13515_v45  ;;  %v13131_v20 = vmax.f32 %v12694_v14, %v14512_v8  ;;  %v13335_v11 = vrot.slane %v13129_v62, %v19925_v13  ;;  %v13339_v15 = vrot.slane %v13130_v24, %v19925_v13  ;;  %v14515_v34 = vrot.slane %v12709_v23, 9 }
 0x4b5   : > { %v14516_v1 = vrot.slane %v12711_v56, 9  ;;  %v13132_v30 = vmax.f32 %v12702_v33, %v14513_v35  ;;  %v13133_v60 = vmax.f32 %v12710_v53, %v14514_v58  ;;  %v12528_v0 = vmax.f32 %v12496_v37, 0.0 }
 0x4b6   : > { %v13343_v28 = vrot.slane %v13131_v20, %v19925_v13  ;;  %v13516_v46 = vsel %vm13488_vm15, %v13335_v11, %v13331_v16  ;;  %v13134_v57 = vmax.f32 %v12709_v23, %v14515_v34  ;;  %v12499_v54 = vadd.f32 %v19918_v32, %v12395_v59 }
 0x4b7   : > { %v13517_v39 = vsel %vm13490_vm0, %v13339_v15, %v13516_v46  ;;  %v13135_v10 = vmax.f32 %v12711_v56, %v14516_v1  ;;  %v13347_v42 = vrot.slane %v13132_v30, %v19925_v13  ;;  %v13351_v50 = vrot.slane %v13133_v60, %v19925_v13 }
 0x4b8   : > { %v13355_v25 = vrot.slane %v13134_v57, %v19925_v13  ;;  %v13518_v33 = vsel %vm13492_vm1, %v13343_v28, %v13517_v39  ;;  %v12552_v37 = vmax.f32 %v12528_v0, %v12530_v49  ;;  %v12531_v12 = vmax.f32 %v12499_v54, 0.0 }
 0x4b9   : > { %v13359_v55 = vrot.slane %v13135_v10, %v19925_v13  ;;  %v13519_v63 = vsel %vm13494_vm2, %v13347_v42, %v13518_v33  ;;  %v12393_v59 = vadd.f32 %v20119_v3, %v19990_v31  ;;  %v12398_v23 = vadd.f32 %v15874_v5, %v19995_v36 }
 0x4ba   : > { %v13520_v44 = vsel %vm13496_vm3, %v13351_v50, %v13519_v63  ;;  %v12712_v17 = vcombine.high %v12552_v37, %v12552_v37  ;;  %v12719_v14 = vrot.slane %v12552_v37, %v19923_v21  ;;  %v12396_v22 = vadd.f32 %v12297_v18, %v19999_v43  ;;  %v15878_v18 = vpop.f32.mrf.mxu1 }
 0x4bb   : > { %v13521_v49 = vsel %vm13498_vm4, %v13355_v25, %v13520_v44  ;;  %v12497_v29 = vadd.f32 %v19918_v32, %v12393_v59  ;;  %v12502_v52 = vadd.f32 %v19918_v32, %v12398_v23  ;;  %v12399_v47 = vadd.f32 %v15875_v26, %v20003_v41 }
 0x4bc   : > { %v13522_v31 = vsel %vm13500_vm5, %v13359_v55, %v13521_v49  ;;  %v12726_v36 = vrot.slane %v12712_v17, %v19923_v21  ;;  %v12727_v3 = vcombine.high %v12719_v14, %v12719_v14  ;;  %v14517_v5 = vrot.slane %v12719_v14, 9  ;;  %v12313_v0 = vpop.f32.mrf.mxu1 }
 0x4bd   : > { %13562 = vst [vmem:[%s20065_s7 + $0x18] sm:$0xff] %v13522_v31  ;;  %v12529_v48 = vmax.f32 %v12497_v29, 0.0  ;;  %v12534_v53 = vmax.f32 %v12502_v52, 0.0  ;;  %v12500_v56 = vadd.f32 %v19918_v32, %v12396_v22  ;;  %v12503_v43 = vadd.f32 %v19918_v32, %v12399_v47 }
 0x4be   : > { %v12728_v2 = vcombine.high %v12726_v36, %v12726_v36  ;;  %v14518_v8 = vrot.slane %v12727_v3, 9  ;;  %v14519_v62 = vrot.slane %v12726_v36, 9  ;;  %v13136_v24 = vmax.f32 %v12719_v14, %v14517_v5  ;;  %v15879_v59 = vpop.f32.mrf.mxu1 }
 0x4bf   : > { %v12553_v45 = vmax.f32 %v12529_v48, %v12531_v12  ;;  %v12532_v41 = vmax.f32 %v12500_v56, 0.0  ;;  %v12535_v16 = vmax.f32 %v12503_v43, 0.0  ;;  %v12397_v35 = vadd.f32 %v12300_v38, %v20007_v6 }
 0x4c0   : > { %v14520_v58 = vrot.slane %v12728_v2, 9  ;;  %v13137_v20 = vmax.f32 %v12727_v3, %v14518_v8  ;;  %v13138_v11 = vmax.f32 %v12726_v36, %v14519_v62  ;;  %v13363_v15 = vrot.slane %v13136_v24, %v19925_v13 }
 0x4c1   : > { %v12729_v34 = vcombine.high %v12553_v45, %v12553_v45  ;;  %v12736_v1 = vrot.slane %v12553_v45, %v19923_v21  ;;  %v12554_v30 = vmax.f32 %v12532_v41, %v12534_v53  ;;  %v12501_v60 = vadd.f32 %v19918_v32, %v12397_v35  ;;  %v12316_v53 = vpop.f32.mrf.mxu1 }
 0x4c2   : > { %v13139_v26 = vmax.f32 %v12728_v2, %v14520_v58  ;;  %v13367_v28 = vrot.slane %v13137_v20, %v19925_v13  ;;  %v13371_v46 = vrot.slane %v13138_v11, %v19925_v13  ;;  %v12402_v57 = vadd.f32 %v15878_v18, %v20010_v7  ;;  %v15835_v11 = vpop.f32.mrf.mxu0 }
 0x4c3   : > { %v12743_v6 = vrot.slane %v12729_v34, %v19923_v21  ;;  %v12744_v54 = vcombine.high %v12736_v1, %v12736_v1  ;;  %v14521_v39 = vrot.slane %v12736_v1, 9  ;;  %v12746_v10 = vcombine.high %v12554_v30, %v12554_v30 }
 0x4c4   : > { %v13375_v42 = vrot.slane %v13139_v26, %v19925_v13  ;;  %v13523_v50 = vsel %vm13488_vm15, %v13367_v28, %v13363_v15  ;;  %v12753_v25 = vrot.slane %v12554_v30, %v19923_v21  ;;  %v12533_v33 = vmax.f32 %v12501_v60, 0.0  ;;  %v15882_v60 = vpop.f32.mrf.mxu1 }
 0x4c5   : > { %v13524_v37 = vsel %vm13490_vm0, %v13371_v46, %v13523_v50  ;;  %v12745_v12 = vcombine.high %v12743_v6, %v12743_v6  ;;  %v14522_v55 = vrot.slane %v12744_v54, 9  ;;  %v14523_v63 = vrot.slane %v12743_v6, 9 }
 0x4c6   : > { %v13140_v23 = vmax.f32 %v12736_v1, %v14521_v39  ;;  %v13525_v7 = vsel %vm13492_vm1, %v13375_v42, %v13524_v37  ;;  %v12760_v38 = vrot.slane %v12746_v10, %v19923_v21  ;;  %v12761_v44 = vcombine.high %v12753_v25, %v12753_v25 }
 0x4c7   : > { %v14524_v17 = vrot.slane %v12745_v12, 9  ;;  %v13141_v14 = vmax.f32 %v12744_v54, %v14522_v55  ;;  %v13142_v22 = vmax.f32 %v12743_v6, %v14523_v63  ;;  %v14525_v49 = vrot.slane %v12753_v25, 9 }
 0x4c8   : > { %v13379_v29 = vrot.slane %v13140_v23, %v19925_v13  ;;  %v12762_v52 = vcombine.high %v12760_v38, %v12760_v38  ;;  %v14526_v47 = vrot.slane %v12761_v44, 9  ;;  %v14527_v31 = vrot.slane %v12760_v38, 9  ;;  %v11738_v23 = vpop.f32.mrf.mxu0 }
 0x4c9   : > { %v13143_v36 = vmax.f32 %v12745_v12, %v14524_v17  ;;  %v13383_v3 = vrot.slane %v13141_v14, %v19925_v13  ;;  %v13387_v5 = vrot.slane %v13142_v22, %v19925_v13  ;;  %v13144_v48 = vmax.f32 %v12753_v25, %v14525_v49 }
 0x4ca   : > { %v13526_v56 = vsel %vm13494_vm2, %v13379_v29, %v13525_v7  ;;  %v14528_v43 = vrot.slane %v12762_v52, 9  ;;  %v13145_v18 = vmax.f32 %v12761_v44, %v14526_v47  ;;  %v13146_v2 = vmax.f32 %v12760_v38, %v14527_v31 }
 0x4cb   : > { %v13391_v8 = vrot.slane %v13143_v36, %v19925_v13  ;;  %v13527_v62 = vsel %vm13496_vm3, %v13383_v3, %v13526_v56  ;;  %v13395_v24 = vrot.slane %v13144_v48, %v19925_v13  ;;  %v12555_v45 = vmax.f32 %v12533_v33, %v12535_v16 }
 0x4cc   : > { %v13528_v41 = vsel %vm13498_vm4, %v13387_v5, %v13527_v62  ;;  %v13147_v35 = vmax.f32 %v12762_v52, %v14528_v43  ;;  %v13399_v58 = vrot.slane %v13145_v18, %v19925_v13  ;;  %v13403_v20 = vrot.slane %v13146_v2, %v19925_v13 }
 0x4cd   : > { %v13529_v15 = vsel %vm13500_vm5, %v13391_v8, %v13528_v41  ;;  %v12763_v34 = vcombine.high %v12555_v45, %v12555_v45  ;;  %v12770_v1 = vrot.slane %v12555_v45, %v19923_v21  ;;  %v12506_v30 = vadd.f32 %v19918_v32, %v12402_v57 }
 0x4ce   : > { %13563 = vst [vmem:[%s20065_s7 + $0x20] sm:$0xff] %v13529_v15  ;;  %v13407_v26 = vrot.slane %v13147_v35, %v19925_v13  ;;  %v13530_v16 = vsel %vm13488_vm15, %v13399_v58, %v13395_v24  ;;  %v12400_v28 = vadd.f32 %v12313_v0, %v20014_v51  ;;  %v12403_v46 = vadd.f32 %v15879_v59, %v20017_v4  ;;  %v12329_v51 = vpop.f32.mrf.mxu1 }
 0x4cf   : > { %v13531_v6 = vsel %vm13490_vm0, %v13403_v20, %v13530_v16  ;;  %v12777_v54 = vrot.slane %v12763_v34, %v19923_v21  ;;  %v12778_v39 = vcombine.high %v12770_v1, %v12770_v1  ;;  %v14529_v10 = vrot.slane %v12770_v1, 9 }
 0x4d0   : > { %v11813_v42 = vadd.f32 %v15835_v11, %v19899_v61  ;;  %v13532_v57 = vsel %vm13492_vm1, %v13407_v26, %v13531_v6  ;;  %v12538_v50 = vmax.f32 %v12506_v30, 0.0  ;;  %v12504_v25 = vadd.f32 %v19918_v32, %v12400_v28 }
 0x4d1   : > { %v12779_v33 = vcombine.high %v12777_v54, %v12777_v54  ;;  %v14530_v37 = vrot.slane %v12778_v39, 9  ;;  %v14531_v12 = vrot.slane %v12777_v54, 9  ;;  %v13148_v55 = vmax.f32 %v12770_v1, %v14529_v10 }
 0x4d2   : > { %v12536_v0 = vmax.f32 %v12504_v25, 0.0  ;;  %v12507_v4 = vadd.f32 %v19918_v32, %v12403_v46  ;;  %v12401_v63 = vadd.f32 %v12316_v53, %v20020_v40  ;;  %v12406_v59 = vadd.f32 %v15882_v60, %v20024_v27 }
 0x4d3   : > { %v14532_v7 = vrot.slane %v12779_v33, 9  ;;  %v13149_v61 = vmax.f32 %v12778_v39, %v14530_v37  ;;  %v13150_v38 = vmax.f32 %v12777_v54, %v14531_v12  ;;  %v13411_v44 = vrot.slane %v13148_v55, %v19925_v13 }
 0x4d4   : > { %v12556_v17 = vmax.f32 %v12536_v0, %v12538_v50  ;;  %v12505_v14 = vadd.f32 %v19918_v32, %v12401_v63  ;;  %v12510_v22 = vadd.f32 %v19918_v32, %v12406_v59  ;;  %v12404_v49 = vadd.f32 %v12329_v51, %v20028_v19 }
 0x4d5   : > { %v13151_v29 = vmax.f32 %v12779_v33, %v14532_v7  ;;  %v13415_v52 = vrot.slane %v13149_v61, %v19925_v13  ;;  %v13419_v40 = vrot.slane %v13150_v38, %v19925_v13  ;;  %v13533_v27 = vsel %vm13494_vm2, %v13411_v44, %v13532_v57 }
 0x4d6   : > { %v20213_v47 = vadd.f32 %v11738_v23, %v19904_v9  ;;  %v12780_v31 = vcombine.high %v12556_v17, %v12556_v17  ;;  %v12787_v36 = vrot.slane %v12556_v17, %v19923_v21  ;;  %v12537_v3 = vmax.f32 %v12505_v14, 0.0  ;;  %v15883_v9 = vpop.f32.mrf.mxu1 }
 0x4d7   : > { %v13423_v5 = vrot.slane %v13151_v29, %v19925_v13  ;;  %v13534_v48 = vsel %vm13496_vm3, %v13415_v52, %v13533_v27  ;;  %v12539_v19 = vmax.f32 %v12507_v4, 0.0  ;;  %v12508_v53 = vadd.f32 %v19918_v32, %v12404_v49 }
 0x4d8   : > { %v13535_v56 = vsel %vm13498_vm4, %v13419_v40, %v13534_v48  ;;  %v12794_v43 = vrot.slane %v12780_v31, %v19923_v21  ;;  %v12795_v18 = vcombine.high %v12787_v36, %v12787_v36  ;;  %v14533_v2 = vrot.slane %v12787_v36, 9  ;;  %v12332_v17 = vpop.f32.mrf.mxu1 }
 0x4d9   : > { %v13536_v8 = vsel %vm13500_vm5, %v13423_v5, %v13535_v56  ;;  %v12557_v62 = vmax.f32 %v12537_v3, %v12539_v19  ;;  %v12542_v24 = vmax.f32 %v12510_v22, 0.0  ;;  %v12540_v45 = vmax.f32 %v12508_v53, 0.0 }
 0x4da   : > { %13564 = vst [vmem:[%s20065_s7 + $0x28] sm:$0xff] %v13536_v8  ;;  %v12796_v41 = vcombine.high %v12794_v43, %v12794_v43  ;;  %v14534_v35 = vrot.slane %v12795_v18, 9  ;;  %v14535_v58 = vrot.slane %v12794_v43, 9  ;;  %v13152_v20 = vmax.f32 %v12787_v36, %v14533_v2 }
 0x4db   : > { %v12797_v11 = vcombine.high %v12557_v62, %v12557_v62  ;;  %v12804_v15 = vrot.slane %v12557_v62, %v19923_v21  ;;  %v12558_v34 = vmax.f32 %v12540_v45, %v12542_v24  ;;  %v12407_v1 = vadd.f32 %v15883_v9, %v11813_v42 }
 0x4dc   : > { %v14536_v30 = vrot.slane %v12796_v41, 9  ;;  %v13153_v60 = vmax.f32 %v12795_v18, %v14534_v35  ;;  %v13154_v26 = vmax.f32 %v12794_v43, %v14535_v58  ;;  %v13427_v16 = vrot.slane %v13152_v20, %v19925_v13 }
 0x4dd   : > { %v12811_v28 = vrot.slane %v12797_v11, %v19923_v21  ;;  %v12812_v46 = vcombine.high %v12804_v15, %v12804_v15  ;;  %v14537_v6 = vrot.slane %v12804_v15, 9  ;;  %v12814_v54 = vcombine.high %v12558_v34, %v12558_v34 }
 0x4de   : > { %v13155_v39 = vmax.f32 %v12796_v41, %v14536_v30  ;;  %v13431_v10 = vrot.slane %v13153_v60, %v19925_v13  ;;  %v13435_v57 = vrot.slane %v13154_v26, %v19925_v13  ;;  %v12821_v50 = vrot.slane %v12558_v34, %v19923_v21 }
 0x4df   : > { %v12813_v25 = vcombine.high %v12811_v28, %v12811_v28  ;;  %v14538_v33 = vrot.slane %v12812_v46, 9  ;;  %v14539_v42 = vrot.slane %v12811_v28, 9  ;;  %v13156_v37 = vmax.f32 %v12804_v15, %v14537_v6 }
 0x4e0   : > { %v13439_v12 = vrot.slane %v13155_v39, %v19925_v13  ;;  %v13537_v55 = vsel %vm13488_vm15, %v13431_v10, %v13427_v16  ;;  %v12828_v51 = vrot.slane %v12814_v54, %v19923_v21  ;;  %v12829_v0 = vcombine.high %v12821_v50, %v12821_v50 }
 0x4e1   : > { %v13538_v4 = vsel %vm13490_vm0, %v13435_v57, %v13537_v55  ;;  %v14540_v63 = vrot.slane %v12813_v25, 9  ;;  %v13157_v59 = vmax.f32 %v12812_v46, %v14538_v33  ;;  %v13158_v23 = vmax.f32 %v12811_v28, %v14539_v42 }
 0x4e2   : > { %v13443_v7 = vrot.slane %v13156_v37, %v19925_v13  ;;  %v13539_v61 = vsel %vm13492_vm1, %v13439_v12, %v13538_v4  ;;  %v12830_v38 = vcombine.high %v12828_v51, %v12828_v51  ;;  %v14541_v44 = vrot.slane %v12821_v50, 9 }
 0x4e3   : > { %v13159_v14 = vmax.f32 %v12813_v25, %v14540_v63  ;;  %v13447_v22 = vrot.slane %v13157_v59, %v19925_v13  ;;  %v13451_v49 = vrot.slane %v13158_v23, %v19925_v13  ;;  %v14542_v29 = vrot.slane %v12829_v0, 9 }
 0x4e4   : > { %v13540_v52 = vsel %vm13494_vm2, %v13443_v7, %v13539_v61  ;;  %v14543_v40 = vrot.slane %v12828_v51, 9  ;;  %v12511_v27 = vadd.f32 %v19918_v32, %v12407_v1  ;;  %v12405_v5 = vadd.f32 %v12332_v17, %v20213_v47 }
 0x4e5   : > { %v13455_v31 = vrot.slane %v13159_v14, %v19925_v13  ;;  %v13541_v36 = vsel %vm13496_vm3, %v13447_v22, %v13540_v52  ;;  %v13161_v3 = vmax.f32 %v12829_v0, %v14542_v29  ;;  %v14544_v19 = vrot.slane %v12830_v38, 9 }
 0x4e6   : > { %v13542_v48 = vsel %vm13498_vm4, %v13451_v49, %v13541_v36  ;;  %v13160_v53 = vmax.f32 %v12821_v50, %v14541_v44  ;;  %v13162_v43 = vmax.f32 %v12828_v51, %v14543_v40  ;;  %v12509_v18 = vadd.f32 %v19918_v32, %v12405_v5 }
 0x4e7   : > { %v13543_v56 = vsel %vm13500_vm5, %v13455_v31, %v13542_v48  ;;  %v13463_v2 = vrot.slane %v13161_v3, %v19925_v13  ;;  %v12543_v9 = vmax.f32 %v12511_v27, 0.0  ;;  %v13163_v62 = vmax.f32 %v12830_v38, %v14544_v19 }
 0x4e8   : > { %13565 = vst [vmem:[%s20065_s7 + $0x30] sm:$0xff] %v13543_v56  ;;  %v12541_v8 = vmax.f32 %v12509_v18, 0.0  ;;  %v13459_v24 = vrot.slane %v13160_v53, %v19925_v13  ;;  %v13467_v45 = vrot.slane %v13162_v43, %v19925_v13 }
 0x4e9   : > { %v13471_v32 = vrot.slane %v13163_v62, %v19925_v13 }
 0x4ea   : > { %v12559_v47 = vmax.f32 %v12541_v8, %v12543_v9  ;;  %v13544_v41 = vsel %vm13488_vm15, %v13463_v2, %v13459_v24 }
 0x4eb   : > { %v13545_v20 = vsel %vm13490_vm0, %v13467_v45, %v13544_v41 }
 0x4ec   : > { %v12831_v35 = vcombine.high %v12559_v47, %v12559_v47  ;;  %v12838_v58 = vrot.slane %v12559_v47, %v19923_v21  ;;  %v13546_v16 = vsel %vm13492_vm1, %v13471_v32, %v13545_v20 }
 0x4ee   : > { %v12845_v11 = vrot.slane %v12831_v35, %v19923_v21  ;;  %v12846_v15 = vcombine.high %v12838_v58, %v12838_v58  ;;  %v14545_v34 = vrot.slane %v12838_v58, 9 }
 0x4f0   : > { %v12847_v1 = vcombine.high %v12845_v11, %v12845_v11  ;;  %v14546_v30 = vrot.slane %v12846_v15, 9  ;;  %v14547_v60 = vrot.slane %v12845_v11, 9  ;;  %v13164_v26 = vmax.f32 %v12838_v58, %v14545_v34 }
 0x4f2   : > { %v14548_v28 = vrot.slane %v12847_v1, 9  ;;  %v13165_v46 = vmax.f32 %v12846_v15, %v14546_v30  ;;  %v13166_v6 = vmax.f32 %v12845_v11, %v14547_v60  ;;  %v13475_v54 = vrot.slane %v13164_v26, %v19925_v13 }
 0x4f4   : > { %v13167_v39 = vmax.f32 %v12847_v1, %v14548_v28  ;;  %v13479_v21 = vrot.slane %v13165_v46, %v19925_v13  ;;  %v13483_v10 = vrot.slane %v13166_v6, %v19925_v13  ;;  %v13547_v57 = vsel %vm13494_vm2, %v13475_v54, %v13546_v16 }
 0x4f6   : > { %v13487_v50 = vrot.slane %v13167_v39, %v19925_v13  ;;  %v13548_v25 = vsel %vm13496_vm3, %v13479_v21, %v13547_v57 }
 0x4f7   : > { %v13549_v33 = vsel %vm13498_vm4, %v13483_v10, %v13548_v25 }
 0x4f8   : > { %v13550_v42 = vsel %vm13500_vm5, %v13487_v50, %v13549_v33 }
 0x4f9   : > { %13566 = vst [vmem:[%s20065_s7 + $0x38] sm:$0xff] %v13550_v42 }
 0x4fa   : > { %16183 = shalt.err (!%p16180_p3)
}
 0x4fb   : > { %s16184_s10 = scalar_lea.hbm %s20266_s4, 1024  ;;  %s16188_s19 = scalar_lea.hbm %s20318_s3, 2048 }
 0x4fc   : > { %p16185_p4 = scmp.ne.s32.totalorder %s20266_s4, %s16184_s10  ;;  %p16189_p9 = scmp.lt.s32.totalorder %s20266_s4, %s20318_s3 }
 0x4fd   : > { %p16190_p10 = scmp.lt.s32.totalorder %s16188_s19, %s16184_s10 }
 0x4fe   : > { %p16186_p7 = pnand %p16185_p4, %p16295_p5 }
 0x4ff   : > { %p16191_p11 = por %p16190_p10, %p16189_p9 }
 0x500   : > { %p16187_p8 = pneg %p16186_p7 }
 0x502   : > { %p16192_p12 = pnand %p16191_p11, %p16187_p8 }
 0x504   : > { %16195 = shalt.err (!%p16192_p12)
}
 0x505   : > { %s16235_s25 = smov 128   ;;  %s16236_s26 = smov 8  }
 0x506   : > { %15884 = dma.vmem_to_hbm [thread:$0]  (%p16295_p5), %s20268_s28, 1024, %s20266_s4, %s20275_s16, %s16235_s25, %s16235_s25, %s16236_s26  }
 0x507 PF: > { %p15890_p13 = scmp.ge.s32.totalorder %s16230_s15, 2  ;;  %s13596_s7 = sand.u32 1, %s16218_s12  }
 0x508   : > { %s13597_s27 = scalar_lea.sflag [#allocation5], %s13596_s7 }
 0x509   : > { %p15887_p0 = pnand %p15890_p13, %p16299_p6 }
 0x50b   : > { %p15888_p1 = pneg %p15887_p0 }
 0x50d   : > { %16213 = dma.done.wait (%p15888_p1), %s13597_s27, 1024  }
 0x50e   : > { %16215 = vsyncadd (%p15888_p1), %s13597_s27, 4294966272  ;;  %p13_p2 = scmp.ge.s32.totalorder %s16282_s18, 4   ;;  %s20544_s12 = smov %s16222_s13 }
 0x50f   : > { %s20545_s13 = smov %s16226_s14  ;;  %s20546_s14 = smov %s16293_s21 }
 0x510   : > { %s20547_s15 = smov %s16282_s18  ;;  %15 = sbr.rel (!%p13_p2) target bundleno = 3 (0x3), region = 88 }
 0x515   :  { %13602 = vsyncpa [#allocation5], 1 }
 0x516   :  { %13604 = vsyncpa [#allocation5 + $0x1], 1 }

</bundles_post_ra>
